<compile_context>
chip_gen: v7x
topology: tpu7x:2x2x1
jax: 0.10.0
libtpu: 0.0.40
codegen_flags: <defaults>
</compile_context>

<pallas_src>
import jax
import jax.numpy as jnp
from jax import lax
from jax.experimental import pallas as pl
from jax.experimental.pallas import tpu as pltpu


# ---------------- Fused Pallas kernel ----------------

def make_fused_lstm_kernel(num_layers, seq_len, batch_p, hid_p):
    """Kernel args (flat): x, w_ih[0..L-1], w_hh[0..L-1], b[0..L-1], fc_w, fc_b,
    y_out, gates_scratch, seq_scratch."""

    def kernel(*args):
        x_ref = args[0]
        w_ih = args[1:1 + num_layers]
        w_hh = args[1 + num_layers:1 + 2 * num_layers]
        bias = args[1 + 2 * num_layers:1 + 3 * num_layers]
        fc_w_ref = args[1 + 3 * num_layers]
        fc_b_ref = args[2 + 3 * num_layers]
        y_ref = args[3 + 3 * num_layers]
        gates_scr = args[4 + 3 * num_layers]   # (T*Bp, 4*Hp) VMEM
        seq_scr = args[5 + 3 * num_layers]     # (T*Bp, Hp)   VMEM

        h_last = None
        for layer in range(num_layers):
            # Hoisted input projection over ALL timesteps: one big MXU matmul/layer.
            layer_in = x_ref[...] if layer == 0 else seq_scr[...]
            gates_scr[...] = (
                jnp.dot(layer_in, w_ih[layer][...],
                        preferred_element_type=jnp.float32)
                + bias[layer][...])

            write_seq = layer + 1 < num_layers  # last layer's sequence is never read

            def step(t, carry, _whh=w_hh[layer], _write=write_seq):
                h, c = carry
                row = pl.multiple_of(t * batch_p, batch_p)
                g = (gates_scr[pl.ds(row, batch_p), :]
                     + jnp.dot(h, _whh[...], preferred_element_type=jnp.float32))
                # Gate blocks are 128-lane aligned (hid_p = 128): clean vreg slices.
                i_g = jax.nn.sigmoid(g[:, 0 * hid_p:1 * hid_p])
                f_g = jax.nn.sigmoid(g[:, 1 * hid_p:2 * hid_p])
                g_g = jnp.tanh(g[:, 2 * hid_p:3 * hid_p])
                o_g = jax.nn.sigmoid(g[:, 3 * hid_p:4 * hid_p])
                c_new = f_g * c + i_g * g_g
                h_new = o_g * jnp.tanh(c_new)
                if _write:
                    seq_scr[pl.ds(row, batch_p), :] = h_new
                return (h_new, c_new)

            h0 = jnp.zeros((batch_p, hid_p), jnp.float32)
            c0 = jnp.zeros((batch_p, hid_p), jnp.float32)
            h_last, _ = lax.fori_loop(0, seq_len, step, (h0, c0), unroll=True)

        # FC head on the final layer's last-timestep hidden state.
        y_ref[...] = (jnp.dot(h_last, fc_w_ref[...],
                              preferred_element_type=jnp.float32)
                      + fc_b_ref[...])

    return kernel


# ---------------- Wrapper ----------------

@jax.jit
def lstm_model_forward(x, kparams):
    B, T, D = x.shape
    Bp = max(8, -(-B // 8) * 8)                 # pad batch to sublane height
    Hp = kparams["w_hh"][0].shape[0]            # padded hidden (multiple of 128)
    L = len(kparams["w_ih"])

    # Pad batch, go time-major and flatten so timestep t is rows [t*Bp, (t+1)*Bp).
    x_p = jnp.pad(x, ((0, Bp - B), (0, 0), (0, 0)))
    x_flat = jnp.transpose(x_p, (1, 0, 2)).reshape(T * Bp, D)

    inputs = ([x_flat] + list(kparams["w_ih"]) + list(kparams["w_hh"])
              + list(kparams["b"]) + [kparams["fc_w"], kparams["fc_b"]])

    vmem_spec = pl.BlockSpec(memory_space=pltpu.MemorySpace.VMEM)
    kernel = make_fused_lstm_kernel(L, T, Bp, Hp)

    y = pl.pallas_call(
        kernel,
        out_shape=jax.ShapeDtypeStruct((Bp, 1), jnp.float32),
        in_specs=[vmem_spec] * len(inputs),
        out_specs=vmem_spec,
        scratch_shapes=[
            pltpu.VMEM((T * Bp, 4 * Hp), jnp.float32),   # precomputed input gates
            pltpu.VMEM((T * Bp, Hp), jnp.float32),       # inter-layer hidden sequence
        ],
    )(*inputs)
    return y[:B]


# ---------------- Parameter init (PyTorch-style U(-1/sqrt(H), 1/sqrt(H))) ----------------

def init_params(key, input_size, hidden_size=64, num_layers=4):
    k = 1.0 / jnp.sqrt(hidden_size)
    layers = []
    for layer in range(num_layers):
        d_in = input_size if layer == 0 else hidden_size
        key, k1, k2, k3, k4 = jax.random.split(key, 5)
        w_ih = jax.random.uniform(k1, (4 * hidden_size, d_in), jnp.float32, -k, k)
        w_hh = jax.random.uniform(k2, (4 * hidden_size, hidden_size), jnp.float32, -k, k)
        b_ih = jax.random.uniform(k3, (4 * hidden_size,), jnp.float32, -k, k)
        b_hh = jax.random.uniform(k4, (4 * hidden_size,), jnp.float32, -k, k)
        layers.append((w_ih, w_hh, b_ih, b_hh))
    key, k5, k6 = jax.random.split(key, 3)
    fc_w = jax.random.uniform(k5, (1, hidden_size), jnp.float32, -k, k)
    fc_b = jax.random.uniform(k6, (1,), jnp.float32, -k, k)
    return {"lstm": layers, "fc_w": fc_w, "fc_b": fc_b, "hidden_size": hidden_size}


def prepare_kernel_params(params, lane=128):
    """Transpose + zero-pad PyTorch-layout weights so each gate block occupies a full
    128-lane slot and the hidden width is a multiple of 128. Padded lanes stay exactly
    zero through the recurrence (zero weights & bias)."""
    H = params["hidden_size"]
    Hp = max(lane, -(-H // lane) * lane)
    w_ih_l, w_hh_l, b_l = [], [], []
    for layer, (w_ih, w_hh, b_ih, b_hh) in enumerate(params["lstm"]):
        d_in = w_ih.shape[1]
        d_in_p = d_in if layer == 0 else Hp      # layers >=1 consume the padded hidden
        wi = jnp.zeros((d_in_p, 4 * Hp), jnp.float32)
        wh = jnp.zeros((Hp, 4 * Hp), jnp.float32)
        bb = jnp.zeros((1, 4 * Hp), jnp.float32)
        for g in range(4):
            wi = wi.at[:d_in, g * Hp:g * Hp + H].set(w_ih[g * H:(g + 1) * H, :].T)
            wh = wh.at[:H, g * Hp:g * Hp + H].set(w_hh[g * H:(g + 1) * H, :].T)
            bb = bb.at[0, g * Hp:g * Hp + H].set(b_ih[g * H:(g + 1) * H]
                                                 + b_hh[g * H:(g + 1) * H])
        w_ih_l.append(wi)
        w_hh_l.append(wh)
        b_l.append(bb)
    fc_w = jnp.zeros((Hp, 1), jnp.float32).at[:H, :].set(params["fc_w"].T)
    fc_b = params["fc_b"][None, :]               # (1, 1)
    return {"w_ih": w_ih_l, "w_hh": w_hh_l, "b": b_l, "fc_w": fc_w, "fc_b": fc_b}


# ---------------- Pure-JAX reference (PyTorch semantics) ----------------

def reference_forward(x, params):
    H = params["hidden_size"]
    h_seq = x
    for (w_ih, w_hh, b_ih, b_hh) in params["lstm"]:
        B, T, _ = h_seq.shape
        h = jnp.zeros((B, H), jnp.float32)
        c = jnp.zeros((B, H), jnp.float32)
        outs = []
        for t in range(T):
            gates = h_seq[:, t] @ w_ih.T + h @ w_hh.T + b_ih + b_hh
            i = jax.nn.sigmoid(gates[:, 0 * H:1 * H])
            f = jax.nn.sigmoid(gates[:, 1 * H:2 * H])
            g = jnp.tanh(gates[:, 2 * H:3 * H])
            o = jax.nn.sigmoid(gates[:, 3 * H:4 * H])
            c = f * c + i * g
            h = o * jnp.tanh(c)
            outs.append(h)
        h_seq = jnp.stack(outs, axis=1)
    return h_seq[:, -1] @ params["fc_w"].T + params["fc_b"]


if __name__ == "__main__":
    B, T, D_IN, HID, LAYERS = 2, 8, 16, 64, 4

    key = jax.random.PRNGKey(0)
    key, kx = jax.random.split(key)
    x = jax.random.normal(kx, (B, T, D_IN), jnp.float32)

    params = init_params(key, D_IN, HID, LAYERS)
    kparams = prepare_kernel_params(params)

    y = lstm_model_forward(x, kparams)
    y = jax.block_until_ready(y)

    y_ref = reference_forward(x, params)
    assert y.shape == (B, 1)
    assert jnp.allclose(y, y_ref, atol=1e-4, rtol=1e-4), (y, y_ref)

    print("KERNEL_OK")
</pallas_src>

<mosaic_0001>
module attributes {stable_mosaic.version = 11 : i64} {
  func.func @kernel(%arg0: memref<64x16xf32, #tpu.memory_space<vmem>>, %arg1: memref<16x512xf32, #tpu.memory_space<vmem>>, %arg2: memref<128x512xf32, #tpu.memory_space<vmem>>, %arg3: memref<128x512xf32, #tpu.memory_space<vmem>>, %arg4: memref<128x512xf32, #tpu.memory_space<vmem>>, %arg5: memref<128x512xf32, #tpu.memory_space<vmem>>, %arg6: memref<128x512xf32, #tpu.memory_space<vmem>>, %arg7: memref<128x512xf32, #tpu.memory_space<vmem>>, %arg8: memref<128x512xf32, #tpu.memory_space<vmem>>, %arg9: memref<1x512xf32, #tpu.memory_space<vmem>>, %arg10: memref<1x512xf32, #tpu.memory_space<vmem>>, %arg11: memref<1x512xf32, #tpu.memory_space<vmem>>, %arg12: memref<1x512xf32, #tpu.memory_space<vmem>>, %arg13: memref<128x1xf32, #tpu.memory_space<vmem>>, %arg14: memref<1x1xf32, #tpu.memory_space<vmem>>, %arg15: memref<8x1xf32, #tpu.memory_space<vmem>>, %arg16: memref<64x512xf32, #tpu.memory_space<vmem>>, %arg17: memref<64x128xf32, #tpu.memory_space<vmem>>) attributes {dimension_semantics = [], scalar_prefetch = 0 : i64, scratch_operands = 2 : i64, tpu.core_type = #tpu.core_type<tc>} {
    %c0 = arith.constant 0 : index
    %c0_0 = arith.constant 0 : index
    %0 = vector.load %arg0[%c0, %c0_0] : memref<64x16xf32, #tpu.memory_space<vmem>>, vector<64x16xf32>
    %c0_1 = arith.constant 0 : index
    %c0_2 = arith.constant 0 : index
    %1 = vector.load %arg1[%c0_1, %c0_2] : memref<16x512xf32, #tpu.memory_space<vmem>>, vector<16x512xf32>
    %cst = arith.constant dense<0.000000e+00> : vector<64x512xf32>
    %2 = tpu.matmul %0, %1, %cst {dimension_numbers = #tpu.dot_dimension_numbers<[1], [0], [0], [1], [0, 0, 1, 1], [], []>} : vector<64x16xf32>, vector<16x512xf32>, vector<64x512xf32> -> vector<64x512xf32>
    %c0_3 = arith.constant 0 : index
    %c0_4 = arith.constant 0 : index
    %3 = vector.load %arg9[%c0_3, %c0_4] : memref<1x512xf32, #tpu.memory_space<vmem>>, vector<1x512xf32>
    %4 = vector.broadcast %3 : vector<1x512xf32> to vector<64x512xf32>
    %5 = arith.addf %2, %4 : vector<64x512xf32>
    %c0_5 = arith.constant 0 : index
    %c0_6 = arith.constant 0 : index
    %6 = vector.load %arg16[%c0_5, %c0_6] : memref<64x512xf32, #tpu.memory_space<vmem>>, vector<64x512xf32>
    tpu.vector_store %arg16[%c0_5, %c0_6], %5 {strides = array<i32>} : memref<64x512xf32, #tpu.memory_space<vmem>>, vector<64x512xf32>,
    %cst_7 = arith.constant 0.000000e+00 : f32
    %7 = vector.broadcast %cst_7 : f32 to vector<8x128xf32>
    %cst_8 = arith.constant 0.000000e+00 : f32
    %8 = vector.broadcast %cst_8 : f32 to vector<8x128xf32>
    %c0_i32 = arith.constant 0 : i32
    %c8_i32 = arith.constant 8 : i32
    %9 = arith.muli %c0_i32, %c8_i32 : i32
    %10 = tpu.assume_multiple %9, 8 : i32
    %11 = arith.index_cast %10 : i32 to index
    %c0_9 = arith.constant 0 : index
    %12 = vector.load %arg16[%11, %c0_9] : memref<64x512xf32, #tpu.memory_space<vmem>>, vector<8x512xf32>
    %c0_10 = arith.constant 0 : index
    %c0_11 = arith.constant 0 : index
    %13 = vector.load %arg5[%c0_10, %c0_11] : memref<128x512xf32, #tpu.memory_space<vmem>>, vector<128x512xf32>
    %cst_12 = arith.constant dense<0.000000e+00> : vector<8x512xf32>
    %14 = tpu.matmul %7, %13, %cst_12 {dimension_numbers = #tpu.dot_dimension_numbers<[1], [0], [0], [1], [0, 0, 1, 1], [], []>} : vector<8x128xf32>, vector<128x512xf32>, vector<8x512xf32> -> vector<8x512xf32>
    %15 = arith.addf %12, %14 : vector<8x512xf32>
    %16 = vector.extract_strided_slice %15 {offsets = [0, 0], sizes = [8, 128], strides = [1, 1]} : vector<8x512xf32> to vector<8x128xf32>
    %17 = arith.negf %16 : vector<8x128xf32>
    %18 = math.exp %17 : vector<8x128xf32>
    %cst_13 = arith.constant 1.000000e+00 : f32
    %19 = vector.broadcast %cst_13 : f32 to vector<8x128xf32>
    %20 = arith.addf %19, %18 : vector<8x128xf32>
    %21 = arith.divf %19, %20 : vector<8x128xf32>
    %22 = vector.extract_strided_slice %15 {offsets = [0, 128], sizes = [8, 128], strides = [1, 1]} : vector<8x512xf32> to vector<8x128xf32>
    %23 = arith.negf %22 : vector<8x128xf32>
    %24 = math.exp %23 : vector<8x128xf32>
    %cst_14 = arith.constant 1.000000e+00 : f32
    %25 = vector.broadcast %cst_14 : f32 to vector<8x128xf32>
    %26 = arith.addf %25, %24 : vector<8x128xf32>
    %27 = arith.divf %25, %26 : vector<8x128xf32>
    %28 = vector.extract_strided_slice %15 {offsets = [0, 256], sizes = [8, 128], strides = [1, 1]} : vector<8x512xf32> to vector<8x128xf32>
    %29 = math.tanh %28 : vector<8x128xf32>
    %30 = vector.extract_strided_slice %15 {offsets = [0, 384], sizes = [8, 128], strides = [1, 1]} : vector<8x512xf32> to vector<8x128xf32>
    %31 = arith.negf %30 : vector<8x128xf32>
    %32 = math.exp %31 : vector<8x128xf32>
    %cst_15 = arith.constant 1.000000e+00 : f32
    %33 = vector.broadcast %cst_15 : f32 to vector<8x128xf32>
    %34 = arith.addf %33, %32 : vector<8x128xf32>
    %35 = arith.divf %33, %34 : vector<8x128xf32>
    %36 = arith.mulf %27, %8 : vector<8x128xf32>
    %37 = arith.mulf %21, %29 : vector<8x128xf32>
    %38 = arith.addf %36, %37 : vector<8x128xf32>
    %39 = math.tanh %38 : vector<8x128xf32>
    %40 = arith.mulf %35, %39 : vector<8x128xf32>
    %41 = arith.index_cast %10 : i32 to index
    %c0_16 = arith.constant 0 : index
    %42 = vector.load %arg17[%41, %c0_16] : memref<64x128xf32, #tpu.memory_space<vmem>>, vector<8x128xf32>
    tpu.vector_store %arg17[%41, %c0_16], %40 {strides = array<i32>} : memref<64x128xf32, #tpu.memory_space<vmem>>, vector<8x128xf32>,
    %c1_i32 = arith.constant 1 : i32
    %c8_i32_17 = arith.constant 8 : i32
    %43 = arith.muli %c1_i32, %c8_i32_17 : i32
    %44 = tpu.assume_multiple %43, 8 : i32
    %45 = arith.index_cast %44 : i32 to index
    %c0_18 = arith.constant 0 : index
    %46 = vector.load %arg16[%45, %c0_18] : memref<64x512xf32, #tpu.memory_space<vmem>>, vector<8x512xf32>
    %c0_19 = arith.constant 0 : index
    %c0_20 = arith.constant 0 : index
    %47 = vector.load %arg5[%c0_19, %c0_20] : memref<128x512xf32, #tpu.memory_space<vmem>>, vector<128x512xf32>
    %cst_21 = arith.constant dense<0.000000e+00> : vector<8x512xf32>
    %48 = tpu.matmul %40, %47, %cst_21 {dimension_numbers = #tpu.dot_dimension_numbers<[1], [0], [0], [1], [0, 0, 1, 1], [], []>} : vector<8x128xf32>, vector<128x512xf32>, vector<8x512xf32> -> vector<8x512xf32>
    %49 = arith.addf %46, %48 : vector<8x512xf32>
    %50 = vector.extract_strided_slice %49 {offsets = [0, 0], sizes = [8, 128], strides = [1, 1]} : vector<8x512xf32> to vector<8x128xf32>
    %51 = arith.negf %50 : vector<8x128xf32>
    %52 = math.exp %51 : vector<8x128xf32>
    %cst_22 = arith.constant 1.000000e+00 : f32
    %53 = vector.broadcast %cst_22 : f32 to vector<8x128xf32>
    %54 = arith.addf %53, %52 : vector<8x128xf32>
    %55 = arith.divf %53, %54 : vector<8x128xf32>
    %56 = vector.extract_strided_slice %49 {offsets = [0, 128], sizes = [8, 128], strides = [1, 1]} : vector<8x512xf32> to vector<8x128xf32>
    %57 = arith.negf %56 : vector<8x128xf32>
    %58 = math.exp %57 : vector<8x128xf32>
    %cst_23 = arith.constant 1.000000e+00 : f32
    %59 = vector.broadcast %cst_23 : f32 to vector<8x128xf32>
    %60 = arith.addf %59, %58 : vector<8x128xf32>
    %61 = arith.divf %59, %60 : vector<8x128xf32>
    %62 = vector.extract_strided_slice %49 {offsets = [0, 256], sizes = [8, 128], strides = [1, 1]} : vector<8x512xf32> to vector<8x128xf32>
    %63 = math.tanh %62 : vector<8x128xf32>
    %64 = vector.extract_strided_slice %49 {offsets = [0, 384], sizes = [8, 128], strides = [1, 1]} : vector<8x512xf32> to vector<8x128xf32>
    %65 = arith.negf %64 : vector<8x128xf32>
    %66 = math.exp %65 : vector<8x128xf32>
    %cst_24 = arith.constant 1.000000e+00 : f32
    %67 = vector.broadcast %cst_24 : f32 to vector<8x128xf32>
    %68 = arith.addf %67, %66 : vector<8x128xf32>
    %69 = arith.divf %67, %68 : vector<8x128xf32>
    %70 = arith.mulf %61, %38 : vector<8x128xf32>
    %71 = arith.mulf %55, %63 : vector<8x128xf32>
    %72 = arith.addf %70, %71 : vector<8x128xf32>
    %73 = math.tanh %72 : vector<8x128xf32>
    %74 = arith.mulf %69, %73 : vector<8x128xf32>
    %75 = arith.index_cast %44 : i32 to index
    %c0_25 = arith.constant 0 : index
    %76 = vector.load %arg17[%75, %c0_25] : memref<64x128xf32, #tpu.memory_space<vmem>>, vector<8x128xf32>
    tpu.vector_store %arg17[%75, %c0_25], %74 {strides = array<i32>} : memref<64x128xf32, #tpu.memory_space<vmem>>, vector<8x128xf32>,
    %c2_i32 = arith.constant 2 : i32
    %c8_i32_26 = arith.constant 8 : i32
    %77 = arith.muli %c2_i32, %c8_i32_26 : i32
    %78 = tpu.assume_multiple %77, 8 : i32
    %79 = arith.index_cast %78 : i32 to index
    %c0_27 = arith.constant 0 : index
    %80 = vector.load %arg16[%79, %c0_27] : memref<64x512xf32, #tpu.memory_space<vmem>>, vector<8x512xf32>
    %c0_28 = arith.constant 0 : index
    %c0_29 = arith.constant 0 : index
    %81 = vector.load %arg5[%c0_28, %c0_29] : memref<128x512xf32, #tpu.memory_space<vmem>>, vector<128x512xf32>
    %cst_30 = arith.constant dense<0.000000e+00> : vector<8x512xf32>
    %82 = tpu.matmul %74, %81, %cst_30 {dimension_numbers = #tpu.dot_dimension_numbers<[1], [0], [0], [1], [0, 0, 1, 1], [], []>} : vector<8x128xf32>, vector<128x512xf32>, vector<8x512xf32> -> vector<8x512xf32>
    %83 = arith.addf %80, %82 : vector<8x512xf32>
    %84 = vector.extract_strided_slice %83 {offsets = [0, 0], sizes = [8, 128], strides = [1, 1]} : vector<8x512xf32> to vector<8x128xf32>
    %85 = arith.negf %84 : vector<8x128xf32>
    %86 = math.exp %85 : vector<8x128xf32>
    %cst_31 = arith.constant 1.000000e+00 : f32
    %87 = vector.broadcast %cst_31 : f32 to vector<8x128xf32>
    %88 = arith.addf %87, %86 : vector<8x128xf32>
    %89 = arith.divf %87, %88 : vector<8x128xf32>
    %90 = vector.extract_strided_slice %83 {offsets = [0, 128], sizes = [8, 128], strides = [1, 1]} : vector<8x512xf32> to vector<8x128xf32>
    %91 = arith.negf %90 : vector<8x128xf32>
    %92 = math.exp %91 : vector<8x128xf32>
    %cst_32 = arith.constant 1.000000e+00 : f32
    %93 = vector.broadcast %cst_32 : f32 to vector<8x128xf32>
    %94 = arith.addf %93, %92 : vector<8x128xf32>
    %95 = arith.divf %93, %94 : vector<8x128xf32>
    %96 = vector.extract_strided_slice %83 {offsets = [0, 256], sizes = [8, 128], strides = [1, 1]} : vector<8x512xf32> to vector<8x128xf32>
    %97 = math.tanh %96 : vector<8x128xf32>
    %98 = vector.extract_strided_slice %83 {offsets = [0, 384], sizes = [8, 128], strides = [1, 1]} : vector<8x512xf32> to vector<8x128xf32>
    %99 = arith.negf %98 : vector<8x128xf32>
    %100 = math.exp %99 : vector<8x128xf32>
    %cst_33 = arith.constant 1.000000e+00 : f32
    %101 = vector.broadcast %cst_33 : f32 to vector<8x128xf32>
    %102 = arith.addf %101, %100 : vector<8x128xf32>
    %103 = arith.divf %101, %102 : vector<8x128xf32>
    %104 = arith.mulf %95, %72 : vector<8x128xf32>
    %105 = arith.mulf %89, %97 : vector<8x128xf32>
    %106 = arith.addf %104, %105 : vector<8x128xf32>
    %107 = math.tanh %106 : vector<8x128xf32>
    %108 = arith.mulf %103, %107 : vector<8x128xf32>
    %109 = arith.index_cast %78 : i32 to index
    %c0_34 = arith.constant 0 : index
    %110 = vector.load %arg17[%109, %c0_34] : memref<64x128xf32, #tpu.memory_space<vmem>>, vector<8x128xf32>
    tpu.vector_store %arg17[%109, %c0_34], %108 {strides = array<i32>} : memref<64x128xf32, #tpu.memory_space<vmem>>, vector<8x128xf32>,
    %c3_i32 = arith.constant 3 : i32
    %c8_i32_35 = arith.constant 8 : i32
    %111 = arith.muli %c3_i32, %c8_i32_35 : i32
    %112 = tpu.assume_multiple %111, 8 : i32
    %113 = arith.index_cast %112 : i32 to index
    %c0_36 = arith.constant 0 : index
    %114 = vector.load %arg16[%113, %c0_36] : memref<64x512xf32, #tpu.memory_space<vmem>>, vector<8x512xf32>
    %c0_37 = arith.constant 0 : index
    %c0_38 = arith.constant 0 : index
    %115 = vector.load %arg5[%c0_37, %c0_38] : memref<128x512xf32, #tpu.memory_space<vmem>>, vector<128x512xf32>
    %cst_39 = arith.constant dense<0.000000e+00> : vector<8x512xf32>
    %116 = tpu.matmul %108, %115, %cst_39 {dimension_numbers = #tpu.dot_dimension_numbers<[1], [0], [0], [1], [0, 0, 1, 1], [], []>} : vector<8x128xf32>, vector<128x512xf32>, vector<8x512xf32> -> vector<8x512xf32>
    %117 = arith.addf %114, %116 : vector<8x512xf32>
    %118 = vector.extract_strided_slice %117 {offsets = [0, 0], sizes = [8, 128], strides = [1, 1]} : vector<8x512xf32> to vector<8x128xf32>
    %119 = arith.negf %118 : vector<8x128xf32>
    %120 = math.exp %119 : vector<8x128xf32>
    %cst_40 = arith.constant 1.000000e+00 : f32
    %121 = vector.broadcast %cst_40 : f32 to vector<8x128xf32>
    %122 = arith.addf %121, %120 : vector<8x128xf32>
    %123 = arith.divf %121, %122 : vector<8x128xf32>
    %124 = vector.extract_strided_slice %117 {offsets = [0, 128], sizes = [8, 128], strides = [1, 1]} : vector<8x512xf32> to vector<8x128xf32>
    %125 = arith.negf %124 : vector<8x128xf32>
    %126 = math.exp %125 : vector<8x128xf32>
    %cst_41 = arith.constant 1.000000e+00 : f32
    %127 = vector.broadcast %cst_41 : f32 to vector<8x128xf32>
    %128 = arith.addf %127, %126 : vector<8x128xf32>
    %129 = arith.divf %127, %128 : vector<8x128xf32>
    %130 = vector.extract_strided_slice %117 {offsets = [0, 256], sizes = [8, 128], strides = [1, 1]} : vector<8x512xf32> to vector<8x128xf32>
    %131 = math.tanh %130 : vector<8x128xf32>
    %132 = vector.extract_strided_slice %117 {offsets = [0, 384], sizes = [8, 128], strides = [1, 1]} : vector<8x512xf32> to vector<8x128xf32>
    %133 = arith.negf %132 : vector<8x128xf32>
    %134 = math.exp %133 : vector<8x128xf32>
    %cst_42 = arith.constant 1.000000e+00 : f32
    %135 = vector.broadcast %cst_42 : f32 to vector<8x128xf32>
    %136 = arith.addf %135, %134 : vector<8x128xf32>
    %137 = arith.divf %135, %136 : vector<8x128xf32>
    %138 = arith.mulf %129, %106 : vector<8x128xf32>
    %139 = arith.mulf %123, %131 : vector<8x128xf32>
    %140 = arith.addf %138, %139 : vector<8x128xf32>
    %141 = math.tanh %140 : vector<8x128xf32>
    %142 = arith.mulf %137, %141 : vector<8x128xf32>
    %143 = arith.index_cast %112 : i32 to index
    %c0_43 = arith.constant 0 : index
    %144 = vector.load %arg17[%143, %c0_43] : memref<64x128xf32, #tpu.memory_space<vmem>>, vector<8x128xf32>
    tpu.vector_store %arg17[%143, %c0_43], %142 {strides = array<i32>} : memref<64x128xf32, #tpu.memory_space<vmem>>, vector<8x128xf32>,
    %c4_i32 = arith.constant 4 : i32
    %c8_i32_44 = arith.constant 8 : i32
    %145 = arith.muli %c4_i32, %c8_i32_44 : i32
    %146 = tpu.assume_multiple %145, 8 : i32
    %147 = arith.index_cast %146 : i32 to index
    %c0_45 = arith.constant 0 : index
    %148 = vector.load %arg16[%147, %c0_45] : memref<64x512xf32, #tpu.memory_space<vmem>>, vector<8x512xf32>
    %c0_46 = arith.constant 0 : index
    %c0_47 = arith.constant 0 : index
    %149 = vector.load %arg5[%c0_46, %c0_47] : memref<128x512xf32, #tpu.memory_space<vmem>>, vector<128x512xf32>
    %cst_48 = arith.constant dense<0.000000e+00> : vector<8x512xf32>
    %150 = tpu.matmul %142, %149, %cst_48 {dimension_numbers = #tpu.dot_dimension_numbers<[1], [0], [0], [1], [0, 0, 1, 1], [], []>} : vector<8x128xf32>, vector<128x512xf32>, vector<8x512xf32> -> vector<8x512xf32>
    %151 = arith.addf %148, %150 : vector<8x512xf32>
    %152 = vector.extract_strided_slice %151 {offsets = [0, 0], sizes = [8, 128], strides = [1, 1]} : vector<8x512xf32> to vector<8x128xf32>
    %153 = arith.negf %152 : vector<8x128xf32>
    %154 = math.exp %153 : vector<8x128xf32>
    %cst_49 = arith.constant 1.000000e+00 : f32
    %155 = vector.broadcast %cst_49 : f32 to vector<8x128xf32>
    %156 = arith.addf %155, %154 : vector<8x128xf32>
    %157 = arith.divf %155, %156 : vector<8x128xf32>
    %158 = vector.extract_strided_slice %151 {offsets = [0, 128], sizes = [8, 128], strides = [1, 1]} : vector<8x512xf32> to vector<8x128xf32>
    %159 = arith.negf %158 : vector<8x128xf32>
    %160 = math.exp %159 : vector<8x128xf32>
    %cst_50 = arith.constant 1.000000e+00 : f32
    %161 = vector.broadcast %cst_50 : f32 to vector<8x128xf32>
    %162 = arith.addf %161, %160 : vector<8x128xf32>
    %163 = arith.divf %161, %162 : vector<8x128xf32>
    %164 = vector.extract_strided_slice %151 {offsets = [0, 256], sizes = [8, 128], strides = [1, 1]} : vector<8x512xf32> to vector<8x128xf32>
    %165 = math.tanh %164 : vector<8x128xf32>
    %166 = vector.extract_strided_slice %151 {offsets = [0, 384], sizes = [8, 128], strides = [1, 1]} : vector<8x512xf32> to vector<8x128xf32>
    %167 = arith.negf %166 : vector<8x128xf32>
    %168 = math.exp %167 : vector<8x128xf32>
    %cst_51 = arith.constant 1.000000e+00 : f32
    %169 = vector.broadcast %cst_51 : f32 to vector<8x128xf32>
    %170 = arith.addf %169, %168 : vector<8x128xf32>
    %171 = arith.divf %169, %170 : vector<8x128xf32>
    %172 = arith.mulf %163, %140 : vector<8x128xf32>
    %173 = arith.mulf %157, %165 : vector<8x128xf32>
    %174 = arith.addf %172, %173 : vector<8x128xf32>
    %175 = math.tanh %174 : vector<8x128xf32>
    %176 = arith.mulf %171, %175 : vector<8x128xf32>
    %177 = arith.index_cast %146 : i32 to index
    %c0_52 = arith.constant 0 : index
    %178 = vector.load %arg17[%177, %c0_52] : memref<64x128xf32, #tpu.memory_space<vmem>>, vector<8x128xf32>
    tpu.vector_store %arg17[%177, %c0_52], %176 {strides = array<i32>} : memref<64x128xf32, #tpu.memory_space<vmem>>, vector<8x128xf32>,
    %c5_i32 = arith.constant 5 : i32
    %c8_i32_53 = arith.constant 8 : i32
    %179 = arith.muli %c5_i32, %c8_i32_53 : i32
    %180 = tpu.assume_multiple %179, 8 : i32
    %181 = arith.index_cast %180 : i32 to index
    %c0_54 = arith.constant 0 : index
    %182 = vector.load %arg16[%181, %c0_54] : memref<64x512xf32, #tpu.memory_space<vmem>>, vector<8x512xf32>
    %c0_55 = arith.constant 0 : index
    %c0_56 = arith.constant 0 : index
    %183 = vector.load %arg5[%c0_55, %c0_56] : memref<128x512xf32, #tpu.memory_space<vmem>>, vector<128x512xf32>
    %cst_57 = arith.constant dense<0.000000e+00> : vector<8x512xf32>
    %184 = tpu.matmul %176, %183, %cst_57 {dimension_numbers = #tpu.dot_dimension_numbers<[1], [0], [0], [1], [0, 0, 1, 1], [], []>} : vector<8x128xf32>, vector<128x512xf32>, vector<8x512xf32> -> vector<8x512xf32>
    %185 = arith.addf %182, %184 : vector<8x512xf32>
    %186 = vector.extract_strided_slice %185 {offsets = [0, 0], sizes = [8, 128], strides = [1, 1]} : vector<8x512xf32> to vector<8x128xf32>
    %187 = arith.negf %186 : vector<8x128xf32>
    %188 = math.exp %187 : vector<8x128xf32>
    %cst_58 = arith.constant 1.000000e+00 : f32
    %189 = vector.broadcast %cst_58 : f32 to vector<8x128xf32>
    %190 = arith.addf %189, %188 : vector<8x128xf32>
    %191 = arith.divf %189, %190 : vector<8x128xf32>
    %192 = vector.extract_strided_slice %185 {offsets = [0, 128], sizes = [8, 128], strides = [1, 1]} : vector<8x512xf32> to vector<8x128xf32>
    %193 = arith.negf %192 : vector<8x128xf32>
    %194 = math.exp %193 : vector<8x128xf32>
    %cst_59 = arith.constant 1.000000e+00 : f32
    %195 = vector.broadcast %cst_59 : f32 to vector<8x128xf32>
    %196 = arith.addf %195, %194 : vector<8x128xf32>
    %197 = arith.divf %195, %196 : vector<8x128xf32>
    %198 = vector.extract_strided_slice %185 {offsets = [0, 256], sizes = [8, 128], strides = [1, 1]} : vector<8x512xf32> to vector<8x128xf32>
    %199 = math.tanh %198 : vector<8x128xf32>
    %200 = vector.extract_strided_slice %185 {offsets = [0, 384], sizes = [8, 128], strides = [1, 1]} : vector<8x512xf32> to vector<8x128xf32>
    %201 = arith.negf %200 : vector<8x128xf32>
    %202 = math.exp %201 : vector<8x128xf32>
    %cst_60 = arith.constant 1.000000e+00 : f32
    %203 = vector.broadcast %cst_60 : f32 to vector<8x128xf32>
    %204 = arith.addf %203, %202 : vector<8x128xf32>
    %205 = arith.divf %203, %204 : vector<8x128xf32>
    %206 = arith.mulf %197, %174 : vector<8x128xf32>
    %207 = arith.mulf %191, %199 : vector<8x128xf32>
    %208 = arith.addf %206, %207 : vector<8x128xf32>
    %209 = math.tanh %208 : vector<8x128xf32>
    %210 = arith.mulf %205, %209 : vector<8x128xf32>
    %211 = arith.index_cast %180 : i32 to index
    %c0_61 = arith.constant 0 : index
    %212 = vector.load %arg17[%211, %c0_61] : memref<64x128xf32, #tpu.memory_space<vmem>>, vector<8x128xf32>
    tpu.vector_store %arg17[%211, %c0_61], %210 {strides = array<i32>} : memref<64x128xf32, #tpu.memory_space<vmem>>, vector<8x128xf32>,
    %c6_i32 = arith.constant 6 : i32
    %c8_i32_62 = arith.constant 8 : i32
    %213 = arith.muli %c6_i32, %c8_i32_62 : i32
    %214 = tpu.assume_multiple %213, 8 : i32
    %215 = arith.index_cast %214 : i32 to index
    %c0_63 = arith.constant 0 : index
    %216 = vector.load %arg16[%215, %c0_63] : memref<64x512xf32, #tpu.memory_space<vmem>>, vector<8x512xf32>
    %c0_64 = arith.constant 0 : index
    %c0_65 = arith.constant 0 : index
    %217 = vector.load %arg5[%c0_64, %c0_65] : memref<128x512xf32, #tpu.memory_space<vmem>>, vector<128x512xf32>
    %cst_66 = arith.constant dense<0.000000e+00> : vector<8x512xf32>
    %218 = tpu.matmul %210, %217, %cst_66 {dimension_numbers = #tpu.dot_dimension_numbers<[1], [0], [0], [1], [0, 0, 1, 1], [], []>} : vector<8x128xf32>, vector<128x512xf32>, vector<8x512xf32> -> vector<8x512xf32>
    %219 = arith.addf %216, %218 : vector<8x512xf32>
    %220 = vector.extract_strided_slice %219 {offsets = [0, 0], sizes = [8, 128], strides = [1, 1]} : vector<8x512xf32> to vector<8x128xf32>
    %221 = arith.negf %220 : vector<8x128xf32>
    %222 = math.exp %221 : vector<8x128xf32>
    %cst_67 = arith.constant 1.000000e+00 : f32
    %223 = vector.broadcast %cst_67 : f32 to vector<8x128xf32>
    %224 = arith.addf %223, %222 : vector<8x128xf32>
    %225 = arith.divf %223, %224 : vector<8x128xf32>
    %226 = vector.extract_strided_slice %219 {offsets = [0, 128], sizes = [8, 128], strides = [1, 1]} : vector<8x512xf32> to vector<8x128xf32>
    %227 = arith.negf %226 : vector<8x128xf32>
    %228 = math.exp %227 : vector<8x128xf32>
    %cst_68 = arith.constant 1.000000e+00 : f32
    %229 = vector.broadcast %cst_68 : f32 to vector<8x128xf32>
    %230 = arith.addf %229, %228 : vector<8x128xf32>
    %231 = arith.divf %229, %230 : vector<8x128xf32>
    %232 = vector.extract_strided_slice %219 {offsets = [0, 256], sizes = [8, 128], strides = [1, 1]} : vector<8x512xf32> to vector<8x128xf32>
    %233 = math.tanh %232 : vector<8x128xf32>
    %234 = vector.extract_strided_slice %219 {offsets = [0, 384], sizes = [8, 128], strides = [1, 1]} : vector<8x512xf32> to vector<8x128xf32>
    %235 = arith.negf %234 : vector<8x128xf32>
    %236 = math.exp %235 : vector<8x128xf32>
    %cst_69 = arith.constant 1.000000e+00 : f32
    %237 = vector.broadcast %cst_69 : f32 to vector<8x128xf32>
    %238 = arith.addf %237, %236 : vector<8x128xf32>
    %239 = arith.divf %237, %238 : vector<8x128xf32>
    %240 = arith.mulf %231, %208 : vector<8x128xf32>
    %241 = arith.mulf %225, %233 : vector<8x128xf32>
    %242 = arith.addf %240, %241 : vector<8x128xf32>
    %243 = math.tanh %242 : vector<8x128xf32>
    %244 = arith.mulf %239, %243 : vector<8x128xf32>
    %245 = arith.index_cast %214 : i32 to index
    %c0_70 = arith.constant 0 : index
    %246 = vector.load %arg17[%245, %c0_70] : memref<64x128xf32, #tpu.memory_space<vmem>>, vector<8x128xf32>
    tpu.vector_store %arg17[%245, %c0_70], %244 {strides = array<i32>} : memref<64x128xf32, #tpu.memory_space<vmem>>, vector<8x128xf32>,
    %c7_i32 = arith.constant 7 : i32
    %c8_i32_71 = arith.constant 8 : i32
    %247 = arith.muli %c7_i32, %c8_i32_71 : i32
    %248 = tpu.assume_multiple %247, 8 : i32
    %249 = arith.index_cast %248 : i32 to index
    %c0_72 = arith.constant 0 : index
    %250 = vector.load %arg16[%249, %c0_72] : memref<64x512xf32, #tpu.memory_space<vmem>>, vector<8x512xf32>
    %c0_73 = arith.constant 0 : index
    %c0_74 = arith.constant 0 : index
    %251 = vector.load %arg5[%c0_73, %c0_74] : memref<128x512xf32, #tpu.memory_space<vmem>>, vector<128x512xf32>
    %cst_75 = arith.constant dense<0.000000e+00> : vector<8x512xf32>
    %252 = tpu.matmul %244, %251, %cst_75 {dimension_numbers = #tpu.dot_dimension_numbers<[1], [0], [0], [1], [0, 0, 1, 1], [], []>} : vector<8x128xf32>, vector<128x512xf32>, vector<8x512xf32> -> vector<8x512xf32>
    %253 = arith.addf %250, %252 : vector<8x512xf32>
    %254 = vector.extract_strided_slice %253 {offsets = [0, 0], sizes = [8, 128], strides = [1, 1]} : vector<8x512xf32> to vector<8x128xf32>
    %255 = arith.negf %254 : vector<8x128xf32>
    %256 = math.exp %255 : vector<8x128xf32>
    %cst_76 = arith.constant 1.000000e+00 : f32
    %257 = vector.broadcast %cst_76 : f32 to vector<8x128xf32>
    %258 = arith.addf %257, %256 : vector<8x128xf32>
    %259 = arith.divf %257, %258 : vector<8x128xf32>
    %260 = vector.extract_strided_slice %253 {offsets = [0, 128], sizes = [8, 128], strides = [1, 1]} : vector<8x512xf32> to vector<8x128xf32>
    %261 = arith.negf %260 : vector<8x128xf32>
    %262 = math.exp %261 : vector<8x128xf32>
    %cst_77 = arith.constant 1.000000e+00 : f32
    %263 = vector.broadcast %cst_77 : f32 to vector<8x128xf32>
    %264 = arith.addf %263, %262 : vector<8x128xf32>
    %265 = arith.divf %263, %264 : vector<8x128xf32>
    %266 = vector.extract_strided_slice %253 {offsets = [0, 256], sizes = [8, 128], strides = [1, 1]} : vector<8x512xf32> to vector<8x128xf32>
    %267 = math.tanh %266 : vector<8x128xf32>
    %268 = vector.extract_strided_slice %253 {offsets = [0, 384], sizes = [8, 128], strides = [1, 1]} : vector<8x512xf32> to vector<8x128xf32>
    %269 = arith.negf %268 : vector<8x128xf32>
    %270 = math.exp %269 : vector<8x128xf32>
    %cst_78 = arith.constant 1.000000e+00 : f32
    %271 = vector.broadcast %cst_78 : f32 to vector<8x128xf32>
    %272 = arith.addf %271, %270 : vector<8x128xf32>
    %273 = arith.divf %271, %272 : vector<8x128xf32>
    %274 = arith.mulf %265, %242 : vector<8x128xf32>
    %275 = arith.mulf %259, %267 : vector<8x128xf32>
    %276 = arith.addf %274, %275 : vector<8x128xf32>
    %277 = math.tanh %276 : vector<8x128xf32>
    %278 = arith.mulf %273, %277 : vector<8x128xf32>
    %279 = arith.index_cast %248 : i32 to index
    %c0_79 = arith.constant 0 : index
    %280 = vector.load %arg17[%279, %c0_79] : memref<64x128xf32, #tpu.memory_space<vmem>>, vector<8x128xf32>
    tpu.vector_store %arg17[%279, %c0_79], %278 {strides = array<i32>} : memref<64x128xf32, #tpu.memory_space<vmem>>, vector<8x128xf32>,
    %c8_i32_80 = arith.constant 8 : i32
    %c0_81 = arith.constant 0 : index
    %c0_82 = arith.constant 0 : index
    %281 = vector.load %arg17[%c0_81, %c0_82] : memref<64x128xf32, #tpu.memory_space<vmem>>, vector<64x128xf32>
    %c0_83 = arith.constant 0 : index
    %c0_84 = arith.constant 0 : index
    %282 = vector.load %arg2[%c0_83, %c0_84] : memref<128x512xf32, #tpu.memory_space<vmem>>, vector<128x512xf32>
    %cst_85 = arith.constant dense<0.000000e+00> : vector<64x512xf32>
    %283 = tpu.matmul %281, %282, %cst_85 {dimension_numbers = #tpu.dot_dimension_numbers<[1], [0], [0], [1], [0, 0, 1, 1], [], []>} : vector<64x128xf32>, vector<128x512xf32>, vector<64x512xf32> -> vector<64x512xf32>
    %c0_86 = arith.constant 0 : index
    %c0_87 = arith.constant 0 : index
    %284 = vector.load %arg10[%c0_86, %c0_87] : memref<1x512xf32, #tpu.memory_space<vmem>>, vector<1x512xf32>
    %285 = vector.broadcast %284 : vector<1x512xf32> to vector<64x512xf32>
    %286 = arith.addf %283, %285 : vector<64x512xf32>
    %c0_88 = arith.constant 0 : index
    %c0_89 = arith.constant 0 : index
    %287 = vector.load %arg16[%c0_88, %c0_89] : memref<64x512xf32, #tpu.memory_space<vmem>>, vector<64x512xf32>
    tpu.vector_store %arg16[%c0_88, %c0_89], %286 {strides = array<i32>} : memref<64x512xf32, #tpu.memory_space<vmem>>, vector<64x512xf32>,
    %cst_90 = arith.constant 0.000000e+00 : f32
    %288 = vector.broadcast %cst_90 : f32 to vector<8x128xf32>
    %cst_91 = arith.constant 0.000000e+00 : f32
    %289 = vector.broadcast %cst_91 : f32 to vector<8x128xf32>
    %c0_i32_92 = arith.constant 0 : i32
    %c8_i32_93 = arith.constant 8 : i32
    %290 = arith.muli %c0_i32_92, %c8_i32_93 : i32
    %291 = tpu.assume_multiple %290, 8 : i32
    %292 = arith.index_cast %291 : i32 to index
    %c0_94 = arith.constant 0 : index
    %293 = vector.load %arg16[%292, %c0_94] : memref<64x512xf32, #tpu.memory_space<vmem>>, vector<8x512xf32>
    %c0_95 = arith.constant 0 : index
    %c0_96 = arith.constant 0 : index
    %294 = vector.load %arg6[%c0_95, %c0_96] : memref<128x512xf32, #tpu.memory_space<vmem>>, vector<128x512xf32>
    %cst_97 = arith.constant dense<0.000000e+00> : vector<8x512xf32>
    %295 = tpu.matmul %288, %294, %cst_97 {dimension_numbers = #tpu.dot_dimension_numbers<[1], [0], [0], [1], [0, 0, 1, 1], [], []>} : vector<8x128xf32>, vector<128x512xf32>, vector<8x512xf32> -> vector<8x512xf32>
    %296 = arith.addf %293, %295 : vector<8x512xf32>
    %297 = vector.extract_strided_slice %296 {offsets = [0, 0], sizes = [8, 128], strides = [1, 1]} : vector<8x512xf32> to vector<8x128xf32>
    %298 = arith.negf %297 : vector<8x128xf32>
    %299 = math.exp %298 : vector<8x128xf32>
    %cst_98 = arith.constant 1.000000e+00 : f32
    %300 = vector.broadcast %cst_98 : f32 to vector<8x128xf32>
    %301 = arith.addf %300, %299 : vector<8x128xf32>
    %302 = arith.divf %300, %301 : vector<8x128xf32>
    %303 = vector.extract_strided_slice %296 {offsets = [0, 128], sizes = [8, 128], strides = [1, 1]} : vector<8x512xf32> to vector<8x128xf32>
    %304 = arith.negf %303 : vector<8x128xf32>
    %305 = math.exp %304 : vector<8x128xf32>
    %cst_99 = arith.constant 1.000000e+00 : f32
    %306 = vector.broadcast %cst_99 : f32 to vector<8x128xf32>
    %307 = arith.addf %306, %305 : vector<8x128xf32>
    %308 = arith.divf %306, %307 : vector<8x128xf32>
    %309 = vector.extract_strided_slice %296 {offsets = [0, 256], sizes = [8, 128], strides = [1, 1]} : vector<8x512xf32> to vector<8x128xf32>
    %310 = math.tanh %309 : vector<8x128xf32>
    %311 = vector.extract_strided_slice %296 {offsets = [0, 384], sizes = [8, 128], strides = [1, 1]} : vector<8x512xf32> to vector<8x128xf32>
    %312 = arith.negf %311 : vector<8x128xf32>
    %313 = math.exp %312 : vector<8x128xf32>
    %cst_100 = arith.constant 1.000000e+00 : f32
    %314 = vector.broadcast %cst_100 : f32 to vector<8x128xf32>
    %315 = arith.addf %314, %313 : vector<8x128xf32>
    %316 = arith.divf %314, %315 : vector<8x128xf32>
    %317 = arith.mulf %308, %289 : vector<8x128xf32>
    %318 = arith.mulf %302, %310 : vector<8x128xf32>
    %319 = arith.addf %317, %318 : vector<8x128xf32>
    %320 = math.tanh %319 : vector<8x128xf32>
    %321 = arith.mulf %316, %320 : vector<8x128xf32>
    %322 = arith.index_cast %291 : i32 to index
    %c0_101 = arith.constant 0 : index
    %323 = vector.load %arg17[%322, %c0_101] : memref<64x128xf32, #tpu.memory_space<vmem>>, vector<8x128xf32>
    tpu.vector_store %arg17[%322, %c0_101], %321 {strides = array<i32>} : memref<64x128xf32, #tpu.memory_space<vmem>>, vector<8x128xf32>,
    %c1_i32_102 = arith.constant 1 : i32
    %c8_i32_103 = arith.constant 8 : i32
    %324 = arith.muli %c1_i32_102, %c8_i32_103 : i32
    %325 = tpu.assume_multiple %324, 8 : i32
    %326 = arith.index_cast %325 : i32 to index
    %c0_104 = arith.constant 0 : index
    %327 = vector.load %arg16[%326, %c0_104] : memref<64x512xf32, #tpu.memory_space<vmem>>, vector<8x512xf32>
    %c0_105 = arith.constant 0 : index
    %c0_106 = arith.constant 0 : index
    %328 = vector.load %arg6[%c0_105, %c0_106] : memref<128x512xf32, #tpu.memory_space<vmem>>, vector<128x512xf32>
    %cst_107 = arith.constant dense<0.000000e+00> : vector<8x512xf32>
    %329 = tpu.matmul %321, %328, %cst_107 {dimension_numbers = #tpu.dot_dimension_numbers<[1], [0], [0], [1], [0, 0, 1, 1], [], []>} : vector<8x128xf32>, vector<128x512xf32>, vector<8x512xf32> -> vector<8x512xf32>
    %330 = arith.addf %327, %329 : vector<8x512xf32>
    %331 = vector.extract_strided_slice %330 {offsets = [0, 0], sizes = [8, 128], strides = [1, 1]} : vector<8x512xf32> to vector<8x128xf32>
    %332 = arith.negf %331 : vector<8x128xf32>
    %333 = math.exp %332 : vector<8x128xf32>
    %cst_108 = arith.constant 1.000000e+00 : f32
    %334 = vector.broadcast %cst_108 : f32 to vector<8x128xf32>
    %335 = arith.addf %334, %333 : vector<8x128xf32>
    %336 = arith.divf %334, %335 : vector<8x128xf32>
    %337 = vector.extract_strided_slice %330 {offsets = [0, 128], sizes = [8, 128], strides = [1, 1]} : vector<8x512xf32> to vector<8x128xf32>
    %338 = arith.negf %337 : vector<8x128xf32>
    %339 = math.exp %338 : vector<8x128xf32>
    %cst_109 = arith.constant 1.000000e+00 : f32
    %340 = vector.broadcast %cst_109 : f32 to vector<8x128xf32>
    %341 = arith.addf %340, %339 : vector<8x128xf32>
    %342 = arith.divf %340, %341 : vector<8x128xf32>
    %343 = vector.extract_strided_slice %330 {offsets = [0, 256], sizes = [8, 128], strides = [1, 1]} : vector<8x512xf32> to vector<8x128xf32>
    %344 = math.tanh %343 : vector<8x128xf32>
    %345 = vector.extract_strided_slice %330 {offsets = [0, 384], sizes = [8, 128], strides = [1, 1]} : vector<8x512xf32> to vector<8x128xf32>
    %346 = arith.negf %345 : vector<8x128xf32>
    %347 = math.exp %346 : vector<8x128xf32>
    %cst_110 = arith.constant 1.000000e+00 : f32
    %348 = vector.broadcast %cst_110 : f32 to vector<8x128xf32>
    %349 = arith.addf %348, %347 : vector<8x128xf32>
    %350 = arith.divf %348, %349 : vector<8x128xf32>
    %351 = arith.mulf %342, %319 : vector<8x128xf32>
    %352 = arith.mulf %336, %344 : vector<8x128xf32>
    %353 = arith.addf %351, %352 : vector<8x128xf32>
    %354 = math.tanh %353 : vector<8x128xf32>
    %355 = arith.mulf %350, %354 : vector<8x128xf32>
    %356 = arith.index_cast %325 : i32 to index
    %c0_111 = arith.constant 0 : index
    %357 = vector.load %arg17[%356, %c0_111] : memref<64x128xf32, #tpu.memory_space<vmem>>, vector<8x128xf32>
    tpu.vector_store %arg17[%356, %c0_111], %355 {strides = array<i32>} : memref<64x128xf32, #tpu.memory_space<vmem>>, vector<8x128xf32>,
    %c2_i32_112 = arith.constant 2 : i32
    %c8_i32_113 = arith.constant 8 : i32
    %358 = arith.muli %c2_i32_112, %c8_i32_113 : i32
    %359 = tpu.assume_multiple %358, 8 : i32
    %360 = arith.index_cast %359 : i32 to index
    %c0_114 = arith.constant 0 : index
    %361 = vector.load %arg16[%360, %c0_114] : memref<64x512xf32, #tpu.memory_space<vmem>>, vector<8x512xf32>
    %c0_115 = arith.constant 0 : index
    %c0_116 = arith.constant 0 : index
    %362 = vector.load %arg6[%c0_115, %c0_116] : memref<128x512xf32, #tpu.memory_space<vmem>>, vector<128x512xf32>
    %cst_117 = arith.constant dense<0.000000e+00> : vector<8x512xf32>
    %363 = tpu.matmul %355, %362, %cst_117 {dimension_numbers = #tpu.dot_dimension_numbers<[1], [0], [0], [1], [0, 0, 1, 1], [], []>} : vector<8x128xf32>, vector<128x512xf32>, vector<8x512xf32> -> vector<8x512xf32>
    %364 = arith.addf %361, %363 : vector<8x512xf32>
    %365 = vector.extract_strided_slice %364 {offsets = [0, 0], sizes = [8, 128], strides = [1, 1]} : vector<8x512xf32> to vector<8x128xf32>
    %366 = arith.negf %365 : vector<8x128xf32>
    %367 = math.exp %366 : vector<8x128xf32>
    %cst_118 = arith.constant 1.000000e+00 : f32
    %368 = vector.broadcast %cst_118 : f32 to vector<8x128xf32>
    %369 = arith.addf %368, %367 : vector<8x128xf32>
    %370 = arith.divf %368, %369 : vector<8x128xf32>
    %371 = vector.extract_strided_slice %364 {offsets = [0, 128], sizes = [8, 128], strides = [1, 1]} : vector<8x512xf32> to vector<8x128xf32>
    %372 = arith.negf %371 : vector<8x128xf32>
    %373 = math.exp %372 : vector<8x128xf32>
    %cst_119 = arith.constant 1.000000e+00 : f32
    %374 = vector.broadcast %cst_119 : f32 to vector<8x128xf32>
    %375 = arith.addf %374, %373 : vector<8x128xf32>
    %376 = arith.divf %374, %375 : vector<8x128xf32>
    %377 = vector.extract_strided_slice %364 {offsets = [0, 256], sizes = [8, 128], strides = [1, 1]} : vector<8x512xf32> to vector<8x128xf32>
    %378 = math.tanh %377 : vector<8x128xf32>
    %379 = vector.extract_strided_slice %364 {offsets = [0, 384], sizes = [8, 128], strides = [1, 1]} : vector<8x512xf32> to vector<8x128xf32>
    %380 = arith.negf %379 : vector<8x128xf32>
    %381 = math.exp %380 : vector<8x128xf32>
    %cst_120 = arith.constant 1.000000e+00 : f32
    %382 = vector.broadcast %cst_120 : f32 to vector<8x128xf32>
    %383 = arith.addf %382, %381 : vector<8x128xf32>
    %384 = arith.divf %382, %383 : vector<8x128xf32>
    %385 = arith.mulf %376, %353 : vector<8x128xf32>
    %386 = arith.mulf %370, %378 : vector<8x128xf32>
    %387 = arith.addf %385, %386 : vector<8x128xf32>
    %388 = math.tanh %387 : vector<8x128xf32>
    %389 = arith.mulf %384, %388 : vector<8x128xf32>
    %390 = arith.index_cast %359 : i32 to index
    %c0_121 = arith.constant 0 : index
    %391 = vector.load %arg17[%390, %c0_121] : memref<64x128xf32, #tpu.memory_space<vmem>>, vector<8x128xf32>
    tpu.vector_store %arg17[%390, %c0_121], %389 {strides = array<i32>} : memref<64x128xf32, #tpu.memory_space<vmem>>, vector<8x128xf32>,
    %c3_i32_122 = arith.constant 3 : i32
    %c8_i32_123 = arith.constant 8 : i32
    %392 = arith.muli %c3_i32_122, %c8_i32_123 : i32
    %393 = tpu.assume_multiple %392, 8 : i32
    %394 = arith.index_cast %393 : i32 to index
    %c0_124 = arith.constant 0 : index
    %395 = vector.load %arg16[%394, %c0_124] : memref<64x512xf32, #tpu.memory_space<vmem>>, vector<8x512xf32>
    %c0_125 = arith.constant 0 : index
    %c0_126 = arith.constant 0 : index
    %396 = vector.load %arg6[%c0_125, %c0_126] : memref<128x512xf32, #tpu.memory_space<vmem>>, vector<128x512xf32>
    %cst_127 = arith.constant dense<0.000000e+00> : vector<8x512xf32>
    %397 = tpu.matmul %389, %396, %cst_127 {dimension_numbers = #tpu.dot_dimension_numbers<[1], [0], [0], [1], [0, 0, 1, 1], [], []>} : vector<8x128xf32>, vector<128x512xf32>, vector<8x512xf32> -> vector<8x512xf32>
    %398 = arith.addf %395, %397 : vector<8x512xf32>
    %399 = vector.extract_strided_slice %398 {offsets = [0, 0], sizes = [8, 128], strides = [1, 1]} : vector<8x512xf32> to vector<8x128xf32>
    %400 = arith.negf %399 : vector<8x128xf32>
    %401 = math.exp %400 : vector<8x128xf32>
    %cst_128 = arith.constant 1.000000e+00 : f32
    %402 = vector.broadcast %cst_128 : f32 to vector<8x128xf32>
    %403 = arith.addf %402, %401 : vector<8x128xf32>
    %404 = arith.divf %402, %403 : vector<8x128xf32>
    %405 = vector.extract_strided_slice %398 {offsets = [0, 128], sizes = [8, 128], strides = [1, 1]} : vector<8x512xf32> to vector<8x128xf32>
    %406 = arith.negf %405 : vector<8x128xf32>
    %407 = math.exp %406 : vector<8x128xf32>
    %cst_129 = arith.constant 1.000000e+00 : f32
    %408 = vector.broadcast %cst_129 : f32 to vector<8x128xf32>
    %409 = arith.addf %408, %407 : vector<8x128xf32>
    %410 = arith.divf %408, %409 : vector<8x128xf32>
    %411 = vector.extract_strided_slice %398 {offsets = [0, 256], sizes = [8, 128], strides = [1, 1]} : vector<8x512xf32> to vector<8x128xf32>
    %412 = math.tanh %411 : vector<8x128xf32>
    %413 = vector.extract_strided_slice %398 {offsets = [0, 384], sizes = [8, 128], strides = [1, 1]} : vector<8x512xf32> to vector<8x128xf32>
    %414 = arith.negf %413 : vector<8x128xf32>
    %415 = math.exp %414 : vector<8x128xf32>
    %cst_130 = arith.constant 1.000000e+00 : f32
    %416 = vector.broadcast %cst_130 : f32 to vector<8x128xf32>
    %417 = arith.addf %416, %415 : vector<8x128xf32>
    %418 = arith.divf %416, %417 : vector<8x128xf32>
    %419 = arith.mulf %410, %387 : vector<8x128xf32>
    %420 = arith.mulf %404, %412 : vector<8x128xf32>
    %421 = arith.addf %419, %420 : vector<8x128xf32>
    %422 = math.tanh %421 : vector<8x128xf32>
    %423 = arith.mulf %418, %422 : vector<8x128xf32>
    %424 = arith.index_cast %393 : i32 to index
    %c0_131 = arith.constant 0 : index
    %425 = vector.load %arg17[%424, %c0_131] : memref<64x128xf32, #tpu.memory_space<vmem>>, vector<8x128xf32>
    tpu.vector_store %arg17[%424, %c0_131], %423 {strides = array<i32>} : memref<64x128xf32, #tpu.memory_space<vmem>>, vector<8x128xf32>,
    %c4_i32_132 = arith.constant 4 : i32
    %c8_i32_133 = arith.constant 8 : i32
    %426 = arith.muli %c4_i32_132, %c8_i32_133 : i32
    %427 = tpu.assume_multiple %426, 8 : i32
    %428 = arith.index_cast %427 : i32 to index
    %c0_134 = arith.constant 0 : index
    %429 = vector.load %arg16[%428, %c0_134] : memref<64x512xf32, #tpu.memory_space<vmem>>, vector<8x512xf32>
    %c0_135 = arith.constant 0 : index
    %c0_136 = arith.constant 0 : index
    %430 = vector.load %arg6[%c0_135, %c0_136] : memref<128x512xf32, #tpu.memory_space<vmem>>, vector<128x512xf32>
    %cst_137 = arith.constant dense<0.000000e+00> : vector<8x512xf32>
    %431 = tpu.matmul %423, %430, %cst_137 {dimension_numbers = #tpu.dot_dimension_numbers<[1], [0], [0], [1], [0, 0, 1, 1], [], []>} : vector<8x128xf32>, vector<128x512xf32>, vector<8x512xf32> -> vector<8x512xf32>
    %432 = arith.addf %429, %431 : vector<8x512xf32>
    %433 = vector.extract_strided_slice %432 {offsets = [0, 0], sizes = [8, 128], strides = [1, 1]} : vector<8x512xf32> to vector<8x128xf32>
    %434 = arith.negf %433 : vector<8x128xf32>
    %435 = math.exp %434 : vector<8x128xf32>
    %cst_138 = arith.constant 1.000000e+00 : f32
    %436 = vector.broadcast %cst_138 : f32 to vector<8x128xf32>
    %437 = arith.addf %436, %435 : vector<8x128xf32>
    %438 = arith.divf %436, %437 : vector<8x128xf32>
    %439 = vector.extract_strided_slice %432 {offsets = [0, 128], sizes = [8, 128], strides = [1, 1]} : vector<8x512xf32> to vector<8x128xf32>
    %440 = arith.negf %439 : vector<8x128xf32>
    %441 = math.exp %440 : vector<8x128xf32>
    %cst_139 = arith.constant 1.000000e+00 : f32
    %442 = vector.broadcast %cst_139 : f32 to vector<8x128xf32>
    %443 = arith.addf %442, %441 : vector<8x128xf32>
    %444 = arith.divf %442, %443 : vector<8x128xf32>
    %445 = vector.extract_strided_slice %432 {offsets = [0, 256], sizes = [8, 128], strides = [1, 1]} : vector<8x512xf32> to vector<8x128xf32>
    %446 = math.tanh %445 : vector<8x128xf32>
    %447 = vector.extract_strided_slice %432 {offsets = [0, 384], sizes = [8, 128], strides = [1, 1]} : vector<8x512xf32> to vector<8x128xf32>
    %448 = arith.negf %447 : vector<8x128xf32>
    %449 = math.exp %448 : vector<8x128xf32>
    %cst_140 = arith.constant 1.000000e+00 : f32
    %450 = vector.broadcast %cst_140 : f32 to vector<8x128xf32>
    %451 = arith.addf %450, %449 : vector<8x128xf32>
    %452 = arith.divf %450, %451 : vector<8x128xf32>
    %453 = arith.mulf %444, %421 : vector<8x128xf32>
    %454 = arith.mulf %438, %446 : vector<8x128xf32>
    %455 = arith.addf %453, %454 : vector<8x128xf32>
    %456 = math.tanh %455 : vector<8x128xf32>
    %457 = arith.mulf %452, %456 : vector<8x128xf32>
    %458 = arith.index_cast %427 : i32 to index
    %c0_141 = arith.constant 0 : index
    %459 = vector.load %arg17[%458, %c0_141] : memref<64x128xf32, #tpu.memory_space<vmem>>, vector<8x128xf32>
    tpu.vector_store %arg17[%458, %c0_141], %457 {strides = array<i32>} : memref<64x128xf32, #tpu.memory_space<vmem>>, vector<8x128xf32>,
    %c5_i32_142 = arith.constant 5 : i32
    %c8_i32_143 = arith.constant 8 : i32
    %460 = arith.muli %c5_i32_142, %c8_i32_143 : i32
    %461 = tpu.assume_multiple %460, 8 : i32
    %462 = arith.index_cast %461 : i32 to index
    %c0_144 = arith.constant 0 : index
    %463 = vector.load %arg16[%462, %c0_144] : memref<64x512xf32, #tpu.memory_space<vmem>>, vector<8x512xf32>
    %c0_145 = arith.constant 0 : index
    %c0_146 = arith.constant 0 : index
    %464 = vector.load %arg6[%c0_145, %c0_146] : memref<128x512xf32, #tpu.memory_space<vmem>>, vector<128x512xf32>
    %cst_147 = arith.constant dense<0.000000e+00> : vector<8x512xf32>
    %465 = tpu.matmul %457, %464, %cst_147 {dimension_numbers = #tpu.dot_dimension_numbers<[1], [0], [0], [1], [0, 0, 1, 1], [], []>} : vector<8x128xf32>, vector<128x512xf32>, vector<8x512xf32> -> vector<8x512xf32>
    %466 = arith.addf %463, %465 : vector<8x512xf32>
    %467 = vector.extract_strided_slice %466 {offsets = [0, 0], sizes = [8, 128], strides = [1, 1]} : vector<8x512xf32> to vector<8x128xf32>
    %468 = arith.negf %467 : vector<8x128xf32>
    %469 = math.exp %468 : vector<8x128xf32>
    %cst_148 = arith.constant 1.000000e+00 : f32
    %470 = vector.broadcast %cst_148 : f32 to vector<8x128xf32>
    %471 = arith.addf %470, %469 : vector<8x128xf32>
    %472 = arith.divf %470, %471 : vector<8x128xf32>
    %473 = vector.extract_strided_slice %466 {offsets = [0, 128], sizes = [8, 128], strides = [1, 1]} : vector<8x512xf32> to vector<8x128xf32>
    %474 = arith.negf %473 : vector<8x128xf32>
    %475 = math.exp %474 : vector<8x128xf32>
    %cst_149 = arith.constant 1.000000e+00 : f32
    %476 = vector.broadcast %cst_149 : f32 to vector<8x128xf32>
    %477 = arith.addf %476, %475 : vector<8x128xf32>
    %478 = arith.divf %476, %477 : vector<8x128xf32>
    %479 = vector.extract_strided_slice %466 {offsets = [0, 256], sizes = [8, 128], strides = [1, 1]} : vector<8x512xf32> to vector<8x128xf32>
    %480 = math.tanh %479 : vector<8x128xf32>
    %481 = vector.extract_strided_slice %466 {offsets = [0, 384], sizes = [8, 128], strides = [1, 1]} : vector<8x512xf32> to vector<8x128xf32>
    %482 = arith.negf %481 : vector<8x128xf32>
    %483 = math.exp %482 : vector<8x128xf32>
    %cst_150 = arith.constant 1.000000e+00 : f32
    %484 = vector.broadcast %cst_150 : f32 to vector<8x128xf32>
    %485 = arith.addf %484, %483 : vector<8x128xf32>
    %486 = arith.divf %484, %485 : vector<8x128xf32>
    %487 = arith.mulf %478, %455 : vector<8x128xf32>
    %488 = arith.mulf %472, %480 : vector<8x128xf32>
    %489 = arith.addf %487, %488 : vector<8x128xf32>
    %490 = math.tanh %489 : vector<8x128xf32>
    %491 = arith.mulf %486, %490 : vector<8x128xf32>
    %492 = arith.index_cast %461 : i32 to index
    %c0_151 = arith.constant 0 : index
    %493 = vector.load %arg17[%492, %c0_151] : memref<64x128xf32, #tpu.memory_space<vmem>>, vector<8x128xf32>
    tpu.vector_store %arg17[%492, %c0_151], %491 {strides = array<i32>} : memref<64x128xf32, #tpu.memory_space<vmem>>, vector<8x128xf32>,
    %c6_i32_152 = arith.constant 6 : i32
    %c8_i32_153 = arith.constant 8 : i32
    %494 = arith.muli %c6_i32_152, %c8_i32_153 : i32
    %495 = tpu.assume_multiple %494, 8 : i32
    %496 = arith.index_cast %495 : i32 to index
    %c0_154 = arith.constant 0 : index
    %497 = vector.load %arg16[%496, %c0_154] : memref<64x512xf32, #tpu.memory_space<vmem>>, vector<8x512xf32>
    %c0_155 = arith.constant 0 : index
    %c0_156 = arith.constant 0 : index
    %498 = vector.load %arg6[%c0_155, %c0_156] : memref<128x512xf32, #tpu.memory_space<vmem>>, vector<128x512xf32>
    %cst_157 = arith.constant dense<0.000000e+00> : vector<8x512xf32>
    %499 = tpu.matmul %491, %498, %cst_157 {dimension_numbers = #tpu.dot_dimension_numbers<[1], [0], [0], [1], [0, 0, 1, 1], [], []>} : vector<8x128xf32>, vector<128x512xf32>, vector<8x512xf32> -> vector<8x512xf32>
    %500 = arith.addf %497, %499 : vector<8x512xf32>
    %501 = vector.extract_strided_slice %500 {offsets = [0, 0], sizes = [8, 128], strides = [1, 1]} : vector<8x512xf32> to vector<8x128xf32>
    %502 = arith.negf %501 : vector<8x128xf32>
    %503 = math.exp %502 : vector<8x128xf32>
    %cst_158 = arith.constant 1.000000e+00 : f32
    %504 = vector.broadcast %cst_158 : f32 to vector<8x128xf32>
    %505 = arith.addf %504, %503 : vector<8x128xf32>
    %506 = arith.divf %504, %505 : vector<8x128xf32>
    %507 = vector.extract_strided_slice %500 {offsets = [0, 128], sizes = [8, 128], strides = [1, 1]} : vector<8x512xf32> to vector<8x128xf32>
    %508 = arith.negf %507 : vector<8x128xf32>
    %509 = math.exp %508 : vector<8x128xf32>
    %cst_159 = arith.constant 1.000000e+00 : f32
    %510 = vector.broadcast %cst_159 : f32 to vector<8x128xf32>
    %511 = arith.addf %510, %509 : vector<8x128xf32>
    %512 = arith.divf %510, %511 : vector<8x128xf32>
    %513 = vector.extract_strided_slice %500 {offsets = [0, 256], sizes = [8, 128], strides = [1, 1]} : vector<8x512xf32> to vector<8x128xf32>
    %514 = math.tanh %513 : vector<8x128xf32>
    %515 = vector.extract_strided_slice %500 {offsets = [0, 384], sizes = [8, 128], strides = [1, 1]} : vector<8x512xf32> to vector<8x128xf32>
    %516 = arith.negf %515 : vector<8x128xf32>
    %517 = math.exp %516 : vector<8x128xf32>
    %cst_160 = arith.constant 1.000000e+00 : f32
    %518 = vector.broadcast %cst_160 : f32 to vector<8x128xf32>
    %519 = arith.addf %518, %517 : vector<8x128xf32>
    %520 = arith.divf %518, %519 : vector<8x128xf32>
    %521 = arith.mulf %512, %489 : vector<8x128xf32>
    %522 = arith.mulf %506, %514 : vector<8x128xf32>
    %523 = arith.addf %521, %522 : vector<8x128xf32>
    %524 = math.tanh %523 : vector<8x128xf32>
    %525 = arith.mulf %520, %524 : vector<8x128xf32>
    %526 = arith.index_cast %495 : i32 to index
    %c0_161 = arith.constant 0 : index
    %527 = vector.load %arg17[%526, %c0_161] : memref<64x128xf32, #tpu.memory_space<vmem>>, vector<8x128xf32>
    tpu.vector_store %arg17[%526, %c0_161], %525 {strides = array<i32>} : memref<64x128xf32, #tpu.memory_space<vmem>>, vector<8x128xf32>,
    %c7_i32_162 = arith.constant 7 : i32
    %c8_i32_163 = arith.constant 8 : i32
    %528 = arith.muli %c7_i32_162, %c8_i32_163 : i32
    %529 = tpu.assume_multiple %528, 8 : i32
    %530 = arith.index_cast %529 : i32 to index
    %c0_164 = arith.constant 0 : index
    %531 = vector.load %arg16[%530, %c0_164] : memref<64x512xf32, #tpu.memory_space<vmem>>, vector<8x512xf32>
    %c0_165 = arith.constant 0 : index
    %c0_166 = arith.constant 0 : index
    %532 = vector.load %arg6[%c0_165, %c0_166] : memref<128x512xf32, #tpu.memory_space<vmem>>, vector<128x512xf32>
    %cst_167 = arith.constant dense<0.000000e+00> : vector<8x512xf32>
    %533 = tpu.matmul %525, %532, %cst_167 {dimension_numbers = #tpu.dot_dimension_numbers<[1], [0], [0], [1], [0, 0, 1, 1], [], []>} : vector<8x128xf32>, vector<128x512xf32>, vector<8x512xf32> -> vector<8x512xf32>
    %534 = arith.addf %531, %533 : vector<8x512xf32>
    %535 = vector.extract_strided_slice %534 {offsets = [0, 0], sizes = [8, 128], strides = [1, 1]} : vector<8x512xf32> to vector<8x128xf32>
    %536 = arith.negf %535 : vector<8x128xf32>
    %537 = math.exp %536 : vector<8x128xf32>
    %cst_168 = arith.constant 1.000000e+00 : f32
    %538 = vector.broadcast %cst_168 : f32 to vector<8x128xf32>
    %539 = arith.addf %538, %537 : vector<8x128xf32>
    %540 = arith.divf %538, %539 : vector<8x128xf32>
    %541 = vector.extract_strided_slice %534 {offsets = [0, 128], sizes = [8, 128], strides = [1, 1]} : vector<8x512xf32> to vector<8x128xf32>
    %542 = arith.negf %541 : vector<8x128xf32>
    %543 = math.exp %542 : vector<8x128xf32>
    %cst_169 = arith.constant 1.000000e+00 : f32
    %544 = vector.broadcast %cst_169 : f32 to vector<8x128xf32>
    %545 = arith.addf %544, %543 : vector<8x128xf32>
    %546 = arith.divf %544, %545 : vector<8x128xf32>
    %547 = vector.extract_strided_slice %534 {offsets = [0, 256], sizes = [8, 128], strides = [1, 1]} : vector<8x512xf32> to vector<8x128xf32>
    %548 = math.tanh %547 : vector<8x128xf32>
    %549 = vector.extract_strided_slice %534 {offsets = [0, 384], sizes = [8, 128], strides = [1, 1]} : vector<8x512xf32> to vector<8x128xf32>
    %550 = arith.negf %549 : vector<8x128xf32>
    %551 = math.exp %550 : vector<8x128xf32>
    %cst_170 = arith.constant 1.000000e+00 : f32
    %552 = vector.broadcast %cst_170 : f32 to vector<8x128xf32>
    %553 = arith.addf %552, %551 : vector<8x128xf32>
    %554 = arith.divf %552, %553 : vector<8x128xf32>
    %555 = arith.mulf %546, %523 : vector<8x128xf32>
    %556 = arith.mulf %540, %548 : vector<8x128xf32>
    %557 = arith.addf %555, %556 : vector<8x128xf32>
    %558 = math.tanh %557 : vector<8x128xf32>
    %559 = arith.mulf %554, %558 : vector<8x128xf32>
    %560 = arith.index_cast %529 : i32 to index
    %c0_171 = arith.constant 0 : index
    %561 = vector.load %arg17[%560, %c0_171] : memref<64x128xf32, #tpu.memory_space<vmem>>, vector<8x128xf32>
    tpu.vector_store %arg17[%560, %c0_171], %559 {strides = array<i32>} : memref<64x128xf32, #tpu.memory_space<vmem>>, vector<8x128xf32>,
    %c8_i32_172 = arith.constant 8 : i32
    %c0_173 = arith.constant 0 : index
    %c0_174 = arith.constant 0 : index
    %562 = vector.load %arg17[%c0_173, %c0_174] : memref<64x128xf32, #tpu.memory_space<vmem>>, vector<64x128xf32>
    %c0_175 = arith.constant 0 : index
    %c0_176 = arith.constant 0 : index
    %563 = vector.load %arg3[%c0_175, %c0_176] : memref<128x512xf32, #tpu.memory_space<vmem>>, vector<128x512xf32>
    %cst_177 = arith.constant dense<0.000000e+00> : vector<64x512xf32>
    %564 = tpu.matmul %562, %563, %cst_177 {dimension_numbers = #tpu.dot_dimension_numbers<[1], [0], [0], [1], [0, 0, 1, 1], [], []>} : vector<64x128xf32>, vector<128x512xf32>, vector<64x512xf32> -> vector<64x512xf32>
    %c0_178 = arith.constant 0 : index
    %c0_179 = arith.constant 0 : index
    %565 = vector.load %arg11[%c0_178, %c0_179] : memref<1x512xf32, #tpu.memory_space<vmem>>, vector<1x512xf32>
    %566 = vector.broadcast %565 : vector<1x512xf32> to vector<64x512xf32>
    %567 = arith.addf %564, %566 : vector<64x512xf32>
    %c0_180 = arith.constant 0 : index
    %c0_181 = arith.constant 0 : index
    %568 = vector.load %arg16[%c0_180, %c0_181] : memref<64x512xf32, #tpu.memory_space<vmem>>, vector<64x512xf32>
    tpu.vector_store %arg16[%c0_180, %c0_181], %567 {strides = array<i32>} : memref<64x512xf32, #tpu.memory_space<vmem>>, vector<64x512xf32>,
    %cst_182 = arith.constant 0.000000e+00 : f32
    %569 = vector.broadcast %cst_182 : f32 to vector<8x128xf32>
    %cst_183 = arith.constant 0.000000e+00 : f32
    %570 = vector.broadcast %cst_183 : f32 to vector<8x128xf32>
    %c0_i32_184 = arith.constant 0 : i32
    %c8_i32_185 = arith.constant 8 : i32
    %571 = arith.muli %c0_i32_184, %c8_i32_185 : i32
    %572 = tpu.assume_multiple %571, 8 : i32
    %573 = arith.index_cast %572 : i32 to index
    %c0_186 = arith.constant 0 : index
    %574 = vector.load %arg16[%573, %c0_186] : memref<64x512xf32, #tpu.memory_space<vmem>>, vector<8x512xf32>
    %c0_187 = arith.constant 0 : index
    %c0_188 = arith.constant 0 : index
    %575 = vector.load %arg7[%c0_187, %c0_188] : memref<128x512xf32, #tpu.memory_space<vmem>>, vector<128x512xf32>
    %cst_189 = arith.constant dense<0.000000e+00> : vector<8x512xf32>
    %576 = tpu.matmul %569, %575, %cst_189 {dimension_numbers = #tpu.dot_dimension_numbers<[1], [0], [0], [1], [0, 0, 1, 1], [], []>} : vector<8x128xf32>, vector<128x512xf32>, vector<8x512xf32> -> vector<8x512xf32>
    %577 = arith.addf %574, %576 : vector<8x512xf32>
    %578 = vector.extract_strided_slice %577 {offsets = [0, 0], sizes = [8, 128], strides = [1, 1]} : vector<8x512xf32> to vector<8x128xf32>
    %579 = arith.negf %578 : vector<8x128xf32>
    %580 = math.exp %579 : vector<8x128xf32>
    %cst_190 = arith.constant 1.000000e+00 : f32
    %581 = vector.broadcast %cst_190 : f32 to vector<8x128xf32>
    %582 = arith.addf %581, %580 : vector<8x128xf32>
    %583 = arith.divf %581, %582 : vector<8x128xf32>
    %584 = vector.extract_strided_slice %577 {offsets = [0, 128], sizes = [8, 128], strides = [1, 1]} : vector<8x512xf32> to vector<8x128xf32>
    %585 = arith.negf %584 : vector<8x128xf32>
    %586 = math.exp %585 : vector<8x128xf32>
    %cst_191 = arith.constant 1.000000e+00 : f32
    %587 = vector.broadcast %cst_191 : f32 to vector<8x128xf32>
    %588 = arith.addf %587, %586 : vector<8x128xf32>
    %589 = arith.divf %587, %588 : vector<8x128xf32>
    %590 = vector.extract_strided_slice %577 {offsets = [0, 256], sizes = [8, 128], strides = [1, 1]} : vector<8x512xf32> to vector<8x128xf32>
    %591 = math.tanh %590 : vector<8x128xf32>
    %592 = vector.extract_strided_slice %577 {offsets = [0, 384], sizes = [8, 128], strides = [1, 1]} : vector<8x512xf32> to vector<8x128xf32>
    %593 = arith.negf %592 : vector<8x128xf32>
    %594 = math.exp %593 : vector<8x128xf32>
    %cst_192 = arith.constant 1.000000e+00 : f32
    %595 = vector.broadcast %cst_192 : f32 to vector<8x128xf32>
    %596 = arith.addf %595, %594 : vector<8x128xf32>
    %597 = arith.divf %595, %596 : vector<8x128xf32>
    %598 = arith.mulf %589, %570 : vector<8x128xf32>
    %599 = arith.mulf %583, %591 : vector<8x128xf32>
    %600 = arith.addf %598, %599 : vector<8x128xf32>
    %601 = math.tanh %600 : vector<8x128xf32>
    %602 = arith.mulf %597, %601 : vector<8x128xf32>
    %603 = arith.index_cast %572 : i32 to index
    %c0_193 = arith.constant 0 : index
    %604 = vector.load %arg17[%603, %c0_193] : memref<64x128xf32, #tpu.memory_space<vmem>>, vector<8x128xf32>
    tpu.vector_store %arg17[%603, %c0_193], %602 {strides = array<i32>} : memref<64x128xf32, #tpu.memory_space<vmem>>, vector<8x128xf32>,
    %c1_i32_194 = arith.constant 1 : i32
    %c8_i32_195 = arith.constant 8 : i32
    %605 = arith.muli %c1_i32_194, %c8_i32_195 : i32
    %606 = tpu.assume_multiple %605, 8 : i32
    %607 = arith.index_cast %606 : i32 to index
    %c0_196 = arith.constant 0 : index
    %608 = vector.load %arg16[%607, %c0_196] : memref<64x512xf32, #tpu.memory_space<vmem>>, vector<8x512xf32>
    %c0_197 = arith.constant 0 : index
    %c0_198 = arith.constant 0 : index
    %609 = vector.load %arg7[%c0_197, %c0_198] : memref<128x512xf32, #tpu.memory_space<vmem>>, vector<128x512xf32>
    %cst_199 = arith.constant dense<0.000000e+00> : vector<8x512xf32>
    %610 = tpu.matmul %602, %609, %cst_199 {dimension_numbers = #tpu.dot_dimension_numbers<[1], [0], [0], [1], [0, 0, 1, 1], [], []>} : vector<8x128xf32>, vector<128x512xf32>, vector<8x512xf32> -> vector<8x512xf32>
    %611 = arith.addf %608, %610 : vector<8x512xf32>
    %612 = vector.extract_strided_slice %611 {offsets = [0, 0], sizes = [8, 128], strides = [1, 1]} : vector<8x512xf32> to vector<8x128xf32>
    %613 = arith.negf %612 : vector<8x128xf32>
    %614 = math.exp %613 : vector<8x128xf32>
    %cst_200 = arith.constant 1.000000e+00 : f32
    %615 = vector.broadcast %cst_200 : f32 to vector<8x128xf32>
    %616 = arith.addf %615, %614 : vector<8x128xf32>
    %617 = arith.divf %615, %616 : vector<8x128xf32>
    %618 = vector.extract_strided_slice %611 {offsets = [0, 128], sizes = [8, 128], strides = [1, 1]} : vector<8x512xf32> to vector<8x128xf32>
    %619 = arith.negf %618 : vector<8x128xf32>
    %620 = math.exp %619 : vector<8x128xf32>
    %cst_201 = arith.constant 1.000000e+00 : f32
    %621 = vector.broadcast %cst_201 : f32 to vector<8x128xf32>
    %622 = arith.addf %621, %620 : vector<8x128xf32>
    %623 = arith.divf %621, %622 : vector<8x128xf32>
    %624 = vector.extract_strided_slice %611 {offsets = [0, 256], sizes = [8, 128], strides = [1, 1]} : vector<8x512xf32> to vector<8x128xf32>
    %625 = math.tanh %624 : vector<8x128xf32>
    %626 = vector.extract_strided_slice %611 {offsets = [0, 384], sizes = [8, 128], strides = [1, 1]} : vector<8x512xf32> to vector<8x128xf32>
    %627 = arith.negf %626 : vector<8x128xf32>
    %628 = math.exp %627 : vector<8x128xf32>
    %cst_202 = arith.constant 1.000000e+00 : f32
    %629 = vector.broadcast %cst_202 : f32 to vector<8x128xf32>
    %630 = arith.addf %629, %628 : vector<8x128xf32>
    %631 = arith.divf %629, %630 : vector<8x128xf32>
    %632 = arith.mulf %623, %600 : vector<8x128xf32>
    %633 = arith.mulf %617, %625 : vector<8x128xf32>
    %634 = arith.addf %632, %633 : vector<8x128xf32>
    %635 = math.tanh %634 : vector<8x128xf32>
    %636 = arith.mulf %631, %635 : vector<8x128xf32>
    %637 = arith.index_cast %606 : i32 to index
    %c0_203 = arith.constant 0 : index
    %638 = vector.load %arg17[%637, %c0_203] : memref<64x128xf32, #tpu.memory_space<vmem>>, vector<8x128xf32>
    tpu.vector_store %arg17[%637, %c0_203], %636 {strides = array<i32>} : memref<64x128xf32, #tpu.memory_space<vmem>>, vector<8x128xf32>,
    %c2_i32_204 = arith.constant 2 : i32
    %c8_i32_205 = arith.constant 8 : i32
    %639 = arith.muli %c2_i32_204, %c8_i32_205 : i32
    %640 = tpu.assume_multiple %639, 8 : i32
    %641 = arith.index_cast %640 : i32 to index
    %c0_206 = arith.constant 0 : index
    %642 = vector.load %arg16[%641, %c0_206] : memref<64x512xf32, #tpu.memory_space<vmem>>, vector<8x512xf32>
    %c0_207 = arith.constant 0 : index
    %c0_208 = arith.constant 0 : index
    %643 = vector.load %arg7[%c0_207, %c0_208] : memref<128x512xf32, #tpu.memory_space<vmem>>, vector<128x512xf32>
    %cst_209 = arith.constant dense<0.000000e+00> : vector<8x512xf32>
    %644 = tpu.matmul %636, %643, %cst_209 {dimension_numbers = #tpu.dot_dimension_numbers<[1], [0], [0], [1], [0, 0, 1, 1], [], []>} : vector<8x128xf32>, vector<128x512xf32>, vector<8x512xf32> -> vector<8x512xf32>
    %645 = arith.addf %642, %644 : vector<8x512xf32>
    %646 = vector.extract_strided_slice %645 {offsets = [0, 0], sizes = [8, 128], strides = [1, 1]} : vector<8x512xf32> to vector<8x128xf32>
    %647 = arith.negf %646 : vector<8x128xf32>
    %648 = math.exp %647 : vector<8x128xf32>
    %cst_210 = arith.constant 1.000000e+00 : f32
    %649 = vector.broadcast %cst_210 : f32 to vector<8x128xf32>
    %650 = arith.addf %649, %648 : vector<8x128xf32>
    %651 = arith.divf %649, %650 : vector<8x128xf32>
    %652 = vector.extract_strided_slice %645 {offsets = [0, 128], sizes = [8, 128], strides = [1, 1]} : vector<8x512xf32> to vector<8x128xf32>
    %653 = arith.negf %652 : vector<8x128xf32>
    %654 = math.exp %653 : vector<8x128xf32>
    %cst_211 = arith.constant 1.000000e+00 : f32
    %655 = vector.broadcast %cst_211 : f32 to vector<8x128xf32>
    %656 = arith.addf %655, %654 : vector<8x128xf32>
    %657 = arith.divf %655, %656 : vector<8x128xf32>
    %658 = vector.extract_strided_slice %645 {offsets = [0, 256], sizes = [8, 128], strides = [1, 1]} : vector<8x512xf32> to vector<8x128xf32>
    %659 = math.tanh %658 : vector<8x128xf32>
    %660 = vector.extract_strided_slice %645 {offsets = [0, 384], sizes = [8, 128], strides = [1, 1]} : vector<8x512xf32> to vector<8x128xf32>
    %661 = arith.negf %660 : vector<8x128xf32>
    %662 = math.exp %661 : vector<8x128xf32>
    %cst_212 = arith.constant 1.000000e+00 : f32
    %663 = vector.broadcast %cst_212 : f32 to vector<8x128xf32>
    %664 = arith.addf %663, %662 : vector<8x128xf32>
    %665 = arith.divf %663, %664 : vector<8x128xf32>
    %666 = arith.mulf %657, %634 : vector<8x128xf32>
    %667 = arith.mulf %651, %659 : vector<8x128xf32>
    %668 = arith.addf %666, %667 : vector<8x128xf32>
    %669 = math.tanh %668 : vector<8x128xf32>
    %670 = arith.mulf %665, %669 : vector<8x128xf32>
    %671 = arith.index_cast %640 : i32 to index
    %c0_213 = arith.constant 0 : index
    %672 = vector.load %arg17[%671, %c0_213] : memref<64x128xf32, #tpu.memory_space<vmem>>, vector<8x128xf32>
    tpu.vector_store %arg17[%671, %c0_213], %670 {strides = array<i32>} : memref<64x128xf32, #tpu.memory_space<vmem>>, vector<8x128xf32>,
    %c3_i32_214 = arith.constant 3 : i32
    %c8_i32_215 = arith.constant 8 : i32
    %673 = arith.muli %c3_i32_214, %c8_i32_215 : i32
    %674 = tpu.assume_multiple %673, 8 : i32
    %675 = arith.index_cast %674 : i32 to index
    %c0_216 = arith.constant 0 : index
    %676 = vector.load %arg16[%675, %c0_216] : memref<64x512xf32, #tpu.memory_space<vmem>>, vector<8x512xf32>
    %c0_217 = arith.constant 0 : index
    %c0_218 = arith.constant 0 : index
    %677 = vector.load %arg7[%c0_217, %c0_218] : memref<128x512xf32, #tpu.memory_space<vmem>>, vector<128x512xf32>
    %cst_219 = arith.constant dense<0.000000e+00> : vector<8x512xf32>
    %678 = tpu.matmul %670, %677, %cst_219 {dimension_numbers = #tpu.dot_dimension_numbers<[1], [0], [0], [1], [0, 0, 1, 1], [], []>} : vector<8x128xf32>, vector<128x512xf32>, vector<8x512xf32> -> vector<8x512xf32>
    %679 = arith.addf %676, %678 : vector<8x512xf32>
    %680 = vector.extract_strided_slice %679 {offsets = [0, 0], sizes = [8, 128], strides = [1, 1]} : vector<8x512xf32> to vector<8x128xf32>
    %681 = arith.negf %680 : vector<8x128xf32>
    %682 = math.exp %681 : vector<8x128xf32>
    %cst_220 = arith.constant 1.000000e+00 : f32
    %683 = vector.broadcast %cst_220 : f32 to vector<8x128xf32>
    %684 = arith.addf %683, %682 : vector<8x128xf32>
    %685 = arith.divf %683, %684 : vector<8x128xf32>
    %686 = vector.extract_strided_slice %679 {offsets = [0, 128], sizes = [8, 128], strides = [1, 1]} : vector<8x512xf32> to vector<8x128xf32>
    %687 = arith.negf %686 : vector<8x128xf32>
    %688 = math.exp %687 : vector<8x128xf32>
    %cst_221 = arith.constant 1.000000e+00 : f32
    %689 = vector.broadcast %cst_221 : f32 to vector<8x128xf32>
    %690 = arith.addf %689, %688 : vector<8x128xf32>
    %691 = arith.divf %689, %690 : vector<8x128xf32>
    %692 = vector.extract_strided_slice %679 {offsets = [0, 256], sizes = [8, 128], strides = [1, 1]} : vector<8x512xf32> to vector<8x128xf32>
    %693 = math.tanh %692 : vector<8x128xf32>
    %694 = vector.extract_strided_slice %679 {offsets = [0, 384], sizes = [8, 128], strides = [1, 1]} : vector<8x512xf32> to vector<8x128xf32>
    %695 = arith.negf %694 : vector<8x128xf32>
    %696 = math.exp %695 : vector<8x128xf32>
    %cst_222 = arith.constant 1.000000e+00 : f32
    %697 = vector.broadcast %cst_222 : f32 to vector<8x128xf32>
    %698 = arith.addf %697, %696 : vector<8x128xf32>
    %699 = arith.divf %697, %698 : vector<8x128xf32>
    %700 = arith.mulf %691, %668 : vector<8x128xf32>
    %701 = arith.mulf %685, %693 : vector<8x128xf32>
    %702 = arith.addf %700, %701 : vector<8x128xf32>
    %703 = math.tanh %702 : vector<8x128xf32>
    %704 = arith.mulf %699, %703 : vector<8x128xf32>
    %705 = arith.index_cast %674 : i32 to index
    %c0_223 = arith.constant 0 : index
    %706 = vector.load %arg17[%705, %c0_223] : memref<64x128xf32, #tpu.memory_space<vmem>>, vector<8x128xf32>
    tpu.vector_store %arg17[%705, %c0_223], %704 {strides = array<i32>} : memref<64x128xf32, #tpu.memory_space<vmem>>, vector<8x128xf32>,
    %c4_i32_224 = arith.constant 4 : i32
    %c8_i32_225 = arith.constant 8 : i32
    %707 = arith.muli %c4_i32_224, %c8_i32_225 : i32
    %708 = tpu.assume_multiple %707, 8 : i32
    %709 = arith.index_cast %708 : i32 to index
    %c0_226 = arith.constant 0 : index
    %710 = vector.load %arg16[%709, %c0_226] : memref<64x512xf32, #tpu.memory_space<vmem>>, vector<8x512xf32>
    %c0_227 = arith.constant 0 : index
    %c0_228 = arith.constant 0 : index
    %711 = vector.load %arg7[%c0_227, %c0_228] : memref<128x512xf32, #tpu.memory_space<vmem>>, vector<128x512xf32>
    %cst_229 = arith.constant dense<0.000000e+00> : vector<8x512xf32>
    %712 = tpu.matmul %704, %711, %cst_229 {dimension_numbers = #tpu.dot_dimension_numbers<[1], [0], [0], [1], [0, 0, 1, 1], [], []>} : vector<8x128xf32>, vector<128x512xf32>, vector<8x512xf32> -> vector<8x512xf32>
    %713 = arith.addf %710, %712 : vector<8x512xf32>
    %714 = vector.extract_strided_slice %713 {offsets = [0, 0], sizes = [8, 128], strides = [1, 1]} : vector<8x512xf32> to vector<8x128xf32>
    %715 = arith.negf %714 : vector<8x128xf32>
    %716 = math.exp %715 : vector<8x128xf32>
    %cst_230 = arith.constant 1.000000e+00 : f32
    %717 = vector.broadcast %cst_230 : f32 to vector<8x128xf32>
    %718 = arith.addf %717, %716 : vector<8x128xf32>
    %719 = arith.divf %717, %718 : vector<8x128xf32>
    %720 = vector.extract_strided_slice %713 {offsets = [0, 128], sizes = [8, 128], strides = [1, 1]} : vector<8x512xf32> to vector<8x128xf32>
    %721 = arith.negf %720 : vector<8x128xf32>
    %722 = math.exp %721 : vector<8x128xf32>
    %cst_231 = arith.constant 1.000000e+00 : f32
    %723 = vector.broadcast %cst_231 : f32 to vector<8x128xf32>
    %724 = arith.addf %723, %722 : vector<8x128xf32>
    %725 = arith.divf %723, %724 : vector<8x128xf32>
    %726 = vector.extract_strided_slice %713 {offsets = [0, 256], sizes = [8, 128], strides = [1, 1]} : vector<8x512xf32> to vector<8x128xf32>
    %727 = math.tanh %726 : vector<8x128xf32>
    %728 = vector.extract_strided_slice %713 {offsets = [0, 384], sizes = [8, 128], strides = [1, 1]} : vector<8x512xf32> to vector<8x128xf32>
    %729 = arith.negf %728 : vector<8x128xf32>
    %730 = math.exp %729 : vector<8x128xf32>
    %cst_232 = arith.constant 1.000000e+00 : f32
    %731 = vector.broadcast %cst_232 : f32 to vector<8x128xf32>
    %732 = arith.addf %731, %730 : vector<8x128xf32>
    %733 = arith.divf %731, %732 : vector<8x128xf32>
    %734 = arith.mulf %725, %702 : vector<8x128xf32>
    %735 = arith.mulf %719, %727 : vector<8x128xf32>
    %736 = arith.addf %734, %735 : vector<8x128xf32>
    %737 = math.tanh %736 : vector<8x128xf32>
    %738 = arith.mulf %733, %737 : vector<8x128xf32>
    %739 = arith.index_cast %708 : i32 to index
    %c0_233 = arith.constant 0 : index
    %740 = vector.load %arg17[%739, %c0_233] : memref<64x128xf32, #tpu.memory_space<vmem>>, vector<8x128xf32>
    tpu.vector_store %arg17[%739, %c0_233], %738 {strides = array<i32>} : memref<64x128xf32, #tpu.memory_space<vmem>>, vector<8x128xf32>,
    %c5_i32_234 = arith.constant 5 : i32
    %c8_i32_235 = arith.constant 8 : i32
    %741 = arith.muli %c5_i32_234, %c8_i32_235 : i32
    %742 = tpu.assume_multiple %741, 8 : i32
    %743 = arith.index_cast %742 : i32 to index
    %c0_236 = arith.constant 0 : index
    %744 = vector.load %arg16[%743, %c0_236] : memref<64x512xf32, #tpu.memory_space<vmem>>, vector<8x512xf32>
    %c0_237 = arith.constant 0 : index
    %c0_238 = arith.constant 0 : index
    %745 = vector.load %arg7[%c0_237, %c0_238] : memref<128x512xf32, #tpu.memory_space<vmem>>, vector<128x512xf32>
    %cst_239 = arith.constant dense<0.000000e+00> : vector<8x512xf32>
    %746 = tpu.matmul %738, %745, %cst_239 {dimension_numbers = #tpu.dot_dimension_numbers<[1], [0], [0], [1], [0, 0, 1, 1], [], []>} : vector<8x128xf32>, vector<128x512xf32>, vector<8x512xf32> -> vector<8x512xf32>
    %747 = arith.addf %744, %746 : vector<8x512xf32>
    %748 = vector.extract_strided_slice %747 {offsets = [0, 0], sizes = [8, 128], strides = [1, 1]} : vector<8x512xf32> to vector<8x128xf32>
    %749 = arith.negf %748 : vector<8x128xf32>
    %750 = math.exp %749 : vector<8x128xf32>
    %cst_240 = arith.constant 1.000000e+00 : f32
    %751 = vector.broadcast %cst_240 : f32 to vector<8x128xf32>
    %752 = arith.addf %751, %750 : vector<8x128xf32>
    %753 = arith.divf %751, %752 : vector<8x128xf32>
    %754 = vector.extract_strided_slice %747 {offsets = [0, 128], sizes = [8, 128], strides = [1, 1]} : vector<8x512xf32> to vector<8x128xf32>
    %755 = arith.negf %754 : vector<8x128xf32>
    %756 = math.exp %755 : vector<8x128xf32>
    %cst_241 = arith.constant 1.000000e+00 : f32
    %757 = vector.broadcast %cst_241 : f32 to vector<8x128xf32>
    %758 = arith.addf %757, %756 : vector<8x128xf32>
    %759 = arith.divf %757, %758 : vector<8x128xf32>
    %760 = vector.extract_strided_slice %747 {offsets = [0, 256], sizes = [8, 128], strides = [1, 1]} : vector<8x512xf32> to vector<8x128xf32>
    %761 = math.tanh %760 : vector<8x128xf32>
    %762 = vector.extract_strided_slice %747 {offsets = [0, 384], sizes = [8, 128], strides = [1, 1]} : vector<8x512xf32> to vector<8x128xf32>
    %763 = arith.negf %762 : vector<8x128xf32>
    %764 = math.exp %763 : vector<8x128xf32>
    %cst_242 = arith.constant 1.000000e+00 : f32
    %765 = vector.broadcast %cst_242 : f32 to vector<8x128xf32>
    %766 = arith.addf %765, %764 : vector<8x128xf32>
    %767 = arith.divf %765, %766 : vector<8x128xf32>
    %768 = arith.mulf %759, %736 : vector<8x128xf32>
    %769 = arith.mulf %753, %761 : vector<8x128xf32>
    %770 = arith.addf %768, %769 : vector<8x128xf32>
    %771 = math.tanh %770 : vector<8x128xf32>
    %772 = arith.mulf %767, %771 : vector<8x128xf32>
    %773 = arith.index_cast %742 : i32 to index
    %c0_243 = arith.constant 0 : index
    %774 = vector.load %arg17[%773, %c0_243] : memref<64x128xf32, #tpu.memory_space<vmem>>, vector<8x128xf32>
    tpu.vector_store %arg17[%773, %c0_243], %772 {strides = array<i32>} : memref<64x128xf32, #tpu.memory_space<vmem>>, vector<8x128xf32>,
    %c6_i32_244 = arith.constant 6 : i32
    %c8_i32_245 = arith.constant 8 : i32
    %775 = arith.muli %c6_i32_244, %c8_i32_245 : i32
    %776 = tpu.assume_multiple %775, 8 : i32
    %777 = arith.index_cast %776 : i32 to index
    %c0_246 = arith.constant 0 : index
    %778 = vector.load %arg16[%777, %c0_246] : memref<64x512xf32, #tpu.memory_space<vmem>>, vector<8x512xf32>
    %c0_247 = arith.constant 0 : index
    %c0_248 = arith.constant 0 : index
    %779 = vector.load %arg7[%c0_247, %c0_248] : memref<128x512xf32, #tpu.memory_space<vmem>>, vector<128x512xf32>
    %cst_249 = arith.constant dense<0.000000e+00> : vector<8x512xf32>
    %780 = tpu.matmul %772, %779, %cst_249 {dimension_numbers = #tpu.dot_dimension_numbers<[1], [0], [0], [1], [0, 0, 1, 1], [], []>} : vector<8x128xf32>, vector<128x512xf32>, vector<8x512xf32> -> vector<8x512xf32>
    %781 = arith.addf %778, %780 : vector<8x512xf32>
    %782 = vector.extract_strided_slice %781 {offsets = [0, 0], sizes = [8, 128], strides = [1, 1]} : vector<8x512xf32> to vector<8x128xf32>
    %783 = arith.negf %782 : vector<8x128xf32>
    %784 = math.exp %783 : vector<8x128xf32>
    %cst_250 = arith.constant 1.000000e+00 : f32
    %785 = vector.broadcast %cst_250 : f32 to vector<8x128xf32>
    %786 = arith.addf %785, %784 : vector<8x128xf32>
    %787 = arith.divf %785, %786 : vector<8x128xf32>
    %788 = vector.extract_strided_slice %781 {offsets = [0, 128], sizes = [8, 128], strides = [1, 1]} : vector<8x512xf32> to vector<8x128xf32>
    %789 = arith.negf %788 : vector<8x128xf32>
    %790 = math.exp %789 : vector<8x128xf32>
    %cst_251 = arith.constant 1.000000e+00 : f32
    %791 = vector.broadcast %cst_251 : f32 to vector<8x128xf32>
    %792 = arith.addf %791, %790 : vector<8x128xf32>
    %793 = arith.divf %791, %792 : vector<8x128xf32>
    %794 = vector.extract_strided_slice %781 {offsets = [0, 256], sizes = [8, 128], strides = [1, 1]} : vector<8x512xf32> to vector<8x128xf32>
    %795 = math.tanh %794 : vector<8x128xf32>
    %796 = vector.extract_strided_slice %781 {offsets = [0, 384], sizes = [8, 128], strides = [1, 1]} : vector<8x512xf32> to vector<8x128xf32>
    %797 = arith.negf %796 : vector<8x128xf32>
    %798 = math.exp %797 : vector<8x128xf32>
    %cst_252 = arith.constant 1.000000e+00 : f32
    %799 = vector.broadcast %cst_252 : f32 to vector<8x128xf32>
    %800 = arith.addf %799, %798 : vector<8x128xf32>
    %801 = arith.divf %799, %800 : vector<8x128xf32>
    %802 = arith.mulf %793, %770 : vector<8x128xf32>
    %803 = arith.mulf %787, %795 : vector<8x128xf32>
    %804 = arith.addf %802, %803 : vector<8x128xf32>
    %805 = math.tanh %804 : vector<8x128xf32>
    %806 = arith.mulf %801, %805 : vector<8x128xf32>
    %807 = arith.index_cast %776 : i32 to index
    %c0_253 = arith.constant 0 : index
    %808 = vector.load %arg17[%807, %c0_253] : memref<64x128xf32, #tpu.memory_space<vmem>>, vector<8x128xf32>
    tpu.vector_store %arg17[%807, %c0_253], %806 {strides = array<i32>} : memref<64x128xf32, #tpu.memory_space<vmem>>, vector<8x128xf32>,
    %c7_i32_254 = arith.constant 7 : i32
    %c8_i32_255 = arith.constant 8 : i32
    %809 = arith.muli %c7_i32_254, %c8_i32_255 : i32
    %810 = tpu.assume_multiple %809, 8 : i32
    %811 = arith.index_cast %810 : i32 to index
    %c0_256 = arith.constant 0 : index
    %812 = vector.load %arg16[%811, %c0_256] : memref<64x512xf32, #tpu.memory_space<vmem>>, vector<8x512xf32>
    %c0_257 = arith.constant 0 : index
    %c0_258 = arith.constant 0 : index
    %813 = vector.load %arg7[%c0_257, %c0_258] : memref<128x512xf32, #tpu.memory_space<vmem>>, vector<128x512xf32>
    %cst_259 = arith.constant dense<0.000000e+00> : vector<8x512xf32>
    %814 = tpu.matmul %806, %813, %cst_259 {dimension_numbers = #tpu.dot_dimension_numbers<[1], [0], [0], [1], [0, 0, 1, 1], [], []>} : vector<8x128xf32>, vector<128x512xf32>, vector<8x512xf32> -> vector<8x512xf32>
    %815 = arith.addf %812, %814 : vector<8x512xf32>
    %816 = vector.extract_strided_slice %815 {offsets = [0, 0], sizes = [8, 128], strides = [1, 1]} : vector<8x512xf32> to vector<8x128xf32>
    %817 = arith.negf %816 : vector<8x128xf32>
    %818 = math.exp %817 : vector<8x128xf32>
    %cst_260 = arith.constant 1.000000e+00 : f32
    %819 = vector.broadcast %cst_260 : f32 to vector<8x128xf32>
    %820 = arith.addf %819, %818 : vector<8x128xf32>
    %821 = arith.divf %819, %820 : vector<8x128xf32>
    %822 = vector.extract_strided_slice %815 {offsets = [0, 128], sizes = [8, 128], strides = [1, 1]} : vector<8x512xf32> to vector<8x128xf32>
    %823 = arith.negf %822 : vector<8x128xf32>
    %824 = math.exp %823 : vector<8x128xf32>
    %cst_261 = arith.constant 1.000000e+00 : f32
    %825 = vector.broadcast %cst_261 : f32 to vector<8x128xf32>
    %826 = arith.addf %825, %824 : vector<8x128xf32>
    %827 = arith.divf %825, %826 : vector<8x128xf32>
    %828 = vector.extract_strided_slice %815 {offsets = [0, 256], sizes = [8, 128], strides = [1, 1]} : vector<8x512xf32> to vector<8x128xf32>
    %829 = math.tanh %828 : vector<8x128xf32>
    %830 = vector.extract_strided_slice %815 {offsets = [0, 384], sizes = [8, 128], strides = [1, 1]} : vector<8x512xf32> to vector<8x128xf32>
    %831 = arith.negf %830 : vector<8x128xf32>
    %832 = math.exp %831 : vector<8x128xf32>
    %cst_262 = arith.constant 1.000000e+00 : f32
    %833 = vector.broadcast %cst_262 : f32 to vector<8x128xf32>
    %834 = arith.addf %833, %832 : vector<8x128xf32>
    %835 = arith.divf %833, %834 : vector<8x128xf32>
    %836 = arith.mulf %827, %804 : vector<8x128xf32>
    %837 = arith.mulf %821, %829 : vector<8x128xf32>
    %838 = arith.addf %836, %837 : vector<8x128xf32>
    %839 = math.tanh %838 : vector<8x128xf32>
    %840 = arith.mulf %835, %839 : vector<8x128xf32>
    %841 = arith.index_cast %810 : i32 to index
    %c0_263 = arith.constant 0 : index
    %842 = vector.load %arg17[%841, %c0_263] : memref<64x128xf32, #tpu.memory_space<vmem>>, vector<8x128xf32>
    tpu.vector_store %arg17[%841, %c0_263], %840 {strides = array<i32>} : memref<64x128xf32, #tpu.memory_space<vmem>>, vector<8x128xf32>,
    %c8_i32_264 = arith.constant 8 : i32
    %c0_265 = arith.constant 0 : index
    %c0_266 = arith.constant 0 : index
    %843 = vector.load %arg17[%c0_265, %c0_266] : memref<64x128xf32, #tpu.memory_space<vmem>>, vector<64x128xf32>
    %c0_267 = arith.constant 0 : index
    %c0_268 = arith.constant 0 : index
    %844 = vector.load %arg4[%c0_267, %c0_268] : memref<128x512xf32, #tpu.memory_space<vmem>>, vector<128x512xf32>
    %cst_269 = arith.constant dense<0.000000e+00> : vector<64x512xf32>
    %845 = tpu.matmul %843, %844, %cst_269 {dimension_numbers = #tpu.dot_dimension_numbers<[1], [0], [0], [1], [0, 0, 1, 1], [], []>} : vector<64x128xf32>, vector<128x512xf32>, vector<64x512xf32> -> vector<64x512xf32>
    %c0_270 = arith.constant 0 : index
    %c0_271 = arith.constant 0 : index
    %846 = vector.load %arg12[%c0_270, %c0_271] : memref<1x512xf32, #tpu.memory_space<vmem>>, vector<1x512xf32>
    %847 = vector.broadcast %846 : vector<1x512xf32> to vector<64x512xf32>
    %848 = arith.addf %845, %847 : vector<64x512xf32>
    %c0_272 = arith.constant 0 : index
    %c0_273 = arith.constant 0 : index
    %849 = vector.load %arg16[%c0_272, %c0_273] : memref<64x512xf32, #tpu.memory_space<vmem>>, vector<64x512xf32>
    tpu.vector_store %arg16[%c0_272, %c0_273], %848 {strides = array<i32>} : memref<64x512xf32, #tpu.memory_space<vmem>>, vector<64x512xf32>,
    %cst_274 = arith.constant 0.000000e+00 : f32
    %850 = vector.broadcast %cst_274 : f32 to vector<8x128xf32>
    %cst_275 = arith.constant 0.000000e+00 : f32
    %851 = vector.broadcast %cst_275 : f32 to vector<8x128xf32>
    %c0_i32_276 = arith.constant 0 : i32
    %c8_i32_277 = arith.constant 8 : i32
    %852 = arith.muli %c0_i32_276, %c8_i32_277 : i32
    %853 = tpu.assume_multiple %852, 8 : i32
    %854 = arith.index_cast %853 : i32 to index
    %c0_278 = arith.constant 0 : index
    %855 = vector.load %arg16[%854, %c0_278] : memref<64x512xf32, #tpu.memory_space<vmem>>, vector<8x512xf32>
    %c0_279 = arith.constant 0 : index
    %c0_280 = arith.constant 0 : index
    %856 = vector.load %arg8[%c0_279, %c0_280] : memref<128x512xf32, #tpu.memory_space<vmem>>, vector<128x512xf32>
    %cst_281 = arith.constant dense<0.000000e+00> : vector<8x512xf32>
    %857 = tpu.matmul %850, %856, %cst_281 {dimension_numbers = #tpu.dot_dimension_numbers<[1], [0], [0], [1], [0, 0, 1, 1], [], []>} : vector<8x128xf32>, vector<128x512xf32>, vector<8x512xf32> -> vector<8x512xf32>
    %858 = arith.addf %855, %857 : vector<8x512xf32>
    %859 = vector.extract_strided_slice %858 {offsets = [0, 0], sizes = [8, 128], strides = [1, 1]} : vector<8x512xf32> to vector<8x128xf32>
    %860 = arith.negf %859 : vector<8x128xf32>
    %861 = math.exp %860 : vector<8x128xf32>
    %cst_282 = arith.constant 1.000000e+00 : f32
    %862 = vector.broadcast %cst_282 : f32 to vector<8x128xf32>
    %863 = arith.addf %862, %861 : vector<8x128xf32>
    %864 = arith.divf %862, %863 : vector<8x128xf32>
    %865 = vector.extract_strided_slice %858 {offsets = [0, 128], sizes = [8, 128], strides = [1, 1]} : vector<8x512xf32> to vector<8x128xf32>
    %866 = arith.negf %865 : vector<8x128xf32>
    %867 = math.exp %866 : vector<8x128xf32>
    %cst_283 = arith.constant 1.000000e+00 : f32
    %868 = vector.broadcast %cst_283 : f32 to vector<8x128xf32>
    %869 = arith.addf %868, %867 : vector<8x128xf32>
    %870 = arith.divf %868, %869 : vector<8x128xf32>
    %871 = vector.extract_strided_slice %858 {offsets = [0, 256], sizes = [8, 128], strides = [1, 1]} : vector<8x512xf32> to vector<8x128xf32>
    %872 = math.tanh %871 : vector<8x128xf32>
    %873 = vector.extract_strided_slice %858 {offsets = [0, 384], sizes = [8, 128], strides = [1, 1]} : vector<8x512xf32> to vector<8x128xf32>
    %874 = arith.negf %873 : vector<8x128xf32>
    %875 = math.exp %874 : vector<8x128xf32>
    %cst_284 = arith.constant 1.000000e+00 : f32
    %876 = vector.broadcast %cst_284 : f32 to vector<8x128xf32>
    %877 = arith.addf %876, %875 : vector<8x128xf32>
    %878 = arith.divf %876, %877 : vector<8x128xf32>
    %879 = arith.mulf %870, %851 : vector<8x128xf32>
    %880 = arith.mulf %864, %872 : vector<8x128xf32>
    %881 = arith.addf %879, %880 : vector<8x128xf32>
    %882 = math.tanh %881 : vector<8x128xf32>
    %883 = arith.mulf %878, %882 : vector<8x128xf32>
    %c1_i32_285 = arith.constant 1 : i32
    %c8_i32_286 = arith.constant 8 : i32
    %884 = arith.muli %c1_i32_285, %c8_i32_286 : i32
    %885 = tpu.assume_multiple %884, 8 : i32
    %886 = arith.index_cast %885 : i32 to index
    %c0_287 = arith.constant 0 : index
    %887 = vector.load %arg16[%886, %c0_287] : memref<64x512xf32, #tpu.memory_space<vmem>>, vector<8x512xf32>
    %c0_288 = arith.constant 0 : index
    %c0_289 = arith.constant 0 : index
    %888 = vector.load %arg8[%c0_288, %c0_289] : memref<128x512xf32, #tpu.memory_space<vmem>>, vector<128x512xf32>
    %cst_290 = arith.constant dense<0.000000e+00> : vector<8x512xf32>
    %889 = tpu.matmul %883, %888, %cst_290 {dimension_numbers = #tpu.dot_dimension_numbers<[1], [0], [0], [1], [0, 0, 1, 1], [], []>} : vector<8x128xf32>, vector<128x512xf32>, vector<8x512xf32> -> vector<8x512xf32>
    %890 = arith.addf %887, %889 : vector<8x512xf32>
    %891 = vector.extract_strided_slice %890 {offsets = [0, 0], sizes = [8, 128], strides = [1, 1]} : vector<8x512xf32> to vector<8x128xf32>
    %892 = arith.negf %891 : vector<8x128xf32>
    %893 = math.exp %892 : vector<8x128xf32>
    %cst_291 = arith.constant 1.000000e+00 : f32
    %894 = vector.broadcast %cst_291 : f32 to vector<8x128xf32>
    %895 = arith.addf %894, %893 : vector<8x128xf32>
    %896 = arith.divf %894, %895 : vector<8x128xf32>
    %897 = vector.extract_strided_slice %890 {offsets = [0, 128], sizes = [8, 128], strides = [1, 1]} : vector<8x512xf32> to vector<8x128xf32>
    %898 = arith.negf %897 : vector<8x128xf32>
    %899 = math.exp %898 : vector<8x128xf32>
    %cst_292 = arith.constant 1.000000e+00 : f32
    %900 = vector.broadcast %cst_292 : f32 to vector<8x128xf32>
    %901 = arith.addf %900, %899 : vector<8x128xf32>
    %902 = arith.divf %900, %901 : vector<8x128xf32>
    %903 = vector.extract_strided_slice %890 {offsets = [0, 256], sizes = [8, 128], strides = [1, 1]} : vector<8x512xf32> to vector<8x128xf32>
    %904 = math.tanh %903 : vector<8x128xf32>
    %905 = vector.extract_strided_slice %890 {offsets = [0, 384], sizes = [8, 128], strides = [1, 1]} : vector<8x512xf32> to vector<8x128xf32>
    %906 = arith.negf %905 : vector<8x128xf32>
    %907 = math.exp %906 : vector<8x128xf32>
    %cst_293 = arith.constant 1.000000e+00 : f32
    %908 = vector.broadcast %cst_293 : f32 to vector<8x128xf32>
    %909 = arith.addf %908, %907 : vector<8x128xf32>
    %910 = arith.divf %908, %909 : vector<8x128xf32>
    %911 = arith.mulf %902, %881 : vector<8x128xf32>
    %912 = arith.mulf %896, %904 : vector<8x128xf32>
    %913 = arith.addf %911, %912 : vector<8x128xf32>
    %914 = math.tanh %913 : vector<8x128xf32>
    %915 = arith.mulf %910, %914 : vector<8x128xf32>
    %c2_i32_294 = arith.constant 2 : i32
    %c8_i32_295 = arith.constant 8 : i32
    %916 = arith.muli %c2_i32_294, %c8_i32_295 : i32
    %917 = tpu.assume_multiple %916, 8 : i32
    %918 = arith.index_cast %917 : i32 to index
    %c0_296 = arith.constant 0 : index
    %919 = vector.load %arg16[%918, %c0_296] : memref<64x512xf32, #tpu.memory_space<vmem>>, vector<8x512xf32>
    %c0_297 = arith.constant 0 : index
    %c0_298 = arith.constant 0 : index
    %920 = vector.load %arg8[%c0_297, %c0_298] : memref<128x512xf32, #tpu.memory_space<vmem>>, vector<128x512xf32>
    %cst_299 = arith.constant dense<0.000000e+00> : vector<8x512xf32>
    %921 = tpu.matmul %915, %920, %cst_299 {dimension_numbers = #tpu.dot_dimension_numbers<[1], [0], [0], [1], [0, 0, 1, 1], [], []>} : vector<8x128xf32>, vector<128x512xf32>, vector<8x512xf32> -> vector<8x512xf32>
    %922 = arith.addf %919, %921 : vector<8x512xf32>
    %923 = vector.extract_strided_slice %922 {offsets = [0, 0], sizes = [8, 128], strides = [1, 1]} : vector<8x512xf32> to vector<8x128xf32>
    %924 = arith.negf %923 : vector<8x128xf32>
    %925 = math.exp %924 : vector<8x128xf32>
    %cst_300 = arith.constant 1.000000e+00 : f32
    %926 = vector.broadcast %cst_300 : f32 to vector<8x128xf32>
    %927 = arith.addf %926, %925 : vector<8x128xf32>
    %928 = arith.divf %926, %927 : vector<8x128xf32>
    %929 = vector.extract_strided_slice %922 {offsets = [0, 128], sizes = [8, 128], strides = [1, 1]} : vector<8x512xf32> to vector<8x128xf32>
    %930 = arith.negf %929 : vector<8x128xf32>
    %931 = math.exp %930 : vector<8x128xf32>
    %cst_301 = arith.constant 1.000000e+00 : f32
    %932 = vector.broadcast %cst_301 : f32 to vector<8x128xf32>
    %933 = arith.addf %932, %931 : vector<8x128xf32>
    %934 = arith.divf %932, %933 : vector<8x128xf32>
    %935 = vector.extract_strided_slice %922 {offsets = [0, 256], sizes = [8, 128], strides = [1, 1]} : vector<8x512xf32> to vector<8x128xf32>
    %936 = math.tanh %935 : vector<8x128xf32>
    %937 = vector.extract_strided_slice %922 {offsets = [0, 384], sizes = [8, 128], strides = [1, 1]} : vector<8x512xf32> to vector<8x128xf32>
    %938 = arith.negf %937 : vector<8x128xf32>
    %939 = math.exp %938 : vector<8x128xf32>
    %cst_302 = arith.constant 1.000000e+00 : f32
    %940 = vector.broadcast %cst_302 : f32 to vector<8x128xf32>
    %941 = arith.addf %940, %939 : vector<8x128xf32>
    %942 = arith.divf %940, %941 : vector<8x128xf32>
    %943 = arith.mulf %934, %913 : vector<8x128xf32>
    %944 = arith.mulf %928, %936 : vector<8x128xf32>
    %945 = arith.addf %943, %944 : vector<8x128xf32>
    %946 = math.tanh %945 : vector<8x128xf32>
    %947 = arith.mulf %942, %946 : vector<8x128xf32>
    %c3_i32_303 = arith.constant 3 : i32
    %c8_i32_304 = arith.constant 8 : i32
    %948 = arith.muli %c3_i32_303, %c8_i32_304 : i32
    %949 = tpu.assume_multiple %948, 8 : i32
    %950 = arith.index_cast %949 : i32 to index
    %c0_305 = arith.constant 0 : index
    %951 = vector.load %arg16[%950, %c0_305] : memref<64x512xf32, #tpu.memory_space<vmem>>, vector<8x512xf32>
    %c0_306 = arith.constant 0 : index
    %c0_307 = arith.constant 0 : index
    %952 = vector.load %arg8[%c0_306, %c0_307] : memref<128x512xf32, #tpu.memory_space<vmem>>, vector<128x512xf32>
    %cst_308 = arith.constant dense<0.000000e+00> : vector<8x512xf32>
    %953 = tpu.matmul %947, %952, %cst_308 {dimension_numbers = #tpu.dot_dimension_numbers<[1], [0], [0], [1], [0, 0, 1, 1], [], []>} : vector<8x128xf32>, vector<128x512xf32>, vector<8x512xf32> -> vector<8x512xf32>
    %954 = arith.addf %951, %953 : vector<8x512xf32>
    %955 = vector.extract_strided_slice %954 {offsets = [0, 0], sizes = [8, 128], strides = [1, 1]} : vector<8x512xf32> to vector<8x128xf32>
    %956 = arith.negf %955 : vector<8x128xf32>
    %957 = math.exp %956 : vector<8x128xf32>
    %cst_309 = arith.constant 1.000000e+00 : f32
    %958 = vector.broadcast %cst_309 : f32 to vector<8x128xf32>
    %959 = arith.addf %958, %957 : vector<8x128xf32>
    %960 = arith.divf %958, %959 : vector<8x128xf32>
    %961 = vector.extract_strided_slice %954 {offsets = [0, 128], sizes = [8, 128], strides = [1, 1]} : vector<8x512xf32> to vector<8x128xf32>
    %962 = arith.negf %961 : vector<8x128xf32>
    %963 = math.exp %962 : vector<8x128xf32>
    %cst_310 = arith.constant 1.000000e+00 : f32
    %964 = vector.broadcast %cst_310 : f32 to vector<8x128xf32>
    %965 = arith.addf %964, %963 : vector<8x128xf32>
    %966 = arith.divf %964, %965 : vector<8x128xf32>
    %967 = vector.extract_strided_slice %954 {offsets = [0, 256], sizes = [8, 128], strides = [1, 1]} : vector<8x512xf32> to vector<8x128xf32>
    %968 = math.tanh %967 : vector<8x128xf32>
    %969 = vector.extract_strided_slice %954 {offsets = [0, 384], sizes = [8, 128], strides = [1, 1]} : vector<8x512xf32> to vector<8x128xf32>
    %970 = arith.negf %969 : vector<8x128xf32>
    %971 = math.exp %970 : vector<8x128xf32>
    %cst_311 = arith.constant 1.000000e+00 : f32
    %972 = vector.broadcast %cst_311 : f32 to vector<8x128xf32>
    %973 = arith.addf %972, %971 : vector<8x128xf32>
    %974 = arith.divf %972, %973 : vector<8x128xf32>
    %975 = arith.mulf %966, %945 : vector<8x128xf32>
    %976 = arith.mulf %960, %968 : vector<8x128xf32>
    %977 = arith.addf %975, %976 : vector<8x128xf32>
    %978 = math.tanh %977 : vector<8x128xf32>
    %979 = arith.mulf %974, %978 : vector<8x128xf32>
    %c4_i32_312 = arith.constant 4 : i32
    %c8_i32_313 = arith.constant 8 : i32
    %980 = arith.muli %c4_i32_312, %c8_i32_313 : i32
    %981 = tpu.assume_multiple %980, 8 : i32
    %982 = arith.index_cast %981 : i32 to index
    %c0_314 = arith.constant 0 : index
    %983 = vector.load %arg16[%982, %c0_314] : memref<64x512xf32, #tpu.memory_space<vmem>>, vector<8x512xf32>
    %c0_315 = arith.constant 0 : index
    %c0_316 = arith.constant 0 : index
    %984 = vector.load %arg8[%c0_315, %c0_316] : memref<128x512xf32, #tpu.memory_space<vmem>>, vector<128x512xf32>
    %cst_317 = arith.constant dense<0.000000e+00> : vector<8x512xf32>
    %985 = tpu.matmul %979, %984, %cst_317 {dimension_numbers = #tpu.dot_dimension_numbers<[1], [0], [0], [1], [0, 0, 1, 1], [], []>} : vector<8x128xf32>, vector<128x512xf32>, vector<8x512xf32> -> vector<8x512xf32>
    %986 = arith.addf %983, %985 : vector<8x512xf32>
    %987 = vector.extract_strided_slice %986 {offsets = [0, 0], sizes = [8, 128], strides = [1, 1]} : vector<8x512xf32> to vector<8x128xf32>
    %988 = arith.negf %987 : vector<8x128xf32>
    %989 = math.exp %988 : vector<8x128xf32>
    %cst_318 = arith.constant 1.000000e+00 : f32
    %990 = vector.broadcast %cst_318 : f32 to vector<8x128xf32>
    %991 = arith.addf %990, %989 : vector<8x128xf32>
    %992 = arith.divf %990, %991 : vector<8x128xf32>
    %993 = vector.extract_strided_slice %986 {offsets = [0, 128], sizes = [8, 128], strides = [1, 1]} : vector<8x512xf32> to vector<8x128xf32>
    %994 = arith.negf %993 : vector<8x128xf32>
    %995 = math.exp %994 : vector<8x128xf32>
    %cst_319 = arith.constant 1.000000e+00 : f32
    %996 = vector.broadcast %cst_319 : f32 to vector<8x128xf32>
    %997 = arith.addf %996, %995 : vector<8x128xf32>
    %998 = arith.divf %996, %997 : vector<8x128xf32>
    %999 = vector.extract_strided_slice %986 {offsets = [0, 256], sizes = [8, 128], strides = [1, 1]} : vector<8x512xf32> to vector<8x128xf32>
    %1000 = math.tanh %999 : vector<8x128xf32>
    %1001 = vector.extract_strided_slice %986 {offsets = [0, 384], sizes = [8, 128], strides = [1, 1]} : vector<8x512xf32> to vector<8x128xf32>
    %1002 = arith.negf %1001 : vector<8x128xf32>
    %1003 = math.exp %1002 : vector<8x128xf32>
    %cst_320 = arith.constant 1.000000e+00 : f32
    %1004 = vector.broadcast %cst_320 : f32 to vector<8x128xf32>
    %1005 = arith.addf %1004, %1003 : vector<8x128xf32>
    %1006 = arith.divf %1004, %1005 : vector<8x128xf32>
    %1007 = arith.mulf %998, %977 : vector<8x128xf32>
    %1008 = arith.mulf %992, %1000 : vector<8x128xf32>
    %1009 = arith.addf %1007, %1008 : vector<8x128xf32>
    %1010 = math.tanh %1009 : vector<8x128xf32>
    %1011 = arith.mulf %1006, %1010 : vector<8x128xf32>
    %c5_i32_321 = arith.constant 5 : i32
    %c8_i32_322 = arith.constant 8 : i32
    %1012 = arith.muli %c5_i32_321, %c8_i32_322 : i32
    %1013 = tpu.assume_multiple %1012, 8 : i32
    %1014 = arith.index_cast %1013 : i32 to index
    %c0_323 = arith.constant 0 : index
    %1015 = vector.load %arg16[%1014, %c0_323] : memref<64x512xf32, #tpu.memory_space<vmem>>, vector<8x512xf32>
    %c0_324 = arith.constant 0 : index
    %c0_325 = arith.constant 0 : index
    %1016 = vector.load %arg8[%c0_324, %c0_325] : memref<128x512xf32, #tpu.memory_space<vmem>>, vector<128x512xf32>
    %cst_326 = arith.constant dense<0.000000e+00> : vector<8x512xf32>
    %1017 = tpu.matmul %1011, %1016, %cst_326 {dimension_numbers = #tpu.dot_dimension_numbers<[1], [0], [0], [1], [0, 0, 1, 1], [], []>} : vector<8x128xf32>, vector<128x512xf32>, vector<8x512xf32> -> vector<8x512xf32>
    %1018 = arith.addf %1015, %1017 : vector<8x512xf32>
    %1019 = vector.extract_strided_slice %1018 {offsets = [0, 0], sizes = [8, 128], strides = [1, 1]} : vector<8x512xf32> to vector<8x128xf32>
    %1020 = arith.negf %1019 : vector<8x128xf32>
    %1021 = math.exp %1020 : vector<8x128xf32>
    %cst_327 = arith.constant 1.000000e+00 : f32
    %1022 = vector.broadcast %cst_327 : f32 to vector<8x128xf32>
    %1023 = arith.addf %1022, %1021 : vector<8x128xf32>
    %1024 = arith.divf %1022, %1023 : vector<8x128xf32>
    %1025 = vector.extract_strided_slice %1018 {offsets = [0, 128], sizes = [8, 128], strides = [1, 1]} : vector<8x512xf32> to vector<8x128xf32>
    %1026 = arith.negf %1025 : vector<8x128xf32>
    %1027 = math.exp %1026 : vector<8x128xf32>
    %cst_328 = arith.constant 1.000000e+00 : f32
    %1028 = vector.broadcast %cst_328 : f32 to vector<8x128xf32>
    %1029 = arith.addf %1028, %1027 : vector<8x128xf32>
    %1030 = arith.divf %1028, %1029 : vector<8x128xf32>
    %1031 = vector.extract_strided_slice %1018 {offsets = [0, 256], sizes = [8, 128], strides = [1, 1]} : vector<8x512xf32> to vector<8x128xf32>
    %1032 = math.tanh %1031 : vector<8x128xf32>
    %1033 = vector.extract_strided_slice %1018 {offsets = [0, 384], sizes = [8, 128], strides = [1, 1]} : vector<8x512xf32> to vector<8x128xf32>
    %1034 = arith.negf %1033 : vector<8x128xf32>
    %1035 = math.exp %1034 : vector<8x128xf32>
    %cst_329 = arith.constant 1.000000e+00 : f32
    %1036 = vector.broadcast %cst_329 : f32 to vector<8x128xf32>
    %1037 = arith.addf %1036, %1035 : vector<8x128xf32>
    %1038 = arith.divf %1036, %1037 : vector<8x128xf32>
    %1039 = arith.mulf %1030, %1009 : vector<8x128xf32>
    %1040 = arith.mulf %1024, %1032 : vector<8x128xf32>
    %1041 = arith.addf %1039, %1040 : vector<8x128xf32>
    %1042 = math.tanh %1041 : vector<8x128xf32>
    %1043 = arith.mulf %1038, %1042 : vector<8x128xf32>
    %c6_i32_330 = arith.constant 6 : i32
    %c8_i32_331 = arith.constant 8 : i32
    %1044 = arith.muli %c6_i32_330, %c8_i32_331 : i32
    %1045 = tpu.assume_multiple %1044, 8 : i32
    %1046 = arith.index_cast %1045 : i32 to index
    %c0_332 = arith.constant 0 : index
    %1047 = vector.load %arg16[%1046, %c0_332] : memref<64x512xf32, #tpu.memory_space<vmem>>, vector<8x512xf32>
    %c0_333 = arith.constant 0 : index
    %c0_334 = arith.constant 0 : index
    %1048 = vector.load %arg8[%c0_333, %c0_334] : memref<128x512xf32, #tpu.memory_space<vmem>>, vector<128x512xf32>
    %cst_335 = arith.constant dense<0.000000e+00> : vector<8x512xf32>
    %1049 = tpu.matmul %1043, %1048, %cst_335 {dimension_numbers = #tpu.dot_dimension_numbers<[1], [0], [0], [1], [0, 0, 1, 1], [], []>} : vector<8x128xf32>, vector<128x512xf32>, vector<8x512xf32> -> vector<8x512xf32>
    %1050 = arith.addf %1047, %1049 : vector<8x512xf32>
    %1051 = vector.extract_strided_slice %1050 {offsets = [0, 0], sizes = [8, 128], strides = [1, 1]} : vector<8x512xf32> to vector<8x128xf32>
    %1052 = arith.negf %1051 : vector<8x128xf32>
    %1053 = math.exp %1052 : vector<8x128xf32>
    %cst_336 = arith.constant 1.000000e+00 : f32
    %1054 = vector.broadcast %cst_336 : f32 to vector<8x128xf32>
    %1055 = arith.addf %1054, %1053 : vector<8x128xf32>
    %1056 = arith.divf %1054, %1055 : vector<8x128xf32>
    %1057 = vector.extract_strided_slice %1050 {offsets = [0, 128], sizes = [8, 128], strides = [1, 1]} : vector<8x512xf32> to vector<8x128xf32>
    %1058 = arith.negf %1057 : vector<8x128xf32>
    %1059 = math.exp %1058 : vector<8x128xf32>
    %cst_337 = arith.constant 1.000000e+00 : f32
    %1060 = vector.broadcast %cst_337 : f32 to vector<8x128xf32>
    %1061 = arith.addf %1060, %1059 : vector<8x128xf32>
    %1062 = arith.divf %1060, %1061 : vector<8x128xf32>
    %1063 = vector.extract_strided_slice %1050 {offsets = [0, 256], sizes = [8, 128], strides = [1, 1]} : vector<8x512xf32> to vector<8x128xf32>
    %1064 = math.tanh %1063 : vector<8x128xf32>
    %1065 = vector.extract_strided_slice %1050 {offsets = [0, 384], sizes = [8, 128], strides = [1, 1]} : vector<8x512xf32> to vector<8x128xf32>
    %1066 = arith.negf %1065 : vector<8x128xf32>
    %1067 = math.exp %1066 : vector<8x128xf32>
    %cst_338 = arith.constant 1.000000e+00 : f32
    %1068 = vector.broadcast %cst_338 : f32 to vector<8x128xf32>
    %1069 = arith.addf %1068, %1067 : vector<8x128xf32>
    %1070 = arith.divf %1068, %1069 : vector<8x128xf32>
    %1071 = arith.mulf %1062, %1041 : vector<8x128xf32>
    %1072 = arith.mulf %1056, %1064 : vector<8x128xf32>
    %1073 = arith.addf %1071, %1072 : vector<8x128xf32>
    %1074 = math.tanh %1073 : vector<8x128xf32>
    %1075 = arith.mulf %1070, %1074 : vector<8x128xf32>
    %c7_i32_339 = arith.constant 7 : i32
    %c8_i32_340 = arith.constant 8 : i32
    %1076 = arith.muli %c7_i32_339, %c8_i32_340 : i32
    %1077 = tpu.assume_multiple %1076, 8 : i32
    %1078 = arith.index_cast %1077 : i32 to index
    %c0_341 = arith.constant 0 : index
    %1079 = vector.load %arg16[%1078, %c0_341] : memref<64x512xf32, #tpu.memory_space<vmem>>, vector<8x512xf32>
    %c0_342 = arith.constant 0 : index
    %c0_343 = arith.constant 0 : index
    %1080 = vector.load %arg8[%c0_342, %c0_343] : memref<128x512xf32, #tpu.memory_space<vmem>>, vector<128x512xf32>
    %cst_344 = arith.constant dense<0.000000e+00> : vector<8x512xf32>
    %1081 = tpu.matmul %1075, %1080, %cst_344 {dimension_numbers = #tpu.dot_dimension_numbers<[1], [0], [0], [1], [0, 0, 1, 1], [], []>} : vector<8x128xf32>, vector<128x512xf32>, vector<8x512xf32> -> vector<8x512xf32>
    %1082 = arith.addf %1079, %1081 : vector<8x512xf32>
    %1083 = vector.extract_strided_slice %1082 {offsets = [0, 0], sizes = [8, 128], strides = [1, 1]} : vector<8x512xf32> to vector<8x128xf32>
    %1084 = arith.negf %1083 : vector<8x128xf32>
    %1085 = math.exp %1084 : vector<8x128xf32>
    %cst_345 = arith.constant 1.000000e+00 : f32
    %1086 = vector.broadcast %cst_345 : f32 to vector<8x128xf32>
    %1087 = arith.addf %1086, %1085 : vector<8x128xf32>
    %1088 = arith.divf %1086, %1087 : vector<8x128xf32>
    %1089 = vector.extract_strided_slice %1082 {offsets = [0, 128], sizes = [8, 128], strides = [1, 1]} : vector<8x512xf32> to vector<8x128xf32>
    %1090 = arith.negf %1089 : vector<8x128xf32>
    %1091 = math.exp %1090 : vector<8x128xf32>
    %cst_346 = arith.constant 1.000000e+00 : f32
    %1092 = vector.broadcast %cst_346 : f32 to vector<8x128xf32>
    %1093 = arith.addf %1092, %1091 : vector<8x128xf32>
    %1094 = arith.divf %1092, %1093 : vector<8x128xf32>
    %1095 = vector.extract_strided_slice %1082 {offsets = [0, 256], sizes = [8, 128], strides = [1, 1]} : vector<8x512xf32> to vector<8x128xf32>
    %1096 = math.tanh %1095 : vector<8x128xf32>
    %1097 = vector.extract_strided_slice %1082 {offsets = [0, 384], sizes = [8, 128], strides = [1, 1]} : vector<8x512xf32> to vector<8x128xf32>
    %1098 = arith.negf %1097 : vector<8x128xf32>
    %1099 = math.exp %1098 : vector<8x128xf32>
    %cst_347 = arith.constant 1.000000e+00 : f32
    %1100 = vector.broadcast %cst_347 : f32 to vector<8x128xf32>
    %1101 = arith.addf %1100, %1099 : vector<8x128xf32>
    %1102 = arith.divf %1100, %1101 : vector<8x128xf32>
    %1103 = arith.mulf %1094, %1073 : vector<8x128xf32>
    %1104 = arith.mulf %1088, %1096 : vector<8x128xf32>
    %1105 = arith.addf %1103, %1104 : vector<8x128xf32>
    %1106 = math.tanh %1105 : vector<8x128xf32>
    %1107 = arith.mulf %1102, %1106 : vector<8x128xf32>
    %c8_i32_348 = arith.constant 8 : i32
    %c0_349 = arith.constant 0 : index
    %c0_350 = arith.constant 0 : index
    %1108 = vector.load %arg13[%c0_349, %c0_350] : memref<128x1xf32, #tpu.memory_space<vmem>>, vector<128x1xf32>
    %cst_351 = arith.constant dense<0.000000e+00> : vector<8x1xf32>
    %1109 = tpu.matmul %1107, %1108, %cst_351 {dimension_numbers = #tpu.dot_dimension_numbers<[1], [0], [0], [1], [0, 0, 1, 1], [], []>} : vector<8x128xf32>, vector<128x1xf32>, vector<8x1xf32> -> vector<8x1xf32>
    %c0_352 = arith.constant 0 : index
    %c0_353 = arith.constant 0 : index
    %1110 = vector.load %arg14[%c0_352, %c0_353] : memref<1x1xf32, #tpu.memory_space<vmem>>, vector<1x1xf32>
    %1111 = vector.broadcast %1110 : vector<1x1xf32> to vector<8x1xf32>
    %1112 = arith.addf %1109, %1111 : vector<8x1xf32>
    %c0_354 = arith.constant 0 : index
    %c0_355 = arith.constant 0 : index
    %1113 = vector.load %arg15[%c0_354, %c0_355] : memref<8x1xf32, #tpu.memory_space<vmem>>, vector<8x1xf32>
    tpu.vector_store %arg15[%c0_354, %c0_355], %1112 {strides = array<i32>} : memref<8x1xf32, #tpu.memory_space<vmem>>, vector<8x1xf32>,
    return
  }
}

</mosaic_0001>

<bundles_post_ra>
// kernel: lstm_model_forward.1
= control target key start
LH: loop header
LB: loop body
LE: loop exit
PB: predicated region body
PF: predicated region fallthrough
CT: control target
= control target key end

     0   :  { %s14607_s0 = inlined_call_operand.vmem [shape: f32[64,16], index: 0, kind: input, shape index: {}]   ;;  %s14608_s1 = inlined_call_operand.vmem [shape: f32[16,512], index: 1, kind: input, shape index: {}]   ;;  %s14609_s2 = inlined_call_operand.hbm [shape: f32[128,512], index: 2, kind: input, shape index: {}]   ;;  %s14610_s3 = inlined_call_operand.hbm [shape: f32[128,512], index: 3, kind: input, shape index: {}]   ;;  %s14611_s4 = inlined_call_operand.hbm [shape: f32[128,512], index: 4, kind: input, shape index: {}]   ;;  %s14612_s5 = inlined_call_operand.hbm [shape: f32[128,512], index: 5, kind: input, shape index: {}]   ;;  %s14613_s6 = inlined_call_operand.hbm [shape: f32[128,512], index: 6, kind: input, shape index: {}]   ;;  %s14614_s7 = inlined_call_operand.hbm [shape: f32[128,512], index: 7, kind: input, shape index: {}]   ;;  %s14615_s8 = inlined_call_operand.hbm [shape: f32[128,512], index: 8, kind: input, shape index: {}]   ;;  %s14616_s9 = inlined_call_operand.vmem [shape: f32[1,512], index: 9, kind: input, shape index: {}]   ;;  %s14617_s10 = inlined_call_operand.vmem [shape: f32[1,512], index: 10, kind: input, shape index: {}]   ;;  %s14618_s11 = inlined_call_operand.vmem [shape: f32[1,512], index: 11, kind: input, shape index: {}]   ;;  %s14619_s12 = inlined_call_operand.vmem [shape: f32[1,512], index: 12, kind: input, shape index: {}]   ;;  %s14620_s13 = inlined_call_operand.vmem [shape: f32[128,1], index: 13, kind: input, shape index: {}]   ;;  %s14621_s14 = inlined_call_operand.<no memory space> [shape: f32[1,1], index: 14, kind: input, shape index: {}]   ;;  %s14622_s15 = inlined_call_operand.vmem [shape: f32[8,1], index: 15, kind: output, shape index: {}]  }
   0x1   :  { %v20_v0 = vstv %s14621_s14 }
   0x2   :  { %21 = vst [vmem:[#allocation4] sm:$0x1] %v20_v0 }
   0x3   :  { %22 = vsyncpa [#allocation6], 0 }
   0x4   :  { %23 = vsyncpa [#allocation8], 0 }
   0x5   :  { %24 = vsyncpa [#allocation11], 0 }
   0x6   :  { %25 = vsyncpa [#allocation14], 0  ;;  %s12236_s20 = smov [#allocation7]   ;;  %s12237_s22 = smov [#allocation10]  }
   0x7   :  { %s47_s21 = sshll.u32 %s12236_s20, 4  ;;  %s71_s23 = sshll.u32 %s12237_s22, 4  ;;  %s48_s21 = int_to_ptr.vmem [resolvable:$true] %s47_s21  ;;  %s12331_s23 = int_to_ptr.vmem [resolvable:$true] %s71_s23 }
   0x8   :  { %s12074_s26 = scalar_lea.hbm %s14610_s3, 8192 }
   0x9   :  { %p12075_p0 = scmp.ne.s32.totalorder %s14610_s3, %s12074_s26  ;;  %p12078_p1 = scmp.lt.u32.totalorder %s12074_s26, %s14610_s3 }
   0xb   :  { %p12080_p2 = pnand %p12078_p1, %p12075_p0 }
   0xd   :  { %12083 = shalt.err (!%p12080_p2)
}
   0xe   :  { %s12084_s30 = scalar_lea.vmem %s48_s21, 8192  ;;  %p12089_p4 = scmp.lt.s32.totalorder %s48_s21, %s48_s21 }
   0xf   :  { %p12085_p3 = scmp.ne.s32.totalorder %s48_s21, %s12084_s30  ;;  %p12090_p5 = scmp.lt.s32.totalorder %s12084_s30, %s12084_s30 }
  0x11   :  { %p12091_p6 = por %p12090_p5, %p12089_p4 }
  0x13   :  { %p12092_p7 = pnand %p12091_p6, %p12085_p3 }
  0x15   :  { %12095 = shalt.err (!%p12092_p7)
}
  0x16   :  { %s12238_s16 = smov 512   ;;  %s12239_s17 = smov 32  }
  0x17   :  { %53 = dma.hbm_to_vmem [thread:$0]  %s14610_s3, 8192, %s48_s21, [#allocation8], %s12238_s16, %s12238_s16, %s12239_s17  }
  0x18   :  { %s12096_s24 = scalar_lea.hbm %s14612_s5, 8192 }
  0x19   :  { %p12097_p8 = scmp.ne.s32.totalorder %s14612_s5, %s12096_s24  ;;  %p12100_p9 = scmp.lt.u32.totalorder %s12096_s24, %s14612_s5 }
  0x1b   :  { %p12102_p10 = pnand %p12100_p9, %p12097_p8 }
  0x1d   :  { %12105 = shalt.err (!%p12102_p10)
}
  0x1e   :  { %s12106_s14 = scalar_lea.vmem %s12331_s23, 8192  ;;  %p12111_p12 = scmp.lt.s32.totalorder %s12331_s23, %s12331_s23 }
  0x1f   :  { %p12107_p11 = scmp.ne.s32.totalorder %s12331_s23, %s12106_s14  ;;  %p12112_p13 = scmp.lt.s32.totalorder %s12106_s14, %s12106_s14 }
  0x21   :  { %p12113_p0 = por %p12112_p13, %p12111_p12 }
  0x23   :  { %p12114_p1 = pnand %p12113_p0, %p12107_p11 }
  0x25   :  { %12117 = shalt.err (!%p12114_p1)
}
  0x26   :  { %77 = dma.hbm_to_vmem [thread:$0]  %s14612_s5, 8192, %s12331_s23, [#allocation11], %s12238_s16, %s12238_s16, %s12239_s17  }
  0x27   :  { %s12240_s29 = smov [#allocation13]   ;;  %s12241_s18 = smov [#allocation5]  }
  0x28   :  { %s95_s30 = sshll.u32 %s12240_s29, 4  ;;  %s35_s19 = sshll.u32 %s12241_s18, 4  ;;  %s96_s30 = int_to_ptr.vmem [resolvable:$true] %s95_s30  ;;  %s12368_s19 = int_to_ptr.vmem [resolvable:$true] %s35_s19 }
  0x29   :  { %s12118_s24 = scalar_lea.hbm %s14614_s7, 8192 }
  0x2a   :  { %p12119_p2 = scmp.ne.s32.totalorder %s14614_s7, %s12118_s24  ;;  %p12122_p3 = scmp.lt.u32.totalorder %s12118_s24, %s14614_s7 }
  0x2c   :  { %p12124_p4 = pnand %p12122_p3, %p12119_p2 }
  0x2e   :  { %12127 = shalt.err (!%p12124_p4)
}
  0x2f   :  { %s12128_s5 = scalar_lea.vmem %s96_s30, 8192  ;;  %p12133_p6 = scmp.lt.s32.totalorder %s96_s30, %s96_s30 }
  0x30   :  { %p12129_p5 = scmp.ne.s32.totalorder %s96_s30, %s12128_s5  ;;  %p12134_p7 = scmp.lt.s32.totalorder %s12128_s5, %s12128_s5 }
  0x32   :  { %p12135_p8 = por %p12134_p7, %p12133_p6 }
  0x34   :  { %p12136_p9 = pnand %p12135_p8, %p12129_p5 }
  0x36   :  { %12139 = shalt.err (!%p12136_p9)
}
  0x37   :  { %101 = dma.hbm_to_vmem [thread:$0]  %s14614_s7, 8192, %s96_s30, [#allocation14], %s12238_s16, %s12238_s16, %s12239_s17  }
  0x38   :  { %s12140_s29 = scalar_lea.hbm %s14609_s2, 8192 }
  0x39   :  { %p12141_p10 = scmp.ne.s32.totalorder %s14609_s2, %s12140_s29  ;;  %p12144_p11 = scmp.lt.u32.totalorder %s12140_s29, %s14609_s2 }
  0x3b   :  { %p12146_p12 = pnand %p12144_p11, %p12141_p10 }
  0x3d   :  { %12149 = shalt.err (!%p12146_p12)
}
  0x3e   :  { %s12150_s25 = scalar_lea.vmem %s12368_s19, 8192  ;;  %p12155_p0 = scmp.lt.s32.totalorder %s12368_s19, %s12368_s19 }
  0x3f   :  { %p12151_p13 = scmp.ne.s32.totalorder %s12368_s19, %s12150_s25  ;;  %p12156_p1 = scmp.lt.s32.totalorder %s12150_s25, %s12150_s25 }
  0x41   :  { %p12157_p2 = por %p12156_p1, %p12155_p0 }
  0x43   :  { %p12158_p3 = pnand %p12157_p2, %p12151_p13 }
  0x45   :  { %12161 = shalt.err (!%p12158_p3)
}
  0x46   :  { %41 = dma.hbm_to_vmem [thread:$0]  %s14609_s2, 8192, %s12368_s19, [#allocation6], %s12238_s16, %s12238_s16, %s12239_s17  }
  0x47   :  { %s12242_s26 = smov [#allocation9]   ;;  %s12243_s28 = smov [#allocation12]  }
  0x48   :  { %s59_s27 = sshll.u32 %s12242_s26, 4  ;;  %s83_s5 = sshll.u32 %s12243_s28, 4  ;;  %s60_s27 = int_to_ptr.vmem [resolvable:$true] %s59_s27  ;;  %s12405_s5 = int_to_ptr.vmem [resolvable:$true] %s83_s5 }
  0x49   :  { %s12162_s3 = scalar_lea.hbm %s14611_s4, 8192 }
  0x4a   :  { %p12163_p4 = scmp.ne.s32.totalorder %s14611_s4, %s12162_s3  ;;  %p12166_p5 = scmp.lt.u32.totalorder %s12162_s3, %s14611_s4 }
  0x4c   :  { %p12168_p6 = pnand %p12166_p5, %p12163_p4 }
  0x4e   :  { %12171 = shalt.err (!%p12168_p6)
}
  0x4f   :  { %s12172_s2 = scalar_lea.vmem %s60_s27, 8192  ;;  %p12177_p8 = scmp.lt.s32.totalorder %s60_s27, %s60_s27 }
  0x50   :  { %p12173_p7 = scmp.ne.s32.totalorder %s60_s27, %s12172_s2  ;;  %p12178_p9 = scmp.lt.s32.totalorder %s12172_s2, %s12172_s2 }
  0x52   :  { %p12179_p10 = por %p12178_p9, %p12177_p8 }
  0x54   :  { %p12180_p11 = pnand %p12179_p10, %p12173_p7 }
  0x56   :  { %12183 = shalt.err (!%p12180_p11)
}
  0x57   :  { %65 = dma.hbm_to_vmem [thread:$0]  %s14611_s4, 8192, %s60_s27, [#allocation8], %s12238_s16, %s12238_s16, %s12239_s17  }
  0x58   :  { %s12184_s7 = scalar_lea.hbm %s14613_s6, 8192 }
  0x59   :  { %p12185_p12 = scmp.ne.s32.totalorder %s14613_s6, %s12184_s7  ;;  %p12188_p13 = scmp.lt.u32.totalorder %s12184_s7, %s14613_s6 }
  0x5b   :  { %p12190_p0 = pnand %p12188_p13, %p12185_p12 }
  0x5d   :  { %12193 = shalt.err (!%p12190_p0)
}
  0x5e   :  { %s12194_s14 = scalar_lea.vmem %s12405_s5, 8192  ;;  %p12199_p2 = scmp.lt.s32.totalorder %s12405_s5, %s12405_s5 }
  0x5f   :  { %p12195_p1 = scmp.ne.s32.totalorder %s12405_s5, %s12194_s14  ;;  %p12200_p3 = scmp.lt.s32.totalorder %s12194_s14, %s12194_s14 }
  0x61   :  { %p12201_p4 = por %p12200_p3, %p12199_p2 }
  0x63   :  { %p12202_p5 = pnand %p12201_p4, %p12195_p1 }
  0x65   :  { %12205 = shalt.err (!%p12202_p5)
}
  0x66   :  { %89 = dma.hbm_to_vmem [thread:$0]  %s14613_s6, 8192, %s12405_s5, [#allocation11], %s12238_s16, %s12238_s16, %s12239_s17  }
  0x67   :  { %s12244_s3 = smov [#allocation15]   ;;  %s12206_s20 = scalar_lea.hbm %s14615_s8, 8192 }
  0x68   :  { %s107_s21 = sshll.u32 %s12244_s3, 4  ;;  %p12207_p6 = scmp.ne.s32.totalorder %s14615_s8, %s12206_s20  ;;  %s108_s21 = int_to_ptr.vmem [resolvable:$true] %s107_s21 }
  0x69   :  { %p12210_p7 = scmp.lt.u32.totalorder %s12206_s20, %s14615_s8 }
  0x6b   :  { %p12212_p8 = pnand %p12210_p7, %p12207_p6 }
  0x6d   :  { %12215 = shalt.err (!%p12212_p8)
}
  0x6e   :  { %s12216_s25 = scalar_lea.vmem %s108_s21, 8192  ;;  %p12221_p10 = scmp.lt.s32.totalorder %s108_s21, %s108_s21 }
  0x6f   :  { %p12217_p9 = scmp.ne.s32.totalorder %s108_s21, %s12216_s25  ;;  %p12222_p11 = scmp.lt.s32.totalorder %s12216_s25, %s12216_s25 }
  0x71   :  { %p12223_p12 = por %p12222_p11, %p12221_p10 }
  0x73   :  { %p12224_p13 = pnand %p12223_p12, %p12217_p9 }
  0x75   :  { %12227 = shalt.err (!%p12224_p13)
}
  0x76   :  { %113 = dma.hbm_to_vmem [thread:$0]  %s14615_s8, 8192, %s108_s21, [#allocation14], %s12238_s16, %s12238_s16, %s12239_s17  }
  0x77   :  { %12228 = dma.done.wait [#allocation6], 8192  }
  0x78   :  { %12229 = vsyncadd [#allocation6], 4294959104 }
  0x79   :  { %12230 = dma.done.wait [#allocation8], 16384  }
  0x7a   :  { %12231 = vsyncadd [#allocation8], 4294950912 }
  0x7b   :  { %12232 = dma.done.wait [#allocation11], 16384  }
  0x7c   :  { %12233 = vsyncadd [#allocation11], 4294950912 }
  0x7d   :  { %12234 = dma.done.wait [#allocation14], 16384  }
  0x7e   :  { %12235 = vsyncadd [#allocation14], 4294950912  ;;  %v12245_v1 = vmov 0.0   ;;  %v156_v2 = vld [vmem:[%s14608_s1 + $0x8] sm:$0xff]  ;;  %v158_v4 = vld [vmem:[%s14608_s1 + $0x18] sm:$0xff]  ;;  %vm185_vm0 = vcmask 130048  }
  0x7f   :  { %274 = vmatprep.mubr.f32.mxu0 %v12245_v1  ;;  %387 = vmatprep.mubr.f32.mxu1 %v12245_v1  ;;  %v160_v3 = vld [vmem:[%s14608_s1 + $0x28] sm:$0xff]  ;;  %v162_v6 = vld [vmem:[%s14608_s1 + $0x38] sm:$0xff]  ;;  %v155_v7 = vld [vmem:[%s14608_s1] sm:$0xff]  ;;  %vm12247_vm1 = vmmov 0   ;;  %vm8840_vm2 = vcmask 7168  }
  0x80   :  { %v9022_v5 = vpack.c.bf16 %v160_v3, %v156_v2  ;;  %v159_v8 = vld [vmem:[%s14608_s1 + $0x20] sm:$0xff]  ;;  %v9026_v9 = vpack.c.bf16 %v162_v6, %v158_v4  ;;  %v157_v11 = vld [vmem:[%s14608_s1 + $0x10] sm:$0xff]  ;;  %v148_v34 = vld [vmem:[%s14607_s0 + $0x8] sm:$0xff] }
  0x81   :  { %v9024_v10 = vpack.c.bf16 %v159_v8, %v155_v7  ;;  %v161_v12 = vld [vmem:[%s14608_s1 + $0x30] sm:$0xff]  ;;  %v147_v13 = vld [vmem:[%s14607_s0] sm:$0xff]  ;;  %v150_v2 = vld [vmem:[%s14607_s0 + $0x18] sm:$0xff] }
  0x82   :  { %9023 = vmatprep.subr.bf16.mxu0 %v9022_v5  ;;  %v9028_v14 = vpack.c.bf16 %v161_v12, %v157_v11  ;;  %v476_v15 = vld [vmem:[#allocation10 + $0x8] sm:$0xff]  ;;  %v478_v17 = vld [vmem:[#allocation10 + $0x18] sm:$0xff]  ;;  %9027 = vmatprep.subr.bf16.mxu1 %v9026_v9  ;;  %v475_v20 = vld [vmem:[#allocation10] sm:$0xff] }
  0x83   :  { %v480_v16 = vld [vmem:[#allocation10 + $0x28] sm:$0xff]  ;;  %9025 = vmatpush1.bf16.msra.mxu0 %v9024_v10  ;;  %v482_v19 = vld [vmem:[#allocation10 + $0x38] sm:$0xff]  ;;  %v479_v21 = vld [vmem:[#allocation10 + $0x20] sm:$0xff] }
  0x84   :  { %v12486_v18 = vpack.c.bf16 %v480_v16, %v476_v15  ;;  %9029 = vmatpush1.bf16.msra.mxu1 %v9028_v14  ;;  %v12488_v22 = vpack.c.bf16 %v482_v19, %v478_v17  ;;  %v12490_v23 = vpack.c.bf16 %v479_v21, %v475_v20  ;;  %v477_v24 = vld [vmem:[#allocation10 + $0x10] sm:$0xff]  ;;  %v484_v27 = vld [vmem:[#allocation10 + $0x48] sm:$0xff]  ;;  %v486_v29 = vld [vmem:[#allocation10 + $0x58] sm:$0xff] }
  0x85   :  { %v481_v25 = vld [vmem:[#allocation10 + $0x30] sm:$0xff]  ;;  %v488_v28 = vld [vmem:[#allocation10 + $0x68] sm:$0xff]  ;;  %v490_v31 = vld [vmem:[#allocation10 + $0x78] sm:$0xff] }
  0x86   :  { %9031 = vmatprep.subr.bf16.mxu0 %v12486_v18  ;;  %v12493_v26 = vpack.c.bf16 %v481_v25, %v477_v24  ;;  %8857 = vmatmul.mubr.msk.f32.vlgmr.msra.gmra.mrb[0].mxu0 %vm185_vm0, %v147_v13  ;;  %v12497_v30 = vpack.c.bf16 %v488_v28, %v484_v27  ;;  %v483_v32 = vld [vmem:[#allocation10 + $0x40] sm:$0xff]  ;;  %v12504_v35 = vpack.c.bf16 %v490_v31, %v486_v29  ;;  %v485_v37 = vld [vmem:[#allocation10 + $0x50] sm:$0xff]  ;;  %v492_v40 = vld [vmem:[#allocation10 + $0x88] sm:$0xff] }
  0x87   :  { %9063 = vmatprep.subr.bf16.mxu1 %v12488_v22  ;;  %v487_v33 = vld [vmem:[#allocation10 + $0x60] sm:$0xff]  ;;  %8865 = vmatmul.mubr.msk.f32.vlgmr.msra.gmra.mrb[0].mxu1 %vm185_vm0, %v147_v13  ;;  %v489_v38 = vld [vmem:[#allocation10 + $0x70] sm:$0xff]  ;;  %v496_v41 = vld [vmem:[#allocation10 + $0xa8] sm:$0xff] }
  0x88   :  { %9033 = vmatpush1.bf16.msra.mxu0 %v12490_v23  ;;  %v12506_v36 = vpack.c.bf16 %v487_v33, %v483_v32  ;;  %9065 = vmatpush1.bf16.msra.mxu1 %v12493_v26  ;;  %v12510_v39 = vpack.c.bf16 %v489_v38, %v485_v37  ;;  %v494_v42 = vld [vmem:[#allocation10 + $0x98] sm:$0xff]  ;;  %v12514_v43 = vpack.c.bf16 %v496_v41, %v492_v40  ;;  %v491_v45 = vld [vmem:[#allocation10 + $0x80] sm:$0xff]  ;;  %v149_v47 = vld [vmem:[%s14607_s0 + $0x10] sm:$0xff] }
  0x89   :  { %280 = vmatprep.mubr.f32.mxu0 %v12245_v1  ;;  %393 = vmatprep.mubr.f32.mxu1 %v12245_v1  ;;  %v498_v44 = vld [vmem:[#allocation10 + $0xb8] sm:$0xff]  ;;  %v495_v46 = vld [vmem:[#allocation10 + $0xa0] sm:$0xff]  ;;  %v493_v49 = vld [vmem:[#allocation10 + $0x90] sm:$0xff] }
  0x8a   :  { %9035 = vmatprep.subr.bf16.mxu0 %v12497_v30  ;;  %8858 = vmatmul.mubr.msk.f32.gmra.mrb[2].mxu0 %vm185_vm0, %v148_v34  ;;  %v12521_v48 = vpack.c.bf16 %v498_v44, %v494_v42  ;;  %v497_v50 = vld [vmem:[#allocation10 + $0xb0] sm:$0xff]  ;;  %v12525_v51 = vpack.c.bf16 %v495_v46, %v491_v45  ;;  %v500_v52 = vld [vmem:[#allocation10 + $0xc8] sm:$0xff]  ;;  %v502_v54 = vld [vmem:[#allocation10 + $0xd8] sm:$0xff] }
  0x8b   :  { %9067 = vmatprep.subr.bf16.mxu1 %v12504_v35  ;;  %8866 = vmatmul.mubr.msk.f32.gmra.mrb[2].mxu1 %vm185_vm0, %v148_v34  ;;  %v504_v53 = vld [vmem:[#allocation10 + $0xe8] sm:$0xff]  ;;  %v12529_v55 = vpack.c.bf16 %v497_v50, %v493_v49  ;;  %v506_v56 = vld [vmem:[#allocation10 + $0xf8] sm:$0xff]  ;;  %v499_v57 = vld [vmem:[#allocation10 + $0xc0] sm:$0xff] }
  0x8c   :  { %9037 = vmatpush1.bf16.msra.mxu0 %v12506_v36  ;;  %9069 = vmatpush1.bf16.msra.mxu1 %v12510_v39  ;;  %v503_v58 = vld [vmem:[#allocation10 + $0xe0] sm:$0xff]  ;;  %v12533_v59 = vpack.c.bf16 %v504_v53, %v500_v52  ;;  %v501_v60 = vld [vmem:[#allocation10 + $0xd0] sm:$0xff]  ;;  %v12537_v62 = vpack.c.bf16 %v506_v56, %v502_v54  ;;  %v508_v63 = vld [vmem:[#allocation10 + $0x108] sm:$0xff] }
  0x8d   :  { %286 = vmatprep.mubr.f32.mxu0 %v12245_v1  ;;  %399 = vmatprep.mubr.f32.mxu1 %v12245_v1  ;;  %v505_v61 = vld [vmem:[#allocation10 + $0xf0] sm:$0xff]  ;;  %v512_v0 = vld [vmem:[#allocation10 + $0x128] sm:$0xff]  ;;  %v12544_v3 = vpack.c.bf16 %v503_v58, %v499_v57  ;;  %v510_v4 = vld [vmem:[#allocation10 + $0x118] sm:$0xff] }
  0x8e   :  { %9039 = vmatprep.subr.bf16.mxu0 %v12514_v43  ;;  %8859 = vmatmul.mubr.msk.f32.gmra.mrb[4].mxu0 %vm185_vm0, %v149_v47  ;;  %v514_v5 = vld [vmem:[#allocation10 + $0x138] sm:$0xff]  ;;  %v12548_v6 = vpack.c.bf16 %v505_v61, %v501_v60  ;;  %v507_v7 = vld [vmem:[#allocation10 + $0x100] sm:$0xff]  ;;  %v12552_v9 = vpack.c.bf16 %v512_v0, %v508_v63  ;;  %v509_v10 = vld [vmem:[#allocation10 + $0x110] sm:$0xff] }
  0x8f   :  { %9071 = vmatprep.subr.bf16.mxu1 %v12521_v48  ;;  %8867 = vmatmul.mubr.msk.f32.gmra.mrb[4].mxu1 %vm185_vm0, %v149_v47  ;;  %v511_v8 = vld [vmem:[#allocation10 + $0x120] sm:$0xff]  ;;  %v513_v11 = vld [vmem:[#allocation10 + $0x130] sm:$0xff]  ;;  %v12556_v12 = vpack.c.bf16 %v514_v5, %v510_v4  ;;  %v516_v13 = vld [vmem:[#allocation10 + $0x148] sm:$0xff] }
  0x90   :  { %9041 = vmatpush1.bf16.msra.mxu0 %v12525_v51  ;;  %9073 = vmatpush1.bf16.msra.mxu1 %v12529_v55  ;;  %v520_v14 = vld [vmem:[#allocation10 + $0x168] sm:$0xff]  ;;  %v151_v15 = vld [vmem:[%s14607_s0 + $0x20] sm:$0xff]  ;;  %v12563_v16 = vpack.c.bf16 %v511_v8, %v507_v7  ;;  %v12567_v20 = vpack.c.bf16 %v513_v11, %v509_v10  ;;  %v517_v27 = vld [vmem:[#allocation10 + $0x150] sm:$0xff]  ;;  %v165_v8 = vlaneseq }
  0x91   :  { %292 = vmatprep.mubr.f32.mxu0 %v12245_v1  ;;  %405 = vmatprep.mubr.f32.mxu1 %v12245_v1  ;;  %v518_v17 = vld [vmem:[#allocation10 + $0x158] sm:$0xff]  ;;  %v515_v21 = vld [vmem:[#allocation10 + $0x140] sm:$0xff]  ;;  %v12571_v25 = vpack.c.bf16 %v520_v14, %v516_v13  ;;  %v521_v28 = vld [vmem:[#allocation10 + $0x170] sm:$0xff] }
  0x92   :  { %9043 = vmatprep.subr.bf16.mxu0 %v12533_v59  ;;  %8860 = vmatmul.mubr.msk.f32.gmra.mrb[6].mxu0 %vm185_vm0, %v150_v2  ;;  %v522_v19 = vld [vmem:[#allocation10 + $0x178] sm:$0xff]  ;;  %v519_v24 = vld [vmem:[#allocation10 + $0x160] sm:$0xff]  ;;  %v524_v31 = vld [vmem:[#allocation10 + $0x188] sm:$0xff]  ;;  %v12586_v40 = vpack.c.bf16 %v521_v28, %v517_v27  ;;  %v166_v10 = vshrl.u32 %v165_v8, 7 }
  0x93   :  { %9075 = vmatprep.subr.bf16.mxu1 %v12537_v62  ;;  %8868 = vmatmul.mubr.msk.f32.gmra.mrb[6].mxu1 %vm185_vm0, %v150_v2  ;;  %v12575_v29 = vpack.c.bf16 %v522_v19, %v518_v17  ;;  %v528_v32 = vld [vmem:[#allocation10 + $0x1a8] sm:$0xff]  ;;  %v12582_v34 = vpack.c.bf16 %v519_v24, %v515_v21  ;;  %v526_v37 = vld [vmem:[#allocation10 + $0x198] sm:$0xff]  ;;  %v523_v41 = vld [vmem:[#allocation10 + $0x180] sm:$0xff] }
  0x94   :  { %9045 = vmatpush1.bf16.msra.mxu0 %v12544_v3  ;;  %9077 = vmatpush1.bf16.msra.mxu1 %v12548_v6  ;;  %v152_v33 = vld [vmem:[%s14607_s0 + $0x28] sm:$0xff]  ;;  %v530_v38 = vld [vmem:[#allocation10 + $0x1b8] sm:$0xff]  ;;  %v12590_v44 = vpack.c.bf16 %v528_v32, %v524_v31  ;;  %v525_v45 = vld [vmem:[#allocation10 + $0x190] sm:$0xff]  ;;  %v12673_v11 = vsub.s32 0, %v166_v10  ;;  %v12678_v14 = vsub.s32 1, %v166_v10 }
  0x95   :  { %298 = vmatprep.mubr.f32.mxu0 %v12245_v1  ;;  %411 = vmatprep.mubr.f32.mxu1 %v12245_v1  ;;  %v527_v42 = vld [vmem:[#allocation10 + $0x1a0] sm:$0xff]  ;;  %v529_v46 = vld [vmem:[#allocation10 + $0x1b0] sm:$0xff]  ;;  %v12594_v47 = vpack.c.bf16 %v530_v38, %v526_v37  ;;  %v532_v49 = vld [vmem:[#allocation10 + $0x1c8] sm:$0xff]  ;;  %v12693_v37 = vsub.s32 2, %v166_v10 }
  0x96   :  { %9047 = vmatprep.subr.bf16.mxu0 %v12552_v9  ;;  %8861 = vmatmul.mubr.msk.f32.gmra.mrb[8].mxu0 %vm185_vm0, %v151_v15  ;;  %v536_v50 = vld [vmem:[#allocation10 + $0x1e8] sm:$0xff]  ;;  %v12601_v53 = vpack.c.bf16 %v527_v42, %v523_v41  ;;  %v534_v54 = vld [vmem:[#allocation10 + $0x1d8] sm:$0xff]  ;;  %v12605_v57 = vpack.c.bf16 %v529_v46, %v525_v45  ;;  %v531_v58 = vld [vmem:[#allocation10 + $0x1c0] sm:$0xff] }
  0x97   :  { %9079 = vmatprep.subr.bf16.mxu1 %v12556_v12  ;;  %8869 = vmatmul.mubr.msk.f32.gmra.mrb[8].mxu1 %vm185_vm0, %v151_v15  ;;  %v153_v52 = vld [vmem:[%s14607_s0 + $0x30] sm:$0xff]  ;;  %v538_v56 = vld [vmem:[#allocation10 + $0x1f8] sm:$0xff]  ;;  %v535_v60 = vld [vmem:[#allocation10 + $0x1e0] sm:$0xff]  ;;  %v12609_v61 = vpack.c.bf16 %v536_v50, %v532_v49 }
  0x98   :  { %9049 = vmatpush1.bf16.msra.mxu0 %v12563_v16  ;;  %9081 = vmatpush1.bf16.msra.mxu1 %v12567_v20  ;;  %v533_v63 = vld [vmem:[#allocation10 + $0x1d0] sm:$0xff]  ;;  %v12613_v2 = vpack.c.bf16 %v538_v56, %v534_v54  ;;  %v12620_v5 = vpack.c.bf16 %v535_v60, %v531_v58  ;;  %v163_v13 = vld [vmem:[%s14616_s9] sm:$0xf] }
  0x99   :  { %304 = vmatprep.mubr.f32.mxu0 %v12245_v1  ;;  %417 = vmatprep.mubr.f32.mxu1 %v12245_v1  ;;  %v537_v0 = vld [vmem:[#allocation10 + $0x1f0] sm:$0xff]  ;;  %v12681_v15 = vrot.slane %v163_v13, %v12673_v11  ;;  %v12684_v17 = vrot.slane %v163_v13, %v12678_v14  ;;  %v12697_v41 = vrot.slane %v163_v13, %v12693_v37 }
  0x9a   :  { %9051 = vmatprep.subr.bf16.mxu0 %v12571_v25  ;;  %8862 = vmatmul.mubr.msk.f32.gmra.mrb[10].mxu0 %vm185_vm0, %v152_v33  ;;  %v154_v4 = vld [vmem:[%s14607_s0 + $0x38] sm:$0xff]  ;;  %v12624_v7 = vpack.c.bf16 %v537_v0, %v533_v63 }
  0x9b   :  { %9083 = vmatprep.subr.bf16.mxu1 %v12575_v29  ;;  %8870 = vmatmul.mubr.msk.f32.gmra.mrb[10].mxu1 %vm185_vm0, %v152_v33 }
  0x9c   :  { %9053 = vmatpush1.bf16.msra.mxu0 %v12582_v34  ;;  %9085 = vmatpush1.bf16.msra.mxu1 %v12586_v40 }
  0x9d   :  { %310 = vmatprep.mubr.f32.mxu0 %v12245_v1  ;;  %423 = vmatprep.mubr.f32.mxu1 %v12245_v1 }
  0x9e   :  { %9055 = vmatprep.subr.bf16.mxu0 %v12590_v44  ;;  %8863 = vmatmul.mubr.msk.f32.gmra.mrb[12].mxu0 %vm185_vm0, %v153_v52 }
  0x9f   :  { %9087 = vmatprep.subr.bf16.mxu1 %v12594_v47  ;;  %8871 = vmatmul.mubr.msk.f32.gmra.mrb[12].mxu1 %vm185_vm0, %v153_v52 }
  0xa0   :  { %9057 = vmatpush1.bf16.msra.mxu0 %v12601_v53  ;;  %9089 = vmatpush1.bf16.msra.mxu1 %v12605_v57 }
  0xa1   :  { %316 = vmatprep.mubr.f32.mxu0 %v12245_v1  ;;  %429 = vmatprep.mubr.f32.mxu1 %v12245_v1 }
  0xa2   :  { %9059 = vmatprep.subr.bf16.mxu0 %v12609_v61  ;;  %8864 = vmatmul.mubr.msk.f32.gmra.mrb[14].mxu0 %vm185_vm0, %v154_v4 }
  0xa3   :  { %9091 = vmatprep.subr.bf16.mxu1 %v12613_v2  ;;  %8872 = vmatmul.mubr.msk.f32.gmra.mrb[14].mxu1 %vm185_vm0, %v154_v4 }
  0xa4   :  { %9061 = vmatpush1.bf16.msra.mxu0 %v12620_v5  ;;  %9093 = vmatpush1.bf16.msra.mxu1 %v12624_v7 }
  0xa5   :  { %603 = vmatprep.mubr.f32.mxu0 %v12245_v1  ;;  %674 = vmatprep.mubr.f32.mxu1 %v12245_v1 }
  0xa6   :  { %9095 = vmatprep.subr.bf16.mxu0 %v12486_v18  ;;  %9127 = vmatprep.subr.bf16.mxu1 %v12488_v22 }
  0xa7   :  { %604 = vmatmul.mubr.f32.vlgmr.msra.gmra.mrb[0].mxu0 %v12245_v1  ;;  %675 = vmatmul.mubr.f32.vlgmr.msra.gmra.mrb[0].mxu1 %v12245_v1 }
  0xa8   :  { %9097 = vmatpush1.bf16.msra.mxu0 %v12490_v23  ;;  %9129 = vmatpush1.bf16.msra.mxu1 %v12493_v26 }
  0xa9   :  { %9099 = vmatprep.subr.bf16.mxu0 %v12497_v30  ;;  %9131 = vmatprep.subr.bf16.mxu1 %v12504_v35 }
  0xaa   :  { %845 = vmatprep.mubr.f32.mxu0 %v12245_v1  ;;  %916 = vmatprep.mubr.f32.mxu1 %v12245_v1 }
  0xac   :  { %9101 = vmatpush1.bf16.msra.mxu0 %v12506_v36  ;;  %9133 = vmatpush1.bf16.msra.mxu1 %v12510_v39 }
  0xad   :  { %9103 = vmatprep.subr.bf16.mxu0 %v12514_v43  ;;  %9135 = vmatprep.subr.bf16.mxu1 %v12521_v48 }
  0xb0   :  { %9105 = vmatpush1.bf16.msra.mxu0 %v12525_v51  ;;  %9137 = vmatpush1.bf16.msra.mxu1 %v12529_v55 }
  0xb1   :  { %9107 = vmatprep.subr.bf16.mxu0 %v12533_v59  ;;  %9139 = vmatprep.subr.bf16.mxu1 %v12537_v62 }
  0xb4   :  { %9109 = vmatpush1.bf16.msra.mxu0 %v12544_v3  ;;  %9141 = vmatpush1.bf16.msra.mxu1 %v12548_v6 }
  0xb5   :  { %9111 = vmatprep.subr.bf16.mxu0 %v12552_v9  ;;  %9143 = vmatprep.subr.bf16.mxu1 %v12556_v12 }
  0xb8   :  { %9113 = vmatpush1.bf16.msra.mxu0 %v12563_v16  ;;  %9145 = vmatpush1.bf16.msra.mxu1 %v12567_v20 }
  0xb9   :  { %9115 = vmatprep.subr.bf16.mxu0 %v12571_v25  ;;  %9147 = vmatprep.subr.bf16.mxu1 %v12575_v29 }
  0xbc   :  { %9117 = vmatpush1.bf16.msra.mxu0 %v12582_v34  ;;  %9149 = vmatpush1.bf16.msra.mxu1 %v12586_v40 }
  0xbd   :  { %9119 = vmatprep.subr.bf16.mxu0 %v12590_v44  ;;  %9151 = vmatprep.subr.bf16.mxu1 %v12594_v47 }
  0xc0   :  { %9121 = vmatpush1.bf16.msra.mxu0 %v12601_v53  ;;  %9153 = vmatpush1.bf16.msra.mxu1 %v12605_v57 }
  0xc1   :  { %9123 = vmatprep.subr.bf16.mxu0 %v12609_v61  ;;  %9155 = vmatprep.subr.bf16.mxu1 %v12613_v2 }
  0xc4   :  { %9125 = vmatpush1.bf16.msra.mxu0 %v12620_v5  ;;  %9157 = vmatpush1.bf16.msra.mxu1 %v12624_v7 }
  0xc5   :  { %9159 = vmatprep.subr.bf16.mxu0 %v12486_v18  ;;  %9191 = vmatprep.subr.bf16.mxu1 %v12488_v22  ;;  %v12686_v18 = vsub.s32 3, %v166_v10 }
  0xc7   :  { %v12691_v33 = vrot.slane %v163_v13, %v12686_v18 }
 0x17a   :  { %v605_v19 = vpop.f32.mrb[0].mxu0  ;;  %v676_v21 = vpop.f32.mrb[0].mxu1 }
 0x17b   :  { %v11294_v22 = vadd.f32 %v605_v19, %v12681_v15  ;;  %v607_v24 = vpop.f32.mrb[1].mxu0  ;;  %v678_v28 = vpop.f32.mrb[1].mxu1  ;;  %v11310_v45 = vadd.f32 %v676_v21, %v12697_v41 }
 0x17c   :  { %v11295_v27 = vadd.f32 %v607_v24, %v12684_v17  ;;  %v11311_v38 = vadd.f32 %v678_v28, %v12691_v33 }
 0x17d   :  { %v8873_v31 = vmul.f32 -1.442695, %v11294_v22 }
 0x17e   :  { %v8874_v32 = vmul.f32 -1.442695, %v11295_v27  ;;  %v8875_v42 = vmul.f32 -1.442695, %v11311_v38 }
 0x17f   :  { %11562 = vpow2.f32 %v8873_v31 }
 0x180   :  { %11564 = vpow2.f32 %v8874_v32 }
 0x181   :  { %11566 = vpow2.f32 %v8875_v42 }
 0x182   :  { %11568 = vtanh.f32 %v11310_v45 }
 0x189   :  { %v11563_v46 = vpop.eup %11562 }
 0x18a   :  { %v11565_v49 = vpop.eup %11564  ;;  %v688_v50 = vadd.f32 1.0, %v11563_v46 }
 0x18b   :  { %v694_v52 = vadd.f32 1.0, %v11565_v49  ;;  %v11567_v54 = vpop.eup %11566 }
 0x18c   :  { %11570 = vrcp.f32 %v688_v50  ;;  %v11569_v56 = vpop.eup %11568  ;;  %v701_v0 = vadd.f32 1.0, %v11567_v54 }
 0x18d   :  { %11572 = vrcp.f32 %v694_v52 }
 0x18e   :  { %11574 = vrcp.f32 %v701_v0 }
 0x196   :  { %v11571_v58 = vpop.eup %11570 }
 0x197   :  { %v11573_v60 = vpop.eup %11572  ;;  %v705_v63 = vmul.f32 %v11571_v58, %v11569_v56 }
 0x198   :  { %v704_v4 = vmul.f32 0.0, %v11573_v60  ;;  %v11575_v10 = vpop.eup %11574 }
 0x19a   :  { %v12700_v8 = vadd.f32 %v705_v63, %v704_v4  ;;  %v1204_v4 = vld [vmem:[#allocation10 + $0x8] sm:$0xff] }
 0x19c   :  { %11576 = vtanh.f32 %v12700_v8 }
 0x1a6   :  { %v11577_v13 = vpop.eup %11576 }
 0x1a7   :  { %v12703_v19 = vmul.f32 %v11577_v13, %v11575_v10  ;;  %v1208_v10 = vld [vmem:[#allocation10 + $0x28] sm:$0xff] }
 0x1a8   :  { %v12753_v13 = vpack.c.bf16 %v1208_v10, %v1204_v4  ;;  %v1469_v10 = vld [vmem:[#allocation10 + $0xb8] sm:$0xff] }
 0x1a9   :  { %846 = vmatmul.mubr.f32.vlgmr.msra.gmra.mrb[2].mxu0 %v12703_v19  ;;  %917 = vmatmul.mubr.f32.vlgmr.msra.gmra.mrb[2].mxu1 %v12703_v19 }
 0x1aa   :  { %9161 = vmatpush1.bf16.msra.mxu0 %v12490_v23  ;;  %9193 = vmatpush1.bf16.msra.mxu1 %v12493_v26 }
 0x1ab   :  { %9163 = vmatprep.subr.bf16.mxu0 %v12497_v30  ;;  %9195 = vmatprep.subr.bf16.mxu1 %v12504_v35 }
 0x1ac   :  { %1088 = vmatprep.mubr.f32.mxu0 %v12245_v1  ;;  %1159 = vmatprep.mubr.f32.mxu1 %v12245_v1 }
 0x1ae   :  { %9165 = vmatpush1.bf16.msra.mxu0 %v12506_v36  ;;  %9197 = vmatpush1.bf16.msra.mxu1 %v12510_v39 }
 0x1af   :  { %9167 = vmatprep.subr.bf16.mxu0 %v12514_v43  ;;  %9199 = vmatprep.subr.bf16.mxu1 %v12521_v48 }
 0x1b2   :  { %9169 = vmatpush1.bf16.msra.mxu0 %v12525_v51  ;;  %9201 = vmatpush1.bf16.msra.mxu1 %v12529_v55 }
 0x1b3   :  { %9171 = vmatprep.subr.bf16.mxu0 %v12533_v59  ;;  %9203 = vmatprep.subr.bf16.mxu1 %v12537_v62 }
 0x1b6   :  { %9173 = vmatpush1.bf16.msra.mxu0 %v12544_v3  ;;  %9205 = vmatpush1.bf16.msra.mxu1 %v12548_v6 }
 0x1b7   :  { %9175 = vmatprep.subr.bf16.mxu0 %v12552_v9  ;;  %9207 = vmatprep.subr.bf16.mxu1 %v12556_v12 }
 0x1ba   :  { %9177 = vmatpush1.bf16.msra.mxu0 %v12563_v16  ;;  %9209 = vmatpush1.bf16.msra.mxu1 %v12567_v20 }
 0x1bb   :  { %9179 = vmatprep.subr.bf16.mxu0 %v12571_v25  ;;  %9211 = vmatprep.subr.bf16.mxu1 %v12575_v29 }
 0x1be   :  { %9181 = vmatpush1.bf16.msra.mxu0 %v12582_v34  ;;  %9213 = vmatpush1.bf16.msra.mxu1 %v12586_v40 }
 0x1bf   :  { %9183 = vmatprep.subr.bf16.mxu0 %v12590_v44  ;;  %9215 = vmatprep.subr.bf16.mxu1 %v12594_v47 }
 0x1c2   :  { %9185 = vmatpush1.bf16.msra.mxu0 %v12601_v53  ;;  %9217 = vmatpush1.bf16.msra.mxu1 %v12605_v57 }
 0x1c3   :  { %9187 = vmatprep.subr.bf16.mxu0 %v12609_v61  ;;  %9219 = vmatprep.subr.bf16.mxu1 %v12613_v2 }
 0x1c6   :  { %9189 = vmatpush1.bf16.msra.mxu0 %v12620_v5  ;;  %9221 = vmatpush1.bf16.msra.mxu1 %v12624_v7 }
 0x1c7   :  { %9223 = vmatprep.subr.bf16.mxu0 %v12753_v13 }
 0x27c   :  { %v847_v23 = vpop.f32.mrb[2].mxu0  ;;  %v918_v26 = vpop.f32.mrb[2].mxu1 }
 0x27d   :  { %v11296_v30 = vadd.f32 %v847_v23, %v12681_v15  ;;  %v849_v35 = vpop.f32.mrb[3].mxu0  ;;  %v920_v36 = vpop.f32.mrb[3].mxu1  ;;  %v11312_v28 = vadd.f32 %v918_v26, %v12697_v41  ;;  %v1210_v23 = vld [vmem:[#allocation10 + $0x38] sm:$0xff]  ;;  %v1203_v26 = vld [vmem:[#allocation10] sm:$0xff] }
 0x27e   :  { %v11297_v39 = vadd.f32 %v849_v35, %v12684_v17  ;;  %v11313_v24 = vadd.f32 %v920_v36, %v12691_v33 }
 0x27f   :  { %v8876_v22 = vmul.f32 -1.442695, %v11296_v30  ;;  %v1207_v30 = vld [vmem:[#allocation10 + $0x20] sm:$0xff] }
 0x280   :  { %v8877_v21 = vmul.f32 -1.442695, %v11297_v39  ;;  %v8878_v27 = vmul.f32 -1.442695, %v11313_v24  ;;  %v12757_v36 = vpack.c.bf16 %v1207_v30, %v1203_v26  ;;  %v1205_v39 = vld [vmem:[#allocation10 + $0x10] sm:$0xff]  ;;  %v1212_v24 = vld [vmem:[#allocation10 + $0x48] sm:$0xff] }
 0x281   :  { %11578 = vpow2.f32 %v8876_v22  ;;  %v1209_v22 = vld [vmem:[#allocation10 + $0x30] sm:$0xff] }
 0x282   :  { %11580 = vpow2.f32 %v8877_v21  ;;  %v12760_v21 = vpack.c.bf16 %v1209_v22, %v1205_v39  ;;  %v1464_v39 = vld [vmem:[#allocation10 + $0x90] sm:$0xff] }
 0x283   :  { %11582 = vpow2.f32 %v8878_v27  ;;  %v1216_v27 = vld [vmem:[#allocation10 + $0x68] sm:$0xff]  ;;  %v1468_v22 = vld [vmem:[#allocation10 + $0xb0] sm:$0xff] }
 0x284   :  { %11584 = vtanh.f32 %v11312_v28  ;;  %v1214_v28 = vld [vmem:[#allocation10 + $0x58] sm:$0xff] }
 0x28b   :  { %v11579_v31 = vpop.eup %11578 }
 0x28c   :  { %v11581_v32 = vpop.eup %11580  ;;  %v930_v38 = vadd.f32 1.0, %v11579_v31  ;;  %v12765_v31 = vpack.c.bf16 %v1216_v27, %v1212_v24  ;;  %v12830_v24 = vpack.c.bf16 %v1468_v22, %v1464_v39  ;;  %v1471_v27 = vld [vmem:[#allocation10 + $0xc8] sm:$0xff]  ;;  %v1497_v22 = vld [vmem:[#allocation10 + $0x198] sm:$0xff] }
 0x28d   :  { %v936_v42 = vadd.f32 1.0, %v11581_v32  ;;  %v11583_v45 = vpop.eup %11582  ;;  %v1218_v32 = vld [vmem:[#allocation10 + $0x78] sm:$0xff]  ;;  %v1499_v39 = vld [vmem:[#allocation10 + $0x1a8] sm:$0xff] }
 0x28e   :  { %11586 = vrcp.f32 %v930_v38  ;;  %v11585_v46 = vpop.eup %11584  ;;  %v943_v54 = vadd.f32 1.0, %v11583_v45  ;;  %v1211_v38 = vld [vmem:[#allocation10 + $0x40] sm:$0xff]  ;;  %v12767_v45 = vpack.c.bf16 %v1218_v32, %v1214_v28  ;;  %v1475_v28 = vld [vmem:[#allocation10 + $0xe8] sm:$0xff]  ;;  %v1473_v32 = vld [vmem:[#allocation10 + $0xd8] sm:$0xff] }
 0x28f   :  { %11588 = vrcp.f32 %v936_v42  ;;  %v1215_v42 = vld [vmem:[#allocation10 + $0x60] sm:$0xff] }
 0x290   :  { %11590 = vrcp.f32 %v943_v54 }
 0x298   :  { %v11587_v49 = vpop.eup %11586 }
 0x299   :  { %v11589_v50 = vpop.eup %11588  ;;  %v947_v52 = vmul.f32 %v11587_v49, %v11585_v46  ;;  %v12769_v46 = vpack.c.bf16 %v1215_v42, %v1211_v38  ;;  %v1213_v49 = vld [vmem:[#allocation10 + $0x50] sm:$0xff]  ;;  %v12835_v38 = vpack.c.bf16 %v1475_v28, %v1471_v27  ;;  %v1477_v42 = vld [vmem:[#allocation10 + $0xf8] sm:$0xff] }
 0x29a   :  { %v946_v56 = vmul.f32 %v11589_v50, %v12700_v8  ;;  %v11591_v60 = vpop.eup %11590  ;;  %v1206_v8 = vld [vmem:[#allocation10 + $0x18] sm:$0xff]  ;;  %v1217_v50 = vld [vmem:[#allocation10 + $0x70] sm:$0xff] }
 0x29b   :  { %v12755_v35 = vpack.c.bf16 %v1210_v23, %v1206_v8  ;;  %v1462_v8 = vld [vmem:[#allocation10 + $0x80] sm:$0xff]  ;;  %v1501_v27 = vld [vmem:[#allocation10 + $0x1b8] sm:$0xff] }
 0x29c   :  { %v12744_v58 = vadd.f32 %v947_v52, %v946_v56  ;;  %v12772_v52 = vpack.c.bf16 %v1217_v50, %v1213_v49  ;;  %v1466_v23 = vld [vmem:[#allocation10 + $0xa0] sm:$0xff] }
 0x29d   :  { %9255 = vmatprep.subr.bf16.mxu1 %v12755_v35  ;;  %v12827_v30 = vpack.c.bf16 %v1466_v23, %v1462_v8  ;;  %v1470_v49 = vld [vmem:[#allocation10 + $0xc0] sm:$0xff]  ;;  %v1495_v8 = vld [vmem:[#allocation10 + $0x188] sm:$0xff] }
 0x29e   :  { %11592 = vtanh.f32 %v12744_v58  ;;  %v1474_v50 = vld [vmem:[#allocation10 + $0xe0] sm:$0xff]  ;;  %v12869_v28 = vpack.c.bf16 %v1499_v39, %v1495_v8 }
 0x2a8   :  { %v11593_v63 = vpop.eup %11592 }
 0x2a9   :  { %v12747_v0 = vmul.f32 %v11593_v63, %v11591_v60  ;;  %v1467_v60 = vld [vmem:[#allocation10 + $0xa8] sm:$0xff]  ;;  %v1465_v63 = vld [vmem:[#allocation10 + $0x98] sm:$0xff] }
 0x2aa   :  { %v12825_v26 = vpack.c.bf16 %v1469_v10, %v1465_v63  ;;  %v1488_v63 = vld [vmem:[#allocation10 + $0x150] sm:$0xff] }
 0x2ab   :  { %1089 = vmatmul.mubr.f32.vlgmr.msra.gmra.mrb[4].mxu0 %v12747_v0  ;;  %1160 = vmatmul.mubr.f32.vlgmr.msra.gmra.mrb[4].mxu1 %v12747_v0  ;;  %v1492_v10 = vld [vmem:[#allocation10 + $0x170] sm:$0xff] }
 0x2ac   :  { %1331 = vmatprep.mubr.f32.mxu0 %v12245_v1  ;;  %1402 = vmatprep.mubr.f32.mxu1 %v12245_v1  ;;  %v12866_v23 = vpack.c.bf16 %v1492_v10, %v1488_v63 }
 0x2ad   :  { %9225 = vmatpush1.bf16.msra.mxu0 %v12757_v36  ;;  %9257 = vmatpush1.bf16.msra.mxu1 %v12760_v21 }
 0x2ae   :  { %9227 = vmatprep.subr.bf16.mxu0 %v12765_v31  ;;  %9259 = vmatprep.subr.bf16.mxu1 %v12767_v45 }
 0x2b1   :  { %9229 = vmatpush1.bf16.msra.mxu0 %v12769_v46  ;;  %9261 = vmatpush1.bf16.msra.mxu1 %v12772_v52 }
 0x2b2   :  { %9231 = vmatprep.subr.bf16.mxu0 %v12514_v43  ;;  %9263 = vmatprep.subr.bf16.mxu1 %v12521_v48 }
 0x2b5   :  { %9233 = vmatpush1.bf16.msra.mxu0 %v12525_v51  ;;  %9265 = vmatpush1.bf16.msra.mxu1 %v12529_v55 }
 0x2b6   :  { %9235 = vmatprep.subr.bf16.mxu0 %v12533_v59  ;;  %9267 = vmatprep.subr.bf16.mxu1 %v12537_v62 }
 0x2b9   :  { %9237 = vmatpush1.bf16.msra.mxu0 %v12544_v3  ;;  %9269 = vmatpush1.bf16.msra.mxu1 %v12548_v6 }
 0x2ba   :  { %9239 = vmatprep.subr.bf16.mxu0 %v12552_v9  ;;  %9271 = vmatprep.subr.bf16.mxu1 %v12556_v12 }
 0x2bd   :  { %9241 = vmatpush1.bf16.msra.mxu0 %v12563_v16  ;;  %9273 = vmatpush1.bf16.msra.mxu1 %v12567_v20 }
 0x2be   :  { %9243 = vmatprep.subr.bf16.mxu0 %v12571_v25  ;;  %9275 = vmatprep.subr.bf16.mxu1 %v12575_v29 }
 0x2c1   :  { %9245 = vmatpush1.bf16.msra.mxu0 %v12582_v34  ;;  %9277 = vmatpush1.bf16.msra.mxu1 %v12586_v40 }
 0x2c2   :  { %9247 = vmatprep.subr.bf16.mxu0 %v12590_v44  ;;  %9279 = vmatprep.subr.bf16.mxu1 %v12594_v47 }
 0x2c5   :  { %9249 = vmatpush1.bf16.msra.mxu0 %v12601_v53  ;;  %9281 = vmatpush1.bf16.msra.mxu1 %v12605_v57 }
 0x2c6   :  { %9251 = vmatprep.subr.bf16.mxu0 %v12609_v61  ;;  %9283 = vmatprep.subr.bf16.mxu1 %v12613_v2 }
 0x2c9   :  { %9253 = vmatpush1.bf16.msra.mxu0 %v12620_v5  ;;  %9285 = vmatpush1.bf16.msra.mxu1 %v12624_v7 }
 0x2ca   :  { %9287 = vmatprep.subr.bf16.mxu0 %v12753_v13  ;;  %9319 = vmatprep.subr.bf16.mxu1 %v12755_v35 }
 0x37e   :  { %v1090_v43 = vpop.f32.mrb[4].mxu0  ;;  %v1161_v48 = vpop.f32.mrb[4].mxu1 }
 0x37f   :  { %v11298_v51 = vadd.f32 %v1090_v43, %v12681_v15  ;;  %v1092_v55 = vpop.f32.mrb[5].mxu0  ;;  %v1163_v59 = vpop.f32.mrb[5].mxu1  ;;  %v11314_v16 = vadd.f32 %v1161_v48, %v12697_v41  ;;  %v12837_v43 = vpack.c.bf16 %v1477_v42, %v1473_v32  ;;  %v12839_v48 = vpack.c.bf16 %v1474_v50, %v1470_v49  ;;  %v1494_v42 = vld [vmem:[#allocation10 + $0x180] sm:$0xff]  ;;  %v1496_v50 = vld [vmem:[#allocation10 + $0x190] sm:$0xff] }
 0x380   :  { %v11299_v62 = vadd.f32 %v1092_v55, %v12684_v17  ;;  %v11315_v9 = vadd.f32 %v1163_v59, %v12691_v33  ;;  %v1476_v55 = vld [vmem:[#allocation10 + $0xf0] sm:$0xff]  ;;  %v12871_v32 = vpack.c.bf16 %v1501_v27, %v1497_v22  ;;  %v1498_v49 = vld [vmem:[#allocation10 + $0x1a0] sm:$0xff] }
 0x381   :  { %v8879_v3 = vmul.f32 -1.442695, %v11298_v51  ;;  %v1472_v51 = vld [vmem:[#allocation10 + $0xd0] sm:$0xff] }
 0x382   :  { %v8880_v6 = vmul.f32 -1.442695, %v11299_v62  ;;  %v8881_v12 = vmul.f32 -1.442695, %v11315_v9  ;;  %v12842_v59 = vpack.c.bf16 %v1476_v55, %v1472_v51  ;;  %v1479_v62 = vld [vmem:[#allocation10 + $0x108] sm:$0xff]  ;;  %v12874_v51 = vpack.c.bf16 %v1498_v49, %v1494_v42  ;;  %v1500_v55 = vld [vmem:[#allocation10 + $0x1b0] sm:$0xff] }
 0x383   :  { %11594 = vpow2.f32 %v8879_v3  ;;  %v1483_v3 = vld [vmem:[#allocation10 + $0x128] sm:$0xff] }
 0x384   :  { %11596 = vpow2.f32 %v8880_v6  ;;  %v1481_v6 = vld [vmem:[#allocation10 + $0x118] sm:$0xff]  ;;  %v12847_v9 = vpack.c.bf16 %v1483_v3, %v1479_v62  ;;  %v1503_v62 = vld [vmem:[#allocation10 + $0x1c8] sm:$0xff] }
 0x385   :  { %11598 = vpow2.f32 %v8881_v12  ;;  %v1485_v12 = vld [vmem:[#allocation10 + $0x138] sm:$0xff]  ;;  %v1507_v3 = vld [vmem:[#allocation10 + $0x1e8] sm:$0xff] }
 0x386   :  { %11600 = vtanh.f32 %v11314_v16  ;;  %v1478_v16 = vld [vmem:[#allocation10 + $0x100] sm:$0xff] }
 0x38d   :  { %v11595_v20 = vpop.eup %11594 }
 0x38e   :  { %v11597_v25 = vpop.eup %11596  ;;  %v1173_v29 = vadd.f32 1.0, %v11595_v20  ;;  %v1482_v20 = vld [vmem:[#allocation10 + $0x120] sm:$0xff] }
 0x38f   :  { %v1179_v34 = vadd.f32 1.0, %v11597_v25  ;;  %v11599_v40 = vpop.eup %11598  ;;  %v12849_v25 = vpack.c.bf16 %v1485_v12, %v1481_v6  ;;  %v12878_v6 = vpack.c.bf16 %v1500_v55, %v1496_v50  ;;  %v12880_v12 = vpack.c.bf16 %v1507_v3, %v1503_v62 }
 0x390   :  { %11602 = vrcp.f32 %v1173_v29  ;;  %v11601_v44 = vpop.eup %11600  ;;  %v1186_v61 = vadd.f32 1.0, %v11599_v40  ;;  %v12851_v29 = vpack.c.bf16 %v1482_v20, %v1478_v16  ;;  %v1484_v40 = vld [vmem:[#allocation10 + $0x130] sm:$0xff]  ;;  %v1505_v16 = vld [vmem:[#allocation10 + $0x1d8] sm:$0xff] }
 0x391   :  { %11604 = vrcp.f32 %v1179_v34  ;;  %v1480_v34 = vld [vmem:[#allocation10 + $0x110] sm:$0xff]  ;;  %v1509_v20 = vld [vmem:[#allocation10 + $0x1f8] sm:$0xff] }
 0x392   :  { %11606 = vrcp.f32 %v1186_v61 }
 0x39a   :  { %v11603_v47 = vpop.eup %11602 }
 0x39b   :  { %v11605_v53 = vpop.eup %11604  ;;  %v1190_v57 = vmul.f32 %v11603_v47, %v11601_v44  ;;  %v12854_v44 = vpack.c.bf16 %v1484_v40, %v1480_v34  ;;  %v1487_v47 = vld [vmem:[#allocation10 + $0x148] sm:$0xff]  ;;  %v1502_v34 = vld [vmem:[#allocation10 + $0x1c0] sm:$0xff]  ;;  %v12883_v40 = vpack.c.bf16 %v1509_v20, %v1505_v16 }
 0x39c   :  { %v1189_v2 = vmul.f32 %v11605_v53, %v12744_v58  ;;  %v11607_v7 = vpop.eup %11606  ;;  %v1463_v58 = vld [vmem:[#allocation10 + $0x88] sm:$0xff] }
 0x39d   :  { %v12823_v4 = vpack.c.bf16 %v1467_v60, %v1463_v58  ;;  %v1491_v53 = vld [vmem:[#allocation10 + $0x168] sm:$0xff] }
 0x39e   :  { %v12808_v5 = vadd.f32 %v1190_v57, %v1189_v2  ;;  %v1489_v57 = vld [vmem:[#allocation10 + $0x158] sm:$0xff]  ;;  %v12858_v61 = vpack.c.bf16 %v1491_v53, %v1487_v47  ;;  %v1506_v47 = vld [vmem:[#allocation10 + $0x1e0] sm:$0xff]  ;;  %v1504_v53 = vld [vmem:[#allocation10 + $0x1d0] sm:$0xff] }
 0x39f   :  { %v1493_v2 = vld [vmem:[#allocation10 + $0x178] sm:$0xff] }
 0x3a0   :  { %11608 = vtanh.f32 %v12808_v5  ;;  %v12861_v58 = vpack.c.bf16 %v1493_v2, %v1489_v57  ;;  %v1508_v57 = vld [vmem:[#allocation10 + $0x1f0] sm:$0xff]  ;;  %v12886_v2 = vpack.c.bf16 %v1506_v47, %v1502_v34 }
 0x3aa   :  { %v11609_v54 = vpop.eup %11608 }
 0x3ab   :  { %v12811_v56 = vmul.f32 %v11609_v54, %v11607_v7  ;;  %v1486_v7 = vld [vmem:[#allocation10 + $0x140] sm:$0xff] }
 0x3ac   :  { %v1490_v54 = vld [vmem:[#allocation10 + $0x160] sm:$0xff] }
 0x3ad   :  { %1332 = vmatmul.mubr.f32.vlgmr.msra.gmra.mrb[6].mxu0 %v12811_v56  ;;  %1403 = vmatmul.mubr.f32.vlgmr.msra.gmra.mrb[6].mxu1 %v12811_v56  ;;  %v12863_v60 = vpack.c.bf16 %v1490_v54, %v1486_v7  ;;  %v12890_v7 = vpack.c.bf16 %v1508_v57, %v1504_v53 }
 0x3ae   :  { %9289 = vmatpush1.bf16.msra.mxu0 %v12757_v36  ;;  %9321 = vmatpush1.bf16.msra.mxu1 %v12760_v21 }
 0x3af   :  { %9291 = vmatprep.subr.bf16.mxu0 %v12765_v31  ;;  %9323 = vmatprep.subr.bf16.mxu1 %v12767_v45 }
 0x3b0   :  { %1574 = vmatprep.mubr.f32.mxu0 %v12245_v1  ;;  %1645 = vmatprep.mubr.f32.mxu1 %v12245_v1 }
 0x3b2   :  { %9293 = vmatpush1.bf16.msra.mxu0 %v12769_v46  ;;  %9325 = vmatpush1.bf16.msra.mxu1 %v12772_v52 }
 0x3b3   :  { %9295 = vmatprep.subr.bf16.mxu0 %v12823_v4  ;;  %9327 = vmatprep.subr.bf16.mxu1 %v12825_v26 }
 0x3b6   :  { %9297 = vmatpush1.bf16.msra.mxu0 %v12827_v30  ;;  %9329 = vmatpush1.bf16.msra.mxu1 %v12830_v24 }
 0x3b7   :  { %9299 = vmatprep.subr.bf16.mxu0 %v12835_v38  ;;  %9331 = vmatprep.subr.bf16.mxu1 %v12837_v43 }
 0x3ba   :  { %9301 = vmatpush1.bf16.msra.mxu0 %v12839_v48  ;;  %9333 = vmatpush1.bf16.msra.mxu1 %v12842_v59 }
 0x3bb   :  { %9303 = vmatprep.subr.bf16.mxu0 %v12847_v9  ;;  %9335 = vmatprep.subr.bf16.mxu1 %v12849_v25 }
 0x3be   :  { %9305 = vmatpush1.bf16.msra.mxu0 %v12851_v29  ;;  %9337 = vmatpush1.bf16.msra.mxu1 %v12854_v44 }
 0x3bf   :  { %9307 = vmatprep.subr.bf16.mxu0 %v12858_v61  ;;  %9339 = vmatprep.subr.bf16.mxu1 %v12861_v58 }
 0x3c2   :  { %9309 = vmatpush1.bf16.msra.mxu0 %v12863_v60  ;;  %9341 = vmatpush1.bf16.msra.mxu1 %v12866_v23 }
 0x3c3   :  { %9311 = vmatprep.subr.bf16.mxu0 %v12869_v28  ;;  %9343 = vmatprep.subr.bf16.mxu1 %v12871_v32 }
 0x3c6   :  { %9313 = vmatpush1.bf16.msra.mxu0 %v12874_v51  ;;  %9345 = vmatpush1.bf16.msra.mxu1 %v12878_v6 }
 0x3c7   :  { %9315 = vmatprep.subr.bf16.mxu0 %v12880_v12  ;;  %9347 = vmatprep.subr.bf16.mxu1 %v12883_v40 }
 0x3ca   :  { %9317 = vmatpush1.bf16.msra.mxu0 %v12886_v2  ;;  %9349 = vmatpush1.bf16.msra.mxu1 %v12890_v7 }
 0x3cb   :  { %9351 = vmatprep.subr.bf16.mxu0 %v12753_v13  ;;  %9383 = vmatprep.subr.bf16.mxu1 %v12755_v35 }
 0x480   :  { %v1333_v54 = vpop.f32.mrb[6].mxu0  ;;  %v1404_v63 = vpop.f32.mrb[6].mxu1 }
 0x481   :  { %v11300_v10 = vadd.f32 %v1333_v54, %v12681_v15  ;;  %v1335_v8 = vpop.f32.mrb[7].mxu0  ;;  %v1406_v39 = vpop.f32.mrb[7].mxu1  ;;  %v11316_v55 = vadd.f32 %v1404_v63, %v12697_v41 }
 0x482   :  { %v11301_v22 = vadd.f32 %v1335_v8, %v12684_v17  ;;  %v11317_v49 = vadd.f32 %v1406_v39, %v12691_v33 }
 0x483   :  { %v8882_v27 = vmul.f32 -1.442695, %v11300_v10 }
 0x484   :  { %v8883_v42 = vmul.f32 -1.442695, %v11301_v22  ;;  %v8884_v50 = vmul.f32 -1.442695, %v11317_v49 }
 0x485   :  { %11610 = vpow2.f32 %v8882_v27 }
 0x486   :  { %11612 = vpow2.f32 %v8883_v42 }
 0x487   :  { %11614 = vpow2.f32 %v8884_v50 }
 0x488   :  { %11616 = vtanh.f32 %v11316_v55 }
 0x48f   :  { %v11611_v62 = vpop.eup %11610 }
 0x490   :  { %v11613_v3 = vpop.eup %11612  ;;  %v1416_v16 = vadd.f32 1.0, %v11611_v62 }
 0x491   :  { %v1422_v20 = vadd.f32 1.0, %v11613_v3  ;;  %v11615_v34 = vpop.eup %11614 }
 0x492   :  { %11618 = vrcp.f32 %v1416_v16  ;;  %v11617_v47 = vpop.eup %11616  ;;  %v1429_v10 = vadd.f32 1.0, %v11615_v34 }
 0x493   :  { %11620 = vrcp.f32 %v1422_v20 }
 0x494   :  { %11622 = vrcp.f32 %v1429_v10 }
 0x49c   :  { %v11619_v53 = vpop.eup %11618 }
 0x49d   :  { %v11621_v57 = vpop.eup %11620  ;;  %v1433_v54 = vmul.f32 %v11619_v53, %v11617_v47 }
 0x49e   :  { %v1432_v8 = vmul.f32 %v11621_v57, %v12808_v5  ;;  %v11623_v63 = vpop.eup %11622 }
 0x4a0   :  { %v12902_v39 = vadd.f32 %v1433_v54, %v1432_v8 }
 0x4a2   :  { %11624 = vtanh.f32 %v12902_v39 }
 0x4ac   :  { %v11625_v22 = vpop.eup %11624 }
 0x4ad   :  { %v12905_v27 = vmul.f32 %v11625_v22, %v11623_v63 }
 0x4af   :  { %1575 = vmatmul.mubr.f32.vlgmr.msra.gmra.mrb[8].mxu0 %v12905_v27  ;;  %1646 = vmatmul.mubr.f32.vlgmr.msra.gmra.mrb[8].mxu1 %v12905_v27 }
 0x4b0   :  { %9353 = vmatpush1.bf16.msra.mxu0 %v12757_v36  ;;  %9385 = vmatpush1.bf16.msra.mxu1 %v12760_v21 }
 0x4b1   :  { %9355 = vmatprep.subr.bf16.mxu0 %v12765_v31  ;;  %9387 = vmatprep.subr.bf16.mxu1 %v12767_v45 }
 0x4b2   :  { %1817 = vmatprep.mubr.f32.mxu0 %v12245_v1  ;;  %1888 = vmatprep.mubr.f32.mxu1 %v12245_v1 }
 0x4b4   :  { %9357 = vmatpush1.bf16.msra.mxu0 %v12769_v46  ;;  %9389 = vmatpush1.bf16.msra.mxu1 %v12772_v52 }
 0x4b5   :  { %9359 = vmatprep.subr.bf16.mxu0 %v12823_v4  ;;  %9391 = vmatprep.subr.bf16.mxu1 %v12825_v26 }
 0x4b8   :  { %9361 = vmatpush1.bf16.msra.mxu0 %v12827_v30  ;;  %9393 = vmatpush1.bf16.msra.mxu1 %v12830_v24 }
 0x4b9   :  { %9363 = vmatprep.subr.bf16.mxu0 %v12835_v38  ;;  %9395 = vmatprep.subr.bf16.mxu1 %v12837_v43 }
 0x4bc   :  { %9365 = vmatpush1.bf16.msra.mxu0 %v12839_v48  ;;  %9397 = vmatpush1.bf16.msra.mxu1 %v12842_v59 }
 0x4bd   :  { %9367 = vmatprep.subr.bf16.mxu0 %v12847_v9  ;;  %9399 = vmatprep.subr.bf16.mxu1 %v12849_v25 }
 0x4c0   :  { %9369 = vmatpush1.bf16.msra.mxu0 %v12851_v29  ;;  %9401 = vmatpush1.bf16.msra.mxu1 %v12854_v44 }
 0x4c1   :  { %9371 = vmatprep.subr.bf16.mxu0 %v12858_v61  ;;  %9403 = vmatprep.subr.bf16.mxu1 %v12861_v58 }
 0x4c4   :  { %9373 = vmatpush1.bf16.msra.mxu0 %v12863_v60  ;;  %9405 = vmatpush1.bf16.msra.mxu1 %v12866_v23 }
 0x4c5   :  { %9375 = vmatprep.subr.bf16.mxu0 %v12869_v28  ;;  %9407 = vmatprep.subr.bf16.mxu1 %v12871_v32 }
 0x4c8   :  { %9377 = vmatpush1.bf16.msra.mxu0 %v12874_v51  ;;  %9409 = vmatpush1.bf16.msra.mxu1 %v12878_v6 }
 0x4c9   :  { %9379 = vmatprep.subr.bf16.mxu0 %v12880_v12  ;;  %9411 = vmatprep.subr.bf16.mxu1 %v12883_v40 }
 0x4cc   :  { %9381 = vmatpush1.bf16.msra.mxu0 %v12886_v2  ;;  %9413 = vmatpush1.bf16.msra.mxu1 %v12890_v7 }
 0x4cd   :  { %9415 = vmatprep.subr.bf16.mxu0 %v12753_v13  ;;  %9447 = vmatprep.subr.bf16.mxu1 %v12755_v35 }
 0x582   :  { %v1576_v5 = vpop.f32.mrb[8].mxu0  ;;  %v1647_v42 = vpop.f32.mrb[8].mxu1 }
 0x583   :  { %v11302_v49 = vadd.f32 %v1576_v5, %v12681_v15  ;;  %v1578_v50 = vpop.f32.mrb[9].mxu0  ;;  %v1649_v55 = vpop.f32.mrb[9].mxu1  ;;  %v11318_v47 = vadd.f32 %v1647_v42, %v12697_v41 }
 0x584   :  { %v11303_v62 = vadd.f32 %v1578_v50, %v12684_v17  ;;  %v11319_v20 = vadd.f32 %v1649_v55, %v12691_v33 }
 0x585   :  { %v8885_v3 = vmul.f32 -1.442695, %v11302_v49 }
 0x586   :  { %v8886_v16 = vmul.f32 -1.442695, %v11303_v62  ;;  %v8887_v34 = vmul.f32 -1.442695, %v11319_v20 }
 0x587   :  { %11626 = vpow2.f32 %v8885_v3 }
 0x588   :  { %11628 = vpow2.f32 %v8886_v16 }
 0x589   :  { %11630 = vpow2.f32 %v8887_v34 }
 0x58a   :  { %11632 = vtanh.f32 %v11318_v47 }
 0x591   :  { %v11627_v13 = vpop.eup %11626 }
 0x592   :  { %v11629_v53 = vpop.eup %11628  ;;  %v1659_v35 = vadd.f32 1.0, %v11627_v13 }
 0x593   :  { %v1665_v57 = vadd.f32 1.0, %v11629_v53  ;;  %v11631_v54 = vpop.eup %11630 }
 0x594   :  { %11634 = vrcp.f32 %v1659_v35  ;;  %v11633_v10 = vpop.eup %11632  ;;  %v1672_v5 = vadd.f32 1.0, %v11631_v54 }
 0x595   :  { %11636 = vrcp.f32 %v1665_v57 }
 0x596   :  { %11638 = vrcp.f32 %v1672_v5 }
 0x59e   :  { %v11635_v8 = vpop.eup %11634 }
 0x59f   :  { %v11637_v63 = vpop.eup %11636  ;;  %v1676_v22 = vmul.f32 %v11635_v8, %v11633_v10 }
 0x5a0   :  { %v1675_v49 = vmul.f32 %v11637_v63, %v12902_v39  ;;  %v11639_v42 = vpop.eup %11638 }
 0x5a2   :  { %v12948_v50 = vadd.f32 %v1676_v22, %v1675_v49 }
 0x5a4   :  { %11640 = vtanh.f32 %v12948_v50 }
 0x5ae   :  { %v11641_v55 = vpop.eup %11640 }
 0x5af   :  { %v12951_v62 = vmul.f32 %v11641_v55, %v11639_v42 }
 0x5b1   :  { %1818 = vmatmul.mubr.f32.vlgmr.msra.gmra.mrb[10].mxu0 %v12951_v62  ;;  %1889 = vmatmul.mubr.f32.vlgmr.msra.gmra.mrb[10].mxu1 %v12951_v62 }
 0x5b2   :  { %9417 = vmatpush1.bf16.msra.mxu0 %v12757_v36  ;;  %9449 = vmatpush1.bf16.msra.mxu1 %v12760_v21 }
 0x5b3   :  { %9419 = vmatprep.subr.bf16.mxu0 %v12765_v31  ;;  %9451 = vmatprep.subr.bf16.mxu1 %v12767_v45 }
 0x5b4   :  { %2060 = vmatprep.mubr.f32.mxu0 %v12245_v1  ;;  %2131 = vmatprep.mubr.f32.mxu1 %v12245_v1 }
 0x5b6   :  { %9421 = vmatpush1.bf16.msra.mxu0 %v12769_v46  ;;  %9453 = vmatpush1.bf16.msra.mxu1 %v12772_v52 }
 0x5b7   :  { %9423 = vmatprep.subr.bf16.mxu0 %v12823_v4  ;;  %9455 = vmatprep.subr.bf16.mxu1 %v12825_v26 }
 0x5ba   :  { %9425 = vmatpush1.bf16.msra.mxu0 %v12827_v30  ;;  %9457 = vmatpush1.bf16.msra.mxu1 %v12830_v24 }
 0x5bb   :  { %9427 = vmatprep.subr.bf16.mxu0 %v12835_v38  ;;  %9459 = vmatprep.subr.bf16.mxu1 %v12837_v43 }
 0x5be   :  { %9429 = vmatpush1.bf16.msra.mxu0 %v12839_v48  ;;  %9461 = vmatpush1.bf16.msra.mxu1 %v12842_v59 }
 0x5bf   :  { %9431 = vmatprep.subr.bf16.mxu0 %v12847_v9  ;;  %9463 = vmatprep.subr.bf16.mxu1 %v12849_v25 }
 0x5c2   :  { %9433 = vmatpush1.bf16.msra.mxu0 %v12851_v29  ;;  %9465 = vmatpush1.bf16.msra.mxu1 %v12854_v44 }
 0x5c3   :  { %9435 = vmatprep.subr.bf16.mxu0 %v12858_v61  ;;  %9467 = vmatprep.subr.bf16.mxu1 %v12861_v58 }
 0x5c6   :  { %9437 = vmatpush1.bf16.msra.mxu0 %v12863_v60  ;;  %9469 = vmatpush1.bf16.msra.mxu1 %v12866_v23 }
 0x5c7   :  { %9439 = vmatprep.subr.bf16.mxu0 %v12869_v28  ;;  %9471 = vmatprep.subr.bf16.mxu1 %v12871_v32 }
 0x5ca   :  { %9441 = vmatpush1.bf16.msra.mxu0 %v12874_v51  ;;  %9473 = vmatpush1.bf16.msra.mxu1 %v12878_v6 }
 0x5cb   :  { %9443 = vmatprep.subr.bf16.mxu0 %v12880_v12  ;;  %9475 = vmatprep.subr.bf16.mxu1 %v12883_v40 }
 0x5ce   :  { %9445 = vmatpush1.bf16.msra.mxu0 %v12886_v2  ;;  %9477 = vmatpush1.bf16.msra.mxu1 %v12890_v7 }
 0x684   :  { %v1819_v36 = vpop.f32.mrb[10].mxu0  ;;  %v1890_v21 = vpop.f32.mrb[10].mxu1 }
 0x685   :  { %v11304_v31 = vadd.f32 %v1819_v36, %v12681_v15  ;;  %v1821_v45 = vpop.f32.mrb[11].mxu0  ;;  %v1892_v46 = vpop.f32.mrb[11].mxu1  ;;  %v11320_v34 = vadd.f32 %v1890_v21, %v12697_v41  ;;  %v2176_v21 = vld [vmem:[#allocation10 + $0x8] sm:$0xff] }
 0x686   :  { %v11305_v52 = vadd.f32 %v1821_v45, %v12684_v17  ;;  %v11321_v16 = vadd.f32 %v1892_v46, %v12691_v33  ;;  %v2182_v46 = vld [vmem:[#allocation10 + $0x38] sm:$0xff] }
 0x687   :  { %v8888_v39 = vmul.f32 -1.442695, %v11304_v31  ;;  %v2180_v31 = vld [vmem:[#allocation10 + $0x28] sm:$0xff] }
 0x688   :  { %v8889_v3 = vmul.f32 -1.442695, %v11305_v52  ;;  %v8890_v20 = vmul.f32 -1.442695, %v11321_v16  ;;  %v9478_v45 = vpack.c.bf16 %v2180_v31, %v2176_v21  ;;  %v2175_v52 = vld [vmem:[#allocation10] sm:$0xff] }
 0x689   :  { %11642 = vpow2.f32 %v8888_v39  ;;  %v2179_v39 = vld [vmem:[#allocation10 + $0x20] sm:$0xff] }
 0x68a   :  { %11644 = vpow2.f32 %v8889_v3  ;;  %v9480_v16 = vpack.c.bf16 %v2179_v39, %v2175_v52  ;;  %9479 = vmatprep.subr.bf16.mxu0 %v9478_v45  ;;  %v2419_v52 = vld [vmem:[#allocation5] sm:$0xff] }
 0x68b   :  { %11646 = vpow2.f32 %v8890_v20  ;;  %v2177_v20 = vld [vmem:[#allocation10 + $0x10] sm:$0xff]  ;;  %v2423_v39 = vld [vmem:[#allocation5 + $0x20] sm:$0xff] }
 0x68c   :  { %11648 = vtanh.f32 %v11320_v34  ;;  %v2181_v34 = vld [vmem:[#allocation10 + $0x30] sm:$0xff] }
 0x693   :  { %v11643_v47 = vpop.eup %11642 }
 0x694   :  { %v11645_v13 = vpop.eup %11644  ;;  %v1902_v53 = vadd.f32 1.0, %v11643_v47  ;;  %v9512_v47 = vpack.c.bf16 %v2181_v34, %v2177_v20  ;;  %v2428_v20 = vld [vmem:[#allocation5 + $0x48] sm:$0xff] }
 0x695   :  { %v1908_v35 = vadd.f32 1.0, %v11645_v13  ;;  %v11647_v57 = vpop.eup %11646  ;;  %v2184_v13 = vld [vmem:[#allocation10 + $0x48] sm:$0xff] }
 0x696   :  { %11650 = vrcp.f32 %v1902_v53  ;;  %v11649_v54 = vpop.eup %11648  ;;  %v1915_v22 = vadd.f32 1.0, %v11647_v57  ;;  %v2188_v53 = vld [vmem:[#allocation10 + $0x68] sm:$0xff] }
 0x697   :  { %11652 = vrcp.f32 %v1908_v35  ;;  %v2186_v35 = vld [vmem:[#allocation10 + $0x58] sm:$0xff]  ;;  %v9482_v57 = vpack.c.bf16 %v2188_v53, %v2184_v13  ;;  %v2432_v34 = vld [vmem:[#allocation5 + $0x68] sm:$0xff] }
 0x698   :  { %11654 = vrcp.f32 %v1915_v22  ;;  %v2434_v13 = vld [vmem:[#allocation5 + $0x78] sm:$0xff] }
 0x6a0   :  { %v11651_v10 = vpop.eup %11650 }
 0x6a1   :  { %v11653_v8 = vpop.eup %11652  ;;  %v1919_v63 = vmul.f32 %v11651_v10, %v11649_v54  ;;  %v2190_v54 = vld [vmem:[#allocation10 + $0x78] sm:$0xff]  ;;  %v2183_v10 = vld [vmem:[#allocation10 + $0x40] sm:$0xff] }
 0x6a2   :  { %v1918_v5 = vmul.f32 %v11653_v8, %v12948_v50  ;;  %v11655_v42 = vpop.eup %11654  ;;  %v2178_v50 = vld [vmem:[#allocation10 + $0x18] sm:$0xff]  ;;  %v2187_v8 = vld [vmem:[#allocation10 + $0x60] sm:$0xff] }
 0x6a3   :  { %v9510_v3 = vpack.c.bf16 %v2182_v46, %v2178_v50  ;;  %v9484_v22 = vpack.c.bf16 %v2187_v8, %v2183_v10  ;;  %v2427_v10 = vld [vmem:[#allocation5 + $0x40] sm:$0xff] }
 0x6a4   :  { %v12992_v49 = vadd.f32 %v1919_v63, %v1918_v5  ;;  %v9514_v63 = vpack.c.bf16 %v2190_v54, %v2186_v35  ;;  %v2185_v5 = vld [vmem:[#allocation10 + $0x50] sm:$0xff]  ;;  %v2431_v8 = vld [vmem:[#allocation5 + $0x60] sm:$0xff] }
 0x6a5   :  { %9511 = vmatprep.subr.bf16.mxu1 %v9510_v3  ;;  %v2421_v3 = vld [vmem:[#allocation5 + $0x10] sm:$0xff] }
 0x6a6   :  { %11656 = vtanh.f32 %v12992_v49 }
 0x6b0   :  { %v11657_v55 = vpop.eup %11656 }
 0x6b1   :  { %v12995_v36 = vmul.f32 %v11657_v55, %v11655_v42  ;;  %v2189_v42 = vld [vmem:[#allocation10 + $0x70] sm:$0xff] }
 0x6b2   :  { %v9516_v55 = vpack.c.bf16 %v2189_v42, %v2185_v5  ;;  %v2429_v5 = vld [vmem:[#allocation5 + $0x50] sm:$0xff] }
 0x6b3   :  { %2061 = vmatmul.mubr.f32.vlgmr.msra.gmra.mrb[12].mxu0 %v12995_v36  ;;  %2132 = vmatmul.mubr.f32.vlgmr.msra.gmra.mrb[12].mxu1 %v12995_v36  ;;  %v2433_v42 = vld [vmem:[#allocation5 + $0x70] sm:$0xff] }
 0x6b4   :  { %2303 = vmatprep.mubr.f32.mxu0 %v12245_v1  ;;  %2374 = vmatprep.mubr.f32.mxu1 %v12245_v1 }
 0x6b5   :  { %9481 = vmatpush1.bf16.msra.mxu0 %v9480_v16  ;;  %9513 = vmatpush1.bf16.msra.mxu1 %v9512_v47  ;;  %v2425_v16 = vld [vmem:[#allocation5 + $0x30] sm:$0xff]  ;;  %v2430_v47 = vld [vmem:[#allocation5 + $0x58] sm:$0xff] }
 0x6b6   :  { %9483 = vmatprep.subr.bf16.mxu0 %v9482_v57  ;;  %9515 = vmatprep.subr.bf16.mxu1 %v9514_v63  ;;  %v9544_v57 = vpack.c.bf16 %v2423_v39, %v2419_v52  ;;  %v9576_v54 = vpack.c.bf16 %v2425_v16, %v2421_v3  ;;  %v9546_v63 = vpack.c.bf16 %v2432_v34, %v2428_v20  ;;  %v2451_v39 = vld [vmem:[#allocation5 + $0x100] sm:$0xff]  ;;  %v2453_v34 = vld [vmem:[#allocation5 + $0x110] sm:$0xff] }
 0x6b7   :  { %v2455_v3 = vld [vmem:[#allocation5 + $0x120] sm:$0xff] }
 0x6b9   :  { %9485 = vmatpush1.bf16.msra.mxu0 %v9484_v22  ;;  %9517 = vmatpush1.bf16.msra.mxu1 %v9516_v55  ;;  %v9578_v22 = vpack.c.bf16 %v2434_v13, %v2430_v47  ;;  %v2436_v55 = vld [vmem:[#allocation5 + $0x88] sm:$0xff]  ;;  %v2457_v47 = vld [vmem:[#allocation5 + $0x130] sm:$0xff] }
 0x6ba   :  { %9487 = vmatprep.subr.bf16.mxu0 %v12823_v4  ;;  %9519 = vmatprep.subr.bf16.mxu1 %v12825_v26  ;;  %v2420_v4 = vld [vmem:[#allocation5 + $0x8] sm:$0xff] }
 0x6bb   :  { %v2424_v26 = vld [vmem:[#allocation5 + $0x28] sm:$0xff] }
 0x6bc   :  { %v2460_v13 = vld [vmem:[#allocation5 + $0x148] sm:$0xff] }
 0x6bd   :  { %9489 = vmatpush1.bf16.msra.mxu0 %v12827_v30  ;;  %9521 = vmatpush1.bf16.msra.mxu1 %v12830_v24  ;;  %v2422_v30 = vld [vmem:[#allocation5 + $0x18] sm:$0xff] }
 0x6be   :  { %9491 = vmatprep.subr.bf16.mxu0 %v12835_v38  ;;  %9523 = vmatprep.subr.bf16.mxu1 %v12837_v43  ;;  %v2426_v24 = vld [vmem:[#allocation5 + $0x38] sm:$0xff]  ;;  %v9542_v38 = vpack.c.bf16 %v2424_v26, %v2420_v4  ;;  %v2440_v4 = vld [vmem:[#allocation5 + $0xa8] sm:$0xff] }
 0x6bf   :  { %v9574_v43 = vpack.c.bf16 %v2426_v24, %v2422_v30  ;;  %v2438_v26 = vld [vmem:[#allocation5 + $0x98] sm:$0xff]  ;;  %v9548_v24 = vpack.c.bf16 %v2431_v8, %v2427_v10  ;;  %v9592_v10 = vpack.c.bf16 %v2457_v47, %v2453_v34  ;;  %v2459_v8 = vld [vmem:[#allocation5 + $0x140] sm:$0xff] }
 0x6c0   :  { %v2442_v30 = vld [vmem:[#allocation5 + $0xb8] sm:$0xff] }
 0x6c1   :  { %9493 = vmatpush1.bf16.msra.mxu0 %v12839_v48  ;;  %9525 = vmatpush1.bf16.msra.mxu1 %v12842_v59  ;;  %v2778_v34 = vld [vmem:[#allocation12 + $0x58] sm:$0xff] }
 0x6c2   :  { %9495 = vmatprep.subr.bf16.mxu0 %v12847_v9  ;;  %9527 = vmatprep.subr.bf16.mxu1 %v12849_v25 }
 0x6c5   :  { %9497 = vmatpush1.bf16.msra.mxu0 %v12851_v29  ;;  %9529 = vmatpush1.bf16.msra.mxu1 %v12854_v44 }
 0x6c6   :  { %9499 = vmatprep.subr.bf16.mxu0 %v12858_v61  ;;  %9531 = vmatprep.subr.bf16.mxu1 %v12861_v58 }
 0x6c9   :  { %9501 = vmatpush1.bf16.msra.mxu0 %v12863_v60  ;;  %9533 = vmatpush1.bf16.msra.mxu1 %v12866_v23 }
 0x6ca   :  { %9503 = vmatprep.subr.bf16.mxu0 %v12869_v28  ;;  %9535 = vmatprep.subr.bf16.mxu1 %v12871_v32 }
 0x6cd   :  { %9505 = vmatpush1.bf16.msra.mxu0 %v12874_v51  ;;  %9537 = vmatpush1.bf16.msra.mxu1 %v12878_v6 }
 0x6ce   :  { %9507 = vmatprep.subr.bf16.mxu0 %v12880_v12  ;;  %9539 = vmatprep.subr.bf16.mxu1 %v12883_v40 }
 0x6d1   :  { %9509 = vmatpush1.bf16.msra.mxu0 %v12886_v2  ;;  %9541 = vmatpush1.bf16.msra.mxu1 %v12890_v7 }
 0x6d2   :  { %9543 = vmatprep.subr.bf16.mxu0 %v9542_v38  ;;  %9575 = vmatprep.subr.bf16.mxu1 %v9574_v43  ;;  %v9580_v38 = vpack.c.bf16 %v2433_v42, %v2429_v5  ;;  %v2435_v43 = vld [vmem:[#allocation5 + $0x80] sm:$0xff]  ;;  %v2461_v42 = vld [vmem:[#allocation5 + $0x150] sm:$0xff] }
 0x786   :  { %v2062_v48 = vpop.f32.mrb[12].mxu0  ;;  %v2133_v59 = vpop.f32.mrb[12].mxu1 }
 0x787   :  { %v11306_v9 = vadd.f32 %v2062_v48, %v12681_v15  ;;  %v2064_v25 = vpop.f32.mrb[13].mxu0  ;;  %v2135_v29 = vpop.f32.mrb[13].mxu1  ;;  %v11322_v28 = vadd.f32 %v2133_v59, %v12697_v41  ;;  %v2439_v48 = vld [vmem:[#allocation5 + $0xa0] sm:$0xff]  ;;  %v9550_v59 = vpack.c.bf16 %v2440_v4, %v2436_v55  ;;  %v2465_v55 = vld [vmem:[#allocation5 + $0x170] sm:$0xff]  ;;  %v2468_v4 = vld [vmem:[#allocation5 + $0x188] sm:$0xff] }
 0x788   :  { %v11307_v44 = vadd.f32 %v2064_v25, %v12684_v17  ;;  %v11323_v60 = vadd.f32 %v2135_v29, %v12691_v33  ;;  %v2437_v25 = vld [vmem:[#allocation5 + $0x90] sm:$0xff] }
 0x789   :  { %v8891_v61 = vmul.f32 -1.442695, %v11306_v9  ;;  %v9582_v9 = vpack.c.bf16 %v2442_v30, %v2438_v26  ;;  %v2441_v29 = vld [vmem:[#allocation5 + $0xb0] sm:$0xff]  ;;  %v2472_v26 = vld [vmem:[#allocation5 + $0x1a8] sm:$0xff]  ;;  %v2470_v30 = vld [vmem:[#allocation5 + $0x198] sm:$0xff] }
 0x78a   :  { %v8892_v58 = vmul.f32 -1.442695, %v11307_v44  ;;  %v8893_v23 = vmul.f32 -1.442695, %v11323_v60  ;;  %v2444_v44 = vld [vmem:[#allocation5 + $0xc8] sm:$0xff]  ;;  %v2450_v60 = vld [vmem:[#allocation5 + $0xf8] sm:$0xff] }
 0x78b   :  { %11658 = vpow2.f32 %v8891_v61  ;;  %v2448_v61 = vld [vmem:[#allocation5 + $0xe8] sm:$0xff] }
 0x78c   :  { %11660 = vpow2.f32 %v8892_v58  ;;  %v2446_v58 = vld [vmem:[#allocation5 + $0xd8] sm:$0xff] }
 0x78d   :  { %11662 = vpow2.f32 %v8893_v23  ;;  %v9552_v23 = vpack.c.bf16 %v2439_v48, %v2435_v43  ;;  %v9596_v43 = vpack.c.bf16 %v2465_v55, %v2461_v42  ;;  %v2467_v48 = vld [vmem:[#allocation5 + $0x180] sm:$0xff]  ;;  %v2786_v42 = vld [vmem:[#allocation12 + $0x98] sm:$0xff] }
 0x78e   :  { %11664 = vtanh.f32 %v11322_v28  ;;  %v9584_v28 = vpack.c.bf16 %v2441_v29, %v2437_v25  ;;  %v2469_v29 = vld [vmem:[#allocation5 + $0x190] sm:$0xff] }
 0x795   :  { %v11659_v32 = vpop.eup %11658 }
 0x796   :  { %v11661_v51 = vpop.eup %11660  ;;  %v2145_v6 = vadd.f32 1.0, %v11659_v32  ;;  %v2443_v32 = vld [vmem:[#allocation5 + $0xc0] sm:$0xff] }
 0x797   :  { %v2151_v12 = vadd.f32 1.0, %v11661_v51  ;;  %v11663_v40 = vpop.eup %11662  ;;  %v2447_v51 = vld [vmem:[#allocation5 + $0xe0] sm:$0xff] }
 0x798   :  { %11666 = vrcp.f32 %v2145_v6  ;;  %v11665_v2 = vpop.eup %11664  ;;  %v2158_v50 = vadd.f32 1.0, %v11663_v40  ;;  %v9554_v6 = vpack.c.bf16 %v2448_v61, %v2444_v44  ;;  %v2445_v40 = vld [vmem:[#allocation5 + $0xd0] sm:$0xff]  ;;  %v2476_v61 = vld [vmem:[#allocation5 + $0x1c8] sm:$0xff] }
 0x799   :  { %11668 = vrcp.f32 %v2151_v12  ;;  %v9586_v12 = vpack.c.bf16 %v2450_v60, %v2446_v58  ;;  %v2473_v44 = vld [vmem:[#allocation5 + $0x1b0] sm:$0xff]  ;;  %v2480_v58 = vld [vmem:[#allocation5 + $0x1e8] sm:$0xff]  ;;  %v2478_v60 = vld [vmem:[#allocation5 + $0x1d8] sm:$0xff] }
 0x79a   :  { %11670 = vrcp.f32 %v2158_v50  ;;  %v2458_v50 = vld [vmem:[#allocation5 + $0x138] sm:$0xff] }
 0x7a2   :  { %v11667_v7 = vpop.eup %11666 }
 0x7a3   :  { %v11669_v21 = vpop.eup %11668  ;;  %v2162_v31 = vmul.f32 %v11667_v7, %v11665_v2  ;;  %v2449_v2 = vld [vmem:[#allocation5 + $0xf0] sm:$0xff]  ;;  %v2452_v7 = vld [vmem:[#allocation5 + $0x108] sm:$0xff] }
 0x7a4   :  { %v2161_v45 = vmul.f32 %v11669_v21, %v12992_v49  ;;  %v11671_v53 = vpop.eup %11670  ;;  %v2456_v21 = vld [vmem:[#allocation5 + $0x128] sm:$0xff]  ;;  %v9588_v52 = vpack.c.bf16 %v2449_v2, %v2445_v40  ;;  %v2479_v40 = vld [vmem:[#allocation5 + $0x1e0] sm:$0xff]  ;;  %v2477_v2 = vld [vmem:[#allocation5 + $0x1d0] sm:$0xff] }
 0x7a5   :  { %v9558_v16 = vpack.c.bf16 %v2456_v21, %v2452_v7  ;;  %v2481_v7 = vld [vmem:[#allocation5 + $0x1f0] sm:$0xff] }
 0x7a6   :  { %v13030_v46 = vadd.f32 %v2162_v31, %v2161_v45  ;;  %v2454_v31 = vld [vmem:[#allocation5 + $0x118] sm:$0xff]  ;;  %v9556_v45 = vpack.c.bf16 %v2447_v51, %v2443_v32  ;;  %v9600_v32 = vpack.c.bf16 %v2473_v44, %v2469_v29  ;;  %v2475_v51 = vld [vmem:[#allocation5 + $0x1c0] sm:$0xff] }
 0x7a7   :  { %v9590_v20 = vpack.c.bf16 %v2458_v50, %v2454_v31  ;;  %v9572_v21 = vpack.c.bf16 %v2479_v40, %v2475_v51  ;;  %v9604_v31 = vpack.c.bf16 %v2481_v7, %v2477_v2  ;;  %v2767_v50 = vld [vmem:[#allocation12] sm:$0xff]  ;;  %v2794_v29 = vld [vmem:[#allocation12 + $0xd8] sm:$0xff]  ;;  %v2797_v51 = vld [vmem:[#allocation12 + $0xf0] sm:$0xff] }
 0x7a8   :  { %11672 = vtanh.f32 %v13030_v46  ;;  %v2804_v40 = vld [vmem:[#allocation12 + $0x128] sm:$0xff]  ;;  %v2802_v2 = vld [vmem:[#allocation12 + $0x118] sm:$0xff] }
 0x7a9   :  { %v2806_v7 = vld [vmem:[#allocation12 + $0x138] sm:$0xff] }
 0x7b2   :  { %v11673_v35 = vpop.eup %11672 }
 0x7b3   :  { %v13033_v49 = vmul.f32 %v11673_v35, %v11671_v53  ;;  %v2464_v53 = vld [vmem:[#allocation5 + $0x168] sm:$0xff]  ;;  %v2462_v35 = vld [vmem:[#allocation5 + $0x158] sm:$0xff] }
 0x7b5   :  { %2304 = vmatmul.mubr.f32.vlgmr.msra.gmra.mrb[14].mxu0 %v13033_v49  ;;  %2375 = vmatmul.mubr.f32.vlgmr.msra.gmra.mrb[14].mxu1 %v13033_v49 }
 0x7b6   :  { %9545 = vmatpush1.bf16.msra.mxu0 %v9544_v57  ;;  %9577 = vmatpush1.bf16.msra.mxu1 %v9576_v54  ;;  %v2466_v57 = vld [vmem:[#allocation5 + $0x178] sm:$0xff]  ;;  %v9560_v54 = vpack.c.bf16 %v2455_v3, %v2451_v39  ;;  %v2769_v39 = vld [vmem:[#allocation12 + $0x10] sm:$0xff] }
 0x7b7   :  { %9547 = vmatprep.subr.bf16.mxu0 %v9546_v63  ;;  %9579 = vmatprep.subr.bf16.mxu1 %v9578_v22  ;;  %v2463_v63 = vld [vmem:[#allocation5 + $0x160] sm:$0xff]  ;;  %v9562_v22 = vpack.c.bf16 %v2464_v53, %v2460_v13  ;;  %v9594_v5 = vpack.c.bf16 %v2466_v57, %v2462_v35  ;;  %v2773_v3 = vld [vmem:[#allocation12 + $0x30] sm:$0xff]  ;;  %v2782_v13 = vld [vmem:[#allocation12 + $0x78] sm:$0xff] }
 0x7b8   :  { %2569 = vmatprep.mubr.f32.mxu0 %v12245_v1  ;;  %2682 = vmatprep.mubr.f32.mxu1 %v12245_v1  ;;  %v2775_v53 = vld [vmem:[#allocation12 + $0x40] sm:$0xff]  ;;  %v13081_v57 = vpack.c.bf16 %v2782_v13, %v2778_v34  ;;  %v2814_v34 = vld [vmem:[#allocation12 + $0x178] sm:$0xff] }
 0x7b9   :  { %v2779_v35 = vld [vmem:[#allocation12 + $0x60] sm:$0xff] }
 0x7ba   :  { %9549 = vmatpush1.bf16.msra.mxu0 %v9548_v24  ;;  %9581 = vmatpush1.bf16.msra.mxu1 %v9580_v38  ;;  %v2474_v24 = vld [vmem:[#allocation5 + $0x1b8] sm:$0xff]  ;;  %v9564_v38 = vpack.c.bf16 %v2463_v63, %v2459_v8  ;;  %v2781_v8 = vld [vmem:[#allocation12 + $0x70] sm:$0xff]  ;;  %v2807_v13 = vld [vmem:[#allocation12 + $0x140] sm:$0xff] }
 0x7bb   :  { %9551 = vmatprep.subr.bf16.mxu0 %v9550_v59  ;;  %9583 = vmatprep.subr.bf16.mxu1 %v9582_v9  ;;  %v2471_v59 = vld [vmem:[#allocation5 + $0x1a0] sm:$0xff]  ;;  %v9566_v9 = vpack.c.bf16 %v2472_v26, %v2468_v4  ;;  %v9598_v25 = vpack.c.bf16 %v2474_v24, %v2470_v30  ;;  %v2790_v4 = vld [vmem:[#allocation12 + $0xb8] sm:$0xff] }
 0x7bc   :  { %v2783_v26 = vld [vmem:[#allocation12 + $0x80] sm:$0xff]  ;;  %v13093_v24 = vpack.c.bf16 %v2790_v4, %v2786_v42  ;;  %v2820_v42 = vld [vmem:[#allocation12 + $0x1a8] sm:$0xff]  ;;  %v2818_v4 = vld [vmem:[#allocation12 + $0x198] sm:$0xff] }
 0x7bd   :  { %v2787_v30 = vld [vmem:[#allocation12 + $0xa0] sm:$0xff] }
 0x7be   :  { %9553 = vmatpush1.bf16.msra.mxu0 %v9552_v23  ;;  %9585 = vmatpush1.bf16.msra.mxu1 %v9584_v28  ;;  %v2482_v23 = vld [vmem:[#allocation5 + $0x1f8] sm:$0xff]  ;;  %v9568_v28 = vpack.c.bf16 %v2471_v59, %v2467_v48  ;;  %v2789_v48 = vld [vmem:[#allocation12 + $0xb0] sm:$0xff] }
 0x7bf   :  { %9555 = vmatprep.subr.bf16.mxu0 %v9554_v6  ;;  %9587 = vmatprep.subr.bf16.mxu1 %v9586_v12  ;;  %v9570_v6 = vpack.c.bf16 %v2480_v58, %v2476_v61  ;;  %v9602_v12 = vpack.c.bf16 %v2482_v23, %v2478_v60  ;;  %v2798_v61 = vld [vmem:[#allocation12 + $0xf8] sm:$0xff]  ;;  %v2791_v58 = vld [vmem:[#allocation12 + $0xc0] sm:$0xff] }
 0x7c0   :  { %v2795_v60 = vld [vmem:[#allocation12 + $0xe0] sm:$0xff]  ;;  %v13105_v23 = vpack.c.bf16 %v2798_v61, %v2794_v29  ;;  %v2817_v29 = vld [vmem:[#allocation12 + $0x190] sm:$0xff] }
 0x7c1   :  { %v2821_v61 = vld [vmem:[#allocation12 + $0x1b0] sm:$0xff] }
 0x7c2   :  { %9557 = vmatpush1.bf16.msra.mxu0 %v9556_v45  ;;  %9589 = vmatpush1.bf16.msra.mxu1 %v9588_v52 }
 0x7c3   :  { %9559 = vmatprep.subr.bf16.mxu0 %v9558_v16  ;;  %9591 = vmatprep.subr.bf16.mxu1 %v9590_v20  ;;  %v2776_v16 = vld [vmem:[#allocation12 + $0x48] sm:$0xff] }
 0x7c4   :  { %v2780_v20 = vld [vmem:[#allocation12 + $0x68] sm:$0xff] }
 0x7c5   :  { %v13079_v47 = vpack.c.bf16 %v2780_v20, %v2776_v16  ;;  %v2810_v20 = vld [vmem:[#allocation12 + $0x158] sm:$0xff] }
 0x7c6   :  { %9561 = vmatpush1.bf16.msra.mxu0 %v9560_v54  ;;  %9593 = vmatpush1.bf16.msra.mxu1 %v9592_v10  ;;  %v13083_v54 = vpack.c.bf16 %v2779_v35, %v2775_v53  ;;  %v2777_v10 = vld [vmem:[#allocation12 + $0x50] sm:$0xff]  ;;  %v13127_v53 = vpack.c.bf16 %v2814_v34, %v2810_v20  ;;  %v2811_v35 = vld [vmem:[#allocation12 + $0x160] sm:$0xff] }
 0x7c7   :  { %9563 = vmatprep.subr.bf16.mxu0 %v9562_v22  ;;  %9595 = vmatprep.subr.bf16.mxu1 %v9594_v5  ;;  %v13086_v63 = vpack.c.bf16 %v2781_v8, %v2777_v10  ;;  %v2784_v22 = vld [vmem:[#allocation12 + $0x88] sm:$0xff]  ;;  %v2809_v10 = vld [vmem:[#allocation12 + $0x150] sm:$0xff] }
 0x7c8   :  { %v2788_v5 = vld [vmem:[#allocation12 + $0xa8] sm:$0xff]  ;;  %v2813_v8 = vld [vmem:[#allocation12 + $0x170] sm:$0xff] }
 0x7c9   :  { %v13091_v55 = vpack.c.bf16 %v2788_v5, %v2784_v22  ;;  %v13130_v22 = vpack.c.bf16 %v2811_v35, %v2807_v13  ;;  %v2816_v5 = vld [vmem:[#allocation12 + $0x188] sm:$0xff] }
 0x7ca   :  { %9565 = vmatpush1.bf16.msra.mxu0 %v9564_v38  ;;  %9597 = vmatpush1.bf16.msra.mxu1 %v9596_v43  ;;  %v13095_v38 = vpack.c.bf16 %v2787_v30, %v2783_v26  ;;  %v2785_v43 = vld [vmem:[#allocation12 + $0x90] sm:$0xff]  ;;  %v13134_v26 = vpack.c.bf16 %v2813_v8, %v2809_v10  ;;  %v13136_v30 = vpack.c.bf16 %v2820_v42, %v2816_v5 }
 0x7cb   :  { %9567 = vmatprep.subr.bf16.mxu0 %v9566_v9  ;;  %9599 = vmatprep.subr.bf16.mxu1 %v9598_v25  ;;  %v13098_v59 = vpack.c.bf16 %v2789_v48, %v2785_v43  ;;  %v2792_v9 = vld [vmem:[#allocation12 + $0xc8] sm:$0xff]  ;;  %v2822_v43 = vld [vmem:[#allocation12 + $0x1b8] sm:$0xff]  ;;  %v2815_v48 = vld [vmem:[#allocation12 + $0x180] sm:$0xff] }
 0x7cc   :  { %v2796_v25 = vld [vmem:[#allocation12 + $0xe8] sm:$0xff] }
 0x7cd   :  { %v13103_v44 = vpack.c.bf16 %v2796_v25, %v2792_v9  ;;  %v2819_v9 = vld [vmem:[#allocation12 + $0x1a0] sm:$0xff]  ;;  %v13139_v25 = vpack.c.bf16 %v2822_v43, %v2818_v4 }
 0x7ce   :  { %9569 = vmatpush1.bf16.msra.mxu0 %v9568_v28  ;;  %9601 = vmatpush1.bf16.msra.mxu1 %v9600_v32  ;;  %v13107_v28 = vpack.c.bf16 %v2795_v60, %v2791_v58  ;;  %v2793_v32 = vld [vmem:[#allocation12 + $0xd0] sm:$0xff]  ;;  %v13142_v58 = vpack.c.bf16 %v2819_v9, %v2815_v48  ;;  %v13146_v60 = vpack.c.bf16 %v2821_v61, %v2817_v29 }
 0x7cf   :  { %9571 = vmatprep.subr.bf16.mxu0 %v9570_v6  ;;  %9603 = vmatprep.subr.bf16.mxu1 %v9602_v12  ;;  %v2800_v6 = vld [vmem:[#allocation12 + $0x108] sm:$0xff]  ;;  %v13110_v12 = vpack.c.bf16 %v2797_v51, %v2793_v32 }
 0x7d0   :  { %v2824_v32 = vld [vmem:[#allocation12 + $0x1c8] sm:$0xff] }
 0x7d1   :  { %v2828_v51 = vld [vmem:[#allocation12 + $0x1e8] sm:$0xff] }
 0x7d2   :  { %9573 = vmatpush1.bf16.msra.mxu0 %v9572_v21  ;;  %9605 = vmatpush1.bf16.msra.mxu1 %v9604_v31  ;;  %v13114_v21 = vpack.c.bf16 %v2804_v40, %v2800_v6  ;;  %v13116_v31 = vpack.c.bf16 %v2806_v7, %v2802_v2  ;;  %v2826_v6 = vld [vmem:[#allocation12 + $0x1d8] sm:$0xff]  ;;  %v13151_v40 = vpack.c.bf16 %v2828_v51, %v2824_v32  ;;  %v2823_v7 = vld [vmem:[#allocation12 + $0x1c0] sm:$0xff] }
 0x7d3   :  { %v2830_v2 = vld [vmem:[#allocation12 + $0x1f8] sm:$0xff] }
 0x7d5   :  { %2570 = vmatmul.mubr.f32.vlgmr.msra.gmra.mrb[16].mxu0 %v12703_v19  ;;  %2683 = vmatmul.mubr.f32.vlgmr.msra.gmra.mrb[16].mxu1 %v12703_v19  ;;  %v2768_v19 = vld [vmem:[#allocation12 + $0x8] sm:$0xff] }
 0x7d6   :  { %2575 = vmatprep.mubr.f32.mxu0 %v12245_v1  ;;  %2688 = vmatprep.mubr.f32.mxu1 %v12245_v1 }
 0x7d9   :  { %2576 = vmatmul.mubr.f32.gmra.mrb[18].mxu0 %v12747_v0  ;;  %2689 = vmatmul.mubr.f32.gmra.mrb[18].mxu1 %v12747_v0  ;;  %v2772_v0 = vld [vmem:[#allocation12 + $0x28] sm:$0xff] }
 0x7da   :  { %2581 = vmatprep.mubr.f32.mxu0 %v12245_v1  ;;  %2694 = vmatprep.mubr.f32.mxu1 %v12245_v1 }
 0x7dd   :  { %2582 = vmatmul.mubr.f32.gmra.mrb[20].mxu0 %v12811_v56  ;;  %2695 = vmatmul.mubr.f32.gmra.mrb[20].mxu1 %v12811_v56  ;;  %v2770_v56 = vld [vmem:[#allocation12 + $0x18] sm:$0xff] }
 0x7de   :  { %2587 = vmatprep.mubr.f32.mxu0 %v12245_v1  ;;  %2700 = vmatprep.mubr.f32.mxu1 %v12245_v1 }
 0x7e1   :  { %2588 = vmatmul.mubr.f32.gmra.mrb[22].mxu0 %v12905_v27  ;;  %2701 = vmatmul.mubr.f32.gmra.mrb[22].mxu1 %v12905_v27  ;;  %v13067_v27 = vpack.c.bf16 %v2772_v0, %v2768_v19  ;;  %v2799_v19 = vld [vmem:[#allocation12 + $0x100] sm:$0xff] }
 0x7e2   :  { %2593 = vmatprep.mubr.f32.mxu0 %v12245_v1  ;;  %2706 = vmatprep.mubr.f32.mxu1 %v12245_v1  ;;  %v2803_v0 = vld [vmem:[#allocation12 + $0x120] sm:$0xff] }
 0x7e3   :  { %9607 = vmatprep.subr.bf16.mxu0 %v13067_v27 }
 0x7e5   :  { %2594 = vmatmul.mubr.f32.gmra.mrb[24].mxu0 %v12951_v62  ;;  %2707 = vmatmul.mubr.f32.gmra.mrb[24].mxu1 %v12951_v62  ;;  %v2774_v62 = vld [vmem:[#allocation12 + $0x38] sm:$0xff] }
 0x7e6   :  { %2599 = vmatprep.mubr.f32.mxu0 %v12245_v1  ;;  %2712 = vmatprep.mubr.f32.mxu1 %v12245_v1  ;;  %v13069_v45 = vpack.c.bf16 %v2774_v62, %v2770_v56  ;;  %v2801_v56 = vld [vmem:[#allocation12 + $0x110] sm:$0xff]  ;;  %v13119_v62 = vpack.c.bf16 %v2803_v0, %v2799_v19  ;;  %v2827_v19 = vld [vmem:[#allocation12 + $0x1e0] sm:$0xff]  ;;  %v13153_v0 = vpack.c.bf16 %v2830_v2, %v2826_v6 }
 0x7e8   :  { %9639 = vmatprep.subr.bf16.mxu1 %v13069_v45 }
 0x7e9   :  { %2600 = vmatmul.mubr.f32.gmra.mrb[26].mxu0 %v12995_v36  ;;  %2713 = vmatmul.mubr.f32.gmra.mrb[26].mxu1 %v12995_v36  ;;  %v2771_v36 = vld [vmem:[#allocation12 + $0x20] sm:$0xff] }
 0x7ea   :  { %2605 = vmatprep.mubr.f32.mxu0 %v12245_v1  ;;  %2718 = vmatprep.mubr.f32.mxu1 %v12245_v1  ;;  %v13071_v52 = vpack.c.bf16 %v2771_v36, %v2767_v50  ;;  %v2805_v50 = vld [vmem:[#allocation12 + $0x130] sm:$0xff]  ;;  %v2808_v36 = vld [vmem:[#allocation12 + $0x148] sm:$0xff] }
 0x7ec   :  { %9609 = vmatpush1.bf16.msra.mxu0 %v13071_v52 }
 0x7ed   :  { %2606 = vmatmul.mubr.f32.gmra.mrb[28].mxu0 %v13033_v49  ;;  %2719 = vmatmul.mubr.f32.gmra.mrb[28].mxu1 %v13033_v49  ;;  %v13074_v49 = vpack.c.bf16 %v2773_v3, %v2769_v39  ;;  %v2812_v39 = vld [vmem:[#allocation12 + $0x168] sm:$0xff]  ;;  %v13123_v3 = vpack.c.bf16 %v2805_v50, %v2801_v56  ;;  %v13155_v56 = vpack.c.bf16 %v2827_v19, %v2823_v7  ;;  %v2825_v50 = vld [vmem:[#allocation12 + $0x1d0] sm:$0xff] }
 0x7ee   :  { %2611 = vmatprep.mubr.f32.mxu0 %v12245_v1  ;;  %2724 = vmatprep.mubr.f32.mxu1 %v12245_v1  ;;  %v13125_v16 = vpack.c.bf16 %v2812_v39, %v2808_v36  ;;  %v2829_v36 = vld [vmem:[#allocation12 + $0x1f0] sm:$0xff] }
 0x7ef   :  { %9641 = vmatpush1.bf16.msra.mxu1 %v13074_v49  ;;  %9611 = vmatprep.subr.bf16.mxu0 %v13079_v47  ;;  %v13158_v39 = vpack.c.bf16 %v2829_v36, %v2825_v50 }
 0x7f0   :  { %9643 = vmatprep.subr.bf16.mxu1 %v13081_v57  ;;  %9613 = vmatpush1.bf16.msra.mxu0 %v13083_v54 }
 0x7f1   :  { %9615 = vmatprep.subr.bf16.mxu0 %v13091_v55 }
 0x7f3   :  { %9645 = vmatpush1.bf16.msra.mxu1 %v13086_v63 }
 0x7f4   :  { %9647 = vmatprep.subr.bf16.mxu1 %v13093_v24  ;;  %9617 = vmatpush1.bf16.msra.mxu0 %v13095_v38 }
 0x7f5   :  { %9619 = vmatprep.subr.bf16.mxu0 %v13103_v44 }
 0x7f7   :  { %9649 = vmatpush1.bf16.msra.mxu1 %v13098_v59 }
 0x7f8   :  { %9651 = vmatprep.subr.bf16.mxu1 %v13105_v23  ;;  %9621 = vmatpush1.bf16.msra.mxu0 %v13107_v28 }
 0x7f9   :  { %9623 = vmatprep.subr.bf16.mxu0 %v13114_v21 }
 0x7fb   :  { %9653 = vmatpush1.bf16.msra.mxu1 %v13110_v12 }
 0x7fc   :  { %9655 = vmatprep.subr.bf16.mxu1 %v13116_v31  ;;  %9625 = vmatpush1.bf16.msra.mxu0 %v13119_v62 }
 0x7fd   :  { %9627 = vmatprep.subr.bf16.mxu0 %v13125_v16 }
 0x7ff   :  { %9657 = vmatpush1.bf16.msra.mxu1 %v13123_v3 }
 0x800   :  { %9659 = vmatprep.subr.bf16.mxu1 %v13127_v53  ;;  %9629 = vmatpush1.bf16.msra.mxu0 %v13130_v22 }
 0x801   :  { %9631 = vmatprep.subr.bf16.mxu0 %v13136_v30 }
 0x803   :  { %9661 = vmatpush1.bf16.msra.mxu1 %v13134_v26 }
 0x804   :  { %9663 = vmatprep.subr.bf16.mxu1 %v13139_v25  ;;  %9633 = vmatpush1.bf16.msra.mxu0 %v13142_v58 }
 0x805   :  { %9635 = vmatprep.subr.bf16.mxu0 %v13151_v40 }
 0x807   :  { %9665 = vmatpush1.bf16.msra.mxu1 %v13146_v60 }
 0x808   :  { %9667 = vmatprep.subr.bf16.mxu1 %v13153_v0  ;;  %9637 = vmatpush1.bf16.msra.mxu0 %v13155_v56 }
 0x809   :  { %9671 = vmatprep.subr.bf16.mxu0 %v13067_v27 }
 0x80b   :  { %9669 = vmatpush1.bf16.msra.mxu1 %v13158_v39 }
 0x80c   :  { %9703 = vmatprep.subr.bf16.mxu1 %v13069_v45 }
 0x888   :  { %v2305_v20 = vpop.f32.mrb[14].mxu0  ;;  %v2376_v34 = vpop.f32.mrb[14].mxu1 }
 0x889   :  { %v11308_v13 = vadd.f32 %v2305_v20, %v12681_v15  ;;  %v2307_v35 = vpop.f32.mrb[15].mxu0  ;;  %v2378_v10 = vpop.f32.mrb[15].mxu1  ;;  %v11324_v48 = vadd.f32 %v2376_v34, %v12697_v41 }
 0x88a   :  { %v11309_v8 = vadd.f32 %v2307_v35, %v12684_v17  ;;  %v11325_v4 = vadd.f32 %v2378_v10, %v12691_v33 }
 0x88b   :  { %v8894_v5 = vmul.f32 -1.442695, %v11308_v13 }
 0x88c   :  { %v8895_v42 = vmul.f32 -1.442695, %v11309_v8  ;;  %v8896_v43 = vmul.f32 -1.442695, %v11325_v4 }
 0x88d   :  { %11674 = vpow2.f32 %v8894_v5 }
 0x88e   :  { %11676 = vpow2.f32 %v8895_v42 }
 0x88f   :  { %11678 = vpow2.f32 %v8896_v43 }
 0x890   :  { %11680 = vtanh.f32 %v11324_v48 }
 0x897   :  { %v11675_v9 = vpop.eup %11674 }
 0x898   :  { %v11677_v29 = vpop.eup %11676  ;;  %v2388_v61 = vadd.f32 1.0, %v11675_v9 }
 0x899   :  { %v2394_v32 = vadd.f32 1.0, %v11677_v29  ;;  %v11679_v15 = vpop.eup %11678 }
 0x89a   :  { %11682 = vrcp.f32 %v2388_v61  ;;  %v11681_v51 = vpop.eup %11680  ;;  %v2401_v7 = vadd.f32 1.0, %v11679_v15 }
 0x89b   :  { %11684 = vrcp.f32 %v2394_v32 }
 0x89c   :  { %11686 = vrcp.f32 %v2401_v7 }
 0x8a4   :  { %v11683_v17 = vpop.eup %11682 }
 0x8a5   :  { %v11685_v6 = vpop.eup %11684  ;;  %v2405_v2 = vmul.f32 %v11683_v17, %v11681_v51 }
 0x8a6   :  { %v2404_v19 = vmul.f32 %v11685_v6, %v13030_v46  ;;  %v11687_v41 = vpop.eup %11686  ;;  %v2483_v46 = vld [vmem:[%s14617_s10] sm:$0xf] }
 0x8a7   :  { %v13212_v20 = vrot.slane %v2483_v46, %v12673_v11  ;;  %v13215_v34 = vrot.slane %v2483_v46, %v12678_v14  ;;  %v13220_v48 = vrot.slane %v2483_v46, %v12686_v18  ;;  %v13224_v29 = vrot.slane %v2483_v46, %v12693_v37 }
 0x8a8   :  { %v2406_v33 = vadd.f32 %v2405_v2, %v2404_v19 }
 0x8aa   :  { %11688 = vtanh.f32 %v2406_v33 }
 0x8b4   :  { %v11689_v50 = vpop.eup %11688 }
 0x8b5   :  { %v2408_v36 = vmul.f32 %v11689_v50, %v11687_v41 }
 0x8b7   :  { %2612 = vmatmul.mubr.f32.gmra.mrb[30].mxu0 %v2408_v36  ;;  %2725 = vmatmul.mubr.f32.gmra.mrb[30].mxu1 %v2408_v36 }
 0x8b8   :  { %2895 = vmatprep.mubr.f32.mxu0 %v12245_v1  ;;  %2966 = vmatprep.mubr.f32.mxu1 %v12245_v1 }
 0x8bb   :  { %2896 = vmatmul.mubr.f32.vlgmr.msra.gmra.mrb[16].mxu0 %v12245_v1  ;;  %2967 = vmatmul.mubr.f32.vlgmr.msra.gmra.mrb[16].mxu1 %v12245_v1 }
 0x8bc   :  { %9673 = vmatpush1.bf16.msra.mxu0 %v13071_v52  ;;  %9705 = vmatpush1.bf16.msra.mxu1 %v13074_v49 }
 0x8bd   :  { %9675 = vmatprep.subr.bf16.mxu0 %v13079_v47  ;;  %9707 = vmatprep.subr.bf16.mxu1 %v13081_v57 }
 0x8be   :  { %3134 = vmatprep.mubr.f32.mxu0 %v12245_v1  ;;  %3205 = vmatprep.mubr.f32.mxu1 %v12245_v1 }
 0x8c0   :  { %9677 = vmatpush1.bf16.msra.mxu0 %v13083_v54  ;;  %9709 = vmatpush1.bf16.msra.mxu1 %v13086_v63 }
 0x8c1   :  { %9679 = vmatprep.subr.bf16.mxu0 %v13091_v55  ;;  %9711 = vmatprep.subr.bf16.mxu1 %v13093_v24 }
 0x8c4   :  { %9681 = vmatpush1.bf16.msra.mxu0 %v13095_v38  ;;  %9713 = vmatpush1.bf16.msra.mxu1 %v13098_v59 }
 0x8c5   :  { %9683 = vmatprep.subr.bf16.mxu0 %v13103_v44  ;;  %9715 = vmatprep.subr.bf16.mxu1 %v13105_v23 }
 0x8c8   :  { %9685 = vmatpush1.bf16.msra.mxu0 %v13107_v28  ;;  %9717 = vmatpush1.bf16.msra.mxu1 %v13110_v12 }
 0x8c9   :  { %9687 = vmatprep.subr.bf16.mxu0 %v13114_v21  ;;  %9719 = vmatprep.subr.bf16.mxu1 %v13116_v31 }
 0x8cc   :  { %9689 = vmatpush1.bf16.msra.mxu0 %v13119_v62  ;;  %9721 = vmatpush1.bf16.msra.mxu1 %v13123_v3 }
 0x8cd   :  { %9691 = vmatprep.subr.bf16.mxu0 %v13125_v16  ;;  %9723 = vmatprep.subr.bf16.mxu1 %v13127_v53 }
 0x8d0   :  { %9693 = vmatpush1.bf16.msra.mxu0 %v13130_v22  ;;  %9725 = vmatpush1.bf16.msra.mxu1 %v13134_v26 }
 0x8d1   :  { %9695 = vmatprep.subr.bf16.mxu0 %v13136_v30  ;;  %9727 = vmatprep.subr.bf16.mxu1 %v13139_v25 }
 0x8d4   :  { %9697 = vmatpush1.bf16.msra.mxu0 %v13142_v58  ;;  %9729 = vmatpush1.bf16.msra.mxu1 %v13146_v60 }
 0x8d5   :  { %9699 = vmatprep.subr.bf16.mxu0 %v13151_v40  ;;  %9731 = vmatprep.subr.bf16.mxu1 %v13153_v0 }
 0x8d8   :  { %9701 = vmatpush1.bf16.msra.mxu0 %v13155_v56  ;;  %9733 = vmatpush1.bf16.msra.mxu1 %v13158_v39 }
 0x8d9   :  { %9735 = vmatprep.subr.bf16.mxu0 %v13067_v27  ;;  %9767 = vmatprep.subr.bf16.mxu1 %v13069_v45 }
 0x98e   :  { %v2897_v13 = vpop.f32.mrb[16].mxu0  ;;  %v2968_v35 = vpop.f32.mrb[16].mxu1 }
 0x98f   :  { %v11326_v10 = vadd.f32 %v2897_v13, %v13212_v20  ;;  %v2899_v8 = vpop.f32.mrb[17].mxu0  ;;  %v2970_v5 = vpop.f32.mrb[17].mxu1  ;;  %v11342_v32 = vadd.f32 %v2968_v35, %v13224_v29 }
 0x990   :  { %v11327_v42 = vadd.f32 %v2899_v8, %v13215_v34  ;;  %v11343_v9 = vadd.f32 %v2970_v5, %v13220_v48 }
 0x991   :  { %v8897_v4 = vmul.f32 -1.442695, %v11326_v10 }
 0x992   :  { %v8898_v43 = vmul.f32 -1.442695, %v11327_v42  ;;  %v8899_v61 = vmul.f32 -1.442695, %v11343_v9 }
 0x993   :  { %11690 = vpow2.f32 %v8897_v4 }
 0x994   :  { %11692 = vpow2.f32 %v8898_v43 }
 0x995   :  { %11694 = vpow2.f32 %v8899_v61 }
 0x996   :  { %11696 = vtanh.f32 %v11342_v32 }
 0x99d   :  { %v11691_v15 = vpop.eup %11690 }
 0x99e   :  { %v11693_v51 = vpop.eup %11692  ;;  %v2980_v17 = vadd.f32 1.0, %v11691_v15 }
 0x99f   :  { %v2986_v6 = vadd.f32 1.0, %v11693_v51  ;;  %v11695_v2 = vpop.eup %11694 }
 0x9a0   :  { %11698 = vrcp.f32 %v2980_v17  ;;  %v11697_v7 = vpop.eup %11696  ;;  %v2993_v50 = vadd.f32 1.0, %v11695_v2 }
 0x9a1   :  { %11700 = vrcp.f32 %v2986_v6 }
 0x9a2   :  { %11702 = vrcp.f32 %v2993_v50 }
 0x9aa   :  { %v11699_v19 = vpop.eup %11698 }
 0x9ab   :  { %v11701_v33 = vpop.eup %11700  ;;  %v2997_v41 = vmul.f32 %v11699_v19, %v11697_v7 }
 0x9ac   :  { %v2996_v36 = vmul.f32 0.0, %v11701_v33  ;;  %v11703_v13 = vpop.eup %11702 }
 0x9ae   :  { %v13227_v46 = vadd.f32 %v2997_v41, %v2996_v36 }
 0x9b0   :  { %11704 = vtanh.f32 %v13227_v46 }
 0x9ba   :  { %v11705_v35 = vpop.eup %11704 }
 0x9bb   :  { %v13230_v10 = vmul.f32 %v11705_v35, %v11703_v13 }
 0x9bd   :  { %3135 = vmatmul.mubr.f32.vlgmr.msra.gmra.mrb[18].mxu0 %v13230_v10  ;;  %3206 = vmatmul.mubr.f32.vlgmr.msra.gmra.mrb[18].mxu1 %v13230_v10 }
 0x9be   :  { %9737 = vmatpush1.bf16.msra.mxu0 %v13071_v52  ;;  %9769 = vmatpush1.bf16.msra.mxu1 %v13074_v49 }
 0x9bf   :  { %9739 = vmatprep.subr.bf16.mxu0 %v13079_v47  ;;  %9771 = vmatprep.subr.bf16.mxu1 %v13081_v57 }
 0x9c0   :  { %3373 = vmatprep.mubr.f32.mxu0 %v12245_v1  ;;  %3444 = vmatprep.mubr.f32.mxu1 %v12245_v1 }
 0x9c2   :  { %9741 = vmatpush1.bf16.msra.mxu0 %v13083_v54  ;;  %9773 = vmatpush1.bf16.msra.mxu1 %v13086_v63 }
 0x9c3   :  { %9743 = vmatprep.subr.bf16.mxu0 %v13091_v55  ;;  %9775 = vmatprep.subr.bf16.mxu1 %v13093_v24 }
 0x9c6   :  { %9745 = vmatpush1.bf16.msra.mxu0 %v13095_v38  ;;  %9777 = vmatpush1.bf16.msra.mxu1 %v13098_v59 }
 0x9c7   :  { %9747 = vmatprep.subr.bf16.mxu0 %v13103_v44  ;;  %9779 = vmatprep.subr.bf16.mxu1 %v13105_v23 }
 0x9ca   :  { %9749 = vmatpush1.bf16.msra.mxu0 %v13107_v28  ;;  %9781 = vmatpush1.bf16.msra.mxu1 %v13110_v12 }
 0x9cb   :  { %9751 = vmatprep.subr.bf16.mxu0 %v13114_v21  ;;  %9783 = vmatprep.subr.bf16.mxu1 %v13116_v31 }
 0x9ce   :  { %9753 = vmatpush1.bf16.msra.mxu0 %v13119_v62  ;;  %9785 = vmatpush1.bf16.msra.mxu1 %v13123_v3 }
 0x9cf   :  { %9755 = vmatprep.subr.bf16.mxu0 %v13125_v16  ;;  %9787 = vmatprep.subr.bf16.mxu1 %v13127_v53 }
 0x9d2   :  { %9757 = vmatpush1.bf16.msra.mxu0 %v13130_v22  ;;  %9789 = vmatpush1.bf16.msra.mxu1 %v13134_v26 }
 0x9d3   :  { %9759 = vmatprep.subr.bf16.mxu0 %v13136_v30  ;;  %9791 = vmatprep.subr.bf16.mxu1 %v13139_v25 }
 0x9d6   :  { %9761 = vmatpush1.bf16.msra.mxu0 %v13142_v58  ;;  %9793 = vmatpush1.bf16.msra.mxu1 %v13146_v60 }
 0x9d7   :  { %9763 = vmatprep.subr.bf16.mxu0 %v13151_v40  ;;  %9795 = vmatprep.subr.bf16.mxu1 %v13153_v0 }
 0x9da   :  { %9765 = vmatpush1.bf16.msra.mxu0 %v13155_v56  ;;  %9797 = vmatpush1.bf16.msra.mxu1 %v13158_v39 }
 0x9db   :  { %9799 = vmatprep.subr.bf16.mxu0 %v13067_v27  ;;  %9831 = vmatprep.subr.bf16.mxu1 %v13069_v45 }
 0xa90   :  { %v3136_v8 = vpop.f32.mrb[18].mxu0  ;;  %v3207_v5 = vpop.f32.mrb[18].mxu1 }
 0xa91   :  { %v11328_v42 = vadd.f32 %v3136_v8, %v13212_v20  ;;  %v3138_v4 = vpop.f32.mrb[19].mxu0  ;;  %v3209_v43 = vpop.f32.mrb[19].mxu1  ;;  %v11344_v17 = vadd.f32 %v3207_v5, %v13224_v29 }
 0xa92   :  { %v11329_v9 = vadd.f32 %v3138_v4, %v13215_v34  ;;  %v11345_v15 = vadd.f32 %v3209_v43, %v13220_v48  ;;  %v3723_v4 = vld [vmem:[#allocation12] sm:$0xff] }
 0xa93   :  { %v8900_v61 = vmul.f32 -1.442695, %v11328_v42  ;;  %v3727_v43 = vld [vmem:[#allocation12 + $0x20] sm:$0xff] }
 0xa94   :  { %v8901_v32 = vmul.f32 -1.442695, %v11329_v9  ;;  %v8902_v51 = vmul.f32 -1.442695, %v11345_v15  ;;  %v3729_v15 = vld [vmem:[#allocation12 + $0x30] sm:$0xff] }
 0xa95   :  { %11706 = vpow2.f32 %v8900_v61  ;;  %v13330_v61 = vpack.c.bf16 %v3727_v43, %v3723_v4 }
 0xa96   :  { %11708 = vpow2.f32 %v8901_v32  ;;  %v3725_v32 = vld [vmem:[#allocation12 + $0x10] sm:$0xff] }
 0xa97   :  { %11710 = vpow2.f32 %v8902_v51  ;;  %v13333_v51 = vpack.c.bf16 %v3729_v15, %v3725_v32  ;;  %v3757_v32 = vld [vmem:[#allocation12 + $0x110] sm:$0xff] }
 0xa98   :  { %11712 = vtanh.f32 %v11344_v17  ;;  %v3732_v17 = vld [vmem:[#allocation12 + $0x48] sm:$0xff]  ;;  %v3761_v15 = vld [vmem:[#allocation12 + $0x130] sm:$0xff] }
 0xa9f   :  { %v11707_v27 = vpop.eup %11706 }
 0xaa0   :  { %v11709_v6 = vpop.eup %11708  ;;  %v3219_v45 = vadd.f32 1.0, %v11707_v27  ;;  %v3736_v27 = vld [vmem:[#allocation12 + $0x68] sm:$0xff] }
 0xaa1   :  { %v3225_v2 = vadd.f32 1.0, %v11709_v6  ;;  %v11711_v7 = vpop.eup %11710  ;;  %v3734_v6 = vld [vmem:[#allocation12 + $0x58] sm:$0xff] }
 0xaa2   :  { %11714 = vrcp.f32 %v3219_v45  ;;  %v11713_v19 = vpop.eup %11712  ;;  %v3232_v36 = vadd.f32 1.0, %v11711_v7  ;;  %v13338_v45 = vpack.c.bf16 %v3736_v27, %v3732_v17  ;;  %v3731_v7 = vld [vmem:[#allocation12 + $0x40] sm:$0xff]  ;;  %v13381_v17 = vpack.c.bf16 %v3761_v15, %v3757_v32  ;;  %v3764_v27 = vld [vmem:[#allocation12 + $0x148] sm:$0xff] }
 0xaa3   :  { %11716 = vrcp.f32 %v3225_v2  ;;  %v3738_v2 = vld [vmem:[#allocation12 + $0x78] sm:$0xff]  ;;  %v3779_v32 = vld [vmem:[#allocation12 + $0x1c0] sm:$0xff] }
 0xaa4   :  { %11718 = vrcp.f32 %v3232_v36  ;;  %v3737_v36 = vld [vmem:[#allocation12 + $0x70] sm:$0xff] }
 0xaac   :  { %v11715_v33 = vpop.eup %11714 }
 0xaad   :  { %v11717_v41 = vpop.eup %11716  ;;  %v3236_v50 = vmul.f32 %v11715_v33, %v11713_v19  ;;  %v3735_v19 = vld [vmem:[#allocation12 + $0x60] sm:$0xff]  ;;  %v13340_v33 = vpack.c.bf16 %v3738_v2, %v3734_v6  ;;  %v3768_v6 = vld [vmem:[#allocation12 + $0x168] sm:$0xff]  ;;  %v3766_v2 = vld [vmem:[#allocation12 + $0x158] sm:$0xff] }
 0xaae   :  { %v3235_v13 = vmul.f32 %v11717_v41, %v13227_v46  ;;  %v11719_v8 = vpop.eup %11718  ;;  %v3730_v46 = vld [vmem:[#allocation12 + $0x38] sm:$0xff]  ;;  %v13342_v41 = vpack.c.bf16 %v3735_v19, %v3731_v7  ;;  %v13385_v7 = vpack.c.bf16 %v3768_v6, %v3764_v27  ;;  %v3783_v27 = vld [vmem:[#allocation12 + $0x1e0] sm:$0xff]  ;;  %v3781_v6 = vld [vmem:[#allocation12 + $0x1d0] sm:$0xff] }
 0xaaf   :  { %v3770_v19 = vld [vmem:[#allocation12 + $0x178] sm:$0xff] }
 0xab0   :  { %v13273_v35 = vadd.f32 %v3236_v50, %v3235_v13  ;;  %v3733_v50 = vld [vmem:[#allocation12 + $0x50] sm:$0xff] }
 0xab1   :  { %v13345_v13 = vpack.c.bf16 %v3737_v36, %v3733_v50  ;;  %v3763_v50 = vld [vmem:[#allocation12 + $0x140] sm:$0xff] }
 0xab2   :  { %11720 = vtanh.f32 %v13273_v35  ;;  %v3767_v36 = vld [vmem:[#allocation12 + $0x160] sm:$0xff] }
 0xabc   :  { %v11721_v5 = vpop.eup %11720 }
 0xabd   :  { %v13276_v42 = vmul.f32 %v11721_v5, %v11719_v8  ;;  %v3744_v8 = vld [vmem:[#allocation12 + $0xa8] sm:$0xff]  ;;  %v3742_v5 = vld [vmem:[#allocation12 + $0x98] sm:$0xff] }
 0xabf   :  { %3374 = vmatmul.mubr.f32.vlgmr.msra.gmra.mrb[20].mxu0 %v13276_v42  ;;  %3445 = vmatmul.mubr.f32.vlgmr.msra.gmra.mrb[20].mxu1 %v13276_v42 }
 0xac0   :  { %9801 = vmatpush1.bf16.msra.mxu0 %v13071_v52  ;;  %9833 = vmatpush1.bf16.msra.mxu1 %v13074_v49 }
 0xac1   :  { %9803 = vmatprep.subr.bf16.mxu0 %v13079_v47  ;;  %9835 = vmatprep.subr.bf16.mxu1 %v13081_v57 }
 0xac2   :  { %3612 = vmatprep.mubr.f32.mxu0 %v12245_v1  ;;  %3683 = vmatprep.mubr.f32.mxu1 %v12245_v1 }
 0xac4   :  { %9805 = vmatpush1.bf16.msra.mxu0 %v13083_v54  ;;  %9837 = vmatpush1.bf16.msra.mxu1 %v13086_v63 }
 0xac5   :  { %9807 = vmatprep.subr.bf16.mxu0 %v13091_v55  ;;  %9839 = vmatprep.subr.bf16.mxu1 %v13093_v24 }
 0xac8   :  { %9809 = vmatpush1.bf16.msra.mxu0 %v13095_v38  ;;  %9841 = vmatpush1.bf16.msra.mxu1 %v13098_v59 }
 0xac9   :  { %9811 = vmatprep.subr.bf16.mxu0 %v13103_v44  ;;  %9843 = vmatprep.subr.bf16.mxu1 %v13105_v23 }
 0xacc   :  { %9813 = vmatpush1.bf16.msra.mxu0 %v13107_v28  ;;  %9845 = vmatpush1.bf16.msra.mxu1 %v13110_v12 }
 0xacd   :  { %9815 = vmatprep.subr.bf16.mxu0 %v13114_v21  ;;  %9847 = vmatprep.subr.bf16.mxu1 %v13116_v31 }
 0xad0   :  { %9817 = vmatpush1.bf16.msra.mxu0 %v13119_v62  ;;  %9849 = vmatpush1.bf16.msra.mxu1 %v13123_v3 }
 0xad1   :  { %9819 = vmatprep.subr.bf16.mxu0 %v13125_v16  ;;  %9851 = vmatprep.subr.bf16.mxu1 %v13127_v53 }
 0xad4   :  { %9821 = vmatpush1.bf16.msra.mxu0 %v13130_v22  ;;  %9853 = vmatpush1.bf16.msra.mxu1 %v13134_v26 }
 0xad5   :  { %9823 = vmatprep.subr.bf16.mxu0 %v13136_v30  ;;  %9855 = vmatprep.subr.bf16.mxu1 %v13139_v25 }
 0xad8   :  { %9825 = vmatpush1.bf16.msra.mxu0 %v13142_v58  ;;  %9857 = vmatpush1.bf16.msra.mxu1 %v13146_v60 }
 0xad9   :  { %9827 = vmatprep.subr.bf16.mxu0 %v13151_v40  ;;  %9859 = vmatprep.subr.bf16.mxu1 %v13153_v0  ;;  %v3724_v40 = vld [vmem:[#allocation12 + $0x8] sm:$0xff] }
 0xada   :  { %v3728_v0 = vld [vmem:[#allocation12 + $0x28] sm:$0xff] }
 0xadc   :  { %9829 = vmatpush1.bf16.msra.mxu0 %v13155_v56  ;;  %9861 = vmatpush1.bf16.msra.mxu1 %v13158_v39  ;;  %v3726_v56 = vld [vmem:[#allocation12 + $0x18] sm:$0xff]  ;;  %v13326_v39 = vpack.c.bf16 %v3728_v0, %v3724_v40 }
 0xadd   :  { %v13328_v9 = vpack.c.bf16 %v3730_v46, %v3726_v56  ;;  %v3762_v0 = vld [vmem:[#allocation12 + $0x138] sm:$0xff]  ;;  %v3755_v56 = vld [vmem:[#allocation12 + $0x100] sm:$0xff] }
 0xade   :  { %9863 = vmatprep.subr.bf16.mxu0 %v13326_v39  ;;  %v3759_v46 = vld [vmem:[#allocation12 + $0x120] sm:$0xff] }
 0xadf   :  { %9895 = vmatprep.subr.bf16.mxu1 %v13328_v9  ;;  %v13378_v43 = vpack.c.bf16 %v3759_v46, %v3755_v56  ;;  %v3782_v56 = vld [vmem:[#allocation12 + $0x1d8] sm:$0xff] }
 0xae0   :  { %v3786_v46 = vld [vmem:[#allocation12 + $0x1f8] sm:$0xff] }
 0xae1   :  { %v13410_v15 = vpack.c.bf16 %v3786_v46, %v3782_v56 }
 0xb92   :  { %v3375_v52 = vpop.f32.mrb[20].mxu0  ;;  %v3446_v49 = vpop.f32.mrb[20].mxu1 }
 0xb93   :  { %v11330_v47 = vadd.f32 %v3375_v52, %v13212_v20  ;;  %v3377_v57 = vpop.f32.mrb[21].mxu0  ;;  %v3448_v54 = vpop.f32.mrb[21].mxu1  ;;  %v11346_v44 = vadd.f32 %v3446_v49, %v13224_v29  ;;  %v3746_v49 = vld [vmem:[#allocation12 + $0xb8] sm:$0xff] }
 0xb94   :  { %v11331_v63 = vadd.f32 %v3377_v57, %v13215_v34  ;;  %v11347_v38 = vadd.f32 %v3448_v54, %v13220_v48  ;;  %v3743_v57 = vld [vmem:[#allocation12 + $0xa0] sm:$0xff]  ;;  %v13352_v54 = vpack.c.bf16 %v3746_v49, %v3742_v5  ;;  %v3765_v5 = vld [vmem:[#allocation12 + $0x150] sm:$0xff] }
 0xb95   :  { %v8903_v55 = vmul.f32 -1.442695, %v11330_v47  ;;  %v3739_v47 = vld [vmem:[#allocation12 + $0x80] sm:$0xff]  ;;  %v3769_v49 = vld [vmem:[#allocation12 + $0x170] sm:$0xff] }
 0xb96   :  { %v8904_v24 = vmul.f32 -1.442695, %v11331_v63  ;;  %v8905_v59 = vmul.f32 -1.442695, %v11347_v38  ;;  %v13354_v63 = vpack.c.bf16 %v3743_v57, %v3739_v47  ;;  %v3772_v47 = vld [vmem:[#allocation12 + $0x188] sm:$0xff]  ;;  %v13393_v57 = vpack.c.bf16 %v3769_v49, %v3765_v5 }
 0xb97   :  { %11722 = vpow2.f32 %v8903_v55  ;;  %v3741_v55 = vld [vmem:[#allocation12 + $0x90] sm:$0xff] }
 0xb98   :  { %11724 = vpow2.f32 %v8904_v24  ;;  %v3745_v24 = vld [vmem:[#allocation12 + $0xb0] sm:$0xff] }
 0xb99   :  { %11726 = vpow2.f32 %v8905_v59  ;;  %v13357_v38 = vpack.c.bf16 %v3745_v24, %v3741_v55  ;;  %v3748_v59 = vld [vmem:[#allocation12 + $0xc8] sm:$0xff]  ;;  %v3774_v24 = vld [vmem:[#allocation12 + $0x198] sm:$0xff] }
 0xb9a   :  { %11728 = vtanh.f32 %v11346_v44  ;;  %v3752_v44 = vld [vmem:[#allocation12 + $0xe8] sm:$0xff] }
 0xb9b   :  { %v3776_v55 = vld [vmem:[#allocation12 + $0x1a8] sm:$0xff] }
 0xba1   :  { %v11723_v23 = vpop.eup %11722 }
 0xba2   :  { %v11725_v28 = vpop.eup %11724  ;;  %v3458_v12 = vadd.f32 1.0, %v11723_v23  ;;  %v3750_v23 = vld [vmem:[#allocation12 + $0xd8] sm:$0xff] }
 0xba3   :  { %v3464_v21 = vadd.f32 1.0, %v11725_v28  ;;  %v11727_v31 = vpop.eup %11726  ;;  %v13362_v28 = vpack.c.bf16 %v3752_v44, %v3748_v59  ;;  %v3778_v59 = vld [vmem:[#allocation12 + $0x1b8] sm:$0xff]  ;;  %v13396_v44 = vpack.c.bf16 %v3776_v55, %v3772_v47 }
 0xba4   :  { %11730 = vrcp.f32 %v3458_v12  ;;  %v11729_v62 = vpop.eup %11728  ;;  %v3471_v22 = vadd.f32 1.0, %v11727_v31  ;;  %v3754_v12 = vld [vmem:[#allocation12 + $0xf8] sm:$0xff]  ;;  %v3751_v31 = vld [vmem:[#allocation12 + $0xe0] sm:$0xff] }
 0xba5   :  { %11732 = vrcp.f32 %v3464_v21  ;;  %v3747_v21 = vld [vmem:[#allocation12 + $0xc0] sm:$0xff] }
 0xba6   :  { %11734 = vrcp.f32 %v3471_v22 }
 0xbae   :  { %v11731_v3 = vpop.eup %11730 }
 0xbaf   :  { %v11733_v16 = vpop.eup %11732  ;;  %v3475_v53 = vmul.f32 %v11731_v3, %v11729_v62  ;;  %v13364_v62 = vpack.c.bf16 %v3754_v12, %v3750_v23  ;;  %v13366_v3 = vpack.c.bf16 %v3751_v31, %v3747_v21  ;;  %v13398_v23 = vpack.c.bf16 %v3778_v59, %v3774_v24  ;;  %v3771_v12 = vld [vmem:[#allocation12 + $0x180] sm:$0xff]  ;;  %v3773_v31 = vld [vmem:[#allocation12 + $0x190] sm:$0xff] }
 0xbb0   :  { %v3474_v26 = vmul.f32 %v11733_v16, %v13273_v35  ;;  %v11735_v25 = vpop.eup %11734  ;;  %v3740_v35 = vld [vmem:[#allocation12 + $0x88] sm:$0xff]  ;;  %v3749_v16 = vld [vmem:[#allocation12 + $0xd0] sm:$0xff]  ;;  %v3775_v21 = vld [vmem:[#allocation12 + $0x1a0] sm:$0xff] }
 0xbb1   :  { %v13350_v52 = vpack.c.bf16 %v3744_v8, %v3740_v35  ;;  %v13388_v35 = vpack.c.bf16 %v3770_v19, %v3766_v2  ;;  %v13390_v8 = vpack.c.bf16 %v3767_v36, %v3763_v50  ;;  %v3785_v2 = vld [vmem:[#allocation12 + $0x1f0] sm:$0xff]  ;;  %v13413_v19 = vpack.c.bf16 %v3783_v27, %v3779_v32 }
 0xbb2   :  { %v13317_v30 = vadd.f32 %v3475_v53, %v3474_v26  ;;  %v3753_v53 = vld [vmem:[#allocation12 + $0xf0] sm:$0xff]  ;;  %v3756_v26 = vld [vmem:[#allocation12 + $0x108] sm:$0xff]  ;;  %v13417_v50 = vpack.c.bf16 %v3785_v2, %v3781_v6 }
 0xbb3   :  { %v13369_v22 = vpack.c.bf16 %v3753_v53, %v3749_v16  ;;  %v13401_v16 = vpack.c.bf16 %v3775_v21, %v3771_v12  ;;  %v3777_v53 = vld [vmem:[#allocation12 + $0x1b0] sm:$0xff] }
 0xbb4   :  { %11736 = vtanh.f32 %v13317_v30 }
 0xbbe   :  { %v11737_v58 = vpop.eup %11736 }
 0xbbf   :  { %v13320_v60 = vmul.f32 %v11737_v58, %v11735_v25  ;;  %v3760_v25 = vld [vmem:[#allocation12 + $0x128] sm:$0xff]  ;;  %v3758_v58 = vld [vmem:[#allocation12 + $0x118] sm:$0xff] }
 0xbc0   :  { %v13374_v40 = vpack.c.bf16 %v3760_v25, %v3756_v26  ;;  %v13376_v4 = vpack.c.bf16 %v3762_v0, %v3758_v58  ;;  %v3780_v26 = vld [vmem:[#allocation12 + $0x1c8] sm:$0xff]  ;;  %v13405_v58 = vpack.c.bf16 %v3777_v53, %v3773_v31 }
 0xbc1   :  { %3613 = vmatmul.mubr.f32.vlgmr.msra.gmra.mrb[22].mxu0 %v13320_v60  ;;  %3684 = vmatmul.mubr.f32.vlgmr.msra.gmra.mrb[22].mxu1 %v13320_v60  ;;  %v3784_v25 = vld [vmem:[#allocation12 + $0x1e8] sm:$0xff] }
 0xbc2   :  { %3851 = vmatprep.mubr.f32.mxu0 %v12245_v1  ;;  %3922 = vmatprep.mubr.f32.mxu1 %v12245_v1  ;;  %v13407_v0 = vpack.c.bf16 %v3784_v25, %v3780_v26 }
 0xbc3   :  { %9865 = vmatpush1.bf16.msra.mxu0 %v13330_v61  ;;  %9897 = vmatpush1.bf16.msra.mxu1 %v13333_v51 }
 0xbc4   :  { %9867 = vmatprep.subr.bf16.mxu0 %v13338_v45  ;;  %9899 = vmatprep.subr.bf16.mxu1 %v13340_v33 }
 0xbc7   :  { %9869 = vmatpush1.bf16.msra.mxu0 %v13342_v41  ;;  %9901 = vmatpush1.bf16.msra.mxu1 %v13345_v13 }
 0xbc8   :  { %9871 = vmatprep.subr.bf16.mxu0 %v13350_v52  ;;  %9903 = vmatprep.subr.bf16.mxu1 %v13352_v54 }
 0xbcb   :  { %9873 = vmatpush1.bf16.msra.mxu0 %v13354_v63  ;;  %9905 = vmatpush1.bf16.msra.mxu1 %v13357_v38 }
 0xbcc   :  { %9875 = vmatprep.subr.bf16.mxu0 %v13362_v28  ;;  %9907 = vmatprep.subr.bf16.mxu1 %v13364_v62 }
 0xbcf   :  { %9877 = vmatpush1.bf16.msra.mxu0 %v13366_v3  ;;  %9909 = vmatpush1.bf16.msra.mxu1 %v13369_v22 }
 0xbd0   :  { %9879 = vmatprep.subr.bf16.mxu0 %v13374_v40  ;;  %9911 = vmatprep.subr.bf16.mxu1 %v13376_v4 }
 0xbd3   :  { %9881 = vmatpush1.bf16.msra.mxu0 %v13378_v43  ;;  %9913 = vmatpush1.bf16.msra.mxu1 %v13381_v17 }
 0xbd4   :  { %9883 = vmatprep.subr.bf16.mxu0 %v13385_v7  ;;  %9915 = vmatprep.subr.bf16.mxu1 %v13388_v35 }
 0xbd7   :  { %9885 = vmatpush1.bf16.msra.mxu0 %v13390_v8  ;;  %9917 = vmatpush1.bf16.msra.mxu1 %v13393_v57 }
 0xbd8   :  { %9887 = vmatprep.subr.bf16.mxu0 %v13396_v44  ;;  %9919 = vmatprep.subr.bf16.mxu1 %v13398_v23 }
 0xbdb   :  { %9889 = vmatpush1.bf16.msra.mxu0 %v13401_v16  ;;  %9921 = vmatpush1.bf16.msra.mxu1 %v13405_v58 }
 0xbdc   :  { %9891 = vmatprep.subr.bf16.mxu0 %v13407_v0  ;;  %9923 = vmatprep.subr.bf16.mxu1 %v13410_v15 }
 0xbdf   :  { %9893 = vmatpush1.bf16.msra.mxu0 %v13413_v19  ;;  %9925 = vmatpush1.bf16.msra.mxu1 %v13417_v50 }
 0xbe0   :  { %9927 = vmatprep.subr.bf16.mxu0 %v13326_v39  ;;  %9959 = vmatprep.subr.bf16.mxu1 %v13328_v9 }
 0xc94   :  { %v3614_v36 = vpop.f32.mrb[22].mxu0  ;;  %v3685_v5 = vpop.f32.mrb[22].mxu1 }
 0xc95   :  { %v11332_v49 = vadd.f32 %v3614_v36, %v13212_v20  ;;  %v3616_v47 = vpop.f32.mrb[23].mxu0  ;;  %v3687_v55 = vpop.f32.mrb[23].mxu1  ;;  %v11348_v53 = vadd.f32 %v3685_v5, %v13224_v29 }
 0xc96   :  { %v11333_v24 = vadd.f32 %v3616_v47, %v13215_v34  ;;  %v11349_v21 = vadd.f32 %v3687_v55, %v13220_v48 }
 0xc97   :  { %v8906_v59 = vmul.f32 -1.442695, %v11332_v49 }
 0xc98   :  { %v8907_v12 = vmul.f32 -1.442695, %v11333_v24  ;;  %v8908_v31 = vmul.f32 -1.442695, %v11349_v21 }
 0xc99   :  { %11738 = vpow2.f32 %v8906_v59 }
 0xc9a   :  { %11740 = vpow2.f32 %v8907_v12 }
 0xc9b   :  { %11742 = vpow2.f32 %v8908_v31 }
 0xc9c   :  { %11744 = vtanh.f32 %v11348_v53 }
 0xca3   :  { %v11739_v26 = vpop.eup %11738 }
 0xca4   :  { %v11741_v25 = vpop.eup %11740  ;;  %v3697_v56 = vadd.f32 1.0, %v11739_v26 }
 0xca5   :  { %v3703_v46 = vadd.f32 1.0, %v11741_v25  ;;  %v11743_v32 = vpop.eup %11742 }
 0xca6   :  { %11746 = vrcp.f32 %v3697_v56  ;;  %v11745_v27 = vpop.eup %11744  ;;  %v3710_v49 = vadd.f32 1.0, %v11743_v32 }
 0xca7   :  { %11748 = vrcp.f32 %v3703_v46 }
 0xca8   :  { %11750 = vrcp.f32 %v3710_v49 }
 0xcb0   :  { %v11747_v6 = vpop.eup %11746 }
 0xcb1   :  { %v11749_v2 = vpop.eup %11748  ;;  %v3714_v36 = vmul.f32 %v11747_v6, %v11745_v27 }
 0xcb2   :  { %v3713_v47 = vmul.f32 %v11749_v2, %v13317_v30  ;;  %v11751_v5 = vpop.eup %11750 }
 0xcb4   :  { %v13429_v55 = vadd.f32 %v3714_v36, %v3713_v47 }
 0xcb6   :  { %11752 = vtanh.f32 %v13429_v55 }
 0xcc0   :  { %v11753_v24 = vpop.eup %11752 }
 0xcc1   :  { %v13432_v59 = vmul.f32 %v11753_v24, %v11751_v5 }
 0xcc3   :  { %3852 = vmatmul.mubr.f32.vlgmr.msra.gmra.mrb[24].mxu0 %v13432_v59  ;;  %3923 = vmatmul.mubr.f32.vlgmr.msra.gmra.mrb[24].mxu1 %v13432_v59 }
 0xcc4   :  { %9929 = vmatpush1.bf16.msra.mxu0 %v13330_v61  ;;  %9961 = vmatpush1.bf16.msra.mxu1 %v13333_v51 }
 0xcc5   :  { %9931 = vmatprep.subr.bf16.mxu0 %v13338_v45  ;;  %9963 = vmatprep.subr.bf16.mxu1 %v13340_v33 }
 0xcc6   :  { %4090 = vmatprep.mubr.f32.mxu0 %v12245_v1  ;;  %4161 = vmatprep.mubr.f32.mxu1 %v12245_v1 }
 0xcc8   :  { %9933 = vmatpush1.bf16.msra.mxu0 %v13342_v41  ;;  %9965 = vmatpush1.bf16.msra.mxu1 %v13345_v13 }
 0xcc9   :  { %9935 = vmatprep.subr.bf16.mxu0 %v13350_v52  ;;  %9967 = vmatprep.subr.bf16.mxu1 %v13352_v54 }
 0xccc   :  { %9937 = vmatpush1.bf16.msra.mxu0 %v13354_v63  ;;  %9969 = vmatpush1.bf16.msra.mxu1 %v13357_v38 }
 0xccd   :  { %9939 = vmatprep.subr.bf16.mxu0 %v13362_v28  ;;  %9971 = vmatprep.subr.bf16.mxu1 %v13364_v62 }
 0xcd0   :  { %9941 = vmatpush1.bf16.msra.mxu0 %v13366_v3  ;;  %9973 = vmatpush1.bf16.msra.mxu1 %v13369_v22 }
 0xcd1   :  { %9943 = vmatprep.subr.bf16.mxu0 %v13374_v40  ;;  %9975 = vmatprep.subr.bf16.mxu1 %v13376_v4 }
 0xcd4   :  { %9945 = vmatpush1.bf16.msra.mxu0 %v13378_v43  ;;  %9977 = vmatpush1.bf16.msra.mxu1 %v13381_v17 }
 0xcd5   :  { %9947 = vmatprep.subr.bf16.mxu0 %v13385_v7  ;;  %9979 = vmatprep.subr.bf16.mxu1 %v13388_v35 }
 0xcd8   :  { %9949 = vmatpush1.bf16.msra.mxu0 %v13390_v8  ;;  %9981 = vmatpush1.bf16.msra.mxu1 %v13393_v57 }
 0xcd9   :  { %9951 = vmatprep.subr.bf16.mxu0 %v13396_v44  ;;  %9983 = vmatprep.subr.bf16.mxu1 %v13398_v23 }
 0xcdc   :  { %9953 = vmatpush1.bf16.msra.mxu0 %v13401_v16  ;;  %9985 = vmatpush1.bf16.msra.mxu1 %v13405_v58 }
 0xcdd   :  { %9955 = vmatprep.subr.bf16.mxu0 %v13407_v0  ;;  %9987 = vmatprep.subr.bf16.mxu1 %v13410_v15 }
 0xce0   :  { %9957 = vmatpush1.bf16.msra.mxu0 %v13413_v19  ;;  %9989 = vmatpush1.bf16.msra.mxu1 %v13417_v50 }
 0xce1   :  { %9991 = vmatprep.subr.bf16.mxu0 %v13326_v39  ;;  %10023 = vmatprep.subr.bf16.mxu1 %v13328_v9 }
 0xd96   :  { %v3853_v30 = vpop.f32.mrb[24].mxu0  ;;  %v3924_v12 = vpop.f32.mrb[24].mxu1 }
 0xd97   :  { %v11334_v21 = vadd.f32 %v3853_v30, %v13212_v20  ;;  %v3855_v31 = vpop.f32.mrb[25].mxu0  ;;  %v3926_v53 = vpop.f32.mrb[25].mxu1  ;;  %v11350_v27 = vadd.f32 %v3924_v12, %v13224_v29 }
 0xd98   :  { %v11335_v26 = vadd.f32 %v3855_v31, %v13215_v34  ;;  %v11351_v46 = vadd.f32 %v3926_v53, %v13220_v48 }
 0xd99   :  { %v8909_v25 = vmul.f32 -1.442695, %v11334_v21 }
 0xd9a   :  { %v8910_v56 = vmul.f32 -1.442695, %v11335_v26  ;;  %v8911_v32 = vmul.f32 -1.442695, %v11351_v46 }
 0xd9b   :  { %11754 = vpow2.f32 %v8909_v25 }
 0xd9c   :  { %11756 = vpow2.f32 %v8910_v56 }
 0xd9d   :  { %11758 = vpow2.f32 %v8911_v32 }
 0xd9e   :  { %11760 = vtanh.f32 %v11350_v27 }
 0xda5   :  { %v11755_v6 = vpop.eup %11754 }
 0xda6   :  { %v11757_v2 = vpop.eup %11756  ;;  %v3936_v36 = vadd.f32 1.0, %v11755_v6 }
 0xda7   :  { %v3942_v49 = vadd.f32 1.0, %v11757_v2  ;;  %v11759_v47 = vpop.eup %11758 }
 0xda8   :  { %11762 = vrcp.f32 %v3936_v36  ;;  %v11761_v5 = vpop.eup %11760  ;;  %v3949_v31 = vadd.f32 1.0, %v11759_v47 }
 0xda9   :  { %11764 = vrcp.f32 %v3942_v49 }
 0xdaa   :  { %11766 = vrcp.f32 %v3949_v31 }
 0xdb2   :  { %v11763_v24 = vpop.eup %11762 }
 0xdb3   :  { %v11765_v30 = vpop.eup %11764  ;;  %v3953_v21 = vmul.f32 %v11763_v24, %v11761_v5 }
 0xdb4   :  { %v3952_v26 = vmul.f32 %v11765_v30, %v13429_v55  ;;  %v11767_v12 = vpop.eup %11766 }
 0xdb6   :  { %v13475_v53 = vadd.f32 %v3953_v21, %v3952_v26 }
 0xdb8   :  { %11768 = vtanh.f32 %v13475_v53 }
 0xdc2   :  { %v11769_v25 = vpop.eup %11768 }
 0xdc3   :  { %v13478_v56 = vmul.f32 %v11769_v25, %v11767_v12 }
 0xdc5   :  { %4091 = vmatmul.mubr.f32.vlgmr.msra.gmra.mrb[26].mxu0 %v13478_v56  ;;  %4162 = vmatmul.mubr.f32.vlgmr.msra.gmra.mrb[26].mxu1 %v13478_v56 }
 0xdc6   :  { %9993 = vmatpush1.bf16.msra.mxu0 %v13330_v61  ;;  %10025 = vmatpush1.bf16.msra.mxu1 %v13333_v51 }
 0xdc7   :  { %9995 = vmatprep.subr.bf16.mxu0 %v13338_v45  ;;  %10027 = vmatprep.subr.bf16.mxu1 %v13340_v33 }
 0xdc8   :  { %4329 = vmatprep.mubr.f32.mxu0 %v12245_v1  ;;  %4400 = vmatprep.mubr.f32.mxu1 %v12245_v1 }
 0xdca   :  { %9997 = vmatpush1.bf16.msra.mxu0 %v13342_v41  ;;  %10029 = vmatpush1.bf16.msra.mxu1 %v13345_v13 }
 0xdcb   :  { %9999 = vmatprep.subr.bf16.mxu0 %v13350_v52  ;;  %10031 = vmatprep.subr.bf16.mxu1 %v13352_v54 }
 0xdce   :  { %10001 = vmatpush1.bf16.msra.mxu0 %v13354_v63  ;;  %10033 = vmatpush1.bf16.msra.mxu1 %v13357_v38 }
 0xdcf   :  { %10003 = vmatprep.subr.bf16.mxu0 %v13362_v28  ;;  %10035 = vmatprep.subr.bf16.mxu1 %v13364_v62 }
 0xdd2   :  { %10005 = vmatpush1.bf16.msra.mxu0 %v13366_v3  ;;  %10037 = vmatpush1.bf16.msra.mxu1 %v13369_v22 }
 0xdd3   :  { %10007 = vmatprep.subr.bf16.mxu0 %v13374_v40  ;;  %10039 = vmatprep.subr.bf16.mxu1 %v13376_v4 }
 0xdd6   :  { %10009 = vmatpush1.bf16.msra.mxu0 %v13378_v43  ;;  %10041 = vmatpush1.bf16.msra.mxu1 %v13381_v17 }
 0xdd7   :  { %10011 = vmatprep.subr.bf16.mxu0 %v13385_v7  ;;  %10043 = vmatprep.subr.bf16.mxu1 %v13388_v35 }
 0xdda   :  { %10013 = vmatpush1.bf16.msra.mxu0 %v13390_v8  ;;  %10045 = vmatpush1.bf16.msra.mxu1 %v13393_v57 }
 0xddb   :  { %10015 = vmatprep.subr.bf16.mxu0 %v13396_v44  ;;  %10047 = vmatprep.subr.bf16.mxu1 %v13398_v23 }
 0xdde   :  { %10017 = vmatpush1.bf16.msra.mxu0 %v13401_v16  ;;  %10049 = vmatpush1.bf16.msra.mxu1 %v13405_v58 }
 0xddf   :  { %10019 = vmatprep.subr.bf16.mxu0 %v13407_v0  ;;  %10051 = vmatprep.subr.bf16.mxu1 %v13410_v15 }
 0xde2   :  { %10021 = vmatpush1.bf16.msra.mxu0 %v13413_v19  ;;  %10053 = vmatpush1.bf16.msra.mxu1 %v13417_v50 }
 0xde3   :  { %10055 = vmatprep.subr.bf16.mxu0 %v13326_v39  ;;  %10087 = vmatprep.subr.bf16.mxu1 %v13328_v9 }
 0xe98   :  { %v4092_v55 = vpop.f32.mrb[26].mxu0  ;;  %v4163_v46 = vpop.f32.mrb[26].mxu1 }
 0xe99   :  { %v11336_v32 = vadd.f32 %v4092_v55, %v13212_v20  ;;  %v4094_v27 = vpop.f32.mrb[27].mxu0  ;;  %v4165_v6 = vpop.f32.mrb[27].mxu1  ;;  %v11352_v24 = vadd.f32 %v4163_v46, %v13224_v29 }
 0xe9a   :  { %v11337_v2 = vadd.f32 %v4094_v27, %v13215_v34  ;;  %v11353_v47 = vadd.f32 %v4165_v6, %v13220_v48 }
 0xe9b   :  { %v8912_v36 = vmul.f32 -1.442695, %v11336_v32 }
 0xe9c   :  { %v8913_v49 = vmul.f32 -1.442695, %v11337_v2  ;;  %v8914_v5 = vmul.f32 -1.442695, %v11353_v47  ;;  %v4689_v47 = vld [vmem:[#allocation7 + $0x30] sm:$0xff] }
 0xe9d   :  { %11770 = vpow2.f32 %v8912_v36 }
 0xe9e   :  { %11772 = vpow2.f32 %v8913_v49  ;;  %v4685_v49 = vld [vmem:[#allocation7 + $0x10] sm:$0xff] }
 0xe9f   :  { %11774 = vpow2.f32 %v8914_v5  ;;  %v4692_v5 = vld [vmem:[#allocation7 + $0x48] sm:$0xff] }
 0xea0   :  { %11776 = vtanh.f32 %v11352_v24  ;;  %v4696_v24 = vld [vmem:[#allocation7 + $0x68] sm:$0xff] }
 0xea7   :  { %v11771_v39 = vpop.eup %11770 }
 0xea8   :  { %v11773_v30 = vpop.eup %11772  ;;  %v4175_v9 = vadd.f32 1.0, %v11771_v39  ;;  %v4694_v39 = vld [vmem:[#allocation7 + $0x58] sm:$0xff] }
 0xea9   :  { %v4181_v21 = vadd.f32 1.0, %v11773_v30  ;;  %v11775_v31 = vpop.eup %11774  ;;  %v4698_v30 = vld [vmem:[#allocation7 + $0x78] sm:$0xff] }
 0xeaa   :  { %11778 = vrcp.f32 %v4175_v9  ;;  %v11777_v26 = vpop.eup %11776  ;;  %v4188_v32 = vadd.f32 1.0, %v11775_v31 }
 0xeab   :  { %11780 = vrcp.f32 %v4181_v21 }
 0xeac   :  { %11782 = vrcp.f32 %v4188_v32  ;;  %v10122_v32 = vpack.c.bf16 %v4696_v24, %v4692_v5  ;;  %v4717_v24 = vld [vmem:[#allocation7 + $0x110] sm:$0xff] }
 0xeb4   :  { %v11779_v12 = vpop.eup %11778 }
 0xeb5   :  { %v11781_v25 = vpop.eup %11780  ;;  %v4192_v55 = vmul.f32 %v11779_v12, %v11777_v26  ;;  %v10152_v26 = vpack.c.bf16 %v4689_v47, %v4685_v49  ;;  %v4691_v12 = vld [vmem:[#allocation7 + $0x40] sm:$0xff] }
 0xeb6   :  { %v4191_v27 = vmul.f32 %v11781_v25, %v13475_v53  ;;  %v11783_v46 = vpop.eup %11782  ;;  %v4687_v53 = vld [vmem:[#allocation7 + $0x20] sm:$0xff] }
 0xeb7   :  { %v4695_v25 = vld [vmem:[#allocation7 + $0x60] sm:$0xff] }
 0xeb8   :  { %v13521_v6 = vadd.f32 %v4192_v55, %v4191_v27  ;;  %v10154_v27 = vpack.c.bf16 %v4698_v30, %v4694_v39  ;;  %v4719_v49 = vld [vmem:[#allocation7 + $0x120] sm:$0xff]  ;;  %v4721_v39 = vld [vmem:[#allocation7 + $0x130] sm:$0xff]  ;;  %v4724_v30 = vld [vmem:[#allocation7 + $0x148] sm:$0xff] }
 0xeba   :  { %11784 = vtanh.f32 %v13521_v6 }
 0xec4   :  { %v11785_v2 = vpop.eup %11784 }
 0xec5   :  { %v13524_v36 = vmul.f32 %v11785_v2, %v11783_v46  ;;  %v4697_v46 = vld [vmem:[#allocation7 + $0x70] sm:$0xff]  ;;  %v4700_v2 = vld [vmem:[#allocation7 + $0x88] sm:$0xff] }
 0xec7   :  { %4330 = vmatmul.mubr.f32.vlgmr.msra.gmra.mrb[28].mxu0 %v13524_v36  ;;  %4401 = vmatmul.mubr.f32.vlgmr.msra.gmra.mrb[28].mxu1 %v13524_v36 }
 0xec8   :  { %10057 = vmatpush1.bf16.msra.mxu0 %v13330_v61  ;;  %10089 = vmatpush1.bf16.msra.mxu1 %v13333_v51  ;;  %v4684_v61 = vld [vmem:[#allocation7 + $0x8] sm:$0xff] }
 0xec9   :  { %10059 = vmatprep.subr.bf16.mxu0 %v13338_v45  ;;  %10091 = vmatprep.subr.bf16.mxu1 %v13340_v33  ;;  %v4688_v51 = vld [vmem:[#allocation7 + $0x28] sm:$0xff]  ;;  %v4686_v45 = vld [vmem:[#allocation7 + $0x18] sm:$0xff] }
 0xeca   :  { %4568 = vmatprep.mubr.f32.mxu0 %v12245_v1  ;;  %4639 = vmatprep.mubr.f32.mxu1 %v12245_v1  ;;  %v10118_v33 = vpack.c.bf16 %v4688_v51, %v4684_v61  ;;  %v4704_v61 = vld [vmem:[#allocation7 + $0xa8] sm:$0xff]  ;;  %v4702_v51 = vld [vmem:[#allocation7 + $0x98] sm:$0xff] }
 0xecc   :  { %10061 = vmatpush1.bf16.msra.mxu0 %v13342_v41  ;;  %10093 = vmatpush1.bf16.msra.mxu1 %v13345_v13  ;;  %v4690_v41 = vld [vmem:[#allocation7 + $0x38] sm:$0xff] }
 0xecd   :  { %10063 = vmatprep.subr.bf16.mxu0 %v13350_v52  ;;  %10095 = vmatprep.subr.bf16.mxu1 %v13352_v54  ;;  %v10150_v13 = vpack.c.bf16 %v4690_v41, %v4686_v45  ;;  %v4706_v45 = vld [vmem:[#allocation7 + $0xb8] sm:$0xff] }
 0xed0   :  { %10065 = vmatpush1.bf16.msra.mxu0 %v13354_v63  ;;  %10097 = vmatpush1.bf16.msra.mxu1 %v13357_v38 }
 0xed1   :  { %10067 = vmatprep.subr.bf16.mxu0 %v13362_v28  ;;  %10099 = vmatprep.subr.bf16.mxu1 %v13364_v62 }
 0xed4   :  { %10069 = vmatpush1.bf16.msra.mxu0 %v13366_v3  ;;  %10101 = vmatpush1.bf16.msra.mxu1 %v13369_v22 }
 0xed5   :  { %10071 = vmatprep.subr.bf16.mxu0 %v13374_v40  ;;  %10103 = vmatprep.subr.bf16.mxu1 %v13376_v4 }
 0xed8   :  { %10073 = vmatpush1.bf16.msra.mxu0 %v13378_v43  ;;  %10105 = vmatpush1.bf16.msra.mxu1 %v13381_v17 }
 0xed9   :  { %10075 = vmatprep.subr.bf16.mxu0 %v13385_v7  ;;  %10107 = vmatprep.subr.bf16.mxu1 %v13388_v35 }
 0xedc   :  { %10077 = vmatpush1.bf16.msra.mxu0 %v13390_v8  ;;  %10109 = vmatpush1.bf16.msra.mxu1 %v13393_v57 }
 0xedd   :  { %10079 = vmatprep.subr.bf16.mxu0 %v13396_v44  ;;  %10111 = vmatprep.subr.bf16.mxu1 %v13398_v23 }
 0xee0   :  { %10081 = vmatpush1.bf16.msra.mxu0 %v13401_v16  ;;  %10113 = vmatpush1.bf16.msra.mxu1 %v13405_v58 }
 0xee1   :  { %10083 = vmatprep.subr.bf16.mxu0 %v13407_v0  ;;  %10115 = vmatprep.subr.bf16.mxu1 %v13410_v15 }
 0xee4   :  { %10085 = vmatpush1.bf16.msra.mxu0 %v13413_v19  ;;  %10117 = vmatpush1.bf16.msra.mxu1 %v13417_v50  ;;  %v4683_v50 = vld [vmem:[#allocation7] sm:$0xff] }
 0xee5   :  { %10119 = vmatprep.subr.bf16.mxu0 %v10118_v33  ;;  %10151 = vmatprep.subr.bf16.mxu1 %v10150_v13  ;;  %v10120_v31 = vpack.c.bf16 %v4687_v53, %v4683_v50  ;;  %v10124_v33 = vpack.c.bf16 %v4695_v25, %v4691_v12  ;;  %v4699_v13 = vld [vmem:[#allocation7 + $0x80] sm:$0xff]  ;;  %v10168_v12 = vpack.c.bf16 %v4721_v39, %v4717_v24  ;;  %v5042_v24 = vld [vmem:[#allocation13 + $0x58] sm:$0xff] }
 0xee6   :  { %v4715_v53 = vld [vmem:[#allocation7 + $0x100] sm:$0xff] }
 0xee7   :  { %v4723_v25 = vld [vmem:[#allocation7 + $0x140] sm:$0xff] }
 0xf9a   :  { %v4331_v52 = vpop.f32.mrb[28].mxu0  ;;  %v4402_v54 = vpop.f32.mrb[28].mxu1 }
 0xf9b   :  { %v11338_v63 = vadd.f32 %v4331_v52, %v13212_v20  ;;  %v4333_v38 = vpop.f32.mrb[29].mxu0  ;;  %v4404_v28 = vpop.f32.mrb[29].mxu1  ;;  %v11354_v43 = vadd.f32 %v4402_v54, %v13224_v29  ;;  %v4703_v52 = vld [vmem:[#allocation7 + $0xa0] sm:$0xff]  ;;  %v10126_v54 = vpack.c.bf16 %v4704_v61, %v4700_v2  ;;  %v4729_v2 = vld [vmem:[#allocation7 + $0x170] sm:$0xff]  ;;  %v4732_v61 = vld [vmem:[#allocation7 + $0x188] sm:$0xff] }
 0xf9c   :  { %v11339_v62 = vadd.f32 %v4333_v38, %v13215_v34  ;;  %v11355_v40 = vadd.f32 %v4404_v28, %v13220_v48  ;;  %v4701_v38 = vld [vmem:[#allocation7 + $0x90] sm:$0xff] }
 0xf9d   :  { %v8915_v3 = vmul.f32 -1.442695, %v11338_v63  ;;  %v10158_v63 = vpack.c.bf16 %v4706_v45, %v4702_v51  ;;  %v4705_v28 = vld [vmem:[#allocation7 + $0xb0] sm:$0xff]  ;;  %v4736_v51 = vld [vmem:[#allocation7 + $0x1a8] sm:$0xff]  ;;  %v4734_v45 = vld [vmem:[#allocation7 + $0x198] sm:$0xff] }
 0xf9e   :  { %v8916_v22 = vmul.f32 -1.442695, %v11339_v62  ;;  %v8917_v4 = vmul.f32 -1.442695, %v11355_v40  ;;  %v4708_v62 = vld [vmem:[#allocation7 + $0xc8] sm:$0xff]  ;;  %v4714_v40 = vld [vmem:[#allocation7 + $0xf8] sm:$0xff] }
 0xf9f   :  { %11786 = vpow2.f32 %v8915_v3  ;;  %v4712_v3 = vld [vmem:[#allocation7 + $0xe8] sm:$0xff] }
 0xfa0   :  { %11788 = vpow2.f32 %v8916_v22  ;;  %v4710_v22 = vld [vmem:[#allocation7 + $0xd8] sm:$0xff] }
 0xfa1   :  { %11790 = vpow2.f32 %v8917_v4  ;;  %v10128_v4 = vpack.c.bf16 %v4703_v52, %v4699_v13  ;;  %v4731_v52 = vld [vmem:[#allocation7 + $0x180] sm:$0xff] }
 0xfa2   :  { %11792 = vtanh.f32 %v11354_v43  ;;  %v10160_v43 = vpack.c.bf16 %v4705_v28, %v4701_v38  ;;  %v4733_v28 = vld [vmem:[#allocation7 + $0x190] sm:$0xff] }
 0xfa9   :  { %v11787_v17 = vpop.eup %11786 }
 0xfaa   :  { %v11789_v7 = vpop.eup %11788  ;;  %v4414_v35 = vadd.f32 1.0, %v11787_v17  ;;  %v4707_v17 = vld [vmem:[#allocation7 + $0xc0] sm:$0xff] }
 0xfab   :  { %v4420_v8 = vadd.f32 1.0, %v11789_v7  ;;  %v11791_v57 = vpop.eup %11790  ;;  %v4711_v7 = vld [vmem:[#allocation7 + $0xe0] sm:$0xff] }
 0xfac   :  { %11794 = vrcp.f32 %v4414_v35  ;;  %v11793_v44 = vpop.eup %11792  ;;  %v4427_v0 = vadd.f32 1.0, %v11791_v57  ;;  %v10130_v35 = vpack.c.bf16 %v4712_v3, %v4708_v62  ;;  %v4709_v57 = vld [vmem:[#allocation7 + $0xd0] sm:$0xff]  ;;  %v4740_v3 = vld [vmem:[#allocation7 + $0x1c8] sm:$0xff] }
 0xfad   :  { %11796 = vrcp.f32 %v4420_v8  ;;  %v10162_v8 = vpack.c.bf16 %v4714_v40, %v4710_v22  ;;  %v4737_v62 = vld [vmem:[#allocation7 + $0x1b0] sm:$0xff]  ;;  %v4744_v22 = vld [vmem:[#allocation7 + $0x1e8] sm:$0xff]  ;;  %v4742_v40 = vld [vmem:[#allocation7 + $0x1d8] sm:$0xff] }
 0xfae   :  { %11798 = vrcp.f32 %v4427_v0  ;;  %v4722_v0 = vld [vmem:[#allocation7 + $0x138] sm:$0xff] }
 0xfb6   :  { %v11795_v23 = vpop.eup %11794 }
 0xfb7   :  { %v11797_v16 = vpop.eup %11796  ;;  %v4431_v58 = vmul.f32 %v11795_v23, %v11793_v44  ;;  %v4713_v44 = vld [vmem:[#allocation7 + $0xf0] sm:$0xff]  ;;  %v4716_v23 = vld [vmem:[#allocation7 + $0x108] sm:$0xff] }
 0xfb8   :  { %v4430_v15 = vmul.f32 %v11797_v16, %v13521_v6  ;;  %v11799_v9 = vpop.eup %11798  ;;  %v4693_v6 = vld [vmem:[#allocation7 + $0x50] sm:$0xff]  ;;  %v4720_v16 = vld [vmem:[#allocation7 + $0x128] sm:$0xff]  ;;  %v10164_v50 = vpack.c.bf16 %v4713_v44, %v4709_v57  ;;  %v4743_v57 = vld [vmem:[#allocation7 + $0x1e0] sm:$0xff] }
 0xfb9   :  { %v10156_v41 = vpack.c.bf16 %v4697_v46, %v4693_v6  ;;  %v10134_v47 = vpack.c.bf16 %v4720_v16, %v4716_v23  ;;  %v4725_v46 = vld [vmem:[#allocation7 + $0x150] sm:$0xff] }
 0xfba   :  { %v13565_v19 = vadd.f32 %v4431_v58, %v4430_v15  ;;  %v4718_v58 = vld [vmem:[#allocation7 + $0x118] sm:$0xff]  ;;  %v10132_v15 = vpack.c.bf16 %v4711_v7, %v4707_v17  ;;  %v10172_v13 = vpack.c.bf16 %v4729_v2, %v4725_v46  ;;  %v10176_v17 = vpack.c.bf16 %v4737_v62, %v4733_v28  ;;  %v4739_v7 = vld [vmem:[#allocation7 + $0x1c0] sm:$0xff]  ;;  %v4741_v44 = vld [vmem:[#allocation7 + $0x1d0] sm:$0xff] }
 0xfbb   :  { %v10166_v5 = vpack.c.bf16 %v4722_v0, %v4718_v58  ;;  %v4745_v23 = vld [vmem:[#allocation7 + $0x1f0] sm:$0xff]  ;;  %v10148_v16 = vpack.c.bf16 %v4743_v57, %v4739_v7  ;;  %v5031_v0 = vld [vmem:[#allocation13] sm:$0xff]  ;;  %v5050_v46 = vld [vmem:[#allocation13 + $0x98] sm:$0xff] }
 0xfbc   :  { %11800 = vtanh.f32 %v13565_v19  ;;  %v10180_v58 = vpack.c.bf16 %v4745_v23, %v4741_v44  ;;  %v5058_v28 = vld [vmem:[#allocation13 + $0xd8] sm:$0xff]  ;;  %v5061_v7 = vld [vmem:[#allocation13 + $0xf0] sm:$0xff]  ;;  %v5068_v57 = vld [vmem:[#allocation13 + $0x128] sm:$0xff] }
 0xfbd   :  { %v5066_v44 = vld [vmem:[#allocation13 + $0x118] sm:$0xff] }
 0xfbe   :  { %v5070_v23 = vld [vmem:[#allocation13 + $0x138] sm:$0xff] }
 0xfc6   :  { %v11801_v21 = vpop.eup %11800 }
 0xfc7   :  { %v13568_v55 = vmul.f32 %v11801_v21, %v11799_v9  ;;  %v4728_v9 = vld [vmem:[#allocation7 + $0x168] sm:$0xff]  ;;  %v4726_v21 = vld [vmem:[#allocation7 + $0x158] sm:$0xff] }
 0xfc9   :  { %4569 = vmatmul.mubr.f32.vlgmr.msra.gmra.mrb[30].mxu0 %v13568_v55  ;;  %4640 = vmatmul.mubr.f32.vlgmr.msra.gmra.mrb[30].mxu1 %v13568_v55 }
 0xfca   :  { %10121 = vmatpush1.bf16.msra.mxu0 %v10120_v31  ;;  %10153 = vmatpush1.bf16.msra.mxu1 %v10152_v26  ;;  %v4730_v31 = vld [vmem:[#allocation7 + $0x178] sm:$0xff]  ;;  %v10136_v26 = vpack.c.bf16 %v4719_v49, %v4715_v53  ;;  %v5033_v53 = vld [vmem:[#allocation13 + $0x10] sm:$0xff] }
 0xfcb   :  { %10123 = vmatprep.subr.bf16.mxu0 %v10122_v32  ;;  %10155 = vmatprep.subr.bf16.mxu1 %v10154_v27  ;;  %v4727_v32 = vld [vmem:[#allocation7 + $0x160] sm:$0xff]  ;;  %v10138_v27 = vpack.c.bf16 %v4728_v9, %v4724_v30  ;;  %v10170_v6 = vpack.c.bf16 %v4730_v31, %v4726_v21  ;;  %v5037_v49 = vld [vmem:[#allocation13 + $0x30] sm:$0xff]  ;;  %v5046_v30 = vld [vmem:[#allocation13 + $0x78] sm:$0xff] }
 0xfcc   :  { %4833 = vmatprep.mubr.f32.mxu0 %v12245_v1  ;;  %4946 = vmatprep.mubr.f32.mxu1 %v12245_v1  ;;  %v5039_v9 = vld [vmem:[#allocation13 + $0x40] sm:$0xff]  ;;  %v13616_v31 = vpack.c.bf16 %v5046_v30, %v5042_v24  ;;  %v5078_v24 = vld [vmem:[#allocation13 + $0x178] sm:$0xff] }
 0xfcd   :  { %v5043_v21 = vld [vmem:[#allocation13 + $0x60] sm:$0xff] }
 0xfce   :  { %10125 = vmatpush1.bf16.msra.mxu0 %v10124_v33  ;;  %10157 = vmatpush1.bf16.msra.mxu1 %v10156_v41  ;;  %v4738_v33 = vld [vmem:[#allocation7 + $0x1b8] sm:$0xff]  ;;  %v10140_v41 = vpack.c.bf16 %v4727_v32, %v4723_v25  ;;  %v5045_v25 = vld [vmem:[#allocation13 + $0x70] sm:$0xff]  ;;  %v5071_v30 = vld [vmem:[#allocation13 + $0x140] sm:$0xff] }
 0xfcf   :  { %10127 = vmatprep.subr.bf16.mxu0 %v10126_v54  ;;  %10159 = vmatprep.subr.bf16.mxu1 %v10158_v63  ;;  %v4735_v54 = vld [vmem:[#allocation7 + $0x1a0] sm:$0xff]  ;;  %v10142_v63 = vpack.c.bf16 %v4736_v51, %v4732_v61  ;;  %v10174_v38 = vpack.c.bf16 %v4738_v33, %v4734_v45  ;;  %v5054_v61 = vld [vmem:[#allocation13 + $0xb8] sm:$0xff] }
 0xfd0   :  { %v5047_v51 = vld [vmem:[#allocation13 + $0x80] sm:$0xff]  ;;  %v13628_v33 = vpack.c.bf16 %v5054_v61, %v5050_v46  ;;  %v5084_v46 = vld [vmem:[#allocation13 + $0x1a8] sm:$0xff]  ;;  %v5082_v61 = vld [vmem:[#allocation13 + $0x198] sm:$0xff] }
 0xfd1   :  { %v5051_v45 = vld [vmem:[#allocation13 + $0xa0] sm:$0xff] }
 0xfd2   :  { %10129 = vmatpush1.bf16.msra.mxu0 %v10128_v4  ;;  %10161 = vmatpush1.bf16.msra.mxu1 %v10160_v43  ;;  %v4746_v4 = vld [vmem:[#allocation7 + $0x1f8] sm:$0xff]  ;;  %v10144_v43 = vpack.c.bf16 %v4735_v54, %v4731_v52  ;;  %v5053_v52 = vld [vmem:[#allocation13 + $0xb0] sm:$0xff] }
 0xfd3   :  { %10131 = vmatprep.subr.bf16.mxu0 %v10130_v35  ;;  %10163 = vmatprep.subr.bf16.mxu1 %v10162_v8  ;;  %v10146_v35 = vpack.c.bf16 %v4744_v22, %v4740_v3  ;;  %v10178_v8 = vpack.c.bf16 %v4746_v4, %v4742_v40  ;;  %v5062_v3 = vld [vmem:[#allocation13 + $0xf8] sm:$0xff]  ;;  %v5055_v22 = vld [vmem:[#allocation13 + $0xc0] sm:$0xff] }
 0xfd4   :  { %v5059_v40 = vld [vmem:[#allocation13 + $0xe0] sm:$0xff]  ;;  %v13640_v4 = vpack.c.bf16 %v5062_v3, %v5058_v28  ;;  %v5081_v28 = vld [vmem:[#allocation13 + $0x190] sm:$0xff] }
 0xfd5   :  { %v5085_v3 = vld [vmem:[#allocation13 + $0x1b0] sm:$0xff] }
 0xfd6   :  { %10133 = vmatpush1.bf16.msra.mxu0 %v10132_v15  ;;  %10165 = vmatpush1.bf16.msra.mxu1 %v10164_v50 }
 0xfd7   :  { %10135 = vmatprep.subr.bf16.mxu0 %v10134_v47  ;;  %10167 = vmatprep.subr.bf16.mxu1 %v10166_v5  ;;  %v5040_v47 = vld [vmem:[#allocation13 + $0x48] sm:$0xff] }
 0xfd8   :  { %v5044_v5 = vld [vmem:[#allocation13 + $0x68] sm:$0xff] }
 0xfd9   :  { %v13614_v39 = vpack.c.bf16 %v5044_v5, %v5040_v47  ;;  %v5074_v5 = vld [vmem:[#allocation13 + $0x158] sm:$0xff] }
 0xfda   :  { %10137 = vmatpush1.bf16.msra.mxu0 %v10136_v26  ;;  %10169 = vmatpush1.bf16.msra.mxu1 %v10168_v12  ;;  %v13618_v26 = vpack.c.bf16 %v5043_v21, %v5039_v9  ;;  %v5041_v12 = vld [vmem:[#allocation13 + $0x50] sm:$0xff]  ;;  %v13662_v9 = vpack.c.bf16 %v5078_v24, %v5074_v5  ;;  %v5075_v21 = vld [vmem:[#allocation13 + $0x160] sm:$0xff] }
 0xfdb   :  { %10139 = vmatprep.subr.bf16.mxu0 %v10138_v27  ;;  %10171 = vmatprep.subr.bf16.mxu1 %v10170_v6  ;;  %v13621_v32 = vpack.c.bf16 %v5045_v25, %v5041_v12  ;;  %v5048_v27 = vld [vmem:[#allocation13 + $0x88] sm:$0xff]  ;;  %v5073_v12 = vld [vmem:[#allocation13 + $0x150] sm:$0xff] }
 0xfdc   :  { %v5052_v6 = vld [vmem:[#allocation13 + $0xa8] sm:$0xff]  ;;  %v5077_v25 = vld [vmem:[#allocation13 + $0x170] sm:$0xff] }
 0xfdd   :  { %v13626_v2 = vpack.c.bf16 %v5052_v6, %v5048_v27  ;;  %v13665_v27 = vpack.c.bf16 %v5075_v21, %v5071_v30  ;;  %v5080_v6 = vld [vmem:[#allocation13 + $0x188] sm:$0xff] }
 0xfde   :  { %10141 = vmatpush1.bf16.msra.mxu0 %v10140_v41  ;;  %10173 = vmatpush1.bf16.msra.mxu1 %v10172_v13  ;;  %v13630_v41 = vpack.c.bf16 %v5051_v45, %v5047_v51  ;;  %v5049_v13 = vld [vmem:[#allocation13 + $0x90] sm:$0xff]  ;;  %v13669_v51 = vpack.c.bf16 %v5077_v25, %v5073_v12  ;;  %v13671_v45 = vpack.c.bf16 %v5084_v46, %v5080_v6 }
 0xfdf   :  { %10143 = vmatprep.subr.bf16.mxu0 %v10142_v63  ;;  %10175 = vmatprep.subr.bf16.mxu1 %v10174_v38  ;;  %v13633_v54 = vpack.c.bf16 %v5053_v52, %v5049_v13  ;;  %v5056_v63 = vld [vmem:[#allocation13 + $0xc8] sm:$0xff]  ;;  %v5086_v13 = vld [vmem:[#allocation13 + $0x1b8] sm:$0xff]  ;;  %v5079_v52 = vld [vmem:[#allocation13 + $0x180] sm:$0xff] }
 0xfe0   :  { %v5060_v38 = vld [vmem:[#allocation13 + $0xe8] sm:$0xff] }
 0xfe1   :  { %v13638_v62 = vpack.c.bf16 %v5060_v38, %v5056_v63  ;;  %v5083_v63 = vld [vmem:[#allocation13 + $0x1a0] sm:$0xff]  ;;  %v13674_v38 = vpack.c.bf16 %v5086_v13, %v5082_v61 }
 0xfe2   :  { %10145 = vmatpush1.bf16.msra.mxu0 %v10144_v43  ;;  %10177 = vmatpush1.bf16.msra.mxu1 %v10176_v17  ;;  %v13642_v43 = vpack.c.bf16 %v5059_v40, %v5055_v22  ;;  %v5057_v17 = vld [vmem:[#allocation13 + $0xd0] sm:$0xff]  ;;  %v13677_v22 = vpack.c.bf16 %v5083_v63, %v5079_v52  ;;  %v13681_v40 = vpack.c.bf16 %v5085_v3, %v5081_v28 }
 0xfe3   :  { %10147 = vmatprep.subr.bf16.mxu0 %v10146_v35  ;;  %10179 = vmatprep.subr.bf16.mxu1 %v10178_v8  ;;  %v5064_v35 = vld [vmem:[#allocation13 + $0x108] sm:$0xff]  ;;  %v13645_v8 = vpack.c.bf16 %v5061_v7, %v5057_v17 }
 0xfe4   :  { %v5088_v17 = vld [vmem:[#allocation13 + $0x1c8] sm:$0xff] }
 0xfe5   :  { %v5092_v7 = vld [vmem:[#allocation13 + $0x1e8] sm:$0xff] }
 0xfe6   :  { %10149 = vmatpush1.bf16.msra.mxu0 %v10148_v16  ;;  %10181 = vmatpush1.bf16.msra.mxu1 %v10180_v58  ;;  %v13649_v16 = vpack.c.bf16 %v5068_v57, %v5064_v35  ;;  %v13651_v58 = vpack.c.bf16 %v5070_v23, %v5066_v44  ;;  %v5090_v35 = vld [vmem:[#allocation13 + $0x1d8] sm:$0xff]  ;;  %v13686_v57 = vpack.c.bf16 %v5092_v7, %v5088_v17  ;;  %v5087_v23 = vld [vmem:[#allocation13 + $0x1c0] sm:$0xff] }
 0xfe7   :  { %v5094_v44 = vld [vmem:[#allocation13 + $0x1f8] sm:$0xff] }
 0xfe9   :  { %4834 = vmatmul.mubr.f32.vlgmr.msra.gmra.mrb[32].mxu0 %v13230_v10  ;;  %4947 = vmatmul.mubr.f32.vlgmr.msra.gmra.mrb[32].mxu1 %v13230_v10  ;;  %v5032_v10 = vld [vmem:[#allocation13 + $0x8] sm:$0xff] }
 0xfea   :  { %4839 = vmatprep.mubr.f32.mxu0 %v12245_v1  ;;  %4952 = vmatprep.mubr.f32.mxu1 %v12245_v1 }
 0xfed   :  { %4840 = vmatmul.mubr.f32.gmra.mrb[34].mxu0 %v13276_v42  ;;  %4953 = vmatmul.mubr.f32.gmra.mrb[34].mxu1 %v13276_v42  ;;  %v5036_v42 = vld [vmem:[#allocation13 + $0x28] sm:$0xff] }
 0xfee   :  { %4845 = vmatprep.mubr.f32.mxu0 %v12245_v1  ;;  %4958 = vmatprep.mubr.f32.mxu1 %v12245_v1 }
 0xff1   :  { %4846 = vmatmul.mubr.f32.gmra.mrb[36].mxu0 %v13320_v60  ;;  %4959 = vmatmul.mubr.f32.gmra.mrb[36].mxu1 %v13320_v60  ;;  %v5034_v60 = vld [vmem:[#allocation13 + $0x18] sm:$0xff] }
 0xff2   :  { %4851 = vmatprep.mubr.f32.mxu0 %v12245_v1  ;;  %4964 = vmatprep.mubr.f32.mxu1 %v12245_v1 }
 0xff5   :  { %4852 = vmatmul.mubr.f32.gmra.mrb[38].mxu0 %v13432_v59  ;;  %4965 = vmatmul.mubr.f32.gmra.mrb[38].mxu1 %v13432_v59  ;;  %v13602_v59 = vpack.c.bf16 %v5036_v42, %v5032_v10  ;;  %v5063_v10 = vld [vmem:[#allocation13 + $0x100] sm:$0xff] }
 0xff6   :  { %4857 = vmatprep.mubr.f32.mxu0 %v12245_v1  ;;  %4970 = vmatprep.mubr.f32.mxu1 %v12245_v1  ;;  %v5067_v42 = vld [vmem:[#allocation13 + $0x120] sm:$0xff] }
 0xff7   :  { %10183 = vmatprep.subr.bf16.mxu0 %v13602_v59 }
 0xff9   :  { %4858 = vmatmul.mubr.f32.gmra.mrb[40].mxu0 %v13478_v56  ;;  %4971 = vmatmul.mubr.f32.gmra.mrb[40].mxu1 %v13478_v56  ;;  %v5038_v56 = vld [vmem:[#allocation13 + $0x38] sm:$0xff] }
 0xffa   :  { %4863 = vmatprep.mubr.f32.mxu0 %v12245_v1  ;;  %4976 = vmatprep.mubr.f32.mxu1 %v12245_v1  ;;  %v13604_v15 = vpack.c.bf16 %v5038_v56, %v5034_v60  ;;  %v5065_v60 = vld [vmem:[#allocation13 + $0x110] sm:$0xff]  ;;  %v13654_v56 = vpack.c.bf16 %v5067_v42, %v5063_v10  ;;  %v5091_v10 = vld [vmem:[#allocation13 + $0x1e0] sm:$0xff]  ;;  %v13688_v42 = vpack.c.bf16 %v5094_v44, %v5090_v35 }
 0xffc   :  { %10215 = vmatprep.subr.bf16.mxu1 %v13604_v15 }
 0xffd   :  { %4864 = vmatmul.mubr.f32.gmra.mrb[42].mxu0 %v13524_v36  ;;  %4977 = vmatmul.mubr.f32.gmra.mrb[42].mxu1 %v13524_v36  ;;  %v5035_v36 = vld [vmem:[#allocation13 + $0x20] sm:$0xff] }
 0xffe   :  { %4869 = vmatprep.mubr.f32.mxu0 %v12245_v1  ;;  %4982 = vmatprep.mubr.f32.mxu1 %v12245_v1  ;;  %v13606_v50 = vpack.c.bf16 %v5035_v36, %v5031_v0  ;;  %v5069_v0 = vld [vmem:[#allocation13 + $0x130] sm:$0xff]  ;;  %v5072_v36 = vld [vmem:[#allocation13 + $0x148] sm:$0xff] }
0x1000   :  { %10185 = vmatpush1.bf16.msra.mxu0 %v13606_v50 }
0x1001   :  { %4870 = vmatmul.mubr.f32.gmra.mrb[44].mxu0 %v13568_v55  ;;  %4983 = vmatmul.mubr.f32.gmra.mrb[44].mxu1 %v13568_v55  ;;  %v13609_v55 = vpack.c.bf16 %v5037_v49, %v5033_v53  ;;  %v5076_v53 = vld [vmem:[#allocation13 + $0x168] sm:$0xff]  ;;  %v13658_v49 = vpack.c.bf16 %v5069_v0, %v5065_v60  ;;  %v13690_v60 = vpack.c.bf16 %v5091_v10, %v5087_v23  ;;  %v5089_v0 = vld [vmem:[#allocation13 + $0x1d0] sm:$0xff] }
0x1002   :  { %4875 = vmatprep.mubr.f32.mxu0 %v12245_v1  ;;  %4988 = vmatprep.mubr.f32.mxu1 %v12245_v1  ;;  %v13660_v47 = vpack.c.bf16 %v5076_v53, %v5072_v36  ;;  %v5093_v36 = vld [vmem:[#allocation13 + $0x1f0] sm:$0xff] }
0x1003   :  { %10217 = vmatpush1.bf16.msra.mxu1 %v13609_v55  ;;  %10187 = vmatprep.subr.bf16.mxu0 %v13614_v39  ;;  %v13693_v53 = vpack.c.bf16 %v5093_v36, %v5089_v0 }
0x1004   :  { %10219 = vmatprep.subr.bf16.mxu1 %v13616_v31  ;;  %10189 = vmatpush1.bf16.msra.mxu0 %v13618_v26 }
0x1005   :  { %10191 = vmatprep.subr.bf16.mxu0 %v13626_v2 }
0x1007   :  { %10221 = vmatpush1.bf16.msra.mxu1 %v13621_v32 }
0x1008   :  { %10223 = vmatprep.subr.bf16.mxu1 %v13628_v33  ;;  %10193 = vmatpush1.bf16.msra.mxu0 %v13630_v41 }
0x1009   :  { %10195 = vmatprep.subr.bf16.mxu0 %v13638_v62 }
0x100b   :  { %10225 = vmatpush1.bf16.msra.mxu1 %v13633_v54 }
0x100c   :  { %10227 = vmatprep.subr.bf16.mxu1 %v13640_v4  ;;  %10197 = vmatpush1.bf16.msra.mxu0 %v13642_v43 }
0x100d   :  { %10199 = vmatprep.subr.bf16.mxu0 %v13649_v16 }
0x100f   :  { %10229 = vmatpush1.bf16.msra.mxu1 %v13645_v8 }
0x1010   :  { %10231 = vmatprep.subr.bf16.mxu1 %v13651_v58  ;;  %10201 = vmatpush1.bf16.msra.mxu0 %v13654_v56 }
0x1011   :  { %10203 = vmatprep.subr.bf16.mxu0 %v13660_v47 }
0x1013   :  { %10233 = vmatpush1.bf16.msra.mxu1 %v13658_v49 }
0x1014   :  { %10235 = vmatprep.subr.bf16.mxu1 %v13662_v9  ;;  %10205 = vmatpush1.bf16.msra.mxu0 %v13665_v27 }
0x1015   :  { %10207 = vmatprep.subr.bf16.mxu0 %v13671_v45 }
0x1017   :  { %10237 = vmatpush1.bf16.msra.mxu1 %v13669_v51 }
0x1018   :  { %10239 = vmatprep.subr.bf16.mxu1 %v13674_v38  ;;  %10209 = vmatpush1.bf16.msra.mxu0 %v13677_v22 }
0x1019   :  { %10211 = vmatprep.subr.bf16.mxu0 %v13686_v57 }
0x101b   :  { %10241 = vmatpush1.bf16.msra.mxu1 %v13681_v40 }
0x101c   :  { %10243 = vmatprep.subr.bf16.mxu1 %v13688_v42  ;;  %10213 = vmatpush1.bf16.msra.mxu0 %v13690_v60 }
0x101d   :  { %10247 = vmatprep.subr.bf16.mxu0 %v13602_v59 }
0x101f   :  { %10245 = vmatpush1.bf16.msra.mxu1 %v13693_v53 }
0x1020   :  { %10279 = vmatprep.subr.bf16.mxu1 %v13604_v15 }
0x109c   :  { %v4570_v5 = vpop.f32.mrb[30].mxu0  ;;  %v4641_v24 = vpop.f32.mrb[30].mxu1 }
0x109d   :  { %v11340_v30 = vadd.f32 %v4570_v5, %v13212_v20  ;;  %v4572_v21 = vpop.f32.mrb[31].mxu0  ;;  %v4643_v12 = vpop.f32.mrb[31].mxu1  ;;  %v11356_v52 = vadd.f32 %v4641_v24, %v13224_v29 }
0x109e   :  { %v11341_v25 = vadd.f32 %v4572_v21, %v13215_v34  ;;  %v11357_v61 = vadd.f32 %v4643_v12, %v13220_v48 }
0x109f   :  { %v8918_v6 = vmul.f32 -1.442695, %v11340_v30 }
0x10a0   :  { %v8919_v46 = vmul.f32 -1.442695, %v11341_v25  ;;  %v8920_v13 = vmul.f32 -1.442695, %v11357_v61 }
0x10a1   :  { %11802 = vpow2.f32 %v8918_v6 }
0x10a2   :  { %11804 = vpow2.f32 %v8919_v46 }
0x10a3   :  { %11806 = vpow2.f32 %v8920_v13 }
0x10a4   :  { %11808 = vtanh.f32 %v11356_v52 }
0x10ab   :  { %v11803_v63 = vpop.eup %11802 }
0x10ac   :  { %v11805_v28 = vpop.eup %11804  ;;  %v4653_v3 = vadd.f32 1.0, %v11803_v63 }
0x10ad   :  { %v4659_v17 = vadd.f32 1.0, %v11805_v28  ;;  %v11807_v20 = vpop.eup %11806 }
0x10ae   :  { %11810 = vrcp.f32 %v4653_v3  ;;  %v11809_v7 = vpop.eup %11808  ;;  %v4666_v23 = vadd.f32 1.0, %v11807_v20 }
0x10af   :  { %11812 = vrcp.f32 %v4659_v17 }
0x10b0   :  { %11814 = vrcp.f32 %v4666_v23 }
0x10b8   :  { %v11811_v34 = vpop.eup %11810 }
0x10b9   :  { %v11813_v35 = vpop.eup %11812  ;;  %v4670_v44 = vmul.f32 %v11811_v34, %v11809_v7 }
0x10ba   :  { %v4669_v10 = vmul.f32 %v11813_v35, %v13565_v19  ;;  %v11815_v29 = vpop.eup %11814  ;;  %v4747_v19 = vld [vmem:[%s14618_s11] sm:$0xf] }
0x10bb   :  { %v13747_v5 = vrot.slane %v4747_v19, %v12673_v11  ;;  %v13750_v24 = vrot.slane %v4747_v19, %v12678_v14  ;;  %v13755_v52 = vrot.slane %v4747_v19, %v12686_v18  ;;  %v13759_v28 = vrot.slane %v4747_v19, %v12693_v37 }
0x10bc   :  { %v4671_v48 = vadd.f32 %v4670_v44, %v4669_v10 }
0x10be   :  { %11816 = vtanh.f32 %v4671_v48 }
0x10c8   :  { %v11817_v0 = vpop.eup %11816 }
0x10c9   :  { %v4673_v36 = vmul.f32 %v11817_v0, %v11815_v29 }
0x10cb   :  { %4876 = vmatmul.mubr.f32.gmra.mrb[46].mxu0 %v4673_v36  ;;  %4989 = vmatmul.mubr.f32.gmra.mrb[46].mxu1 %v4673_v36 }
0x10cc   :  { %5159 = vmatprep.mubr.f32.mxu0 %v12245_v1  ;;  %5230 = vmatprep.mubr.f32.mxu1 %v12245_v1 }
0x10cf   :  { %5160 = vmatmul.mubr.f32.vlgmr.msra.gmra.mrb[32].mxu0 %v12245_v1  ;;  %5231 = vmatmul.mubr.f32.vlgmr.msra.gmra.mrb[32].mxu1 %v12245_v1 }
0x10d0   :  { %10249 = vmatpush1.bf16.msra.mxu0 %v13606_v50  ;;  %10281 = vmatpush1.bf16.msra.mxu1 %v13609_v55 }
0x10d1   :  { %10251 = vmatprep.subr.bf16.mxu0 %v13614_v39  ;;  %10283 = vmatprep.subr.bf16.mxu1 %v13616_v31 }
0x10d2   :  { %5398 = vmatprep.mubr.f32.mxu0 %v12245_v1  ;;  %5469 = vmatprep.mubr.f32.mxu1 %v12245_v1 }
0x10d4   :  { %10253 = vmatpush1.bf16.msra.mxu0 %v13618_v26  ;;  %10285 = vmatpush1.bf16.msra.mxu1 %v13621_v32 }
0x10d5   :  { %10255 = vmatprep.subr.bf16.mxu0 %v13626_v2  ;;  %10287 = vmatprep.subr.bf16.mxu1 %v13628_v33 }
0x10d8   :  { %10257 = vmatpush1.bf16.msra.mxu0 %v13630_v41  ;;  %10289 = vmatpush1.bf16.msra.mxu1 %v13633_v54 }
0x10d9   :  { %10259 = vmatprep.subr.bf16.mxu0 %v13638_v62  ;;  %10291 = vmatprep.subr.bf16.mxu1 %v13640_v4 }
0x10dc   :  { %10261 = vmatpush1.bf16.msra.mxu0 %v13642_v43  ;;  %10293 = vmatpush1.bf16.msra.mxu1 %v13645_v8 }
0x10dd   :  { %10263 = vmatprep.subr.bf16.mxu0 %v13649_v16  ;;  %10295 = vmatprep.subr.bf16.mxu1 %v13651_v58 }
0x10e0   :  { %10265 = vmatpush1.bf16.msra.mxu0 %v13654_v56  ;;  %10297 = vmatpush1.bf16.msra.mxu1 %v13658_v49 }
0x10e1   :  { %10267 = vmatprep.subr.bf16.mxu0 %v13660_v47  ;;  %10299 = vmatprep.subr.bf16.mxu1 %v13662_v9 }
0x10e4   :  { %10269 = vmatpush1.bf16.msra.mxu0 %v13665_v27  ;;  %10301 = vmatpush1.bf16.msra.mxu1 %v13669_v51 }
0x10e5   :  { %10271 = vmatprep.subr.bf16.mxu0 %v13671_v45  ;;  %10303 = vmatprep.subr.bf16.mxu1 %v13674_v38 }
0x10e8   :  { %10273 = vmatpush1.bf16.msra.mxu0 %v13677_v22  ;;  %10305 = vmatpush1.bf16.msra.mxu1 %v13681_v40 }
0x10e9   :  { %10275 = vmatprep.subr.bf16.mxu0 %v13686_v57  ;;  %10307 = vmatprep.subr.bf16.mxu1 %v13688_v42 }
0x10ec   :  { %10277 = vmatpush1.bf16.msra.mxu0 %v13690_v60  ;;  %10309 = vmatpush1.bf16.msra.mxu1 %v13693_v53 }
0x10ed   :  { %10311 = vmatprep.subr.bf16.mxu0 %v13602_v59  ;;  %10343 = vmatprep.subr.bf16.mxu1 %v13604_v15 }
0x11a2   :  { %v5161_v30 = vpop.f32.mrb[32].mxu0  ;;  %v5232_v21 = vpop.f32.mrb[32].mxu1 }
0x11a3   :  { %v11358_v12 = vadd.f32 %v5161_v30, %v13747_v5  ;;  %v5163_v25 = vpop.f32.mrb[33].mxu0  ;;  %v5234_v6 = vpop.f32.mrb[33].mxu1  ;;  %v11374_v17 = vadd.f32 %v5232_v21, %v13759_v28 }
0x11a4   :  { %v11359_v46 = vadd.f32 %v5163_v25, %v13750_v24  ;;  %v11375_v63 = vadd.f32 %v5234_v6, %v13755_v52 }
0x11a5   :  { %v8921_v61 = vmul.f32 -1.442695, %v11358_v12 }
0x11a6   :  { %v8922_v13 = vmul.f32 -1.442695, %v11359_v46  ;;  %v8923_v3 = vmul.f32 -1.442695, %v11375_v63 }
0x11a7   :  { %11818 = vpow2.f32 %v8921_v61 }
0x11a8   :  { %11820 = vpow2.f32 %v8922_v13 }
0x11a9   :  { %11822 = vpow2.f32 %v8923_v3 }
0x11aa   :  { %11824 = vtanh.f32 %v11374_v17 }
0x11b1   :  { %v11819_v20 = vpop.eup %11818 }
0x11b2   :  { %v11821_v7 = vpop.eup %11820  ;;  %v5244_v34 = vadd.f32 1.0, %v11819_v20 }
0x11b3   :  { %v5250_v35 = vadd.f32 1.0, %v11821_v7  ;;  %v11823_v44 = vpop.eup %11822 }
0x11b4   :  { %11826 = vrcp.f32 %v5244_v34  ;;  %v11825_v23 = vpop.eup %11824  ;;  %v5257_v0 = vadd.f32 1.0, %v11823_v44 }
0x11b5   :  { %11828 = vrcp.f32 %v5250_v35 }
0x11b6   :  { %11830 = vrcp.f32 %v5257_v0 }
0x11be   :  { %v11827_v10 = vpop.eup %11826 }
0x11bf   :  { %v11829_v48 = vpop.eup %11828  ;;  %v5261_v29 = vmul.f32 %v11827_v10, %v11825_v23 }
0x11c0   :  { %v5260_v36 = vmul.f32 0.0, %v11829_v48  ;;  %v11831_v30 = vpop.eup %11830 }
0x11c2   :  { %v13762_v19 = vadd.f32 %v5261_v29, %v5260_v36 }
0x11c4   :  { %11832 = vtanh.f32 %v13762_v19 }
0x11ce   :  { %v11833_v21 = vpop.eup %11832 }
0x11cf   :  { %v13765_v12 = vmul.f32 %v11833_v21, %v11831_v30 }
0x11d1   :  { %5399 = vmatmul.mubr.f32.vlgmr.msra.gmra.mrb[34].mxu0 %v13765_v12  ;;  %5470 = vmatmul.mubr.f32.vlgmr.msra.gmra.mrb[34].mxu1 %v13765_v12 }
0x11d2   :  { %10313 = vmatpush1.bf16.msra.mxu0 %v13606_v50  ;;  %10345 = vmatpush1.bf16.msra.mxu1 %v13609_v55 }
0x11d3   :  { %10315 = vmatprep.subr.bf16.mxu0 %v13614_v39  ;;  %10347 = vmatprep.subr.bf16.mxu1 %v13616_v31 }
0x11d4   :  { %5637 = vmatprep.mubr.f32.mxu0 %v12245_v1  ;;  %5708 = vmatprep.mubr.f32.mxu1 %v12245_v1 }
0x11d6   :  { %10317 = vmatpush1.bf16.msra.mxu0 %v13618_v26  ;;  %10349 = vmatpush1.bf16.msra.mxu1 %v13621_v32 }
0x11d7   :  { %10319 = vmatprep.subr.bf16.mxu0 %v13626_v2  ;;  %10351 = vmatprep.subr.bf16.mxu1 %v13628_v33 }
0x11da   :  { %10321 = vmatpush1.bf16.msra.mxu0 %v13630_v41  ;;  %10353 = vmatpush1.bf16.msra.mxu1 %v13633_v54 }
0x11db   :  { %10323 = vmatprep.subr.bf16.mxu0 %v13638_v62  ;;  %10355 = vmatprep.subr.bf16.mxu1 %v13640_v4 }
0x11de   :  { %10325 = vmatpush1.bf16.msra.mxu0 %v13642_v43  ;;  %10357 = vmatpush1.bf16.msra.mxu1 %v13645_v8 }
0x11df   :  { %10327 = vmatprep.subr.bf16.mxu0 %v13649_v16  ;;  %10359 = vmatprep.subr.bf16.mxu1 %v13651_v58 }
0x11e2   :  { %10329 = vmatpush1.bf16.msra.mxu0 %v13654_v56  ;;  %10361 = vmatpush1.bf16.msra.mxu1 %v13658_v49 }
0x11e3   :  { %10331 = vmatprep.subr.bf16.mxu0 %v13660_v47  ;;  %10363 = vmatprep.subr.bf16.mxu1 %v13662_v9 }
0x11e6   :  { %10333 = vmatpush1.bf16.msra.mxu0 %v13665_v27  ;;  %10365 = vmatpush1.bf16.msra.mxu1 %v13669_v51 }
0x11e7   :  { %10335 = vmatprep.subr.bf16.mxu0 %v13671_v45  ;;  %10367 = vmatprep.subr.bf16.mxu1 %v13674_v38 }
0x11ea   :  { %10337 = vmatpush1.bf16.msra.mxu0 %v13677_v22  ;;  %10369 = vmatpush1.bf16.msra.mxu1 %v13681_v40 }
0x11eb   :  { %10339 = vmatprep.subr.bf16.mxu0 %v13686_v57  ;;  %10371 = vmatprep.subr.bf16.mxu1 %v13688_v42 }
0x11ee   :  { %10341 = vmatpush1.bf16.msra.mxu0 %v13690_v60  ;;  %10373 = vmatpush1.bf16.msra.mxu1 %v13693_v53 }
0x11ef   :  { %10375 = vmatprep.subr.bf16.mxu0 %v13602_v59  ;;  %10407 = vmatprep.subr.bf16.mxu1 %v13604_v15 }
0x12a4   :  { %v5400_v25 = vpop.f32.mrb[34].mxu0  ;;  %v5471_v6 = vpop.f32.mrb[34].mxu1 }
0x12a5   :  { %v11360_v46 = vadd.f32 %v5400_v25, %v13747_v5  ;;  %v5402_v61 = vpop.f32.mrb[35].mxu0  ;;  %v5473_v13 = vpop.f32.mrb[35].mxu1  ;;  %v11376_v34 = vadd.f32 %v5471_v6, %v13759_v28 }
0x12a6   :  { %v11361_v63 = vadd.f32 %v5402_v61, %v13750_v24  ;;  %v11377_v20 = vadd.f32 %v5473_v13, %v13755_v52  ;;  %v5987_v61 = vld [vmem:[#allocation13] sm:$0xff] }
0x12a7   :  { %v8924_v3 = vmul.f32 -1.442695, %v11360_v46  ;;  %v5991_v13 = vld [vmem:[#allocation13 + $0x20] sm:$0xff] }
0x12a8   :  { %v8925_v17 = vmul.f32 -1.442695, %v11361_v63  ;;  %v8926_v7 = vmul.f32 -1.442695, %v11377_v20  ;;  %v5993_v20 = vld [vmem:[#allocation13 + $0x30] sm:$0xff] }
0x12a9   :  { %11834 = vpow2.f32 %v8924_v3  ;;  %v13865_v3 = vpack.c.bf16 %v5991_v13, %v5987_v61 }
0x12aa   :  { %11836 = vpow2.f32 %v8925_v17  ;;  %v5989_v17 = vld [vmem:[#allocation13 + $0x10] sm:$0xff] }
0x12ab   :  { %11838 = vpow2.f32 %v8926_v7  ;;  %v13868_v7 = vpack.c.bf16 %v5993_v20, %v5989_v17  ;;  %v6021_v17 = vld [vmem:[#allocation13 + $0x110] sm:$0xff] }
0x12ac   :  { %11840 = vtanh.f32 %v11376_v34  ;;  %v5996_v34 = vld [vmem:[#allocation13 + $0x48] sm:$0xff]  ;;  %v6025_v20 = vld [vmem:[#allocation13 + $0x130] sm:$0xff] }
0x12b3   :  { %v11835_v59 = vpop.eup %11834 }
0x12b4   :  { %v11837_v35 = vpop.eup %11836  ;;  %v5483_v15 = vadd.f32 1.0, %v11835_v59  ;;  %v6000_v59 = vld [vmem:[#allocation13 + $0x68] sm:$0xff] }
0x12b5   :  { %v5489_v44 = vadd.f32 1.0, %v11837_v35  ;;  %v11839_v23 = vpop.eup %11838  ;;  %v5998_v35 = vld [vmem:[#allocation13 + $0x58] sm:$0xff] }
0x12b6   :  { %11842 = vrcp.f32 %v5483_v15  ;;  %v11841_v10 = vpop.eup %11840  ;;  %v5496_v36 = vadd.f32 1.0, %v11839_v23  ;;  %v13873_v15 = vpack.c.bf16 %v6000_v59, %v5996_v34  ;;  %v5995_v23 = vld [vmem:[#allocation13 + $0x40] sm:$0xff]  ;;  %v13916_v34 = vpack.c.bf16 %v6025_v20, %v6021_v17  ;;  %v6028_v59 = vld [vmem:[#allocation13 + $0x148] sm:$0xff] }
0x12b7   :  { %11844 = vrcp.f32 %v5489_v44  ;;  %v6002_v44 = vld [vmem:[#allocation13 + $0x78] sm:$0xff]  ;;  %v6043_v17 = vld [vmem:[#allocation13 + $0x1c0] sm:$0xff] }
0x12b8   :  { %11846 = vrcp.f32 %v5496_v36  ;;  %v6001_v36 = vld [vmem:[#allocation13 + $0x70] sm:$0xff] }
0x12c0   :  { %v11843_v48 = vpop.eup %11842 }
0x12c1   :  { %v11845_v29 = vpop.eup %11844  ;;  %v5500_v0 = vmul.f32 %v11843_v48, %v11841_v10  ;;  %v5999_v10 = vld [vmem:[#allocation13 + $0x60] sm:$0xff]  ;;  %v13875_v48 = vpack.c.bf16 %v6002_v44, %v5998_v35  ;;  %v6032_v35 = vld [vmem:[#allocation13 + $0x168] sm:$0xff]  ;;  %v6030_v44 = vld [vmem:[#allocation13 + $0x158] sm:$0xff] }
0x12c2   :  { %v5499_v30 = vmul.f32 %v11845_v29, %v13762_v19  ;;  %v11847_v25 = vpop.eup %11846  ;;  %v5994_v19 = vld [vmem:[#allocation13 + $0x38] sm:$0xff]  ;;  %v13877_v29 = vpack.c.bf16 %v5999_v10, %v5995_v23  ;;  %v13920_v23 = vpack.c.bf16 %v6032_v35, %v6028_v59  ;;  %v6047_v59 = vld [vmem:[#allocation13 + $0x1e0] sm:$0xff]  ;;  %v6045_v35 = vld [vmem:[#allocation13 + $0x1d0] sm:$0xff] }
0x12c3   :  { %v6034_v10 = vld [vmem:[#allocation13 + $0x178] sm:$0xff] }
0x12c4   :  { %v13808_v21 = vadd.f32 %v5500_v0, %v5499_v30  ;;  %v5997_v0 = vld [vmem:[#allocation13 + $0x50] sm:$0xff] }
0x12c5   :  { %v13880_v30 = vpack.c.bf16 %v6001_v36, %v5997_v0  ;;  %v6027_v0 = vld [vmem:[#allocation13 + $0x140] sm:$0xff] }
0x12c6   :  { %11848 = vtanh.f32 %v13808_v21  ;;  %v6031_v36 = vld [vmem:[#allocation13 + $0x160] sm:$0xff] }
0x12d0   :  { %v11849_v6 = vpop.eup %11848 }
0x12d1   :  { %v13811_v46 = vmul.f32 %v11849_v6, %v11847_v25  ;;  %v6008_v25 = vld [vmem:[#allocation13 + $0xa8] sm:$0xff]  ;;  %v6006_v6 = vld [vmem:[#allocation13 + $0x98] sm:$0xff] }
0x12d3   :  { %5638 = vmatmul.mubr.f32.vlgmr.msra.gmra.mrb[36].mxu0 %v13811_v46  ;;  %5709 = vmatmul.mubr.f32.vlgmr.msra.gmra.mrb[36].mxu1 %v13811_v46 }
0x12d4   :  { %10377 = vmatpush1.bf16.msra.mxu0 %v13606_v50  ;;  %10409 = vmatpush1.bf16.msra.mxu1 %v13609_v55 }
0x12d5   :  { %10379 = vmatprep.subr.bf16.mxu0 %v13614_v39  ;;  %10411 = vmatprep.subr.bf16.mxu1 %v13616_v31 }
0x12d6   :  { %5876 = vmatprep.mubr.f32.mxu0 %v12245_v1  ;;  %5947 = vmatprep.mubr.f32.mxu1 %v12245_v1 }
0x12d8   :  { %10381 = vmatpush1.bf16.msra.mxu0 %v13618_v26  ;;  %10413 = vmatpush1.bf16.msra.mxu1 %v13621_v32 }
0x12d9   :  { %10383 = vmatprep.subr.bf16.mxu0 %v13626_v2  ;;  %10415 = vmatprep.subr.bf16.mxu1 %v13628_v33 }
0x12dc   :  { %10385 = vmatpush1.bf16.msra.mxu0 %v13630_v41  ;;  %10417 = vmatpush1.bf16.msra.mxu1 %v13633_v54 }
0x12dd   :  { %10387 = vmatprep.subr.bf16.mxu0 %v13638_v62  ;;  %10419 = vmatprep.subr.bf16.mxu1 %v13640_v4 }
0x12e0   :  { %10389 = vmatpush1.bf16.msra.mxu0 %v13642_v43  ;;  %10421 = vmatpush1.bf16.msra.mxu1 %v13645_v8 }
0x12e1   :  { %10391 = vmatprep.subr.bf16.mxu0 %v13649_v16  ;;  %10423 = vmatprep.subr.bf16.mxu1 %v13651_v58 }
0x12e4   :  { %10393 = vmatpush1.bf16.msra.mxu0 %v13654_v56  ;;  %10425 = vmatpush1.bf16.msra.mxu1 %v13658_v49 }
0x12e5   :  { %10395 = vmatprep.subr.bf16.mxu0 %v13660_v47  ;;  %10427 = vmatprep.subr.bf16.mxu1 %v13662_v9 }
0x12e8   :  { %10397 = vmatpush1.bf16.msra.mxu0 %v13665_v27  ;;  %10429 = vmatpush1.bf16.msra.mxu1 %v13669_v51 }
0x12e9   :  { %10399 = vmatprep.subr.bf16.mxu0 %v13671_v45  ;;  %10431 = vmatprep.subr.bf16.mxu1 %v13674_v38 }
0x12ec   :  { %10401 = vmatpush1.bf16.msra.mxu0 %v13677_v22  ;;  %10433 = vmatpush1.bf16.msra.mxu1 %v13681_v40 }
0x12ed   :  { %10403 = vmatprep.subr.bf16.mxu0 %v13686_v57  ;;  %10435 = vmatprep.subr.bf16.mxu1 %v13688_v42  ;;  %v5988_v57 = vld [vmem:[#allocation13 + $0x8] sm:$0xff] }
0x12ee   :  { %v5992_v42 = vld [vmem:[#allocation13 + $0x28] sm:$0xff] }
0x12f0   :  { %10405 = vmatpush1.bf16.msra.mxu0 %v13690_v60  ;;  %10437 = vmatpush1.bf16.msra.mxu1 %v13693_v53  ;;  %v5990_v60 = vld [vmem:[#allocation13 + $0x18] sm:$0xff]  ;;  %v13861_v53 = vpack.c.bf16 %v5992_v42, %v5988_v57 }
0x12f1   :  { %v13863_v63 = vpack.c.bf16 %v5994_v19, %v5990_v60  ;;  %v6026_v42 = vld [vmem:[#allocation13 + $0x138] sm:$0xff]  ;;  %v6019_v60 = vld [vmem:[#allocation13 + $0x100] sm:$0xff] }
0x12f2   :  { %10439 = vmatprep.subr.bf16.mxu0 %v13861_v53  ;;  %v6023_v19 = vld [vmem:[#allocation13 + $0x120] sm:$0xff] }
0x12f3   :  { %10471 = vmatprep.subr.bf16.mxu1 %v13863_v63  ;;  %v13913_v13 = vpack.c.bf16 %v6023_v19, %v6019_v60  ;;  %v6046_v60 = vld [vmem:[#allocation13 + $0x1d8] sm:$0xff] }
0x12f4   :  { %v6050_v19 = vld [vmem:[#allocation13 + $0x1f8] sm:$0xff] }
0x12f5   :  { %v13945_v20 = vpack.c.bf16 %v6050_v19, %v6046_v60 }
0x13a6   :  { %v5639_v50 = vpop.f32.mrb[36].mxu0  ;;  %v5710_v55 = vpop.f32.mrb[36].mxu1 }
0x13a7   :  { %v11362_v39 = vadd.f32 %v5639_v50, %v13747_v5  ;;  %v5641_v31 = vpop.f32.mrb[37].mxu0  ;;  %v5712_v26 = vpop.f32.mrb[37].mxu1  ;;  %v11378_v62 = vadd.f32 %v5710_v55, %v13759_v28  ;;  %v6010_v55 = vld [vmem:[#allocation13 + $0xb8] sm:$0xff] }
0x13a8   :  { %v11363_v32 = vadd.f32 %v5641_v31, %v13750_v24  ;;  %v11379_v41 = vadd.f32 %v5712_v26, %v13755_v52  ;;  %v6007_v31 = vld [vmem:[#allocation13 + $0xa0] sm:$0xff]  ;;  %v13887_v26 = vpack.c.bf16 %v6010_v55, %v6006_v6  ;;  %v6029_v6 = vld [vmem:[#allocation13 + $0x150] sm:$0xff] }
0x13a9   :  { %v8927_v2 = vmul.f32 -1.442695, %v11362_v39  ;;  %v6003_v39 = vld [vmem:[#allocation13 + $0x80] sm:$0xff]  ;;  %v6033_v55 = vld [vmem:[#allocation13 + $0x170] sm:$0xff] }
0x13aa   :  { %v8928_v33 = vmul.f32 -1.442695, %v11363_v32  ;;  %v8929_v54 = vmul.f32 -1.442695, %v11379_v41  ;;  %v13889_v32 = vpack.c.bf16 %v6007_v31, %v6003_v39  ;;  %v6036_v39 = vld [vmem:[#allocation13 + $0x188] sm:$0xff]  ;;  %v13928_v31 = vpack.c.bf16 %v6033_v55, %v6029_v6 }
0x13ab   :  { %11850 = vpow2.f32 %v8927_v2  ;;  %v6005_v2 = vld [vmem:[#allocation13 + $0x90] sm:$0xff] }
0x13ac   :  { %11852 = vpow2.f32 %v8928_v33  ;;  %v6009_v33 = vld [vmem:[#allocation13 + $0xb0] sm:$0xff] }
0x13ad   :  { %11854 = vpow2.f32 %v8929_v54  ;;  %v13892_v41 = vpack.c.bf16 %v6009_v33, %v6005_v2  ;;  %v6012_v54 = vld [vmem:[#allocation13 + $0xc8] sm:$0xff]  ;;  %v6038_v33 = vld [vmem:[#allocation13 + $0x198] sm:$0xff] }
0x13ae   :  { %11856 = vtanh.f32 %v11378_v62  ;;  %v6016_v62 = vld [vmem:[#allocation13 + $0xe8] sm:$0xff] }
0x13af   :  { %v6040_v2 = vld [vmem:[#allocation13 + $0x1a8] sm:$0xff] }
0x13b5   :  { %v11851_v4 = vpop.eup %11850 }
0x13b6   :  { %v11853_v43 = vpop.eup %11852  ;;  %v5722_v8 = vadd.f32 1.0, %v11851_v4  ;;  %v6014_v4 = vld [vmem:[#allocation13 + $0xd8] sm:$0xff] }
0x13b7   :  { %v5728_v16 = vadd.f32 1.0, %v11853_v43  ;;  %v11855_v58 = vpop.eup %11854  ;;  %v13897_v43 = vpack.c.bf16 %v6016_v62, %v6012_v54  ;;  %v6042_v54 = vld [vmem:[#allocation13 + $0x1b8] sm:$0xff]  ;;  %v13931_v62 = vpack.c.bf16 %v6040_v2, %v6036_v39 }
0x13b8   :  { %11858 = vrcp.f32 %v5722_v8  ;;  %v11857_v56 = vpop.eup %11856  ;;  %v5735_v27 = vadd.f32 1.0, %v11855_v58  ;;  %v6018_v8 = vld [vmem:[#allocation13 + $0xf8] sm:$0xff]  ;;  %v6015_v58 = vld [vmem:[#allocation13 + $0xe0] sm:$0xff] }
0x13b9   :  { %11860 = vrcp.f32 %v5728_v16  ;;  %v6011_v16 = vld [vmem:[#allocation13 + $0xc0] sm:$0xff] }
0x13ba   :  { %11862 = vrcp.f32 %v5735_v27 }
0x13c2   :  { %v11859_v49 = vpop.eup %11858 }
0x13c3   :  { %v11861_v47 = vpop.eup %11860  ;;  %v5739_v9 = vmul.f32 %v11859_v49, %v11857_v56  ;;  %v13899_v56 = vpack.c.bf16 %v6018_v8, %v6014_v4  ;;  %v13901_v49 = vpack.c.bf16 %v6015_v58, %v6011_v16  ;;  %v13933_v4 = vpack.c.bf16 %v6042_v54, %v6038_v33  ;;  %v6035_v8 = vld [vmem:[#allocation13 + $0x180] sm:$0xff]  ;;  %v6037_v58 = vld [vmem:[#allocation13 + $0x190] sm:$0xff] }
0x13c4   :  { %v5738_v51 = vmul.f32 %v11861_v47, %v13808_v21  ;;  %v11863_v38 = vpop.eup %11862  ;;  %v6004_v21 = vld [vmem:[#allocation13 + $0x88] sm:$0xff]  ;;  %v6013_v47 = vld [vmem:[#allocation13 + $0xd0] sm:$0xff]  ;;  %v6039_v16 = vld [vmem:[#allocation13 + $0x1a0] sm:$0xff] }
0x13c5   :  { %v13885_v50 = vpack.c.bf16 %v6008_v25, %v6004_v21  ;;  %v13923_v21 = vpack.c.bf16 %v6034_v10, %v6030_v44  ;;  %v13925_v25 = vpack.c.bf16 %v6031_v36, %v6027_v0  ;;  %v6049_v44 = vld [vmem:[#allocation13 + $0x1f0] sm:$0xff]  ;;  %v13948_v10 = vpack.c.bf16 %v6047_v59, %v6043_v17 }
0x13c6   :  { %v13852_v45 = vadd.f32 %v5739_v9, %v5738_v51  ;;  %v6017_v9 = vld [vmem:[#allocation13 + $0xf0] sm:$0xff]  ;;  %v6020_v51 = vld [vmem:[#allocation13 + $0x108] sm:$0xff]  ;;  %v13952_v0 = vpack.c.bf16 %v6049_v44, %v6045_v35 }
0x13c7   :  { %v13904_v27 = vpack.c.bf16 %v6017_v9, %v6013_v47  ;;  %v13936_v47 = vpack.c.bf16 %v6039_v16, %v6035_v8  ;;  %v6041_v9 = vld [vmem:[#allocation13 + $0x1b0] sm:$0xff] }
0x13c8   :  { %11864 = vtanh.f32 %v13852_v45 }
0x13d2   :  { %v11865_v22 = vpop.eup %11864 }
0x13d3   :  { %v13855_v40 = vmul.f32 %v11865_v22, %v11863_v38  ;;  %v6024_v38 = vld [vmem:[#allocation13 + $0x128] sm:$0xff]  ;;  %v6022_v22 = vld [vmem:[#allocation13 + $0x118] sm:$0xff] }
0x13d4   :  { %v13909_v57 = vpack.c.bf16 %v6024_v38, %v6020_v51  ;;  %v13911_v61 = vpack.c.bf16 %v6026_v42, %v6022_v22  ;;  %v6044_v51 = vld [vmem:[#allocation13 + $0x1c8] sm:$0xff]  ;;  %v13940_v22 = vpack.c.bf16 %v6041_v9, %v6037_v58 }
0x13d5   :  { %5877 = vmatmul.mubr.f32.vlgmr.msra.gmra.mrb[38].mxu0 %v13855_v40  ;;  %5948 = vmatmul.mubr.f32.vlgmr.msra.gmra.mrb[38].mxu1 %v13855_v40  ;;  %v6048_v38 = vld [vmem:[#allocation13 + $0x1e8] sm:$0xff] }
0x13d6   :  { %6115 = vmatprep.mubr.f32.mxu0 %v12245_v1  ;;  %6186 = vmatprep.mubr.f32.mxu1 %v12245_v1  ;;  %v13942_v42 = vpack.c.bf16 %v6048_v38, %v6044_v51 }
0x13d7   :  { %10441 = vmatpush1.bf16.msra.mxu0 %v13865_v3  ;;  %10473 = vmatpush1.bf16.msra.mxu1 %v13868_v7 }
0x13d8   :  { %10443 = vmatprep.subr.bf16.mxu0 %v13873_v15  ;;  %10475 = vmatprep.subr.bf16.mxu1 %v13875_v48 }
0x13db   :  { %10445 = vmatpush1.bf16.msra.mxu0 %v13877_v29  ;;  %10477 = vmatpush1.bf16.msra.mxu1 %v13880_v30 }
0x13dc   :  { %10447 = vmatprep.subr.bf16.mxu0 %v13885_v50  ;;  %10479 = vmatprep.subr.bf16.mxu1 %v13887_v26 }
0x13df   :  { %10449 = vmatpush1.bf16.msra.mxu0 %v13889_v32  ;;  %10481 = vmatpush1.bf16.msra.mxu1 %v13892_v41 }
0x13e0   :  { %10451 = vmatprep.subr.bf16.mxu0 %v13897_v43  ;;  %10483 = vmatprep.subr.bf16.mxu1 %v13899_v56 }
0x13e3   :  { %10453 = vmatpush1.bf16.msra.mxu0 %v13901_v49  ;;  %10485 = vmatpush1.bf16.msra.mxu1 %v13904_v27 }
0x13e4   :  { %10455 = vmatprep.subr.bf16.mxu0 %v13909_v57  ;;  %10487 = vmatprep.subr.bf16.mxu1 %v13911_v61 }
0x13e7   :  { %10457 = vmatpush1.bf16.msra.mxu0 %v13913_v13  ;;  %10489 = vmatpush1.bf16.msra.mxu1 %v13916_v34 }
0x13e8   :  { %10459 = vmatprep.subr.bf16.mxu0 %v13920_v23  ;;  %10491 = vmatprep.subr.bf16.mxu1 %v13923_v21 }
0x13eb   :  { %10461 = vmatpush1.bf16.msra.mxu0 %v13925_v25  ;;  %10493 = vmatpush1.bf16.msra.mxu1 %v13928_v31 }
0x13ec   :  { %10463 = vmatprep.subr.bf16.mxu0 %v13931_v62  ;;  %10495 = vmatprep.subr.bf16.mxu1 %v13933_v4 }
0x13ef   :  { %10465 = vmatpush1.bf16.msra.mxu0 %v13936_v47  ;;  %10497 = vmatpush1.bf16.msra.mxu1 %v13940_v22 }
0x13f0   :  { %10467 = vmatprep.subr.bf16.mxu0 %v13942_v42  ;;  %10499 = vmatprep.subr.bf16.mxu1 %v13945_v20 }
0x13f3   :  { %10469 = vmatpush1.bf16.msra.mxu0 %v13948_v10  ;;  %10501 = vmatpush1.bf16.msra.mxu1 %v13952_v0 }
0x13f4   :  { %10503 = vmatprep.subr.bf16.mxu0 %v13861_v53  ;;  %10535 = vmatprep.subr.bf16.mxu1 %v13863_v63 }
0x14a8   :  { %v5878_v36 = vpop.f32.mrb[38].mxu0  ;;  %v5949_v6 = vpop.f32.mrb[38].mxu1 }
0x14a9   :  { %v11364_v55 = vadd.f32 %v5878_v36, %v13747_v5  ;;  %v5880_v39 = vpop.f32.mrb[39].mxu0  ;;  %v5951_v2 = vpop.f32.mrb[39].mxu1  ;;  %v11380_v9 = vadd.f32 %v5949_v6, %v13759_v28 }
0x14aa   :  { %v11365_v33 = vadd.f32 %v5880_v39, %v13750_v24  ;;  %v11381_v16 = vadd.f32 %v5951_v2, %v13755_v52 }
0x14ab   :  { %v8930_v54 = vmul.f32 -1.442695, %v11364_v55 }
0x14ac   :  { %v8931_v8 = vmul.f32 -1.442695, %v11365_v33  ;;  %v8932_v58 = vmul.f32 -1.442695, %v11381_v16 }
0x14ad   :  { %11866 = vpow2.f32 %v8930_v54 }
0x14ae   :  { %11868 = vpow2.f32 %v8931_v8 }
0x14af   :  { %11870 = vpow2.f32 %v8932_v58 }
0x14b0   :  { %11872 = vtanh.f32 %v11380_v9 }
0x14b7   :  { %v11867_v51 = vpop.eup %11866 }
0x14b8   :  { %v11869_v38 = vpop.eup %11868  ;;  %v5961_v60 = vadd.f32 1.0, %v11867_v51 }
0x14b9   :  { %v5967_v19 = vadd.f32 1.0, %v11869_v38  ;;  %v11871_v17 = vpop.eup %11870 }
0x14ba   :  { %11874 = vrcp.f32 %v5961_v60  ;;  %v11873_v59 = vpop.eup %11872  ;;  %v5974_v55 = vadd.f32 1.0, %v11871_v17 }
0x14bb   :  { %11876 = vrcp.f32 %v5967_v19 }
0x14bc   :  { %11878 = vrcp.f32 %v5974_v55 }
0x14c4   :  { %v11875_v35 = vpop.eup %11874 }
0x14c5   :  { %v11877_v44 = vpop.eup %11876  ;;  %v5978_v36 = vmul.f32 %v11875_v35, %v11873_v59 }
0x14c6   :  { %v5977_v39 = vmul.f32 %v11877_v44, %v13852_v45  ;;  %v11879_v6 = vpop.eup %11878 }
0x14c8   :  { %v13964_v2 = vadd.f32 %v5978_v36, %v5977_v39 }
0x14ca   :  { %11880 = vtanh.f32 %v13964_v2 }
0x14d4   :  { %v11881_v33 = vpop.eup %11880 }
0x14d5   :  { %v13967_v54 = vmul.f32 %v11881_v33, %v11879_v6 }
0x14d7   :  { %6116 = vmatmul.mubr.f32.vlgmr.msra.gmra.mrb[40].mxu0 %v13967_v54  ;;  %6187 = vmatmul.mubr.f32.vlgmr.msra.gmra.mrb[40].mxu1 %v13967_v54 }
0x14d8   :  { %10505 = vmatpush1.bf16.msra.mxu0 %v13865_v3  ;;  %10537 = vmatpush1.bf16.msra.mxu1 %v13868_v7 }
0x14d9   :  { %10507 = vmatprep.subr.bf16.mxu0 %v13873_v15  ;;  %10539 = vmatprep.subr.bf16.mxu1 %v13875_v48 }
0x14da   :  { %6354 = vmatprep.mubr.f32.mxu0 %v12245_v1  ;;  %6425 = vmatprep.mubr.f32.mxu1 %v12245_v1 }
0x14dc   :  { %10509 = vmatpush1.bf16.msra.mxu0 %v13877_v29  ;;  %10541 = vmatpush1.bf16.msra.mxu1 %v13880_v30 }
0x14dd   :  { %10511 = vmatprep.subr.bf16.mxu0 %v13885_v50  ;;  %10543 = vmatprep.subr.bf16.mxu1 %v13887_v26 }
0x14e0   :  { %10513 = vmatpush1.bf16.msra.mxu0 %v13889_v32  ;;  %10545 = vmatpush1.bf16.msra.mxu1 %v13892_v41 }
0x14e1   :  { %10515 = vmatprep.subr.bf16.mxu0 %v13897_v43  ;;  %10547 = vmatprep.subr.bf16.mxu1 %v13899_v56 }
0x14e4   :  { %10517 = vmatpush1.bf16.msra.mxu0 %v13901_v49  ;;  %10549 = vmatpush1.bf16.msra.mxu1 %v13904_v27 }
0x14e5   :  { %10519 = vmatprep.subr.bf16.mxu0 %v13909_v57  ;;  %10551 = vmatprep.subr.bf16.mxu1 %v13911_v61 }
0x14e8   :  { %10521 = vmatpush1.bf16.msra.mxu0 %v13913_v13  ;;  %10553 = vmatpush1.bf16.msra.mxu1 %v13916_v34 }
0x14e9   :  { %10523 = vmatprep.subr.bf16.mxu0 %v13920_v23  ;;  %10555 = vmatprep.subr.bf16.mxu1 %v13923_v21 }
0x14ec   :  { %10525 = vmatpush1.bf16.msra.mxu0 %v13925_v25  ;;  %10557 = vmatpush1.bf16.msra.mxu1 %v13928_v31 }
0x14ed   :  { %10527 = vmatprep.subr.bf16.mxu0 %v13931_v62  ;;  %10559 = vmatprep.subr.bf16.mxu1 %v13933_v4 }
0x14f0   :  { %10529 = vmatpush1.bf16.msra.mxu0 %v13936_v47  ;;  %10561 = vmatpush1.bf16.msra.mxu1 %v13940_v22 }
0x14f1   :  { %10531 = vmatprep.subr.bf16.mxu0 %v13942_v42  ;;  %10563 = vmatprep.subr.bf16.mxu1 %v13945_v20 }
0x14f4   :  { %10533 = vmatpush1.bf16.msra.mxu0 %v13948_v10  ;;  %10565 = vmatpush1.bf16.msra.mxu1 %v13952_v0 }
0x14f5   :  { %10567 = vmatprep.subr.bf16.mxu0 %v13861_v53  ;;  %10599 = vmatprep.subr.bf16.mxu1 %v13863_v63 }
0x15aa   :  { %v6117_v45 = vpop.f32.mrb[40].mxu0  ;;  %v6188_v8 = vpop.f32.mrb[40].mxu1 }
0x15ab   :  { %v11366_v16 = vadd.f32 %v6117_v45, %v13747_v5  ;;  %v6119_v58 = vpop.f32.mrb[41].mxu0  ;;  %v6190_v9 = vpop.f32.mrb[41].mxu1  ;;  %v11382_v59 = vadd.f32 %v6188_v8, %v13759_v28 }
0x15ac   :  { %v11367_v51 = vadd.f32 %v6119_v58, %v13750_v24  ;;  %v11383_v19 = vadd.f32 %v6190_v9, %v13755_v52 }
0x15ad   :  { %v8933_v38 = vmul.f32 -1.442695, %v11366_v16 }
0x15ae   :  { %v8934_v60 = vmul.f32 -1.442695, %v11367_v51  ;;  %v8935_v17 = vmul.f32 -1.442695, %v11383_v19 }
0x15af   :  { %11882 = vpow2.f32 %v8933_v38 }
0x15b0   :  { %11884 = vpow2.f32 %v8934_v60 }
0x15b1   :  { %11886 = vpow2.f32 %v8935_v17 }
0x15b2   :  { %11888 = vtanh.f32 %v11382_v59 }
0x15b9   :  { %v11883_v35 = vpop.eup %11882 }
0x15ba   :  { %v11885_v44 = vpop.eup %11884  ;;  %v6200_v36 = vadd.f32 1.0, %v11883_v35 }
0x15bb   :  { %v6206_v55 = vadd.f32 1.0, %v11885_v44  ;;  %v11887_v39 = vpop.eup %11886 }
0x15bc   :  { %11890 = vrcp.f32 %v6200_v36  ;;  %v11889_v6 = vpop.eup %11888  ;;  %v6213_v58 = vadd.f32 1.0, %v11887_v39 }
0x15bd   :  { %11892 = vrcp.f32 %v6206_v55 }
0x15be   :  { %11894 = vrcp.f32 %v6213_v58 }
0x15c6   :  { %v11891_v33 = vpop.eup %11890 }
0x15c7   :  { %v11893_v45 = vpop.eup %11892  ;;  %v6217_v16 = vmul.f32 %v11891_v33, %v11889_v6 }
0x15c8   :  { %v6216_v51 = vmul.f32 %v11893_v45, %v13964_v2  ;;  %v11895_v8 = vpop.eup %11894 }
0x15ca   :  { %v14010_v9 = vadd.f32 %v6217_v16, %v6216_v51 }
0x15cc   :  { %11896 = vtanh.f32 %v14010_v9 }
0x15d6   :  { %v11897_v38 = vpop.eup %11896 }
0x15d7   :  { %v14013_v60 = vmul.f32 %v11897_v38, %v11895_v8 }
0x15d9   :  { %6355 = vmatmul.mubr.f32.vlgmr.msra.gmra.mrb[42].mxu0 %v14013_v60  ;;  %6426 = vmatmul.mubr.f32.vlgmr.msra.gmra.mrb[42].mxu1 %v14013_v60 }
0x15da   :  { %10569 = vmatpush1.bf16.msra.mxu0 %v13865_v3  ;;  %10601 = vmatpush1.bf16.msra.mxu1 %v13868_v7 }
0x15db   :  { %10571 = vmatprep.subr.bf16.mxu0 %v13873_v15  ;;  %10603 = vmatprep.subr.bf16.mxu1 %v13875_v48 }
0x15dc   :  { %6593 = vmatprep.mubr.f32.mxu0 %v12245_v1  ;;  %6664 = vmatprep.mubr.f32.mxu1 %v12245_v1 }
0x15de   :  { %10573 = vmatpush1.bf16.msra.mxu0 %v13877_v29  ;;  %10605 = vmatpush1.bf16.msra.mxu1 %v13880_v30 }
0x15df   :  { %10575 = vmatprep.subr.bf16.mxu0 %v13885_v50  ;;  %10607 = vmatprep.subr.bf16.mxu1 %v13887_v26 }
0x15e2   :  { %10577 = vmatpush1.bf16.msra.mxu0 %v13889_v32  ;;  %10609 = vmatpush1.bf16.msra.mxu1 %v13892_v41 }
0x15e3   :  { %10579 = vmatprep.subr.bf16.mxu0 %v13897_v43  ;;  %10611 = vmatprep.subr.bf16.mxu1 %v13899_v56 }
0x15e6   :  { %10581 = vmatpush1.bf16.msra.mxu0 %v13901_v49  ;;  %10613 = vmatpush1.bf16.msra.mxu1 %v13904_v27 }
0x15e7   :  { %10583 = vmatprep.subr.bf16.mxu0 %v13909_v57  ;;  %10615 = vmatprep.subr.bf16.mxu1 %v13911_v61 }
0x15ea   :  { %10585 = vmatpush1.bf16.msra.mxu0 %v13913_v13  ;;  %10617 = vmatpush1.bf16.msra.mxu1 %v13916_v34 }
0x15eb   :  { %10587 = vmatprep.subr.bf16.mxu0 %v13920_v23  ;;  %10619 = vmatprep.subr.bf16.mxu1 %v13923_v21 }
0x15ee   :  { %10589 = vmatpush1.bf16.msra.mxu0 %v13925_v25  ;;  %10621 = vmatpush1.bf16.msra.mxu1 %v13928_v31 }
0x15ef   :  { %10591 = vmatprep.subr.bf16.mxu0 %v13931_v62  ;;  %10623 = vmatprep.subr.bf16.mxu1 %v13933_v4 }
0x15f2   :  { %10593 = vmatpush1.bf16.msra.mxu0 %v13936_v47  ;;  %10625 = vmatpush1.bf16.msra.mxu1 %v13940_v22 }
0x15f3   :  { %10595 = vmatprep.subr.bf16.mxu0 %v13942_v42  ;;  %10627 = vmatprep.subr.bf16.mxu1 %v13945_v20 }
0x15f6   :  { %10597 = vmatpush1.bf16.msra.mxu0 %v13948_v10  ;;  %10629 = vmatpush1.bf16.msra.mxu1 %v13952_v0 }
0x15f7   :  { %10631 = vmatprep.subr.bf16.mxu0 %v13861_v53  ;;  %10663 = vmatprep.subr.bf16.mxu1 %v13863_v63 }
0x16ac   :  { %v6356_v2 = vpop.f32.mrb[42].mxu0  ;;  %v6427_v19 = vpop.f32.mrb[42].mxu1 }
0x16ad   :  { %v11368_v17 = vadd.f32 %v6356_v2, %v13747_v5  ;;  %v6358_v59 = vpop.f32.mrb[43].mxu0  ;;  %v6429_v35 = vpop.f32.mrb[43].mxu1  ;;  %v11384_v33 = vadd.f32 %v6427_v19, %v13759_v28 }
0x16ae   :  { %v11369_v44 = vadd.f32 %v6358_v59, %v13750_v24  ;;  %v11385_v39 = vadd.f32 %v6429_v35, %v13755_v52 }
0x16af   :  { %v8936_v36 = vmul.f32 -1.442695, %v11368_v17 }
0x16b0   :  { %v8937_v55 = vmul.f32 -1.442695, %v11369_v44  ;;  %v8938_v6 = vmul.f32 -1.442695, %v11385_v39  ;;  %v6953_v39 = vld [vmem:[#allocation9 + $0x30] sm:$0xff] }
0x16b1   :  { %11898 = vpow2.f32 %v8936_v36 }
0x16b2   :  { %11900 = vpow2.f32 %v8937_v55  ;;  %v6949_v55 = vld [vmem:[#allocation9 + $0x10] sm:$0xff] }
0x16b3   :  { %11902 = vpow2.f32 %v8938_v6  ;;  %v6956_v6 = vld [vmem:[#allocation9 + $0x48] sm:$0xff] }
0x16b4   :  { %11904 = vtanh.f32 %v11384_v33  ;;  %v6960_v33 = vld [vmem:[#allocation9 + $0x68] sm:$0xff] }
0x16bb   :  { %v11899_v53 = vpop.eup %11898 }
0x16bc   :  { %v11901_v45 = vpop.eup %11900  ;;  %v6439_v63 = vadd.f32 1.0, %v11899_v53  ;;  %v6958_v53 = vld [vmem:[#allocation9 + $0x58] sm:$0xff] }
0x16bd   :  { %v6445_v16 = vadd.f32 1.0, %v11901_v45  ;;  %v11903_v58 = vpop.eup %11902  ;;  %v6962_v45 = vld [vmem:[#allocation9 + $0x78] sm:$0xff] }
0x16be   :  { %11906 = vrcp.f32 %v6439_v63  ;;  %v11905_v51 = vpop.eup %11904  ;;  %v6452_v17 = vadd.f32 1.0, %v11903_v58 }
0x16bf   :  { %11908 = vrcp.f32 %v6445_v16 }
0x16c0   :  { %11910 = vrcp.f32 %v6452_v17  ;;  %v10698_v17 = vpack.c.bf16 %v6960_v33, %v6956_v6  ;;  %v6981_v33 = vld [vmem:[#allocation9 + $0x110] sm:$0xff] }
0x16c8   :  { %v11907_v8 = vpop.eup %11906 }
0x16c9   :  { %v11909_v38 = vpop.eup %11908  ;;  %v6456_v2 = vmul.f32 %v11907_v8, %v11905_v51  ;;  %v10728_v51 = vpack.c.bf16 %v6953_v39, %v6949_v55  ;;  %v6955_v8 = vld [vmem:[#allocation9 + $0x40] sm:$0xff] }
0x16ca   :  { %v6455_v59 = vmul.f32 %v11909_v38, %v14010_v9  ;;  %v11911_v19 = vpop.eup %11910  ;;  %v6951_v9 = vld [vmem:[#allocation9 + $0x20] sm:$0xff] }
0x16cb   :  { %v6959_v38 = vld [vmem:[#allocation9 + $0x60] sm:$0xff] }
0x16cc   :  { %v14056_v35 = vadd.f32 %v6456_v2, %v6455_v59  ;;  %v10730_v59 = vpack.c.bf16 %v6962_v45, %v6958_v53  ;;  %v6983_v55 = vld [vmem:[#allocation9 + $0x120] sm:$0xff]  ;;  %v6985_v53 = vld [vmem:[#allocation9 + $0x130] sm:$0xff]  ;;  %v6988_v45 = vld [vmem:[#allocation9 + $0x148] sm:$0xff] }
0x16ce   :  { %11912 = vtanh.f32 %v14056_v35 }
0x16d8   :  { %v11913_v44 = vpop.eup %11912 }
0x16d9   :  { %v14059_v36 = vmul.f32 %v11913_v44, %v11911_v19  ;;  %v6961_v19 = vld [vmem:[#allocation9 + $0x70] sm:$0xff]  ;;  %v6964_v44 = vld [vmem:[#allocation9 + $0x88] sm:$0xff] }
0x16db   :  { %6594 = vmatmul.mubr.f32.vlgmr.msra.gmra.mrb[44].mxu0 %v14059_v36  ;;  %6665 = vmatmul.mubr.f32.vlgmr.msra.gmra.mrb[44].mxu1 %v14059_v36 }
0x16dc   :  { %10633 = vmatpush1.bf16.msra.mxu0 %v13865_v3  ;;  %10665 = vmatpush1.bf16.msra.mxu1 %v13868_v7  ;;  %v6948_v3 = vld [vmem:[#allocation9 + $0x8] sm:$0xff] }
0x16dd   :  { %10635 = vmatprep.subr.bf16.mxu0 %v13873_v15  ;;  %10667 = vmatprep.subr.bf16.mxu1 %v13875_v48  ;;  %v6952_v7 = vld [vmem:[#allocation9 + $0x28] sm:$0xff]  ;;  %v6950_v15 = vld [vmem:[#allocation9 + $0x18] sm:$0xff] }
0x16de   :  { %6832 = vmatprep.mubr.f32.mxu0 %v12245_v1  ;;  %6903 = vmatprep.mubr.f32.mxu1 %v12245_v1  ;;  %v10694_v48 = vpack.c.bf16 %v6952_v7, %v6948_v3  ;;  %v6968_v3 = vld [vmem:[#allocation9 + $0xa8] sm:$0xff]  ;;  %v6966_v7 = vld [vmem:[#allocation9 + $0x98] sm:$0xff] }
0x16e0   :  { %10637 = vmatpush1.bf16.msra.mxu0 %v13877_v29  ;;  %10669 = vmatpush1.bf16.msra.mxu1 %v13880_v30  ;;  %v6954_v29 = vld [vmem:[#allocation9 + $0x38] sm:$0xff] }
0x16e1   :  { %10639 = vmatprep.subr.bf16.mxu0 %v13885_v50  ;;  %10671 = vmatprep.subr.bf16.mxu1 %v13887_v26  ;;  %v10726_v30 = vpack.c.bf16 %v6954_v29, %v6950_v15  ;;  %v6970_v15 = vld [vmem:[#allocation9 + $0xb8] sm:$0xff] }
0x16e4   :  { %10641 = vmatpush1.bf16.msra.mxu0 %v13889_v32  ;;  %10673 = vmatpush1.bf16.msra.mxu1 %v13892_v41 }
0x16e5   :  { %10643 = vmatprep.subr.bf16.mxu0 %v13897_v43  ;;  %10675 = vmatprep.subr.bf16.mxu1 %v13899_v56 }
0x16e8   :  { %10645 = vmatpush1.bf16.msra.mxu0 %v13901_v49  ;;  %10677 = vmatpush1.bf16.msra.mxu1 %v13904_v27 }
0x16e9   :  { %10647 = vmatprep.subr.bf16.mxu0 %v13909_v57  ;;  %10679 = vmatprep.subr.bf16.mxu1 %v13911_v61 }
0x16ec   :  { %10649 = vmatpush1.bf16.msra.mxu0 %v13913_v13  ;;  %10681 = vmatpush1.bf16.msra.mxu1 %v13916_v34 }
0x16ed   :  { %10651 = vmatprep.subr.bf16.mxu0 %v13920_v23  ;;  %10683 = vmatprep.subr.bf16.mxu1 %v13923_v21 }
0x16f0   :  { %10653 = vmatpush1.bf16.msra.mxu0 %v13925_v25  ;;  %10685 = vmatpush1.bf16.msra.mxu1 %v13928_v31 }
0x16f1   :  { %10655 = vmatprep.subr.bf16.mxu0 %v13931_v62  ;;  %10687 = vmatprep.subr.bf16.mxu1 %v13933_v4 }
0x16f4   :  { %10657 = vmatpush1.bf16.msra.mxu0 %v13936_v47  ;;  %10689 = vmatpush1.bf16.msra.mxu1 %v13940_v22 }
0x16f5   :  { %10659 = vmatprep.subr.bf16.mxu0 %v13942_v42  ;;  %10691 = vmatprep.subr.bf16.mxu1 %v13945_v20 }
0x16f8   :  { %10661 = vmatpush1.bf16.msra.mxu0 %v13948_v10  ;;  %10693 = vmatpush1.bf16.msra.mxu1 %v13952_v0  ;;  %v6947_v0 = vld [vmem:[#allocation9] sm:$0xff] }
0x16f9   :  { %10695 = vmatprep.subr.bf16.mxu0 %v10694_v48  ;;  %10727 = vmatprep.subr.bf16.mxu1 %v10726_v30  ;;  %v10696_v58 = vpack.c.bf16 %v6951_v9, %v6947_v0  ;;  %v10700_v48 = vpack.c.bf16 %v6959_v38, %v6955_v8  ;;  %v6963_v30 = vld [vmem:[#allocation9 + $0x80] sm:$0xff]  ;;  %v10744_v8 = vpack.c.bf16 %v6985_v53, %v6981_v33  ;;  %v7306_v33 = vld [vmem:[#allocation15 + $0x58] sm:$0xff] }
0x16fa   :  { %v6979_v9 = vld [vmem:[#allocation9 + $0x100] sm:$0xff] }
0x16fb   :  { %v6987_v38 = vld [vmem:[#allocation9 + $0x140] sm:$0xff] }
0x17ae   :  { %v6595_v50 = vpop.f32.mrb[44].mxu0  ;;  %v6666_v26 = vpop.f32.mrb[44].mxu1 }
0x17af   :  { %v11370_v32 = vadd.f32 %v6595_v50, %v13747_v5  ;;  %v6597_v41 = vpop.f32.mrb[45].mxu0  ;;  %v6668_v43 = vpop.f32.mrb[45].mxu1  ;;  %v11386_v13 = vadd.f32 %v6666_v26, %v13759_v28  ;;  %v6967_v50 = vld [vmem:[#allocation9 + $0xa0] sm:$0xff]  ;;  %v10702_v26 = vpack.c.bf16 %v6968_v3, %v6964_v44  ;;  %v6993_v44 = vld [vmem:[#allocation9 + $0x170] sm:$0xff]  ;;  %v6996_v3 = vld [vmem:[#allocation9 + $0x188] sm:$0xff] }
0x17b0   :  { %v11371_v56 = vadd.f32 %v6597_v41, %v13750_v24  ;;  %v11387_v57 = vadd.f32 %v6668_v43, %v13755_v52  ;;  %v6965_v41 = vld [vmem:[#allocation9 + $0x90] sm:$0xff] }
0x17b1   :  { %v8939_v49 = vmul.f32 -1.442695, %v11370_v32  ;;  %v10734_v32 = vpack.c.bf16 %v6970_v15, %v6966_v7  ;;  %v6969_v43 = vld [vmem:[#allocation9 + $0xb0] sm:$0xff]  ;;  %v7000_v7 = vld [vmem:[#allocation9 + $0x1a8] sm:$0xff]  ;;  %v6998_v15 = vld [vmem:[#allocation9 + $0x198] sm:$0xff] }
0x17b2   :  { %v8940_v27 = vmul.f32 -1.442695, %v11371_v56  ;;  %v8941_v61 = vmul.f32 -1.442695, %v11387_v57  ;;  %v6972_v56 = vld [vmem:[#allocation9 + $0xc8] sm:$0xff]  ;;  %v6978_v57 = vld [vmem:[#allocation9 + $0xf8] sm:$0xff] }
0x17b3   :  { %11914 = vpow2.f32 %v8939_v49  ;;  %v6976_v49 = vld [vmem:[#allocation9 + $0xe8] sm:$0xff] }
0x17b4   :  { %11916 = vpow2.f32 %v8940_v27  ;;  %v6974_v27 = vld [vmem:[#allocation9 + $0xd8] sm:$0xff] }
0x17b5   :  { %11918 = vpow2.f32 %v8941_v61  ;;  %v10704_v61 = vpack.c.bf16 %v6967_v50, %v6963_v30  ;;  %v6995_v50 = vld [vmem:[#allocation9 + $0x180] sm:$0xff] }
0x17b6   :  { %11920 = vtanh.f32 %v11386_v13  ;;  %v10736_v13 = vpack.c.bf16 %v6969_v43, %v6965_v41  ;;  %v6997_v43 = vld [vmem:[#allocation9 + $0x190] sm:$0xff] }
0x17bd   :  { %v11915_v34 = vpop.eup %11914 }
0x17be   :  { %v11917_v23 = vpop.eup %11916  ;;  %v6678_v21 = vadd.f32 1.0, %v11915_v34  ;;  %v6971_v34 = vld [vmem:[#allocation9 + $0xc0] sm:$0xff] }
0x17bf   :  { %v6684_v25 = vadd.f32 1.0, %v11917_v23  ;;  %v11919_v31 = vpop.eup %11918  ;;  %v6975_v23 = vld [vmem:[#allocation9 + $0xe0] sm:$0xff] }
0x17c0   :  { %11922 = vrcp.f32 %v6678_v21  ;;  %v11921_v62 = vpop.eup %11920  ;;  %v6691_v42 = vadd.f32 1.0, %v11919_v31  ;;  %v10706_v21 = vpack.c.bf16 %v6976_v49, %v6972_v56  ;;  %v6973_v31 = vld [vmem:[#allocation9 + $0xd0] sm:$0xff]  ;;  %v7004_v49 = vld [vmem:[#allocation9 + $0x1c8] sm:$0xff] }
0x17c1   :  { %11924 = vrcp.f32 %v6684_v25  ;;  %v10738_v25 = vpack.c.bf16 %v6978_v57, %v6974_v27  ;;  %v7001_v56 = vld [vmem:[#allocation9 + $0x1b0] sm:$0xff]  ;;  %v7008_v27 = vld [vmem:[#allocation9 + $0x1e8] sm:$0xff]  ;;  %v7006_v57 = vld [vmem:[#allocation9 + $0x1d8] sm:$0xff] }
0x17c2   :  { %11926 = vrcp.f32 %v6691_v42  ;;  %v6986_v42 = vld [vmem:[#allocation9 + $0x138] sm:$0xff] }
0x17ca   :  { %v11923_v4 = vpop.eup %11922 }
0x17cb   :  { %v11925_v47 = vpop.eup %11924  ;;  %v6695_v22 = vmul.f32 %v11923_v4, %v11921_v62  ;;  %v6977_v62 = vld [vmem:[#allocation9 + $0xf0] sm:$0xff]  ;;  %v6980_v4 = vld [vmem:[#allocation9 + $0x108] sm:$0xff] }
0x17cc   :  { %v6694_v20 = vmul.f32 %v11925_v47, %v14056_v35  ;;  %v11927_v63 = vpop.eup %11926  ;;  %v6957_v35 = vld [vmem:[#allocation9 + $0x50] sm:$0xff]  ;;  %v6984_v47 = vld [vmem:[#allocation9 + $0x128] sm:$0xff]  ;;  %v10740_v0 = vpack.c.bf16 %v6977_v62, %v6973_v31  ;;  %v7007_v31 = vld [vmem:[#allocation9 + $0x1e0] sm:$0xff] }
0x17cd   :  { %v10732_v29 = vpack.c.bf16 %v6961_v19, %v6957_v35  ;;  %v10710_v39 = vpack.c.bf16 %v6984_v47, %v6980_v4  ;;  %v6989_v19 = vld [vmem:[#allocation9 + $0x150] sm:$0xff] }
0x17ce   :  { %v14100_v10 = vadd.f32 %v6695_v22, %v6694_v20  ;;  %v6982_v22 = vld [vmem:[#allocation9 + $0x118] sm:$0xff]  ;;  %v10708_v20 = vpack.c.bf16 %v6975_v23, %v6971_v34  ;;  %v10748_v30 = vpack.c.bf16 %v6993_v44, %v6989_v19  ;;  %v10752_v34 = vpack.c.bf16 %v7001_v56, %v6997_v43  ;;  %v7003_v23 = vld [vmem:[#allocation9 + $0x1c0] sm:$0xff]  ;;  %v7005_v62 = vld [vmem:[#allocation9 + $0x1d0] sm:$0xff] }
0x17cf   :  { %v10742_v6 = vpack.c.bf16 %v6986_v42, %v6982_v22  ;;  %v7009_v4 = vld [vmem:[#allocation9 + $0x1f0] sm:$0xff]  ;;  %v10724_v47 = vpack.c.bf16 %v7007_v31, %v7003_v23  ;;  %v7295_v42 = vld [vmem:[#allocation15] sm:$0xff]  ;;  %v7314_v19 = vld [vmem:[#allocation15 + $0x98] sm:$0xff] }
0x17d0   :  { %11928 = vtanh.f32 %v14100_v10  ;;  %v10756_v22 = vpack.c.bf16 %v7009_v4, %v7005_v62  ;;  %v7322_v43 = vld [vmem:[#allocation15 + $0xd8] sm:$0xff]  ;;  %v7325_v23 = vld [vmem:[#allocation15 + $0xf0] sm:$0xff]  ;;  %v7332_v31 = vld [vmem:[#allocation15 + $0x128] sm:$0xff] }
0x17d1   :  { %v7330_v62 = vld [vmem:[#allocation15 + $0x118] sm:$0xff] }
0x17d2   :  { %v7334_v4 = vld [vmem:[#allocation15 + $0x138] sm:$0xff] }
0x17da   :  { %v11929_v16 = vpop.eup %11928 }
0x17db   :  { %v14103_v2 = vmul.f32 %v11929_v16, %v11927_v63  ;;  %v6992_v63 = vld [vmem:[#allocation9 + $0x168] sm:$0xff]  ;;  %v6990_v16 = vld [vmem:[#allocation9 + $0x158] sm:$0xff] }
0x17dd   :  { %6833 = vmatmul.mubr.f32.vlgmr.msra.gmra.mrb[46].mxu0 %v14103_v2  ;;  %6904 = vmatmul.mubr.f32.vlgmr.msra.gmra.mrb[46].mxu1 %v14103_v2 }
0x17de   :  { %10697 = vmatpush1.bf16.msra.mxu0 %v10696_v58  ;;  %10729 = vmatpush1.bf16.msra.mxu1 %v10728_v51  ;;  %v6994_v58 = vld [vmem:[#allocation9 + $0x178] sm:$0xff]  ;;  %v10712_v51 = vpack.c.bf16 %v6983_v55, %v6979_v9  ;;  %v7297_v9 = vld [vmem:[#allocation15 + $0x10] sm:$0xff] }
0x17df   :  { %10699 = vmatprep.subr.bf16.mxu0 %v10698_v17  ;;  %10731 = vmatprep.subr.bf16.mxu1 %v10730_v59  ;;  %v6991_v17 = vld [vmem:[#allocation9 + $0x160] sm:$0xff]  ;;  %v10714_v59 = vpack.c.bf16 %v6992_v63, %v6988_v45  ;;  %v10746_v35 = vpack.c.bf16 %v6994_v58, %v6990_v16  ;;  %v7301_v55 = vld [vmem:[#allocation15 + $0x30] sm:$0xff]  ;;  %v7310_v45 = vld [vmem:[#allocation15 + $0x78] sm:$0xff] }
0x17e0   :  { %7097 = vmatprep.mubr.f32.mxu0 %v12245_v1  ;;  %7210 = vmatprep.mubr.f32.mxu1 %v12245_v1  ;;  %v7303_v63 = vld [vmem:[#allocation15 + $0x40] sm:$0xff]  ;;  %v14151_v58 = vpack.c.bf16 %v7310_v45, %v7306_v33  ;;  %v7342_v33 = vld [vmem:[#allocation15 + $0x178] sm:$0xff] }
0x17e1   :  { %v7307_v16 = vld [vmem:[#allocation15 + $0x60] sm:$0xff] }
0x17e2   :  { %10701 = vmatpush1.bf16.msra.mxu0 %v10700_v48  ;;  %10733 = vmatpush1.bf16.msra.mxu1 %v10732_v29  ;;  %v7002_v48 = vld [vmem:[#allocation9 + $0x1b8] sm:$0xff]  ;;  %v10716_v29 = vpack.c.bf16 %v6991_v17, %v6987_v38  ;;  %v7309_v38 = vld [vmem:[#allocation15 + $0x70] sm:$0xff]  ;;  %v7335_v45 = vld [vmem:[#allocation15 + $0x140] sm:$0xff] }
0x17e3   :  { %10703 = vmatprep.subr.bf16.mxu0 %v10702_v26  ;;  %10735 = vmatprep.subr.bf16.mxu1 %v10734_v32  ;;  %v6999_v26 = vld [vmem:[#allocation9 + $0x1a0] sm:$0xff]  ;;  %v10718_v32 = vpack.c.bf16 %v7000_v7, %v6996_v3  ;;  %v10750_v41 = vpack.c.bf16 %v7002_v48, %v6998_v15  ;;  %v7318_v3 = vld [vmem:[#allocation15 + $0xb8] sm:$0xff] }
0x17e4   :  { %v7311_v7 = vld [vmem:[#allocation15 + $0x80] sm:$0xff]  ;;  %v14163_v48 = vpack.c.bf16 %v7318_v3, %v7314_v19  ;;  %v7348_v19 = vld [vmem:[#allocation15 + $0x1a8] sm:$0xff]  ;;  %v7346_v3 = vld [vmem:[#allocation15 + $0x198] sm:$0xff] }
0x17e5   :  { %v7315_v15 = vld [vmem:[#allocation15 + $0xa0] sm:$0xff] }
0x17e6   :  { %10705 = vmatpush1.bf16.msra.mxu0 %v10704_v61  ;;  %10737 = vmatpush1.bf16.msra.mxu1 %v10736_v13  ;;  %v7010_v61 = vld [vmem:[#allocation9 + $0x1f8] sm:$0xff]  ;;  %v10720_v13 = vpack.c.bf16 %v6999_v26, %v6995_v50  ;;  %v7317_v50 = vld [vmem:[#allocation15 + $0xb0] sm:$0xff] }
0x17e7   :  { %10707 = vmatprep.subr.bf16.mxu0 %v10706_v21  ;;  %10739 = vmatprep.subr.bf16.mxu1 %v10738_v25  ;;  %v10722_v21 = vpack.c.bf16 %v7008_v27, %v7004_v49  ;;  %v10754_v25 = vpack.c.bf16 %v7010_v61, %v7006_v57  ;;  %v7326_v49 = vld [vmem:[#allocation15 + $0xf8] sm:$0xff]  ;;  %v7319_v27 = vld [vmem:[#allocation15 + $0xc0] sm:$0xff] }
0x17e8   :  { %v7323_v57 = vld [vmem:[#allocation15 + $0xe0] sm:$0xff]  ;;  %v14175_v61 = vpack.c.bf16 %v7326_v49, %v7322_v43  ;;  %v7345_v43 = vld [vmem:[#allocation15 + $0x190] sm:$0xff] }
0x17e9   :  { %v7349_v49 = vld [vmem:[#allocation15 + $0x1b0] sm:$0xff] }
0x17ea   :  { %10709 = vmatpush1.bf16.msra.mxu0 %v10708_v20  ;;  %10741 = vmatpush1.bf16.msra.mxu1 %v10740_v0 }
0x17eb   :  { %10711 = vmatprep.subr.bf16.mxu0 %v10710_v39  ;;  %10743 = vmatprep.subr.bf16.mxu1 %v10742_v6  ;;  %v7304_v39 = vld [vmem:[#allocation15 + $0x48] sm:$0xff] }
0x17ec   :  { %v7308_v6 = vld [vmem:[#allocation15 + $0x68] sm:$0xff] }
0x17ed   :  { %v14149_v53 = vpack.c.bf16 %v7308_v6, %v7304_v39  ;;  %v7338_v6 = vld [vmem:[#allocation15 + $0x158] sm:$0xff] }
0x17ee   :  { %10713 = vmatpush1.bf16.msra.mxu0 %v10712_v51  ;;  %10745 = vmatpush1.bf16.msra.mxu1 %v10744_v8  ;;  %v14153_v51 = vpack.c.bf16 %v7307_v16, %v7303_v63  ;;  %v7305_v8 = vld [vmem:[#allocation15 + $0x50] sm:$0xff]  ;;  %v14197_v63 = vpack.c.bf16 %v7342_v33, %v7338_v6  ;;  %v7339_v16 = vld [vmem:[#allocation15 + $0x160] sm:$0xff] }
0x17ef   :  { %10715 = vmatprep.subr.bf16.mxu0 %v10714_v59  ;;  %10747 = vmatprep.subr.bf16.mxu1 %v10746_v35  ;;  %v14156_v17 = vpack.c.bf16 %v7309_v38, %v7305_v8  ;;  %v7312_v59 = vld [vmem:[#allocation15 + $0x88] sm:$0xff]  ;;  %v7337_v8 = vld [vmem:[#allocation15 + $0x150] sm:$0xff] }
0x17f0   :  { %v7316_v35 = vld [vmem:[#allocation15 + $0xa8] sm:$0xff]  ;;  %v7341_v38 = vld [vmem:[#allocation15 + $0x170] sm:$0xff] }
0x17f1   :  { %v14161_v44 = vpack.c.bf16 %v7316_v35, %v7312_v59  ;;  %v14200_v59 = vpack.c.bf16 %v7339_v16, %v7335_v45  ;;  %v7344_v35 = vld [vmem:[#allocation15 + $0x188] sm:$0xff] }
0x17f2   :  { %10717 = vmatpush1.bf16.msra.mxu0 %v10716_v29  ;;  %10749 = vmatpush1.bf16.msra.mxu1 %v10748_v30  ;;  %v14165_v29 = vpack.c.bf16 %v7315_v15, %v7311_v7  ;;  %v7313_v30 = vld [vmem:[#allocation15 + $0x90] sm:$0xff]  ;;  %v14204_v7 = vpack.c.bf16 %v7341_v38, %v7337_v8  ;;  %v14206_v15 = vpack.c.bf16 %v7348_v19, %v7344_v35 }
0x17f3   :  { %10719 = vmatprep.subr.bf16.mxu0 %v10718_v32  ;;  %10751 = vmatprep.subr.bf16.mxu1 %v10750_v41  ;;  %v14168_v26 = vpack.c.bf16 %v7317_v50, %v7313_v30  ;;  %v7320_v32 = vld [vmem:[#allocation15 + $0xc8] sm:$0xff]  ;;  %v7350_v30 = vld [vmem:[#allocation15 + $0x1b8] sm:$0xff]  ;;  %v7343_v50 = vld [vmem:[#allocation15 + $0x180] sm:$0xff] }
0x17f4   :  { %v7324_v41 = vld [vmem:[#allocation15 + $0xe8] sm:$0xff] }
0x17f5   :  { %v14173_v56 = vpack.c.bf16 %v7324_v41, %v7320_v32  ;;  %v7347_v32 = vld [vmem:[#allocation15 + $0x1a0] sm:$0xff]  ;;  %v14209_v41 = vpack.c.bf16 %v7350_v30, %v7346_v3 }
0x17f6   :  { %10721 = vmatpush1.bf16.msra.mxu0 %v10720_v13  ;;  %10753 = vmatpush1.bf16.msra.mxu1 %v10752_v34  ;;  %v14177_v13 = vpack.c.bf16 %v7323_v57, %v7319_v27  ;;  %v7321_v34 = vld [vmem:[#allocation15 + $0xd0] sm:$0xff]  ;;  %v14212_v27 = vpack.c.bf16 %v7347_v32, %v7343_v50  ;;  %v14216_v57 = vpack.c.bf16 %v7349_v49, %v7345_v43 }
0x17f7   :  { %10723 = vmatprep.subr.bf16.mxu0 %v10722_v21  ;;  %10755 = vmatprep.subr.bf16.mxu1 %v10754_v25  ;;  %v7328_v21 = vld [vmem:[#allocation15 + $0x108] sm:$0xff]  ;;  %v14180_v25 = vpack.c.bf16 %v7325_v23, %v7321_v34 }
0x17f8   :  { %v7352_v34 = vld [vmem:[#allocation15 + $0x1c8] sm:$0xff] }
0x17f9   :  { %v7356_v23 = vld [vmem:[#allocation15 + $0x1e8] sm:$0xff] }
0x17fa   :  { %10725 = vmatpush1.bf16.msra.mxu0 %v10724_v47  ;;  %10757 = vmatpush1.bf16.msra.mxu1 %v10756_v22  ;;  %v14184_v47 = vpack.c.bf16 %v7332_v31, %v7328_v21  ;;  %v14186_v22 = vpack.c.bf16 %v7334_v4, %v7330_v62  ;;  %v7354_v21 = vld [vmem:[#allocation15 + $0x1d8] sm:$0xff]  ;;  %v14221_v31 = vpack.c.bf16 %v7356_v23, %v7352_v34  ;;  %v7351_v4 = vld [vmem:[#allocation15 + $0x1c0] sm:$0xff] }
0x17fb   :  { %v7358_v62 = vld [vmem:[#allocation15 + $0x1f8] sm:$0xff] }
0x17fd   :  { %7098 = vmatmul.mubr.f32.vlgmr.msra.gmra.mrb[48].mxu0 %v13765_v12  ;;  %7211 = vmatmul.mubr.f32.vlgmr.msra.gmra.mrb[48].mxu1 %v13765_v12  ;;  %v7296_v12 = vld [vmem:[#allocation15 + $0x8] sm:$0xff] }
0x17fe   :  { %7103 = vmatprep.mubr.f32.mxu0 %v12245_v1  ;;  %7216 = vmatprep.mubr.f32.mxu1 %v12245_v1 }
0x1801   :  { %7104 = vmatmul.mubr.f32.gmra.mrb[50].mxu0 %v13811_v46  ;;  %7217 = vmatmul.mubr.f32.gmra.mrb[50].mxu1 %v13811_v46  ;;  %v7300_v46 = vld [vmem:[#allocation15 + $0x28] sm:$0xff] }
0x1802   :  { %7109 = vmatprep.mubr.f32.mxu0 %v12245_v1  ;;  %7222 = vmatprep.mubr.f32.mxu1 %v12245_v1 }
0x1805   :  { %7110 = vmatmul.mubr.f32.gmra.mrb[52].mxu0 %v13855_v40  ;;  %7223 = vmatmul.mubr.f32.gmra.mrb[52].mxu1 %v13855_v40  ;;  %v7298_v40 = vld [vmem:[#allocation15 + $0x18] sm:$0xff] }
0x1806   :  { %7115 = vmatprep.mubr.f32.mxu0 %v12245_v1  ;;  %7228 = vmatprep.mubr.f32.mxu1 %v12245_v1 }
0x1809   :  { %7116 = vmatmul.mubr.f32.gmra.mrb[54].mxu0 %v13967_v54  ;;  %7229 = vmatmul.mubr.f32.gmra.mrb[54].mxu1 %v13967_v54  ;;  %v14137_v54 = vpack.c.bf16 %v7300_v46, %v7296_v12  ;;  %v7327_v12 = vld [vmem:[#allocation15 + $0x100] sm:$0xff] }
0x180a   :  { %7121 = vmatprep.mubr.f32.mxu0 %v12245_v1  ;;  %7234 = vmatprep.mubr.f32.mxu1 %v12245_v1  ;;  %v7331_v46 = vld [vmem:[#allocation15 + $0x120] sm:$0xff] }
0x180b   :  { %10759 = vmatprep.subr.bf16.mxu0 %v14137_v54 }
0x180d   :  { %7122 = vmatmul.mubr.f32.gmra.mrb[56].mxu0 %v14013_v60  ;;  %7235 = vmatmul.mubr.f32.gmra.mrb[56].mxu1 %v14013_v60  ;;  %v7302_v60 = vld [vmem:[#allocation15 + $0x38] sm:$0xff] }
0x180e   :  { %7127 = vmatprep.mubr.f32.mxu0 %v12245_v1  ;;  %7240 = vmatprep.mubr.f32.mxu1 %v12245_v1  ;;  %v14139_v20 = vpack.c.bf16 %v7302_v60, %v7298_v40  ;;  %v7329_v40 = vld [vmem:[#allocation15 + $0x110] sm:$0xff]  ;;  %v14189_v60 = vpack.c.bf16 %v7331_v46, %v7327_v12  ;;  %v7355_v12 = vld [vmem:[#allocation15 + $0x1e0] sm:$0xff]  ;;  %v14223_v46 = vpack.c.bf16 %v7358_v62, %v7354_v21 }
0x1810   :  { %10791 = vmatprep.subr.bf16.mxu1 %v14139_v20 }
0x1811   :  { %7128 = vmatmul.mubr.f32.gmra.mrb[58].mxu0 %v14059_v36  ;;  %7241 = vmatmul.mubr.f32.gmra.mrb[58].mxu1 %v14059_v36  ;;  %v7299_v36 = vld [vmem:[#allocation15 + $0x20] sm:$0xff] }
0x1812   :  { %7133 = vmatprep.mubr.f32.mxu0 %v12245_v1  ;;  %7246 = vmatprep.mubr.f32.mxu1 %v12245_v1  ;;  %v14141_v0 = vpack.c.bf16 %v7299_v36, %v7295_v42  ;;  %v7333_v42 = vld [vmem:[#allocation15 + $0x130] sm:$0xff]  ;;  %v7336_v36 = vld [vmem:[#allocation15 + $0x148] sm:$0xff] }
0x1814   :  { %10761 = vmatpush1.bf16.msra.mxu0 %v14141_v0 }
0x1815   :  { %7134 = vmatmul.mubr.f32.gmra.mrb[60].mxu0 %v14103_v2  ;;  %7247 = vmatmul.mubr.f32.gmra.mrb[60].mxu1 %v14103_v2  ;;  %v14144_v2 = vpack.c.bf16 %v7301_v55, %v7297_v9  ;;  %v7340_v9 = vld [vmem:[#allocation15 + $0x168] sm:$0xff]  ;;  %v14193_v55 = vpack.c.bf16 %v7333_v42, %v7329_v40  ;;  %v14225_v40 = vpack.c.bf16 %v7355_v12, %v7351_v4  ;;  %v7353_v42 = vld [vmem:[#allocation15 + $0x1d0] sm:$0xff] }
0x1816   :  { %7139 = vmatprep.mubr.f32.mxu0 %v12245_v1  ;;  %7252 = vmatprep.mubr.f32.mxu1 %v12245_v1  ;;  %v14195_v39 = vpack.c.bf16 %v7340_v9, %v7336_v36  ;;  %v7357_v36 = vld [vmem:[#allocation15 + $0x1f0] sm:$0xff] }
0x1817   :  { %10793 = vmatpush1.bf16.msra.mxu1 %v14144_v2  ;;  %10763 = vmatprep.subr.bf16.mxu0 %v14149_v53  ;;  %v14228_v9 = vpack.c.bf16 %v7357_v36, %v7353_v42 }
0x1818   :  { %10795 = vmatprep.subr.bf16.mxu1 %v14151_v58  ;;  %10765 = vmatpush1.bf16.msra.mxu0 %v14153_v51 }
0x1819   :  { %10767 = vmatprep.subr.bf16.mxu0 %v14161_v44 }
0x181b   :  { %10797 = vmatpush1.bf16.msra.mxu1 %v14156_v17 }
0x181c   :  { %10799 = vmatprep.subr.bf16.mxu1 %v14163_v48  ;;  %10769 = vmatpush1.bf16.msra.mxu0 %v14165_v29 }
0x181d   :  { %10771 = vmatprep.subr.bf16.mxu0 %v14173_v56 }
0x181f   :  { %10801 = vmatpush1.bf16.msra.mxu1 %v14168_v26 }
0x1820   :  { %10803 = vmatprep.subr.bf16.mxu1 %v14175_v61  ;;  %10773 = vmatpush1.bf16.msra.mxu0 %v14177_v13 }
0x1821   :  { %10775 = vmatprep.subr.bf16.mxu0 %v14184_v47 }
0x1823   :  { %10805 = vmatpush1.bf16.msra.mxu1 %v14180_v25 }
0x1824   :  { %10807 = vmatprep.subr.bf16.mxu1 %v14186_v22  ;;  %10777 = vmatpush1.bf16.msra.mxu0 %v14189_v60 }
0x1825   :  { %10779 = vmatprep.subr.bf16.mxu0 %v14195_v39 }
0x1827   :  { %10809 = vmatpush1.bf16.msra.mxu1 %v14193_v55 }
0x1828   :  { %10811 = vmatprep.subr.bf16.mxu1 %v14197_v63  ;;  %10781 = vmatpush1.bf16.msra.mxu0 %v14200_v59 }
0x1829   :  { %10783 = vmatprep.subr.bf16.mxu0 %v14206_v15 }
0x182b   :  { %10813 = vmatpush1.bf16.msra.mxu1 %v14204_v7 }
0x182c   :  { %10815 = vmatprep.subr.bf16.mxu1 %v14209_v41  ;;  %10785 = vmatpush1.bf16.msra.mxu0 %v14212_v27 }
0x182d   :  { %10787 = vmatprep.subr.bf16.mxu0 %v14221_v31 }
0x182f   :  { %10817 = vmatpush1.bf16.msra.mxu1 %v14216_v57 }
0x1830   :  { %10819 = vmatprep.subr.bf16.mxu1 %v14223_v46  ;;  %10789 = vmatpush1.bf16.msra.mxu0 %v14225_v40 }
0x1831   :  { %10823 = vmatprep.subr.bf16.mxu0 %v14137_v54 }
0x1833   :  { %10821 = vmatpush1.bf16.msra.mxu1 %v14228_v9 }
0x1834   :  { %10855 = vmatprep.subr.bf16.mxu1 %v14139_v20 }
0x18b0   :  { %v6834_v6 = vpop.f32.mrb[46].mxu0  ;;  %v6905_v33 = vpop.f32.mrb[46].mxu1 }
0x18b1   :  { %v11372_v45 = vadd.f32 %v6834_v6, %v13747_v5  ;;  %v6836_v16 = vpop.f32.mrb[47].mxu0  ;;  %v6907_v8 = vpop.f32.mrb[47].mxu1  ;;  %v11388_v50 = vadd.f32 %v6905_v33, %v13759_v28 }
0x18b2   :  { %v11373_v38 = vadd.f32 %v6836_v16, %v13750_v24  ;;  %v11389_v3 = vadd.f32 %v6907_v8, %v13755_v52 }
0x18b3   :  { %v8942_v35 = vmul.f32 -1.442695, %v11372_v45 }
0x18b4   :  { %v8943_v19 = vmul.f32 -1.442695, %v11373_v38  ;;  %v8944_v30 = vmul.f32 -1.442695, %v11389_v3 }
0x18b5   :  { %11930 = vpow2.f32 %v8942_v35 }
0x18b6   :  { %11932 = vpow2.f32 %v8943_v19 }
0x18b7   :  { %11934 = vpow2.f32 %v8944_v30 }
0x18b8   :  { %11936 = vtanh.f32 %v11388_v50 }
0x18bf   :  { %v11931_v32 = vpop.eup %11930 }
0x18c0   :  { %v11933_v43 = vpop.eup %11932  ;;  %v6917_v49 = vadd.f32 1.0, %v11931_v32 }
0x18c1   :  { %v6923_v34 = vadd.f32 1.0, %v11933_v43  ;;  %v11935_v5 = vpop.eup %11934 }
0x18c2   :  { %11938 = vrcp.f32 %v6917_v49  ;;  %v11937_v23 = vpop.eup %11936  ;;  %v6930_v4 = vadd.f32 1.0, %v11935_v5 }
0x18c3   :  { %11940 = vrcp.f32 %v6923_v34 }
0x18c4   :  { %11942 = vrcp.f32 %v6930_v4 }
0x18cc   :  { %v11939_v24 = vpop.eup %11938 }
0x18cd   :  { %v11941_v21 = vpop.eup %11940  ;;  %v6934_v62 = vmul.f32 %v11939_v24, %v11937_v23 }
0x18ce   :  { %v6933_v12 = vmul.f32 %v11941_v21, %v14100_v10  ;;  %v11943_v28 = vpop.eup %11942  ;;  %v7011_v10 = vld [vmem:[%s14619_s12] sm:$0xf] }
0x18cf   :  { %v14282_v6 = vrot.slane %v7011_v10, %v12673_v11  ;;  %v14285_v33 = vrot.slane %v7011_v10, %v12678_v14  ;;  %v14290_v50 = vrot.slane %v7011_v10, %v12686_v18  ;;  %v14294_v14 = vrot.slane %v7011_v10, %v12693_v37 }
0x18d0   :  { %v6935_v52 = vadd.f32 %v6934_v62, %v6933_v12 }
0x18d2   :  { %11944 = vtanh.f32 %v6935_v52 }
0x18dc   :  { %v11945_v42 = vpop.eup %11944 }
0x18dd   :  { %v6937_v36 = vmul.f32 %v11945_v42, %v11943_v28 }
0x18df   :  { %7140 = vmatmul.mubr.f32.gmra.mrb[62].mxu0 %v6937_v36  ;;  %7253 = vmatmul.mubr.f32.gmra.mrb[62].mxu1 %v6937_v36 }
0x18e0   :  { %7423 = vmatprep.mubr.f32.mxu0 %v12245_v1  ;;  %7494 = vmatprep.mubr.f32.mxu1 %v12245_v1 }
0x18e3   :  { %7424 = vmatmul.mubr.f32.vlgmr.msra.gmra.mrb[48].mxu0 %v12245_v1  ;;  %7495 = vmatmul.mubr.f32.vlgmr.msra.gmra.mrb[48].mxu1 %v12245_v1 }
0x18e4   :  { %10825 = vmatpush1.bf16.msra.mxu0 %v14141_v0  ;;  %10857 = vmatpush1.bf16.msra.mxu1 %v14144_v2 }
0x18e5   :  { %10827 = vmatprep.subr.bf16.mxu0 %v14149_v53  ;;  %10859 = vmatprep.subr.bf16.mxu1 %v14151_v58 }
0x18e6   :  { %7597 = vmatprep.mubr.f32.mxu0 %v12245_v1  ;;  %7668 = vmatprep.mubr.f32.mxu1 %v12245_v1 }
0x18e8   :  { %10829 = vmatpush1.bf16.msra.mxu0 %v14153_v51  ;;  %10861 = vmatpush1.bf16.msra.mxu1 %v14156_v17 }
0x18e9   :  { %10831 = vmatprep.subr.bf16.mxu0 %v14161_v44  ;;  %10863 = vmatprep.subr.bf16.mxu1 %v14163_v48 }
0x18ec   :  { %10833 = vmatpush1.bf16.msra.mxu0 %v14165_v29  ;;  %10865 = vmatpush1.bf16.msra.mxu1 %v14168_v26 }
0x18ed   :  { %10835 = vmatprep.subr.bf16.mxu0 %v14173_v56  ;;  %10867 = vmatprep.subr.bf16.mxu1 %v14175_v61 }
0x18f0   :  { %10837 = vmatpush1.bf16.msra.mxu0 %v14177_v13  ;;  %10869 = vmatpush1.bf16.msra.mxu1 %v14180_v25 }
0x18f1   :  { %10839 = vmatprep.subr.bf16.mxu0 %v14184_v47  ;;  %10871 = vmatprep.subr.bf16.mxu1 %v14186_v22 }
0x18f4   :  { %10841 = vmatpush1.bf16.msra.mxu0 %v14189_v60  ;;  %10873 = vmatpush1.bf16.msra.mxu1 %v14193_v55 }
0x18f5   :  { %10843 = vmatprep.subr.bf16.mxu0 %v14195_v39  ;;  %10875 = vmatprep.subr.bf16.mxu1 %v14197_v63 }
0x18f8   :  { %10845 = vmatpush1.bf16.msra.mxu0 %v14200_v59  ;;  %10877 = vmatpush1.bf16.msra.mxu1 %v14204_v7 }
0x18f9   :  { %10847 = vmatprep.subr.bf16.mxu0 %v14206_v15  ;;  %10879 = vmatprep.subr.bf16.mxu1 %v14209_v41 }
0x18fc   :  { %10849 = vmatpush1.bf16.msra.mxu0 %v14212_v27  ;;  %10881 = vmatpush1.bf16.msra.mxu1 %v14216_v57 }
0x18fd   :  { %10851 = vmatprep.subr.bf16.mxu0 %v14221_v31  ;;  %10883 = vmatprep.subr.bf16.mxu1 %v14223_v46 }
0x1900   :  { %10853 = vmatpush1.bf16.msra.mxu0 %v14225_v40  ;;  %10885 = vmatpush1.bf16.msra.mxu1 %v14228_v9 }
0x1901   :  { %10887 = vmatprep.subr.bf16.mxu0 %v14137_v54  ;;  %10919 = vmatprep.subr.bf16.mxu1 %v14139_v20 }
0x19b6   :  { %v7425_v45 = vpop.f32.mrb[48].mxu0  ;;  %v7496_v16 = vpop.f32.mrb[48].mxu1 }
0x19b7   :  { %v11390_v8 = vadd.f32 %v7425_v45, %v14282_v6  ;;  %v7427_v38 = vpop.f32.mrb[49].mxu0  ;;  %v7498_v35 = vpop.f32.mrb[49].mxu1  ;;  %v11406_v43 = vadd.f32 %v7496_v16, %v14294_v14 }
0x19b8   :  { %v11391_v19 = vadd.f32 %v7427_v38, %v14285_v33  ;;  %v11407_v11 = vadd.f32 %v7498_v35, %v14290_v50 }
0x19b9   :  { %v8945_v3 = vmul.f32 -1.442695, %v11390_v8 }
0x19ba   :  { %v8946_v30 = vmul.f32 -1.442695, %v11391_v19  ;;  %v8947_v32 = vmul.f32 -1.442695, %v11407_v11 }
0x19bb   :  { %11946 = vpow2.f32 %v8945_v3 }
0x19bc   :  { %11948 = vpow2.f32 %v8946_v30 }
0x19bd   :  { %11950 = vpow2.f32 %v8947_v32 }
0x19be   :  { %11952 = vtanh.f32 %v11406_v43 }
0x19c5   :  { %v11947_v49 = vpop.eup %11946 }
0x19c6   :  { %v11949_v34 = vpop.eup %11948  ;;  %v7508_v5 = vadd.f32 1.0, %v11947_v49 }
0x19c7   :  { %v7514_v23 = vadd.f32 1.0, %v11949_v34  ;;  %v11951_v18 = vpop.eup %11950 }
0x19c8   :  { %11954 = vrcp.f32 %v7508_v5  ;;  %v11953_v24 = vpop.eup %11952  ;;  %v7521_v12 = vadd.f32 1.0, %v11951_v18 }
0x19c9   :  { %11956 = vrcp.f32 %v7514_v23 }
0x19ca   :  { %11958 = vrcp.f32 %v7521_v12 }
0x19d2   :  { %v11955_v21 = vpop.eup %11954 }
0x19d3   :  { %v11957_v62 = vpop.eup %11956  ;;  %v7525_v4 = vmul.f32 %v11955_v21, %v11953_v24 }
0x19d4   :  { %v7524_v52 = vmul.f32 0.0, %v11957_v62  ;;  %v11959_v28 = vpop.eup %11958 }
0x19d6   :  { %v14297_v37 = vadd.f32 %v7525_v4, %v7524_v52 }
0x19d8   :  { %11960 = vtanh.f32 %v14297_v37 }
0x19e2   :  { %v11961_v42 = vpop.eup %11960 }
0x19e3   :  { %v7528_v36 = vmul.f32 %v11961_v42, %v11959_v28 }
0x19e5   :  { %7598 = vmatmul.mubr.f32.vlgmr.msra.gmra.mrb[50].mxu0 %v7528_v36  ;;  %7669 = vmatmul.mubr.f32.vlgmr.msra.gmra.mrb[50].mxu1 %v7528_v36 }
0x19e6   :  { %10889 = vmatpush1.bf16.msra.mxu0 %v14141_v0  ;;  %10921 = vmatpush1.bf16.msra.mxu1 %v14144_v2 }
0x19e7   :  { %10891 = vmatprep.subr.bf16.mxu0 %v14149_v53  ;;  %10923 = vmatprep.subr.bf16.mxu1 %v14151_v58 }
0x19e8   :  { %7771 = vmatprep.mubr.f32.mxu0 %v12245_v1  ;;  %7842 = vmatprep.mubr.f32.mxu1 %v12245_v1 }
0x19ea   :  { %10893 = vmatpush1.bf16.msra.mxu0 %v14153_v51  ;;  %10925 = vmatpush1.bf16.msra.mxu1 %v14156_v17 }
0x19eb   :  { %10895 = vmatprep.subr.bf16.mxu0 %v14161_v44  ;;  %10927 = vmatprep.subr.bf16.mxu1 %v14163_v48 }
0x19ee   :  { %10897 = vmatpush1.bf16.msra.mxu0 %v14165_v29  ;;  %10929 = vmatpush1.bf16.msra.mxu1 %v14168_v26 }
0x19ef   :  { %10899 = vmatprep.subr.bf16.mxu0 %v14173_v56  ;;  %10931 = vmatprep.subr.bf16.mxu1 %v14175_v61 }
0x19f2   :  { %10901 = vmatpush1.bf16.msra.mxu0 %v14177_v13  ;;  %10933 = vmatpush1.bf16.msra.mxu1 %v14180_v25 }
0x19f3   :  { %10903 = vmatprep.subr.bf16.mxu0 %v14184_v47  ;;  %10935 = vmatprep.subr.bf16.mxu1 %v14186_v22 }
0x19f6   :  { %10905 = vmatpush1.bf16.msra.mxu0 %v14189_v60  ;;  %10937 = vmatpush1.bf16.msra.mxu1 %v14193_v55 }
0x19f7   :  { %10907 = vmatprep.subr.bf16.mxu0 %v14195_v39  ;;  %10939 = vmatprep.subr.bf16.mxu1 %v14197_v63 }
0x19fa   :  { %10909 = vmatpush1.bf16.msra.mxu0 %v14200_v59  ;;  %10941 = vmatpush1.bf16.msra.mxu1 %v14204_v7 }
0x19fb   :  { %10911 = vmatprep.subr.bf16.mxu0 %v14206_v15  ;;  %10943 = vmatprep.subr.bf16.mxu1 %v14209_v41 }
0x19fe   :  { %10913 = vmatpush1.bf16.msra.mxu0 %v14212_v27  ;;  %10945 = vmatpush1.bf16.msra.mxu1 %v14216_v57 }
0x19ff   :  { %10915 = vmatprep.subr.bf16.mxu0 %v14221_v31  ;;  %10947 = vmatprep.subr.bf16.mxu1 %v14223_v46 }
0x1a02   :  { %10917 = vmatpush1.bf16.msra.mxu0 %v14225_v40  ;;  %10949 = vmatpush1.bf16.msra.mxu1 %v14228_v9 }
0x1a03   :  { %10951 = vmatprep.subr.bf16.mxu0 %v14137_v54  ;;  %10983 = vmatprep.subr.bf16.mxu1 %v14139_v20 }
0x1ab8   :  { %v7599_v10 = vpop.f32.mrb[50].mxu0  ;;  %v7670_v45 = vpop.f32.mrb[50].mxu1 }
0x1ab9   :  { %v11392_v16 = vadd.f32 %v7599_v10, %v14282_v6  ;;  %v7601_v8 = vpop.f32.mrb[51].mxu0  ;;  %v7672_v38 = vpop.f32.mrb[51].mxu1  ;;  %v11408_v32 = vadd.f32 %v7670_v45, %v14294_v14 }
0x1aba   :  { %v11393_v35 = vadd.f32 %v7601_v8, %v14285_v33  ;;  %v11409_v30 = vadd.f32 %v7672_v38, %v14290_v50 }
0x1abb   :  { %v8948_v19 = vmul.f32 -1.442695, %v11392_v16 }
0x1abc   :  { %v8949_v3 = vmul.f32 -1.442695, %v11393_v35  ;;  %v8950_v11 = vmul.f32 -1.442695, %v11409_v30 }
0x1abd   :  { %11962 = vpow2.f32 %v8948_v19 }
0x1abe   :  { %11964 = vpow2.f32 %v8949_v3 }
0x1abf   :  { %11966 = vpow2.f32 %v8950_v11 }
0x1ac0   :  { %11968 = vtanh.f32 %v11408_v32 }
0x1ac7   :  { %v11963_v43 = vpop.eup %11962 }
0x1ac8   :  { %v11965_v49 = vpop.eup %11964  ;;  %v7682_v34 = vadd.f32 1.0, %v11963_v43 }
0x1ac9   :  { %v7688_v5 = vadd.f32 1.0, %v11965_v49  ;;  %v11967_v23 = vpop.eup %11966 }
0x1aca   :  { %11970 = vrcp.f32 %v7682_v34  ;;  %v11969_v18 = vpop.eup %11968  ;;  %v7695_v4 = vadd.f32 1.0, %v11967_v23 }
0x1acb   :  { %11972 = vrcp.f32 %v7688_v5 }
0x1acc   :  { %11974 = vrcp.f32 %v7695_v4 }
0x1ad4   :  { %v11971_v24 = vpop.eup %11970 }
0x1ad5   :  { %v11973_v21 = vpop.eup %11972  ;;  %v7699_v62 = vmul.f32 %v11971_v24, %v11969_v18 }
0x1ad6   :  { %v7698_v12 = vmul.f32 %v11973_v21, %v14297_v37  ;;  %v11975_v28 = vpop.eup %11974 }
0x1ad8   :  { %v14339_v52 = vadd.f32 %v7699_v62, %v7698_v12 }
0x1ada   :  { %11976 = vtanh.f32 %v14339_v52 }
0x1ae4   :  { %v11977_v42 = vpop.eup %11976 }
0x1ae5   :  { %v7702_v36 = vmul.f32 %v11977_v42, %v11975_v28 }
0x1ae7   :  { %7772 = vmatmul.mubr.f32.vlgmr.msra.gmra.mrb[52].mxu0 %v7702_v36  ;;  %7843 = vmatmul.mubr.f32.vlgmr.msra.gmra.mrb[52].mxu1 %v7702_v36 }
0x1ae8   :  { %10953 = vmatpush1.bf16.msra.mxu0 %v14141_v0  ;;  %10985 = vmatpush1.bf16.msra.mxu1 %v14144_v2 }
0x1ae9   :  { %10955 = vmatprep.subr.bf16.mxu0 %v14149_v53  ;;  %10987 = vmatprep.subr.bf16.mxu1 %v14151_v58 }
0x1aea   :  { %7945 = vmatprep.mubr.f32.mxu0 %v12245_v1  ;;  %8016 = vmatprep.mubr.f32.mxu1 %v12245_v1 }
0x1aec   :  { %10957 = vmatpush1.bf16.msra.mxu0 %v14153_v51  ;;  %10989 = vmatpush1.bf16.msra.mxu1 %v14156_v17 }
0x1aed   :  { %10959 = vmatprep.subr.bf16.mxu0 %v14161_v44  ;;  %10991 = vmatprep.subr.bf16.mxu1 %v14163_v48 }
0x1af0   :  { %10961 = vmatpush1.bf16.msra.mxu0 %v14165_v29  ;;  %10993 = vmatpush1.bf16.msra.mxu1 %v14168_v26 }
0x1af1   :  { %10963 = vmatprep.subr.bf16.mxu0 %v14173_v56  ;;  %10995 = vmatprep.subr.bf16.mxu1 %v14175_v61 }
0x1af4   :  { %10965 = vmatpush1.bf16.msra.mxu0 %v14177_v13  ;;  %10997 = vmatpush1.bf16.msra.mxu1 %v14180_v25 }
0x1af5   :  { %10967 = vmatprep.subr.bf16.mxu0 %v14184_v47  ;;  %10999 = vmatprep.subr.bf16.mxu1 %v14186_v22 }
0x1af8   :  { %10969 = vmatpush1.bf16.msra.mxu0 %v14189_v60  ;;  %11001 = vmatpush1.bf16.msra.mxu1 %v14193_v55 }
0x1af9   :  { %10971 = vmatprep.subr.bf16.mxu0 %v14195_v39  ;;  %11003 = vmatprep.subr.bf16.mxu1 %v14197_v63 }
0x1afc   :  { %10973 = vmatpush1.bf16.msra.mxu0 %v14200_v59  ;;  %11005 = vmatpush1.bf16.msra.mxu1 %v14204_v7 }
0x1afd   :  { %10975 = vmatprep.subr.bf16.mxu0 %v14206_v15  ;;  %11007 = vmatprep.subr.bf16.mxu1 %v14209_v41 }
0x1b00   :  { %10977 = vmatpush1.bf16.msra.mxu0 %v14212_v27  ;;  %11009 = vmatpush1.bf16.msra.mxu1 %v14216_v57 }
0x1b01   :  { %10979 = vmatprep.subr.bf16.mxu0 %v14221_v31  ;;  %11011 = vmatprep.subr.bf16.mxu1 %v14223_v46 }
0x1b04   :  { %10981 = vmatpush1.bf16.msra.mxu0 %v14225_v40  ;;  %11013 = vmatpush1.bf16.msra.mxu1 %v14228_v9 }
0x1b05   :  { %11015 = vmatprep.subr.bf16.mxu0 %v14137_v54  ;;  %11047 = vmatprep.subr.bf16.mxu1 %v14139_v20 }
0x1bba   :  { %v7773_v37 = vpop.f32.mrb[52].mxu0  ;;  %v7844_v10 = vpop.f32.mrb[52].mxu1 }
0x1bbb   :  { %v11394_v45 = vadd.f32 %v7773_v37, %v14282_v6  ;;  %v7775_v16 = vpop.f32.mrb[53].mxu0  ;;  %v7846_v8 = vpop.f32.mrb[53].mxu1  ;;  %v11410_v11 = vadd.f32 %v7844_v10, %v14294_v14 }
0x1bbc   :  { %v11395_v38 = vadd.f32 %v7775_v16, %v14285_v33  ;;  %v11411_v3 = vadd.f32 %v7846_v8, %v14290_v50 }
0x1bbd   :  { %v8951_v35 = vmul.f32 -1.442695, %v11394_v45 }
0x1bbe   :  { %v8952_v19 = vmul.f32 -1.442695, %v11395_v38  ;;  %v8953_v30 = vmul.f32 -1.442695, %v11411_v3 }
0x1bbf   :  { %11978 = vpow2.f32 %v8951_v35 }
0x1bc0   :  { %11980 = vpow2.f32 %v8952_v19 }
0x1bc1   :  { %11982 = vpow2.f32 %v8953_v30 }
0x1bc2   :  { %11984 = vtanh.f32 %v11410_v11 }
0x1bc9   :  { %v11979_v32 = vpop.eup %11978 }
0x1bca   :  { %v11981_v43 = vpop.eup %11980  ;;  %v7856_v49 = vadd.f32 1.0, %v11979_v32 }
0x1bcb   :  { %v7862_v34 = vadd.f32 1.0, %v11981_v43  ;;  %v11983_v5 = vpop.eup %11982 }
0x1bcc   :  { %11986 = vrcp.f32 %v7856_v49  ;;  %v11985_v23 = vpop.eup %11984  ;;  %v7869_v62 = vadd.f32 1.0, %v11983_v5 }
0x1bcd   :  { %11988 = vrcp.f32 %v7862_v34 }
0x1bce   :  { %11990 = vrcp.f32 %v7869_v62 }
0x1bd6   :  { %v11987_v18 = vpop.eup %11986 }
0x1bd7   :  { %v11989_v24 = vpop.eup %11988  ;;  %v7873_v21 = vmul.f32 %v11987_v18, %v11985_v23 }
0x1bd8   :  { %v7872_v4 = vmul.f32 %v11989_v24, %v14339_v52  ;;  %v11991_v28 = vpop.eup %11990 }
0x1bda   :  { %v14381_v12 = vadd.f32 %v7873_v21, %v7872_v4 }
0x1bdc   :  { %11992 = vtanh.f32 %v14381_v12 }
0x1be6   :  { %v11993_v42 = vpop.eup %11992 }
0x1be7   :  { %v7876_v36 = vmul.f32 %v11993_v42, %v11991_v28 }
0x1be9   :  { %7946 = vmatmul.mubr.f32.vlgmr.msra.gmra.mrb[54].mxu0 %v7876_v36  ;;  %8017 = vmatmul.mubr.f32.vlgmr.msra.gmra.mrb[54].mxu1 %v7876_v36 }
0x1bea   :  { %11017 = vmatpush1.bf16.msra.mxu0 %v14141_v0  ;;  %11049 = vmatpush1.bf16.msra.mxu1 %v14144_v2 }
0x1beb   :  { %11019 = vmatprep.subr.bf16.mxu0 %v14149_v53  ;;  %11051 = vmatprep.subr.bf16.mxu1 %v14151_v58 }
0x1bec   :  { %8119 = vmatprep.mubr.f32.mxu0 %v12245_v1  ;;  %8190 = vmatprep.mubr.f32.mxu1 %v12245_v1 }
0x1bee   :  { %11021 = vmatpush1.bf16.msra.mxu0 %v14153_v51  ;;  %11053 = vmatpush1.bf16.msra.mxu1 %v14156_v17 }
0x1bef   :  { %11023 = vmatprep.subr.bf16.mxu0 %v14161_v44  ;;  %11055 = vmatprep.subr.bf16.mxu1 %v14163_v48 }
0x1bf2   :  { %11025 = vmatpush1.bf16.msra.mxu0 %v14165_v29  ;;  %11057 = vmatpush1.bf16.msra.mxu1 %v14168_v26 }
0x1bf3   :  { %11027 = vmatprep.subr.bf16.mxu0 %v14173_v56  ;;  %11059 = vmatprep.subr.bf16.mxu1 %v14175_v61 }
0x1bf6   :  { %11029 = vmatpush1.bf16.msra.mxu0 %v14177_v13  ;;  %11061 = vmatpush1.bf16.msra.mxu1 %v14180_v25 }
0x1bf7   :  { %11031 = vmatprep.subr.bf16.mxu0 %v14184_v47  ;;  %11063 = vmatprep.subr.bf16.mxu1 %v14186_v22 }
0x1bfa   :  { %11033 = vmatpush1.bf16.msra.mxu0 %v14189_v60  ;;  %11065 = vmatpush1.bf16.msra.mxu1 %v14193_v55 }
0x1bfb   :  { %11035 = vmatprep.subr.bf16.mxu0 %v14195_v39  ;;  %11067 = vmatprep.subr.bf16.mxu1 %v14197_v63 }
0x1bfe   :  { %11037 = vmatpush1.bf16.msra.mxu0 %v14200_v59  ;;  %11069 = vmatpush1.bf16.msra.mxu1 %v14204_v7 }
0x1bff   :  { %11039 = vmatprep.subr.bf16.mxu0 %v14206_v15  ;;  %11071 = vmatprep.subr.bf16.mxu1 %v14209_v41 }
0x1c02   :  { %11041 = vmatpush1.bf16.msra.mxu0 %v14212_v27  ;;  %11073 = vmatpush1.bf16.msra.mxu1 %v14216_v57 }
0x1c03   :  { %11043 = vmatprep.subr.bf16.mxu0 %v14221_v31  ;;  %11075 = vmatprep.subr.bf16.mxu1 %v14223_v46 }
0x1c06   :  { %11045 = vmatpush1.bf16.msra.mxu0 %v14225_v40  ;;  %11077 = vmatpush1.bf16.msra.mxu1 %v14228_v9 }
0x1c07   :  { %11079 = vmatprep.subr.bf16.mxu0 %v14137_v54  ;;  %11111 = vmatprep.subr.bf16.mxu1 %v14139_v20 }
0x1cbc   :  { %v7947_v52 = vpop.f32.mrb[54].mxu0  ;;  %v8018_v37 = vpop.f32.mrb[54].mxu1 }
0x1cbd   :  { %v11396_v10 = vadd.f32 %v7947_v52, %v14282_v6  ;;  %v7949_v45 = vpop.f32.mrb[55].mxu0  ;;  %v8020_v16 = vpop.f32.mrb[55].mxu1  ;;  %v11412_v30 = vadd.f32 %v8018_v37, %v14294_v14 }
0x1cbe   :  { %v11397_v8 = vadd.f32 %v7949_v45, %v14285_v33  ;;  %v11413_v19 = vadd.f32 %v8020_v16, %v14290_v50 }
0x1cbf   :  { %v8954_v38 = vmul.f32 -1.442695, %v11396_v10 }
0x1cc0   :  { %v8955_v35 = vmul.f32 -1.442695, %v11397_v8  ;;  %v8956_v3 = vmul.f32 -1.442695, %v11413_v19 }
0x1cc1   :  { %11994 = vpow2.f32 %v8954_v38 }
0x1cc2   :  { %11996 = vpow2.f32 %v8955_v35 }
0x1cc3   :  { %11998 = vpow2.f32 %v8956_v3 }
0x1cc4   :  { %12000 = vtanh.f32 %v11412_v30 }
0x1ccb   :  { %v11995_v11 = vpop.eup %11994 }
0x1ccc   :  { %v11997_v32 = vpop.eup %11996  ;;  %v8030_v43 = vadd.f32 1.0, %v11995_v11 }
0x1ccd   :  { %v8036_v49 = vadd.f32 1.0, %v11997_v32  ;;  %v11999_v34 = vpop.eup %11998 }
0x1cce   :  { %12002 = vrcp.f32 %v8030_v43  ;;  %v12001_v5 = vpop.eup %12000  ;;  %v8043_v21 = vadd.f32 1.0, %v11999_v34 }
0x1ccf   :  { %12004 = vrcp.f32 %v8036_v49 }
0x1cd0   :  { %12006 = vrcp.f32 %v8043_v21 }
0x1cd8   :  { %v12003_v23 = vpop.eup %12002 }
0x1cd9   :  { %v12005_v18 = vpop.eup %12004  ;;  %v8047_v24 = vmul.f32 %v12003_v23, %v12001_v5 }
0x1cda   :  { %v8046_v62 = vmul.f32 %v12005_v18, %v14381_v12  ;;  %v12007_v28 = vpop.eup %12006 }
0x1cdc   :  { %v14423_v4 = vadd.f32 %v8047_v24, %v8046_v62 }
0x1cde   :  { %12008 = vtanh.f32 %v14423_v4 }
0x1ce8   :  { %v12009_v42 = vpop.eup %12008 }
0x1ce9   :  { %v8050_v36 = vmul.f32 %v12009_v42, %v12007_v28 }
0x1ceb   :  { %8120 = vmatmul.mubr.f32.vlgmr.msra.gmra.mrb[56].mxu0 %v8050_v36  ;;  %8191 = vmatmul.mubr.f32.vlgmr.msra.gmra.mrb[56].mxu1 %v8050_v36 }
0x1cec   :  { %11081 = vmatpush1.bf16.msra.mxu0 %v14141_v0  ;;  %11113 = vmatpush1.bf16.msra.mxu1 %v14144_v2 }
0x1ced   :  { %11083 = vmatprep.subr.bf16.mxu0 %v14149_v53  ;;  %11115 = vmatprep.subr.bf16.mxu1 %v14151_v58 }
0x1cee   :  { %8293 = vmatprep.mubr.f32.mxu0 %v12245_v1  ;;  %8364 = vmatprep.mubr.f32.mxu1 %v12245_v1 }
0x1cf0   :  { %11085 = vmatpush1.bf16.msra.mxu0 %v14153_v51  ;;  %11117 = vmatpush1.bf16.msra.mxu1 %v14156_v17 }
0x1cf1   :  { %11087 = vmatprep.subr.bf16.mxu0 %v14161_v44  ;;  %11119 = vmatprep.subr.bf16.mxu1 %v14163_v48 }
0x1cf4   :  { %11089 = vmatpush1.bf16.msra.mxu0 %v14165_v29  ;;  %11121 = vmatpush1.bf16.msra.mxu1 %v14168_v26 }
0x1cf5   :  { %11091 = vmatprep.subr.bf16.mxu0 %v14173_v56  ;;  %11123 = vmatprep.subr.bf16.mxu1 %v14175_v61 }
0x1cf8   :  { %11093 = vmatpush1.bf16.msra.mxu0 %v14177_v13  ;;  %11125 = vmatpush1.bf16.msra.mxu1 %v14180_v25 }
0x1cf9   :  { %11095 = vmatprep.subr.bf16.mxu0 %v14184_v47  ;;  %11127 = vmatprep.subr.bf16.mxu1 %v14186_v22 }
0x1cfc   :  { %11097 = vmatpush1.bf16.msra.mxu0 %v14189_v60  ;;  %11129 = vmatpush1.bf16.msra.mxu1 %v14193_v55 }
0x1cfd   :  { %11099 = vmatprep.subr.bf16.mxu0 %v14195_v39  ;;  %11131 = vmatprep.subr.bf16.mxu1 %v14197_v63 }
0x1d00   :  { %11101 = vmatpush1.bf16.msra.mxu0 %v14200_v59  ;;  %11133 = vmatpush1.bf16.msra.mxu1 %v14204_v7 }
0x1d01   :  { %11103 = vmatprep.subr.bf16.mxu0 %v14206_v15  ;;  %11135 = vmatprep.subr.bf16.mxu1 %v14209_v41 }
0x1d04   :  { %11105 = vmatpush1.bf16.msra.mxu0 %v14212_v27  ;;  %11137 = vmatpush1.bf16.msra.mxu1 %v14216_v57 }
0x1d05   :  { %11107 = vmatprep.subr.bf16.mxu0 %v14221_v31  ;;  %11139 = vmatprep.subr.bf16.mxu1 %v14223_v46 }
0x1d08   :  { %11109 = vmatpush1.bf16.msra.mxu0 %v14225_v40  ;;  %11141 = vmatpush1.bf16.msra.mxu1 %v14228_v9 }
0x1d09   :  { %11143 = vmatprep.subr.bf16.mxu0 %v14137_v54  ;;  %11175 = vmatprep.subr.bf16.mxu1 %v14139_v20 }
0x1dbe   :  { %v8121_v12 = vpop.f32.mrb[56].mxu0  ;;  %v8192_v52 = vpop.f32.mrb[56].mxu1 }
0x1dbf   :  { %v11398_v37 = vadd.f32 %v8121_v12, %v14282_v6  ;;  %v8123_v10 = vpop.f32.mrb[57].mxu0  ;;  %v8194_v45 = vpop.f32.mrb[57].mxu1  ;;  %v11414_v3 = vadd.f32 %v8192_v52, %v14294_v14 }
0x1dc0   :  { %v11399_v16 = vadd.f32 %v8123_v10, %v14285_v33  ;;  %v11415_v35 = vadd.f32 %v8194_v45, %v14290_v50 }
0x1dc1   :  { %v8957_v8 = vmul.f32 -1.442695, %v11398_v37 }
0x1dc2   :  { %v8958_v38 = vmul.f32 -1.442695, %v11399_v16  ;;  %v8959_v19 = vmul.f32 -1.442695, %v11415_v35 }
0x1dc3   :  { %12010 = vpow2.f32 %v8957_v8 }
0x1dc4   :  { %12012 = vpow2.f32 %v8958_v38 }
0x1dc5   :  { %12014 = vpow2.f32 %v8959_v19 }
0x1dc6   :  { %12016 = vtanh.f32 %v11414_v3 }
0x1dcd   :  { %v12011_v30 = vpop.eup %12010 }
0x1dce   :  { %v12013_v11 = vpop.eup %12012  ;;  %v8204_v32 = vadd.f32 1.0, %v12011_v30 }
0x1dcf   :  { %v8210_v43 = vadd.f32 1.0, %v12013_v11  ;;  %v12015_v49 = vpop.eup %12014 }
0x1dd0   :  { %12018 = vrcp.f32 %v8204_v32  ;;  %v12017_v34 = vpop.eup %12016  ;;  %v8217_v24 = vadd.f32 1.0, %v12015_v49 }
0x1dd1   :  { %12020 = vrcp.f32 %v8210_v43 }
0x1dd2   :  { %12022 = vrcp.f32 %v8217_v24 }
0x1dda   :  { %v12019_v5 = vpop.eup %12018 }
0x1ddb   :  { %v12021_v23 = vpop.eup %12020  ;;  %v8221_v18 = vmul.f32 %v12019_v5, %v12017_v34 }
0x1ddc   :  { %v8220_v21 = vmul.f32 %v12021_v23, %v14423_v4  ;;  %v12023_v28 = vpop.eup %12022 }
0x1dde   :  { %v14465_v62 = vadd.f32 %v8221_v18, %v8220_v21 }
0x1de0   :  { %12024 = vtanh.f32 %v14465_v62 }
0x1dea   :  { %v12025_v42 = vpop.eup %12024 }
0x1deb   :  { %v8224_v36 = vmul.f32 %v12025_v42, %v12023_v28  ;;  %v8750_v42 = vld [vmem:[%s14620_s13 + $0x18] sm:$0xff] }
0x1ded   :  { %8294 = vmatmul.mubr.f32.vlgmr.msra.gmra.mrb[58].mxu0 %v8224_v36  ;;  %8365 = vmatmul.mubr.f32.vlgmr.msra.gmra.mrb[58].mxu1 %v8224_v36 }
0x1dee   :  { %11145 = vmatpush1.bf16.msra.mxu0 %v14141_v0  ;;  %11177 = vmatpush1.bf16.msra.mxu1 %v14144_v2 }
0x1def   :  { %11147 = vmatprep.subr.bf16.mxu0 %v14149_v53  ;;  %11179 = vmatprep.subr.bf16.mxu1 %v14151_v58 }
0x1df0   :  { %8467 = vmatprep.mubr.f32.mxu0 %v12245_v1  ;;  %8538 = vmatprep.mubr.f32.mxu1 %v12245_v1 }
0x1df2   :  { %11149 = vmatpush1.bf16.msra.mxu0 %v14153_v51  ;;  %11181 = vmatpush1.bf16.msra.mxu1 %v14156_v17 }
0x1df3   :  { %11151 = vmatprep.subr.bf16.mxu0 %v14161_v44  ;;  %11183 = vmatprep.subr.bf16.mxu1 %v14163_v48 }
0x1df6   :  { %11153 = vmatpush1.bf16.msra.mxu0 %v14165_v29  ;;  %11185 = vmatpush1.bf16.msra.mxu1 %v14168_v26 }
0x1df7   :  { %11155 = vmatprep.subr.bf16.mxu0 %v14173_v56  ;;  %11187 = vmatprep.subr.bf16.mxu1 %v14175_v61 }
0x1dfa   :  { %11157 = vmatpush1.bf16.msra.mxu0 %v14177_v13  ;;  %11189 = vmatpush1.bf16.msra.mxu1 %v14180_v25 }
0x1dfb   :  { %11159 = vmatprep.subr.bf16.mxu0 %v14184_v47  ;;  %11191 = vmatprep.subr.bf16.mxu1 %v14186_v22 }
0x1dfe   :  { %11161 = vmatpush1.bf16.msra.mxu0 %v14189_v60  ;;  %11193 = vmatpush1.bf16.msra.mxu1 %v14193_v55 }
0x1dff   :  { %11163 = vmatprep.subr.bf16.mxu0 %v14195_v39  ;;  %11195 = vmatprep.subr.bf16.mxu1 %v14197_v63 }
0x1e02   :  { %11165 = vmatpush1.bf16.msra.mxu0 %v14200_v59  ;;  %11197 = vmatpush1.bf16.msra.mxu1 %v14204_v7 }
0x1e03   :  { %11167 = vmatprep.subr.bf16.mxu0 %v14206_v15  ;;  %11199 = vmatprep.subr.bf16.mxu1 %v14209_v41 }
0x1e06   :  { %11169 = vmatpush1.bf16.msra.mxu0 %v14212_v27  ;;  %11201 = vmatpush1.bf16.msra.mxu1 %v14216_v57 }
0x1e07   :  { %11171 = vmatprep.subr.bf16.mxu0 %v14221_v31  ;;  %11203 = vmatprep.subr.bf16.mxu1 %v14223_v46 }
0x1e0a   :  { %11173 = vmatpush1.bf16.msra.mxu0 %v14225_v40  ;;  %11205 = vmatpush1.bf16.msra.mxu1 %v14228_v9 }
0x1e0b   :  { %11207 = vmatprep.subr.bf16.mxu0 %v14137_v54  ;;  %11239 = vmatprep.subr.bf16.mxu1 %v14139_v20 }
0x1ec0   :  { %v8295_v4 = vpop.f32.mrb[58].mxu0  ;;  %v8366_v12 = vpop.f32.mrb[58].mxu1 }
0x1ec1   :  { %v11400_v52 = vadd.f32 %v8295_v4, %v14282_v6  ;;  %v8297_v37 = vpop.f32.mrb[59].mxu0  ;;  %v8368_v10 = vpop.f32.mrb[59].mxu1  ;;  %v11416_v19 = vadd.f32 %v8366_v12, %v14294_v14  ;;  %v8751_v4 = vld [vmem:[%s14620_s13 + $0x20] sm:$0xff]  ;;  %v8752_v12 = vld [vmem:[%s14620_s13 + $0x28] sm:$0xff] }
0x1ec2   :  { %v11401_v45 = vadd.f32 %v8297_v37, %v14285_v33  ;;  %v11417_v38 = vadd.f32 %v8368_v10, %v14290_v50  ;;  %v8753_v37 = vld [vmem:[%s14620_s13 + $0x30] sm:$0xff]  ;;  %v8754_v10 = vld [vmem:[%s14620_s13 + $0x38] sm:$0xff] }
0x1ec3   :  { %v8960_v16 = vmul.f32 -1.442695, %v11400_v52  ;;  %v11277_v52 = vpack.c.bf16 %v8752_v12, %v8751_v4 }
0x1ec4   :  { %v8961_v8 = vmul.f32 -1.442695, %v11401_v45  ;;  %v8962_v35 = vmul.f32 -1.442695, %v11417_v38  ;;  %v11280_v45 = vpack.c.bf16 %v8754_v10, %v8753_v37 }
0x1ec5   :  { %12026 = vpow2.f32 %v8960_v16  ;;  %v8755_v16 = vld [vmem:[%s14620_s13 + $0x40] sm:$0xff] }
0x1ec6   :  { %12028 = vpow2.f32 %v8961_v8  ;;  %v8756_v8 = vld [vmem:[%s14620_s13 + $0x48] sm:$0xff] }
0x1ec7   :  { %12030 = vpow2.f32 %v8962_v35  ;;  %v11283_v38 = vpack.c.bf16 %v8756_v8, %v8755_v16  ;;  %v8757_v35 = vld [vmem:[%s14620_s13 + $0x50] sm:$0xff] }
0x1ec8   :  { %12032 = vtanh.f32 %v11416_v19  ;;  %v8758_v19 = vld [vmem:[%s14620_s13 + $0x58] sm:$0xff] }
0x1ecf   :  { %v12027_v54 = vpop.eup %12026 }
0x1ed0   :  { %v12029_v3 = vpop.eup %12028  ;;  %v8378_v20 = vadd.f32 1.0, %v12027_v54  ;;  %v8759_v54 = vld [vmem:[%s14620_s13 + $0x60] sm:$0xff] }
0x1ed1   :  { %v8384_v30 = vadd.f32 1.0, %v12029_v3  ;;  %v12031_v11 = vpop.eup %12030  ;;  %v11286_v3 = vpack.c.bf16 %v8758_v19, %v8757_v35 }
0x1ed2   :  { %12034 = vrcp.f32 %v8378_v20  ;;  %v12033_v32 = vpop.eup %12032  ;;  %v8391_v5 = vadd.f32 1.0, %v12031_v11  ;;  %v8760_v20 = vld [vmem:[%s14620_s13 + $0x68] sm:$0xff]  ;;  %v8761_v11 = vld [vmem:[%s14620_s13 + $0x70] sm:$0xff] }
0x1ed3   :  { %12036 = vrcp.f32 %v8384_v30  ;;  %v11289_v30 = vpack.c.bf16 %v8760_v20, %v8759_v54 }
0x1ed4   :  { %12038 = vrcp.f32 %v8391_v5 }
0x1edc   :  { %v12035_v43 = vpop.eup %12034 }
0x1edd   :  { %v12037_v49 = vpop.eup %12036  ;;  %v8395_v34 = vmul.f32 %v12035_v43, %v12033_v32  ;;  %v8762_v32 = vld [vmem:[%s14620_s13 + $0x78] sm:$0xff] }
0x1ede   :  { %v8394_v23 = vmul.f32 %v12037_v49, %v14465_v62  ;;  %v12039_v24 = vpop.eup %12038  ;;  %v8749_v62 = vld [vmem:[%s14620_s13 + $0x10] sm:$0xff]  ;;  %v11292_v43 = vpack.c.bf16 %v8762_v32, %v8761_v11 }
0x1edf   :  { %v11274_v36 = vpack.c.bf16 %v8750_v42, %v8749_v62 }
0x1ee0   :  { %v14507_v18 = vadd.f32 %v8395_v34, %v8394_v23 }
0x1ee2   :  { %12040 = vtanh.f32 %v14507_v18 }
0x1eec   :  { %v12041_v21 = vpop.eup %12040 }
0x1eed   :  { %v8398_v28 = vmul.f32 %v12041_v21, %v12039_v24 }
0x1eef   :  { %8468 = vmatmul.mubr.f32.vlgmr.msra.gmra.mrb[60].mxu0 %v8398_v28  ;;  %8539 = vmatmul.mubr.f32.vlgmr.msra.gmra.mrb[60].mxu1 %v8398_v28 }
0x1ef0   :  { %11209 = vmatpush1.bf16.msra.mxu0 %v14141_v0  ;;  %11241 = vmatpush1.bf16.msra.mxu1 %v14144_v2 }
0x1ef1   :  { %11211 = vmatprep.subr.bf16.mxu0 %v14149_v53  ;;  %11243 = vmatprep.subr.bf16.mxu1 %v14151_v58 }
0x1ef2   :  { %8641 = vmatprep.mubr.f32.mxu0 %v12245_v1  ;;  %8712 = vmatprep.mubr.f32.mxu1 %v12245_v1 }
0x1ef4   :  { %11213 = vmatpush1.bf16.msra.mxu0 %v14153_v51  ;;  %11245 = vmatpush1.bf16.msra.mxu1 %v14156_v17 }
0x1ef5   :  { %11215 = vmatprep.subr.bf16.mxu0 %v14161_v44  ;;  %11247 = vmatprep.subr.bf16.mxu1 %v14163_v48 }
0x1ef8   :  { %11217 = vmatpush1.bf16.msra.mxu0 %v14165_v29  ;;  %11249 = vmatpush1.bf16.msra.mxu1 %v14168_v26 }
0x1ef9   :  { %11219 = vmatprep.subr.bf16.mxu0 %v14173_v56  ;;  %11251 = vmatprep.subr.bf16.mxu1 %v14175_v61 }
0x1efc   :  { %11221 = vmatpush1.bf16.msra.mxu0 %v14177_v13  ;;  %11253 = vmatpush1.bf16.msra.mxu1 %v14180_v25 }
0x1efd   :  { %11223 = vmatprep.subr.bf16.mxu0 %v14184_v47  ;;  %11255 = vmatprep.subr.bf16.mxu1 %v14186_v22 }
0x1f00   :  { %11225 = vmatpush1.bf16.msra.mxu0 %v14189_v60  ;;  %11257 = vmatpush1.bf16.msra.mxu1 %v14193_v55 }
0x1f01   :  { %11227 = vmatprep.subr.bf16.mxu0 %v14195_v39  ;;  %11259 = vmatprep.subr.bf16.mxu1 %v14197_v63 }
0x1f04   :  { %11229 = vmatpush1.bf16.msra.mxu0 %v14200_v59  ;;  %11261 = vmatpush1.bf16.msra.mxu1 %v14204_v7 }
0x1f05   :  { %11231 = vmatprep.subr.bf16.mxu0 %v14206_v15  ;;  %11263 = vmatprep.subr.bf16.mxu1 %v14209_v41 }
0x1f08   :  { %11233 = vmatpush1.bf16.msra.mxu0 %v14212_v27  ;;  %11265 = vmatpush1.bf16.msra.mxu1 %v14216_v57 }
0x1f09   :  { %11235 = vmatprep.subr.bf16.mxu0 %v14221_v31  ;;  %11267 = vmatprep.subr.bf16.mxu1 %v14223_v46  ;;  %v8747_v31 = vld [vmem:[%s14620_s13] sm:$0xff]  ;;  %v8748_v46 = vld [vmem:[%s14620_s13 + $0x8] sm:$0xff] }
0x1f0c   :  { %11237 = vmatpush1.bf16.msra.mxu0 %v14225_v40  ;;  %11269 = vmatpush1.bf16.msra.mxu1 %v14228_v9  ;;  %v11271_v40 = vpack.c.bf16 %v8748_v46, %v8747_v31  ;;  %v12246_v9 = vmov 0.0|0.0  }
0x1f0d   :  { %11270 = vmatprep.subr.bf16.mxu0 %v12246_v9 }
0x1fc2   :  { %v8469_v0 = vpop.f32.mrb[60].mxu0  ;;  %v8540_v2 = vpop.f32.mrb[60].mxu1 }
0x1fc3   :  { %v11402_v53 = vadd.f32 %v8469_v0, %v14282_v6  ;;  %v8471_v58 = vpop.f32.mrb[61].mxu0  ;;  %v8542_v51 = vpop.f32.mrb[61].mxu1  ;;  %v11418_v56 = vadd.f32 %v8540_v2, %v14294_v14 }
0x1fc4   :  { %v11403_v17 = vadd.f32 %v8471_v58, %v14285_v33  ;;  %v11419_v29 = vadd.f32 %v8542_v51, %v14290_v50 }
0x1fc5   :  { %v8963_v44 = vmul.f32 -1.442695, %v11402_v53 }
0x1fc6   :  { %v8964_v48 = vmul.f32 -1.442695, %v11403_v17  ;;  %v8965_v26 = vmul.f32 -1.442695, %v11419_v29 }
0x1fc7   :  { %12042 = vpow2.f32 %v8963_v44 }
0x1fc8   :  { %12044 = vpow2.f32 %v8964_v48 }
0x1fc9   :  { %12046 = vpow2.f32 %v8965_v26 }
0x1fca   :  { %12048 = vtanh.f32 %v11418_v56 }
0x1fd1   :  { %v12043_v61 = vpop.eup %12042 }
0x1fd2   :  { %v12045_v13 = vpop.eup %12044  ;;  %v8552_v25 = vadd.f32 1.0, %v12043_v61 }
0x1fd3   :  { %v8558_v47 = vadd.f32 1.0, %v12045_v13  ;;  %v12047_v22 = vpop.eup %12046 }
0x1fd4   :  { %12050 = vrcp.f32 %v8552_v25  ;;  %v12049_v60 = vpop.eup %12048  ;;  %v8565_v59 = vadd.f32 1.0, %v12047_v22  ;;  %v8969_v25 = vld [vmem:[#allocation4] ss:$0 sm:$0xff] }
0x1fd5   :  { %12052 = vrcp.f32 %v8558_v47 }
0x1fd6   :  { %12054 = vrcp.f32 %v8565_v59 }
0x1fde   :  { %v12051_v55 = vpop.eup %12050 }
0x1fdf   :  { %v12053_v39 = vpop.eup %12052  ;;  %v8569_v63 = vmul.f32 %v12051_v55, %v12049_v60 }
0x1fe0   :  { %v8568_v7 = vmul.f32 %v12053_v39, %v14507_v18  ;;  %v12055_v41 = vpop.eup %12054 }
0x1fe2   :  { %v14547_v15 = vadd.f32 %v8569_v63, %v8568_v7 }
0x1fe4   :  { %12056 = vtanh.f32 %v14547_v15 }
0x1fee   :  { %v12057_v27 = vpop.eup %12056 }
0x1fef   :  { %v8572_v57 = vmul.f32 %v12057_v27, %v12055_v41 }
0x1ff1   :  { %8642 = vmatmul.mubr.f32.vlgmr.msra.gmra.mrb[62].mxu0 %v8572_v57  ;;  %8713 = vmatmul.mubr.f32.vlgmr.msra.gmra.mrb[62].mxu1 %v8572_v57 }
0x1ff2   :  { %11272 = vmatpush3.bf16.msra.mxu0 %v11271_v40  ;;  %9019 = vmatprep.mubr.msk.f32.mxu0 %vm12247_vm1, %v12245_v1 }
0x1ff3   :  { %11273 = vmatprep.subr.bf16.mxu0 %v12246_v9 }
0x1ff6   :  { %11275 = vmatpush3.bf16.msra.mxu0 %v11274_v36 }
0x1ff7   :  { %11276 = vmatprep.subr.bf16.mxu0 %v12246_v9 }
0x1ffa   :  { %11278 = vmatpush3.bf16.msra.mxu0 %v11277_v52 }
0x1ffb   :  { %11279 = vmatprep.subr.bf16.mxu0 %v12246_v9 }
0x1ffe   :  { %11281 = vmatpush3.bf16.msra.mxu0 %v11280_v45 }
0x1fff   :  { %11282 = vmatprep.subr.bf16.mxu0 %v12246_v9 }
0x2002   :  { %11284 = vmatpush3.bf16.msra.mxu0 %v11283_v38 }
0x2003   :  { %11285 = vmatprep.subr.bf16.mxu0 %v12246_v9 }
0x2006   :  { %11287 = vmatpush3.bf16.msra.mxu0 %v11286_v3 }
0x2007   :  { %11288 = vmatprep.subr.bf16.mxu0 %v12246_v9 }
0x200a   :  { %11290 = vmatpush3.bf16.msra.mxu0 %v11289_v30 }
0x200b   :  { %11291 = vmatprep.subr.bf16.mxu0 %v12246_v9 }
0x200e   :  { %11293 = vmatpush3.bf16.msra.mxu0 %v11292_v43 }
0x20c4   :  { %v8643_v49 = vpop.f32.mrb[62].mxu0  ;;  %v8714_v34 = vpop.f32.mrb[62].mxu1 }
0x20c5   :  { %v11404_v5 = vadd.f32 %v8643_v49, %v14282_v6  ;;  %v8645_v1 = vpop.f32.mrb[63].mxu0  ;;  %v8716_v23 = vpop.f32.mrb[63].mxu1  ;;  %v11420_v2 = vadd.f32 %v8714_v34, %v14294_v14 }
0x20c6   :  { %v11405_v18 = vadd.f32 %v8645_v1, %v14285_v33  ;;  %v11421_v28 = vadd.f32 %v8716_v23, %v14290_v50 }
0x20c7   :  { %v8966_v24 = vmul.f32 -1.442695, %v11404_v5 }
0x20c8   :  { %v8967_v21 = vmul.f32 -1.442695, %v11405_v18  ;;  %v8968_v0 = vmul.f32 -1.442695, %v11421_v28 }
0x20c9   :  { %12058 = vpow2.f32 %v8966_v24 }
0x20ca   :  { %12060 = vpow2.f32 %v8967_v21 }
0x20cb   :  { %12062 = vpow2.f32 %v8968_v0 }
0x20cc   :  { %12064 = vtanh.f32 %v11420_v2 }
0x20d3   :  { %v12059_v53 = vpop.eup %12058 }
0x20d4   :  { %v12061_v58 = vpop.eup %12060  ;;  %v8726_v51 = vadd.f32 1.0, %v12059_v53 }
0x20d5   :  { %v8732_v17 = vadd.f32 1.0, %v12061_v58  ;;  %v12063_v6 = vpop.eup %12062 }
0x20d6   :  { %12066 = vrcp.f32 %v8726_v51  ;;  %v12065_v44 = vpop.eup %12064  ;;  %v8739_v26 = vadd.f32 1.0, %v12063_v6 }
0x20d7   :  { %12068 = vrcp.f32 %v8732_v17 }
0x20d8   :  { %12070 = vrcp.f32 %v8739_v26 }
0x20e0   :  { %v12067_v33 = vpop.eup %12066 }
0x20e1   :  { %v12069_v48 = vpop.eup %12068  ;;  %v8743_v29 = vmul.f32 %v12067_v33, %v12065_v44 }
0x20e2   :  { %v8742_v56 = vmul.f32 %v12069_v48, %v14547_v15  ;;  %v12071_v14 = vpop.eup %12070 }
0x20e4   :  { %v8744_v50 = vadd.f32 %v8743_v29, %v8742_v56 }
0x20e6   :  { %12072 = vtanh.f32 %v8744_v50 }
0x20f0   :  { %v12073_v61 = vpop.eup %12072 }
0x20f1   :  { %v8746_v13 = vmul.f32 %v12073_v61, %v12071_v14 }
0x20f3   :  { %9020 = vmatmul.mubr.f32.vlgmr.msra.gmra.mrb[64].mxu0 %v8746_v13 }
0x21c6   :  { %v8836_v47 = vpop.f32.mrb[64].mxu0 }
0x21c7   :  { %v8837_v22 = vadd.f32 %v8969_v25, %v8836_v47  ;;  %v9021_v60 = vpop.f32.mrb[65].mxu0 }
0x21c9   :  { %8841 = vst.msk [vmem:[%s14622_s15] sm:$0xff] %vm8840_vm2, %v8837_v22 }
0x21ca   :  { %8846 = vsyncpa [#allocation6], 1 }
0x21cb   :  { %8847 = vsyncpa [#allocation8], 1 }
0x21cc   :  { %8848 = vsyncpa [#allocation11], 1 }
0x21cd   :  { %8849 = vsyncpa [#allocation14], 1 }

</bundles_post_ra>
